<compile_context>
chip_gen: v5e
topology: v5e:2x2
jax: 0.10.0
libtpu: 0.0.40
codegen_flags: <defaults>
</compile_context>

<pallas_src>
import functools

import jax
import jax.numpy as jnp
from jax.experimental import pallas as pl
from jax.experimental.pallas import tpu as pltpu

N_AGENTS = 5

# com_k input at "time" t is ob_{perm[k][t]+1}
_COM_PERM = [
    [1, 2, 3, 4, 0],   # com1: [ob2, ob3, ob4, ob5, ob1]
    [0, 2, 3, 4, 1],   # com2: [ob1, ob3, ob4, ob5, ob2]
    [0, 1, 3, 4, 2],   # com3
    [0, 1, 2, 4, 3],   # com4
    [0, 1, 2, 3, 4],   # com5
]

# out_i uses com_{j+1}[:, _OUT_SEL[i][j]] for j = 0..4
_OUT_SEL = [
    [4, 0, 0, 0, 0],
    [0, 4, 1, 1, 1],
    [1, 1, 4, 2, 2],
    [2, 2, 2, 4, 3],
    [3, 3, 3, 3, 4],
]


def _round_up(x, m):
    return ((x + m - 1) // m) * m


# ---------------------------------------------------------------------------
# Pallas kernel
# ---------------------------------------------------------------------------
def _network_kernel(xm_ref, h0_ref, c0_ref,
                    mem_wx_ref, mem_wh_ref, mem_b_ref,
                    com_wxt_ref, com_wh_ref, com_xb_ref,
                    w2t_ref, w2mem_ref, b2_ref,
                    out_ref, hn_ref, cn_ref):
    f32 = jnp.float32
    bf16 = jnp.bfloat16
    bt, slab = h0_ref.shape          # slab = lane-padded 5*hidden (multiple of 128)
    g4 = 4 * slab

    def dot(a, b):
        return jnp.dot(a, b, preferred_element_type=f32)

    xm = xm_ref[...]                 # bf16 (bt, xdim_pad); dense1 folded into weights
    h0 = h0_ref[...]                 # f32
    c0 = c0_ref[...]                 # f32

    # ---- memory LSTMs: one fused-gate step over all 5 agents (block-diag) ----
    mg = (dot(xm, mem_wx_ref[...]) + dot(h0.astype(bf16), mem_wh_ref[...])
          + mem_b_ref[...])                                     # (bt, 4*slab)
    i_g = jax.nn.sigmoid(mg[:, 0 * slab:1 * slab])
    f_g = jax.nn.sigmoid(mg[:, 1 * slab:2 * slab])
    g_g = jnp.tanh(mg[:, 2 * slab:3 * slab])
    o_g = jax.nn.sigmoid(mg[:, 3 * slab:4 * slab])
    c_mem = f_g * c0 + i_g * g_g
    h_mem = o_g * jnp.tanh(c_mem)
    hn_ref[...] = h_mem
    cn_ref[...] = c_mem

    # dense2 accumulator: bias + memory-branch contribution
    acc = dot(h_mem.astype(bf16), w2mem_ref[...]) + b2_ref[...]  # (bt, odim_pad)

    # ---- com LSTMs: all 5 timesteps' input projections (incl. biases) hoisted
    #      out of the recurrence into a single wide matmul ----
    xproj = dot(xm, com_wxt_ref[...]) + com_xb_ref[...]          # (bt, 5*4*slab)

    wh = com_wh_ref[...]
    h = jnp.zeros((bt, slab), f32)
    c = jnp.zeros((bt, slab), f32)
    for t in range(N_AGENTS):
        gates = xproj[:, t * g4:(t + 1) * g4] + dot(h.astype(bf16), wh)
        gi = jax.nn.sigmoid(gates[:, 0 * slab:1 * slab])
        gf = jax.nn.sigmoid(gates[:, 1 * slab:2 * slab])
        gg = jnp.tanh(gates[:, 2 * slab:3 * slab])
        go = jax.nn.sigmoid(gates[:, 3 * slab:4 * slab])
        c = gf * c + gi * gg
        h = go * jnp.tanh(c)
        # dense2 contribution of this step (gather/concat folded into w2t[t])
        acc = acc + dot(h.astype(bf16), w2t_ref[t])

    out_ref[...] = acc


# ---------------------------------------------------------------------------
# Wrapper
# ---------------------------------------------------------------------------
def _batch_tiling(batch):
    """Return (padded_batch, batch_tile): pad the batch rather than shrink the
    tile, keep tiles large for the MXU, and (for v7x megacore) produce >= 2
    grid steps whenever the batch is non-tiny."""
    b8 = _round_up(max(batch, 8), 8)
    if b8 <= 16:
        return b8, b8
    best = None
    for steps in range(2, 257):
        bt = _round_up(-(-b8 // steps), 8)
        if bt > 256:
            continue
        if b8 >= 128 and bt < 64:
            break
        cand = (bt * steps, steps, bt)
        if best is None or cand[:2] < best[:2]:
            best = cand
    if best is None:                       # huge batch fallback
        return _round_up(b8, 256), 256
    return best[0], best[2]


@functools.partial(jax.jit, static_argnums=(4,))
def _forward(p, x, h0, c0, out_dim):
    B, _, in_dim = x.shape
    hs = h0.shape[2]
    slab = N_AGENTS * hs
    xdim = N_AGENTS * in_dim
    odim = N_AGENTS * out_dim
    slab_pad = p["mem_wh"].shape[0]
    xdim_pad = p["mem_wx"].shape[0]
    odim_pad = p["b2"].shape[1]

    b_pad, bt = _batch_tiling(B)
    grid = (b_pad // bt,)

    # activation slabs: bf16 inputs (halves DMA), f32 state; all lane-padded
    xm = jnp.pad(x.reshape(B, xdim).astype(jnp.bfloat16),
                 ((0, b_pad - B), (0, xdim_pad - xdim)))
    h0s = jnp.pad(jnp.transpose(h0, (1, 0, 2)).reshape(B, slab),
                  ((0, b_pad - B), (0, slab_pad - slab)))
    c0s = jnp.pad(jnp.transpose(c0, (1, 0, 2)).reshape(B, slab),
                  ((0, b_pad - B), (0, slab_pad - slab)))

    btile = lambda cols: pl.BlockSpec((bt, cols), lambda i: (i, 0))
    full2 = lambda a: pl.BlockSpec(a.shape, lambda i: (0, 0))
    full3 = lambda a: pl.BlockSpec(a.shape, lambda i: (0, 0, 0))

    weights = (p["mem_wx"], p["mem_wh"], p["mem_b"],
               p["com_wxt"], p["com_wh"], p["com_xb"],
               p["w2t"], p["w2mem"], p["b2"])

    in_specs = [
        btile(xdim_pad),                 # xm
        btile(slab_pad),                 # h0 slab
        btile(slab_pad),                 # c0 slab
        full2(p["mem_wx"]),              # (xdim_pad, 4*slab_pad)
        full2(p["mem_wh"]),              # (slab_pad, 4*slab_pad)
        full2(p["mem_b"]),               # (1, 4*slab_pad)
        full2(p["com_wxt"]),             # (xdim_pad, 5*4*slab_pad)
        full2(p["com_wh"]),              # (slab_pad, 4*slab_pad)
        full2(p["com_xb"]),              # (1, 5*4*slab_pad)
        full3(p["w2t"]),                 # (5, slab_pad, odim_pad)
        full2(p["w2mem"]),               # (slab_pad, odim_pad)
        full2(p["b2"]),                  # (1, odim_pad)
    ]
    out_specs = (btile(odim_pad), btile(slab_pad), btile(slab_pad))
    out_shape = (jax.ShapeDtypeStruct((b_pad, odim_pad), jnp.float32),
                 jax.ShapeDtypeStruct((b_pad, slab_pad), jnp.float32),
                 jax.ShapeDtypeStruct((b_pad, slab_pad), jnp.float32))

    # explicit scoped-VMEM budget: resident weights (double-buffered by default)
    # + batch-tiled activation blocks + in-kernel temporaries, with headroom.
    weight_bytes = sum(int(a.size) * a.dtype.itemsize for a in weights)
    act_bytes = bt * (xdim_pad * 2 + (4 * slab_pad + odim_pad) * 4)
    scratch_bytes = bt * (5 * 4 * slab_pad + 8 * slab_pad) * 4
    vmem_limit = int(min(64 << 20,
                         max(32 << 20,
                             2 * weight_bytes + 2 * act_bytes
                             + scratch_bytes + (4 << 20))))

    out_slab, hn_slab, cn_slab = pl.pallas_call(
        _network_kernel,
        grid=grid,
        in_specs=in_specs,
        out_specs=out_specs,
        out_shape=out_shape,
        input_output_aliases={1: 1, 2: 2},   # h0 -> h_n, c0 -> c_n in place
        compiler_params=pltpu.CompilerParams(
            dimension_semantics=("parallel",),
            vmem_limit_bytes=vmem_limit),
    )(xm, h0s, c0s, *weights)

    outs = jnp.transpose(out_slab[:B, :odim].reshape(B, N_AGENTS, out_dim), (1, 0, 2))
    h_n = jnp.transpose(hn_slab[:B, :slab].reshape(B, N_AGENTS, hs), (1, 0, 2))
    c_n = jnp.transpose(cn_slab[:B, :slab].reshape(B, N_AGENTS, hs), (1, 0, 2))
    return outs, h_n, c_n


def network_forward(w, x, h0, c0):
    """w: prepared fused params; x: (B, 5, input_dim); h0/c0: (5, B, hs).

    Returns (outs (5, B, out_dim), h_n (5, B, hs), c_n (5, B, hs))."""
    return _forward(w["params"], x, h0, c0, w["out_dim"])


# ---------------------------------------------------------------------------
# Parameter preparation (block-diagonal / folded / lane-padded fused weights)
# ---------------------------------------------------------------------------
def prepare_params(base):
    f32, bf16 = jnp.float32, jnp.bfloat16
    hs = base["hs"]
    w1, b1, w2, b2 = base["w1"], base["b1"], base["w2"], base["b2"]
    input_dim = w1.shape[0]
    out_dim = w2.shape[1]

    slab = N_AGENTS * hs
    xdim = N_AGENTS * input_dim
    odim = N_AGENTS * out_dim
    slab_pad = _round_up(slab, 128)
    xdim_pad = _round_up(xdim, 128)
    odim_pad = _round_up(odim, 128)
    g4 = 4 * slab_pad

    def fused_lstm(wih, whh, b):
        # wih: (5, ls1, 4hs)  whh: (5, hs, 4hs)  b: (5, 4hs)  (b = b_ih + b_hh)
        wx = jnp.zeros((xdim_pad, g4), f32)
        wh = jnp.zeros((slab_pad, g4), f32)
        bb = jnp.zeros((1, g4), f32)
        for a in range(N_AGENTS):
            for g in range(4):                 # PyTorch gate order i, f, g, o
                gs = slice(g * hs, (g + 1) * hs)
                col = slice(g * slab_pad + a * hs, g * slab_pad + (a + 1) * hs)
                wx = wx.at[a * input_dim:(a + 1) * input_dim, col].set(w1 @ wih[a][:, gs])
                wh = wh.at[a * hs:(a + 1) * hs, col].set(whh[a][:, gs])
                bb = bb.at[0, col].set(b1 @ wih[a][:, gs] + b[a, gs])
        return wx, wh, bb

    mem_wx, mem_wh, mem_b = fused_lstm(base["mem_wih"], base["mem_whh"], base["mem_b"])
    _, com_wh, _ = fused_lstm(base["com_wih"], base["com_whh"], base["com_b"])

    # com input weights with the per-timestep agent permutation baked in:
    # agent a's (dense1-folded) W_ih block is placed at input-row block
    # _COM_PERM[a][t] for timestep t, so the kernel only ever reads xm.
    com_wxt = jnp.zeros((xdim_pad, N_AGENTS * g4), f32)
    com_xb = jnp.zeros((1, N_AGENTS * g4), f32)
    for t in range(N_AGENTS):
        for a in range(N_AGENTS):
            pidx = _COM_PERM[a][t]
            for g in range(4):
                gs = slice(g * hs, (g + 1) * hs)
                col = slice(t * g4 + g * slab_pad + a * hs,
                            t * g4 + g * slab_pad + (a + 1) * hs)
                com_wxt = com_wxt.at[pidx * input_dim:(pidx + 1) * input_dim, col].set(
                    w1 @ base["com_wih"][a][:, gs])
                com_xb = com_xb.at[0, col].set(
                    b1 @ base["com_wih"][a][:, gs] + base["com_b"][a, gs])

    # per-timestep dense2 weights: w2t[t][j*hs:(j+1)*hs, i*out:(i+1)*out] = w2_j
    # iff _OUT_SEL[i][j] == t  (folds the gather + concat into a matmul)
    w2t = jnp.zeros((N_AGENTS, slab_pad, odim_pad), f32)
    for i in range(N_AGENTS):
        for j in range(N_AGENTS):
            t = _OUT_SEL[i][j]
            w2t = w2t.at[t, j * hs:(j + 1) * hs,
                         i * out_dim:(i + 1) * out_dim].set(w2[j * hs:(j + 1) * hs, :])
    w2mem = jnp.zeros((slab_pad, odim_pad), f32)
    b2big = jnp.zeros((1, odim_pad), f32)
    for i in range(N_AGENTS):
        w2mem = w2mem.at[i * hs:(i + 1) * hs,
                         i * out_dim:(i + 1) * out_dim].set(w2[5 * hs:6 * hs, :])
        b2big = b2big.at[0, i * out_dim:(i + 1) * out_dim].set(b2)

    params = {
        "mem_wx": mem_wx.astype(bf16), "mem_wh": mem_wh.astype(bf16), "mem_b": mem_b,
        "com_wxt": com_wxt.astype(bf16), "com_wh": com_wh.astype(bf16), "com_xb": com_xb,
        "w2t": w2t.astype(bf16), "w2mem": w2mem.astype(bf16), "b2": b2big,
    }
    return {"params": params, "hs": hs, "out_dim": out_dim}


def init_base_params(key, input_dim, ls1, hs, out_dim):
    keys = jax.random.split(key, 10)
    s = 0.1
    return {
        "hs": hs,
        "w1": s * jax.random.normal(keys[0], (input_dim, ls1), jnp.float32),
        "b1": s * jax.random.normal(keys[1], (ls1,), jnp.float32),
        "w2": s * jax.random.normal(keys[2], (6 * hs, out_dim), jnp.float32),
        "b2": s * jax.random.normal(keys[3], (out_dim,), jnp.float32),
        # LSTM weights pre-transposed: W_ih -> (ls1, 4hs), W_hh -> (hs, 4hs),
        # bias = b_ih + b_hh combined.
        "mem_wih": s * jax.random.normal(keys[4], (N_AGENTS, ls1, 4 * hs), jnp.float32),
        "mem_whh": s * jax.random.normal(keys[5], (N_AGENTS, hs, 4 * hs), jnp.float32),
        "mem_b":   s * jax.random.normal(keys[6], (N_AGENTS, 4 * hs), jnp.float32),
        "com_wih": s * jax.random.normal(keys[7], (N_AGENTS, ls1, 4 * hs), jnp.float32),
        "com_whh": s * jax.random.normal(keys[8], (N_AGENTS, hs, 4 * hs), jnp.float32),
        "com_b":   s * jax.random.normal(keys[9], (N_AGENTS, 4 * hs), jnp.float32),
    }


# ---------------------------------------------------------------------------
# pure-JAX f32 per-agent reference (same math as the PyTorch module)
# ---------------------------------------------------------------------------
def _ref_lstm_step(x, h, c, wih, whh, b, hs):
    gates = x @ wih + h @ whh + b
    i = jax.nn.sigmoid(gates[:, 0 * hs:1 * hs])
    f = jax.nn.sigmoid(gates[:, 1 * hs:2 * hs])
    g = jnp.tanh(gates[:, 2 * hs:3 * hs])
    o = jax.nn.sigmoid(gates[:, 3 * hs:4 * hs])
    c_new = f * c + i * g
    h_new = o * jnp.tanh(c_new)
    return h_new, c_new


def network_forward_ref(base, x, h0, c0):
    hs = base["hs"]
    B = x.shape[0]
    obs = [x[:, a, :] @ base["w1"] + base["b1"] for a in range(N_AGENTS)]

    mem_last, hns, cns = [], [], []
    for a in range(N_AGENTS):
        h, c = _ref_lstm_step(obs[a], h0[a], c0[a],
                              base["mem_wih"][a], base["mem_whh"][a],
                              base["mem_b"][a], hs)
        mem_last.append(h); hns.append(h); cns.append(c)

    com_out = []
    for a in range(N_AGENTS):
        h = jnp.zeros((B, hs), jnp.float32)
        c = jnp.zeros((B, hs), jnp.float32)
        steps = []
        for t in range(N_AGENTS):
            h, c = _ref_lstm_step(obs[_COM_PERM[a][t]], h, c,
                                  base["com_wih"][a], base["com_whh"][a],
                                  base["com_b"][a], hs)
            steps.append(h)
        com_out.append(steps)

    outs = []
    for i in range(N_AGENTS):
        parts = [com_out[j][_OUT_SEL[i][j]] for j in range(N_AGENTS)]
        parts.append(mem_last[i])
        feat = jnp.concatenate(parts, axis=1)
        outs.append(feat @ base["w2"] + base["b2"])
    return jnp.stack(outs), jnp.stack(hns), jnp.stack(cns)


if __name__ == "__main__":
    # small shapes consistent with the module: 5 agents, batch=2
    B, input_dim, ls1, hs, out_dim = 2, 16, 32, 32, 8   # linear_size2 unused by forward

    key = jax.random.PRNGKey(0)
    kp, kx, kh, kc = jax.random.split(key, 4)
    base = init_base_params(kp, input_dim, ls1, hs, out_dim)
    fused = prepare_params(base)

    x = jax.random.normal(kx, (B, N_AGENTS, input_dim), jnp.float32)
    h0 = jax.random.normal(kh, (N_AGENTS, B, hs), jnp.float32)   # torch h_0, num_layers axis squeezed
    c0 = jax.random.normal(kc, (N_AGENTS, B, hs), jnp.float32)

    outs, h_n, c_n = jax.block_until_ready(network_forward(fused, x, h0, c0))

    # sanity check against the plain-JAX f32 reference (kernel uses bf16 matmuls)
    outs_r, h_r, c_r = network_forward_ref(base, x, h0, c0)
    assert outs.shape == (N_AGENTS, B, out_dim)
    assert h_n.shape == (N_AGENTS, B, hs) and c_n.shape == (N_AGENTS, B, hs)
    assert jnp.allclose(outs, outs_r, atol=5e-2, rtol=5e-2)
    assert jnp.allclose(h_n, h_r, atol=5e-2, rtol=5e-2)
    assert jnp.allclose(c_n, c_r, atol=5e-2, rtol=5e-2)

    print("KERNEL_OK")
</pallas_src>

<mosaic_0001>
module attributes {stable_mosaic.version = 11 : i64} {
  func.func @_network_kernel(%arg0: i32, %arg1: memref<8x128xbf16, #tpu.memory_space<vmem>>, %arg2: memref<8x256xf32, #tpu.memory_space<vmem>>, %arg3: memref<8x256xf32, #tpu.memory_space<vmem>>, %arg4: memref<128x1024xbf16, #tpu.memory_space<vmem>>, %arg5: memref<256x1024xbf16, #tpu.memory_space<vmem>>, %arg6: memref<1x1024xf32, #tpu.memory_space<vmem>>, %arg7: memref<128x5120xbf16, #tpu.memory_space<vmem>>, %arg8: memref<256x1024xbf16, #tpu.memory_space<vmem>>, %arg9: memref<1x5120xf32, #tpu.memory_space<vmem>>, %arg10: memref<5x256x128xbf16, #tpu.memory_space<vmem>>, %arg11: memref<256x128xbf16, #tpu.memory_space<vmem>>, %arg12: memref<1x128xf32, #tpu.memory_space<vmem>>, %arg13: memref<8x128xf32, #tpu.memory_space<vmem>>, %arg14: memref<8x256xf32, #tpu.memory_space<vmem>>, %arg15: memref<8x256xf32, #tpu.memory_space<vmem>>) attributes {dimension_semantics = [#tpu.dimension_semantics<parallel>], iteration_bounds = array<i64: 1>, scalar_prefetch = 0 : i64, scratch_operands = 0 : i64, tpu.core_type = #tpu.core_type<tc>, window_params = [{transform_indices = @transform_0, window_bounds = array<i64: 8, 128>}, {transform_indices = @transform_1, window_bounds = array<i64: 8, 256>}, {transform_indices = @transform_2, window_bounds = array<i64: 8, 256>}, {pipeline_mode = #tpu.pipeline_mode<synchronous>, transform_indices = @transform_3, window_bounds = array<i64: 128, 1024>}, {pipeline_mode = #tpu.pipeline_mode<synchronous>, transform_indices = @transform_4, window_bounds = array<i64: 256, 1024>}, {pipeline_mode = #tpu.pipeline_mode<synchronous>, transform_indices = @transform_5, window_bounds = array<i64: 1, 1024>}, {pipeline_mode = #tpu.pipeline_mode<synchronous>, transform_indices = @transform_6, window_bounds = array<i64: 128, 5120>}, {pipeline_mode = #tpu.pipeline_mode<synchronous>, transform_indices = @transform_7, window_bounds = array<i64: 256, 1024>}, {pipeline_mode = #tpu.pipeline_mode<synchronous>, transform_indices = @transform_8, window_bounds = array<i64: 1, 5120>}, {pipeline_mode = #tpu.pipeline_mode<synchronous>, transform_indices = @transform_9, window_bounds = array<i64: 5, 256, 128>}, {pipeline_mode = #tpu.pipeline_mode<synchronous>, transform_indices = @transform_10, window_bounds = array<i64: 256, 128>}, {pipeline_mode = #tpu.pipeline_mode<synchronous>, transform_indices = @transform_11, window_bounds = array<i64: 1, 128>}, {transform_indices = @transform_12, window_bounds = array<i64: 8, 128>}, {transform_indices = @transform_13, window_bounds = array<i64: 8, 256>}, {transform_indices = @transform_14, window_bounds = array<i64: 8, 256>}]} {
    %c0 = arith.constant 0 : index
    %c0_0 = arith.constant 0 : index
    %0 = vector.load %arg1[%c0, %c0_0] : memref<8x128xbf16, #tpu.memory_space<vmem>>, vector<8x128xbf16>
    %c0_1 = arith.constant 0 : index
    %c0_2 = arith.constant 0 : index
    %1 = vector.load %arg2[%c0_1, %c0_2] : memref<8x256xf32, #tpu.memory_space<vmem>>, vector<8x256xf32>
    %c0_3 = arith.constant 0 : index
    %c0_4 = arith.constant 0 : index
    %2 = vector.load %arg3[%c0_3, %c0_4] : memref<8x256xf32, #tpu.memory_space<vmem>>, vector<8x256xf32>
    %c0_5 = arith.constant 0 : index
    %c0_6 = arith.constant 0 : index
    %3 = vector.load %arg4[%c0_5, %c0_6] : memref<128x1024xbf16, #tpu.memory_space<vmem>>, vector<128x1024xbf16>
    %cst = arith.constant dense<0.000000e+00> : vector<8x1024xf32>
    %4 = tpu.matmul %0, %3, %cst {dimension_numbers = #tpu.dot_dimension_numbers<[1], [0], [0], [1], [0, 0, 1, 1], [], []>} : vector<8x128xbf16>, vector<128x1024xbf16>, vector<8x1024xf32> -> vector<8x1024xf32>
    %5 = arith.truncf %1 : vector<8x256xf32> to vector<8x256xbf16>
    %c0_7 = arith.constant 0 : index
    %c0_8 = arith.constant 0 : index
    %6 = vector.load %arg5[%c0_7, %c0_8] : memref<256x1024xbf16, #tpu.memory_space<vmem>>, vector<256x1024xbf16>
    %cst_9 = arith.constant dense<0.000000e+00> : vector<8x1024xf32>
    %7 = tpu.matmul %5, %6, %cst_9 {dimension_numbers = #tpu.dot_dimension_numbers<[1], [0], [0], [1], [0, 0, 1, 1], [], []>} : vector<8x256xbf16>, vector<256x1024xbf16>, vector<8x1024xf32> -> vector<8x1024xf32>
    %8 = arith.addf %4, %7 : vector<8x1024xf32>
    %c0_10 = arith.constant 0 : index
    %c0_11 = arith.constant 0 : index
    %9 = vector.load %arg6[%c0_10, %c0_11] : memref<1x1024xf32, #tpu.memory_space<vmem>>, vector<1x1024xf32>
    %10 = vector.broadcast %9 : vector<1x1024xf32> to vector<8x1024xf32>
    %11 = arith.addf %8, %10 : vector<8x1024xf32>
    %12 = vector.extract_strided_slice %11 {offsets = [0, 0], sizes = [8, 256], strides = [1, 1]} : vector<8x1024xf32> to vector<8x256xf32>
    %13 = arith.negf %12 : vector<8x256xf32>
    %14 = math.exp %13 : vector<8x256xf32>
    %cst_12 = arith.constant 1.000000e+00 : f32
    %15 = vector.broadcast %cst_12 : f32 to vector<8x256xf32>
    %16 = arith.addf %15, %14 : vector<8x256xf32>
    %17 = arith.divf %15, %16 : vector<8x256xf32>
    %18 = vector.extract_strided_slice %11 {offsets = [0, 256], sizes = [8, 256], strides = [1, 1]} : vector<8x1024xf32> to vector<8x256xf32>
    %19 = arith.negf %18 : vector<8x256xf32>
    %20 = math.exp %19 : vector<8x256xf32>
    %cst_13 = arith.constant 1.000000e+00 : f32
    %21 = vector.broadcast %cst_13 : f32 to vector<8x256xf32>
    %22 = arith.addf %21, %20 : vector<8x256xf32>
    %23 = arith.divf %21, %22 : vector<8x256xf32>
    %24 = vector.extract_strided_slice %11 {offsets = [0, 512], sizes = [8, 256], strides = [1, 1]} : vector<8x1024xf32> to vector<8x256xf32>
    %25 = math.tanh %24 : vector<8x256xf32>
    %26 = vector.extract_strided_slice %11 {offsets = [0, 768], sizes = [8, 256], strides = [1, 1]} : vector<8x1024xf32> to vector<8x256xf32>
    %27 = arith.negf %26 : vector<8x256xf32>
    %28 = math.exp %27 : vector<8x256xf32>
    %cst_14 = arith.constant 1.000000e+00 : f32
    %29 = vector.broadcast %cst_14 : f32 to vector<8x256xf32>
    %30 = arith.addf %29, %28 : vector<8x256xf32>
    %31 = arith.divf %29, %30 : vector<8x256xf32>
    %32 = arith.mulf %23, %2 : vector<8x256xf32>
    %33 = arith.mulf %17, %25 : vector<8x256xf32>
    %34 = arith.addf %32, %33 : vector<8x256xf32>
    %35 = math.tanh %34 : vector<8x256xf32>
    %36 = arith.mulf %31, %35 : vector<8x256xf32>
    %c0_15 = arith.constant 0 : index
    %c0_16 = arith.constant 0 : index
    %37 = vector.load %arg14[%c0_15, %c0_16] : memref<8x256xf32, #tpu.memory_space<vmem>>, vector<8x256xf32>
    tpu.vector_store %arg14[%c0_15, %c0_16], %36 {strides = array<i32>} : memref<8x256xf32, #tpu.memory_space<vmem>>, vector<8x256xf32>,
    %c0_17 = arith.constant 0 : index
    %c0_18 = arith.constant 0 : index
    %38 = vector.load %arg15[%c0_17, %c0_18] : memref<8x256xf32, #tpu.memory_space<vmem>>, vector<8x256xf32>
    tpu.vector_store %arg15[%c0_17, %c0_18], %34 {strides = array<i32>} : memref<8x256xf32, #tpu.memory_space<vmem>>, vector<8x256xf32>,
    %39 = arith.truncf %36 : vector<8x256xf32> to vector<8x256xbf16>
    %c0_19 = arith.constant 0 : index
    %c0_20 = arith.constant 0 : index
    %40 = vector.load %arg11[%c0_19, %c0_20] : memref<256x128xbf16, #tpu.memory_space<vmem>>, vector<256x128xbf16>
    %cst_21 = arith.constant dense<0.000000e+00> : vector<8x128xf32>
    %41 = tpu.matmul %39, %40, %cst_21 {dimension_numbers = #tpu.dot_dimension_numbers<[1], [0], [0], [1], [0, 0, 1, 1], [], []>} : vector<8x256xbf16>, vector<256x128xbf16>, vector<8x128xf32> -> vector<8x128xf32>
    %c0_22 = arith.constant 0 : index
    %c0_23 = arith.constant 0 : index
    %42 = vector.load %arg12[%c0_22, %c0_23] : memref<1x128xf32, #tpu.memory_space<vmem>>, vector<1x128xf32>
    %43 = vector.broadcast %42 : vector<1x128xf32> to vector<8x128xf32>
    %44 = arith.addf %41, %43 : vector<8x128xf32>
    %c0_24 = arith.constant 0 : index
    %c0_25 = arith.constant 0 : index
    %45 = vector.load %arg7[%c0_24, %c0_25] : memref<128x5120xbf16, #tpu.memory_space<vmem>>, vector<128x5120xbf16>
    %cst_26 = arith.constant dense<0.000000e+00> : vector<8x5120xf32>
    %46 = tpu.matmul %0, %45, %cst_26 {dimension_numbers = #tpu.dot_dimension_numbers<[1], [0], [0], [1], [0, 0, 1, 1], [], []>} : vector<8x128xbf16>, vector<128x5120xbf16>, vector<8x5120xf32> -> vector<8x5120xf32>
    %c0_27 = arith.constant 0 : index
    %c0_28 = arith.constant 0 : index
    %47 = vector.load %arg9[%c0_27, %c0_28] : memref<1x5120xf32, #tpu.memory_space<vmem>>, vector<1x5120xf32>
    %48 = vector.broadcast %47 : vector<1x5120xf32> to vector<8x5120xf32>
    %49 = arith.addf %46, %48 : vector<8x5120xf32>
    %c0_29 = arith.constant 0 : index
    %c0_30 = arith.constant 0 : index
    %50 = vector.load %arg8[%c0_29, %c0_30] : memref<256x1024xbf16, #tpu.memory_space<vmem>>, vector<256x1024xbf16>
    %cst_31 = arith.constant 0.000000e+00 : f32
    %51 = vector.broadcast %cst_31 : f32 to vector<8x256xf32>
    %cst_32 = arith.constant 0.000000e+00 : f32
    %52 = vector.broadcast %cst_32 : f32 to vector<8x256xf32>
    %53 = vector.extract_strided_slice %49 {offsets = [0, 0], sizes = [8, 1024], strides = [1, 1]} : vector<8x5120xf32> to vector<8x1024xf32>
    %54 = arith.truncf %51 : vector<8x256xf32> to vector<8x256xbf16>
    %cst_33 = arith.constant dense<0.000000e+00> : vector<8x1024xf32>
    %55 = tpu.matmul %54, %50, %cst_33 {dimension_numbers = #tpu.dot_dimension_numbers<[1], [0], [0], [1], [0, 0, 1, 1], [], []>} : vector<8x256xbf16>, vector<256x1024xbf16>, vector<8x1024xf32> -> vector<8x1024xf32>
    %56 = arith.addf %53, %55 : vector<8x1024xf32>
    %57 = vector.extract_strided_slice %56 {offsets = [0, 0], sizes = [8, 256], strides = [1, 1]} : vector<8x1024xf32> to vector<8x256xf32>
    %58 = arith.negf %57 : vector<8x256xf32>
    %59 = math.exp %58 : vector<8x256xf32>
    %cst_34 = arith.constant 1.000000e+00 : f32
    %60 = vector.broadcast %cst_34 : f32 to vector<8x256xf32>
    %61 = arith.addf %60, %59 : vector<8x256xf32>
    %62 = arith.divf %60, %61 : vector<8x256xf32>
    %63 = vector.extract_strided_slice %56 {offsets = [0, 256], sizes = [8, 256], strides = [1, 1]} : vector<8x1024xf32> to vector<8x256xf32>
    %64 = arith.negf %63 : vector<8x256xf32>
    %65 = math.exp %64 : vector<8x256xf32>
    %cst_35 = arith.constant 1.000000e+00 : f32
    %66 = vector.broadcast %cst_35 : f32 to vector<8x256xf32>
    %67 = arith.addf %66, %65 : vector<8x256xf32>
    %68 = arith.divf %66, %67 : vector<8x256xf32>
    %69 = vector.extract_strided_slice %56 {offsets = [0, 512], sizes = [8, 256], strides = [1, 1]} : vector<8x1024xf32> to vector<8x256xf32>
    %70 = math.tanh %69 : vector<8x256xf32>
    %71 = vector.extract_strided_slice %56 {offsets = [0, 768], sizes = [8, 256], strides = [1, 1]} : vector<8x1024xf32> to vector<8x256xf32>
    %72 = arith.negf %71 : vector<8x256xf32>
    %73 = math.exp %72 : vector<8x256xf32>
    %cst_36 = arith.constant 1.000000e+00 : f32
    %74 = vector.broadcast %cst_36 : f32 to vector<8x256xf32>
    %75 = arith.addf %74, %73 : vector<8x256xf32>
    %76 = arith.divf %74, %75 : vector<8x256xf32>
    %77 = arith.mulf %68, %52 : vector<8x256xf32>
    %78 = arith.mulf %62, %70 : vector<8x256xf32>
    %79 = arith.addf %77, %78 : vector<8x256xf32>
    %80 = math.tanh %79 : vector<8x256xf32>
    %81 = arith.mulf %76, %80 : vector<8x256xf32>
    %82 = arith.truncf %81 : vector<8x256xf32> to vector<8x256xbf16>
    %c0_37 = arith.constant 0 : index
    %c0_38 = arith.constant 0 : index
    %c0_39 = arith.constant 0 : index
    %83 = vector.load %arg10[%c0_37, %c0_38, %c0_39] : memref<5x256x128xbf16, #tpu.memory_space<vmem>>, vector<1x256x128xbf16>
    %84 = vector.shape_cast %83 : vector<1x256x128xbf16> to vector<256x128xbf16>
    %cst_40 = arith.constant dense<0.000000e+00> : vector<8x128xf32>
    %85 = tpu.matmul %82, %84, %cst_40 {dimension_numbers = #tpu.dot_dimension_numbers<[1], [0], [0], [1], [0, 0, 1, 1], [], []>} : vector<8x256xbf16>, vector<256x128xbf16>, vector<8x128xf32> -> vector<8x128xf32>
    %86 = arith.addf %44, %85 : vector<8x128xf32>
    %87 = vector.extract_strided_slice %49 {offsets = [0, 1024], sizes = [8, 1024], strides = [1, 1]} : vector<8x5120xf32> to vector<8x1024xf32>
    %88 = arith.truncf %81 : vector<8x256xf32> to vector<8x256xbf16>
    %cst_41 = arith.constant dense<0.000000e+00> : vector<8x1024xf32>
    %89 = tpu.matmul %88, %50, %cst_41 {dimension_numbers = #tpu.dot_dimension_numbers<[1], [0], [0], [1], [0, 0, 1, 1], [], []>} : vector<8x256xbf16>, vector<256x1024xbf16>, vector<8x1024xf32> -> vector<8x1024xf32>
    %90 = arith.addf %87, %89 : vector<8x1024xf32>
    %91 = vector.extract_strided_slice %90 {offsets = [0, 0], sizes = [8, 256], strides = [1, 1]} : vector<8x1024xf32> to vector<8x256xf32>
    %92 = arith.negf %91 : vector<8x256xf32>
    %93 = math.exp %92 : vector<8x256xf32>
    %cst_42 = arith.constant 1.000000e+00 : f32
    %94 = vector.broadcast %cst_42 : f32 to vector<8x256xf32>
    %95 = arith.addf %94, %93 : vector<8x256xf32>
    %96 = arith.divf %94, %95 : vector<8x256xf32>
    %97 = vector.extract_strided_slice %90 {offsets = [0, 256], sizes = [8, 256], strides = [1, 1]} : vector<8x1024xf32> to vector<8x256xf32>
    %98 = arith.negf %97 : vector<8x256xf32>
    %99 = math.exp %98 : vector<8x256xf32>
    %cst_43 = arith.constant 1.000000e+00 : f32
    %100 = vector.broadcast %cst_43 : f32 to vector<8x256xf32>
    %101 = arith.addf %100, %99 : vector<8x256xf32>
    %102 = arith.divf %100, %101 : vector<8x256xf32>
    %103 = vector.extract_strided_slice %90 {offsets = [0, 512], sizes = [8, 256], strides = [1, 1]} : vector<8x1024xf32> to vector<8x256xf32>
    %104 = math.tanh %103 : vector<8x256xf32>
    %105 = vector.extract_strided_slice %90 {offsets = [0, 768], sizes = [8, 256], strides = [1, 1]} : vector<8x1024xf32> to vector<8x256xf32>
    %106 = arith.negf %105 : vector<8x256xf32>
    %107 = math.exp %106 : vector<8x256xf32>
    %cst_44 = arith.constant 1.000000e+00 : f32
    %108 = vector.broadcast %cst_44 : f32 to vector<8x256xf32>
    %109 = arith.addf %108, %107 : vector<8x256xf32>
    %110 = arith.divf %108, %109 : vector<8x256xf32>
    %111 = arith.mulf %102, %79 : vector<8x256xf32>
    %112 = arith.mulf %96, %104 : vector<8x256xf32>
    %113 = arith.addf %111, %112 : vector<8x256xf32>
    %114 = math.tanh %113 : vector<8x256xf32>
    %115 = arith.mulf %110, %114 : vector<8x256xf32>
    %116 = arith.truncf %115 : vector<8x256xf32> to vector<8x256xbf16>
    %c1 = arith.constant 1 : index
    %c0_45 = arith.constant 0 : index
    %c0_46 = arith.constant 0 : index
    %117 = vector.load %arg10[%c1, %c0_45, %c0_46] : memref<5x256x128xbf16, #tpu.memory_space<vmem>>, vector<1x256x128xbf16>
    %118 = vector.shape_cast %117 : vector<1x256x128xbf16> to vector<256x128xbf16>
    %cst_47 = arith.constant dense<0.000000e+00> : vector<8x128xf32>
    %119 = tpu.matmul %116, %118, %cst_47 {dimension_numbers = #tpu.dot_dimension_numbers<[1], [0], [0], [1], [0, 0, 1, 1], [], []>} : vector<8x256xbf16>, vector<256x128xbf16>, vector<8x128xf32> -> vector<8x128xf32>
    %120 = arith.addf %86, %119 : vector<8x128xf32>
    %121 = vector.extract_strided_slice %49 {offsets = [0, 2048], sizes = [8, 1024], strides = [1, 1]} : vector<8x5120xf32> to vector<8x1024xf32>
    %122 = arith.truncf %115 : vector<8x256xf32> to vector<8x256xbf16>
    %cst_48 = arith.constant dense<0.000000e+00> : vector<8x1024xf32>
    %123 = tpu.matmul %122, %50, %cst_48 {dimension_numbers = #tpu.dot_dimension_numbers<[1], [0], [0], [1], [0, 0, 1, 1], [], []>} : vector<8x256xbf16>, vector<256x1024xbf16>, vector<8x1024xf32> -> vector<8x1024xf32>
    %124 = arith.addf %121, %123 : vector<8x1024xf32>
    %125 = vector.extract_strided_slice %124 {offsets = [0, 0], sizes = [8, 256], strides = [1, 1]} : vector<8x1024xf32> to vector<8x256xf32>
    %126 = arith.negf %125 : vector<8x256xf32>
    %127 = math.exp %126 : vector<8x256xf32>
    %cst_49 = arith.constant 1.000000e+00 : f32
    %128 = vector.broadcast %cst_49 : f32 to vector<8x256xf32>
    %129 = arith.addf %128, %127 : vector<8x256xf32>
    %130 = arith.divf %128, %129 : vector<8x256xf32>
    %131 = vector.extract_strided_slice %124 {offsets = [0, 256], sizes = [8, 256], strides = [1, 1]} : vector<8x1024xf32> to vector<8x256xf32>
    %132 = arith.negf %131 : vector<8x256xf32>
    %133 = math.exp %132 : vector<8x256xf32>
    %cst_50 = arith.constant 1.000000e+00 : f32
    %134 = vector.broadcast %cst_50 : f32 to vector<8x256xf32>
    %135 = arith.addf %134, %133 : vector<8x256xf32>
    %136 = arith.divf %134, %135 : vector<8x256xf32>
    %137 = vector.extract_strided_slice %124 {offsets = [0, 512], sizes = [8, 256], strides = [1, 1]} : vector<8x1024xf32> to vector<8x256xf32>
    %138 = math.tanh %137 : vector<8x256xf32>
    %139 = vector.extract_strided_slice %124 {offsets = [0, 768], sizes = [8, 256], strides = [1, 1]} : vector<8x1024xf32> to vector<8x256xf32>
    %140 = arith.negf %139 : vector<8x256xf32>
    %141 = math.exp %140 : vector<8x256xf32>
    %cst_51 = arith.constant 1.000000e+00 : f32
    %142 = vector.broadcast %cst_51 : f32 to vector<8x256xf32>
    %143 = arith.addf %142, %141 : vector<8x256xf32>
    %144 = arith.divf %142, %143 : vector<8x256xf32>
    %145 = arith.mulf %136, %113 : vector<8x256xf32>
    %146 = arith.mulf %130, %138 : vector<8x256xf32>
    %147 = arith.addf %145, %146 : vector<8x256xf32>
    %148 = math.tanh %147 : vector<8x256xf32>
    %149 = arith.mulf %144, %148 : vector<8x256xf32>
    %150 = arith.truncf %149 : vector<8x256xf32> to vector<8x256xbf16>
    %c2 = arith.constant 2 : index
    %c0_52 = arith.constant 0 : index
    %c0_53 = arith.constant 0 : index
    %151 = vector.load %arg10[%c2, %c0_52, %c0_53] : memref<5x256x128xbf16, #tpu.memory_space<vmem>>, vector<1x256x128xbf16>
    %152 = vector.shape_cast %151 : vector<1x256x128xbf16> to vector<256x128xbf16>
    %cst_54 = arith.constant dense<0.000000e+00> : vector<8x128xf32>
    %153 = tpu.matmul %150, %152, %cst_54 {dimension_numbers = #tpu.dot_dimension_numbers<[1], [0], [0], [1], [0, 0, 1, 1], [], []>} : vector<8x256xbf16>, vector<256x128xbf16>, vector<8x128xf32> -> vector<8x128xf32>
    %154 = arith.addf %120, %153 : vector<8x128xf32>
    %155 = vector.extract_strided_slice %49 {offsets = [0, 3072], sizes = [8, 1024], strides = [1, 1]} : vector<8x5120xf32> to vector<8x1024xf32>
    %156 = arith.truncf %149 : vector<8x256xf32> to vector<8x256xbf16>
    %cst_55 = arith.constant dense<0.000000e+00> : vector<8x1024xf32>
    %157 = tpu.matmul %156, %50, %cst_55 {dimension_numbers = #tpu.dot_dimension_numbers<[1], [0], [0], [1], [0, 0, 1, 1], [], []>} : vector<8x256xbf16>, vector<256x1024xbf16>, vector<8x1024xf32> -> vector<8x1024xf32>
    %158 = arith.addf %155, %157 : vector<8x1024xf32>
    %159 = vector.extract_strided_slice %158 {offsets = [0, 0], sizes = [8, 256], strides = [1, 1]} : vector<8x1024xf32> to vector<8x256xf32>
    %160 = arith.negf %159 : vector<8x256xf32>
    %161 = math.exp %160 : vector<8x256xf32>
    %cst_56 = arith.constant 1.000000e+00 : f32
    %162 = vector.broadcast %cst_56 : f32 to vector<8x256xf32>
    %163 = arith.addf %162, %161 : vector<8x256xf32>
    %164 = arith.divf %162, %163 : vector<8x256xf32>
    %165 = vector.extract_strided_slice %158 {offsets = [0, 256], sizes = [8, 256], strides = [1, 1]} : vector<8x1024xf32> to vector<8x256xf32>
    %166 = arith.negf %165 : vector<8x256xf32>
    %167 = math.exp %166 : vector<8x256xf32>
    %cst_57 = arith.constant 1.000000e+00 : f32
    %168 = vector.broadcast %cst_57 : f32 to vector<8x256xf32>
    %169 = arith.addf %168, %167 : vector<8x256xf32>
    %170 = arith.divf %168, %169 : vector<8x256xf32>
    %171 = vector.extract_strided_slice %158 {offsets = [0, 512], sizes = [8, 256], strides = [1, 1]} : vector<8x1024xf32> to vector<8x256xf32>
    %172 = math.tanh %171 : vector<8x256xf32>
    %173 = vector.extract_strided_slice %158 {offsets = [0, 768], sizes = [8, 256], strides = [1, 1]} : vector<8x1024xf32> to vector<8x256xf32>
    %174 = arith.negf %173 : vector<8x256xf32>
    %175 = math.exp %174 : vector<8x256xf32>
    %cst_58 = arith.constant 1.000000e+00 : f32
    %176 = vector.broadcast %cst_58 : f32 to vector<8x256xf32>
    %177 = arith.addf %176, %175 : vector<8x256xf32>
    %178 = arith.divf %176, %177 : vector<8x256xf32>
    %179 = arith.mulf %170, %147 : vector<8x256xf32>
    %180 = arith.mulf %164, %172 : vector<8x256xf32>
    %181 = arith.addf %179, %180 : vector<8x256xf32>
    %182 = math.tanh %181 : vector<8x256xf32>
    %183 = arith.mulf %178, %182 : vector<8x256xf32>
    %184 = arith.truncf %183 : vector<8x256xf32> to vector<8x256xbf16>
    %c3 = arith.constant 3 : index
    %c0_59 = arith.constant 0 : index
    %c0_60 = arith.constant 0 : index
    %185 = vector.load %arg10[%c3, %c0_59, %c0_60] : memref<5x256x128xbf16, #tpu.memory_space<vmem>>, vector<1x256x128xbf16>
    %186 = vector.shape_cast %185 : vector<1x256x128xbf16> to vector<256x128xbf16>
    %cst_61 = arith.constant dense<0.000000e+00> : vector<8x128xf32>
    %187 = tpu.matmul %184, %186, %cst_61 {dimension_numbers = #tpu.dot_dimension_numbers<[1], [0], [0], [1], [0, 0, 1, 1], [], []>} : vector<8x256xbf16>, vector<256x128xbf16>, vector<8x128xf32> -> vector<8x128xf32>
    %188 = arith.addf %154, %187 : vector<8x128xf32>
    %189 = vector.extract_strided_slice %49 {offsets = [0, 4096], sizes = [8, 1024], strides = [1, 1]} : vector<8x5120xf32> to vector<8x1024xf32>
    %190 = arith.truncf %183 : vector<8x256xf32> to vector<8x256xbf16>
    %cst_62 = arith.constant dense<0.000000e+00> : vector<8x1024xf32>
    %191 = tpu.matmul %190, %50, %cst_62 {dimension_numbers = #tpu.dot_dimension_numbers<[1], [0], [0], [1], [0, 0, 1, 1], [], []>} : vector<8x256xbf16>, vector<256x1024xbf16>, vector<8x1024xf32> -> vector<8x1024xf32>
    %192 = arith.addf %189, %191 : vector<8x1024xf32>
    %193 = vector.extract_strided_slice %192 {offsets = [0, 0], sizes = [8, 256], strides = [1, 1]} : vector<8x1024xf32> to vector<8x256xf32>
    %194 = arith.negf %193 : vector<8x256xf32>
    %195 = math.exp %194 : vector<8x256xf32>
    %cst_63 = arith.constant 1.000000e+00 : f32
    %196 = vector.broadcast %cst_63 : f32 to vector<8x256xf32>
    %197 = arith.addf %196, %195 : vector<8x256xf32>
    %198 = arith.divf %196, %197 : vector<8x256xf32>
    %199 = vector.extract_strided_slice %192 {offsets = [0, 256], sizes = [8, 256], strides = [1, 1]} : vector<8x1024xf32> to vector<8x256xf32>
    %200 = arith.negf %199 : vector<8x256xf32>
    %201 = math.exp %200 : vector<8x256xf32>
    %cst_64 = arith.constant 1.000000e+00 : f32
    %202 = vector.broadcast %cst_64 : f32 to vector<8x256xf32>
    %203 = arith.addf %202, %201 : vector<8x256xf32>
    %204 = arith.divf %202, %203 : vector<8x256xf32>
    %205 = vector.extract_strided_slice %192 {offsets = [0, 512], sizes = [8, 256], strides = [1, 1]} : vector<8x1024xf32> to vector<8x256xf32>
    %206 = math.tanh %205 : vector<8x256xf32>
    %207 = vector.extract_strided_slice %192 {offsets = [0, 768], sizes = [8, 256], strides = [1, 1]} : vector<8x1024xf32> to vector<8x256xf32>
    %208 = arith.negf %207 : vector<8x256xf32>
    %209 = math.exp %208 : vector<8x256xf32>
    %cst_65 = arith.constant 1.000000e+00 : f32
    %210 = vector.broadcast %cst_65 : f32 to vector<8x256xf32>
    %211 = arith.addf %210, %209 : vector<8x256xf32>
    %212 = arith.divf %210, %211 : vector<8x256xf32>
    %213 = arith.mulf %204, %181 : vector<8x256xf32>
    %214 = arith.mulf %198, %206 : vector<8x256xf32>
    %215 = arith.addf %213, %214 : vector<8x256xf32>
    %216 = math.tanh %215 : vector<8x256xf32>
    %217 = arith.mulf %212, %216 : vector<8x256xf32>
    %218 = arith.truncf %217 : vector<8x256xf32> to vector<8x256xbf16>
    %c4 = arith.constant 4 : index
    %c0_66 = arith.constant 0 : index
    %c0_67 = arith.constant 0 : index
    %219 = vector.load %arg10[%c4, %c0_66, %c0_67] : memref<5x256x128xbf16, #tpu.memory_space<vmem>>, vector<1x256x128xbf16>
    %220 = vector.shape_cast %219 : vector<1x256x128xbf16> to vector<256x128xbf16>
    %cst_68 = arith.constant dense<0.000000e+00> : vector<8x128xf32>
    %221 = tpu.matmul %218, %220, %cst_68 {dimension_numbers = #tpu.dot_dimension_numbers<[1], [0], [0], [1], [0, 0, 1, 1], [], []>} : vector<8x256xbf16>, vector<256x128xbf16>, vector<8x128xf32> -> vector<8x128xf32>
    %222 = arith.addf %188, %221 : vector<8x128xf32>
    %c0_69 = arith.constant 0 : index
    %c0_70 = arith.constant 0 : index
    %223 = vector.load %arg13[%c0_69, %c0_70] : memref<8x128xf32, #tpu.memory_space<vmem>>, vector<8x128xf32>
    tpu.vector_store %arg13[%c0_69, %c0_70], %222 {strides = array<i32>} : memref<8x128xf32, #tpu.memory_space<vmem>>, vector<8x128xf32>,
    return
  }
  func.func @transform_0(%arg0: i32) -> (i32, i32) {
    %c0_i32 = arith.constant 0 : i32
    %c0_i32_0 = arith.constant 0 : i32
    return %arg0, %c0_i32 : i32, i32
  }
  func.func @transform_1(%arg0: i32) -> (i32, i32) {
    %c0_i32 = arith.constant 0 : i32
    %c0_i32_0 = arith.constant 0 : i32
    return %arg0, %c0_i32 : i32, i32
  }
  func.func @transform_2(%arg0: i32) -> (i32, i32) {
    %c0_i32 = arith.constant 0 : i32
    %c0_i32_0 = arith.constant 0 : i32
    return %arg0, %c0_i32 : i32, i32
  }
  func.func @transform_3(%arg0: i32) -> (i32, i32) {
    %c0_i32 = arith.constant 0 : i32
    %c0_i32_0 = arith.constant 0 : i32
    %c0_i32_1 = arith.constant 0 : i32
    return %c0_i32, %c0_i32_0 : i32, i32
  }
  func.func @transform_4(%arg0: i32) -> (i32, i32) {
    %c0_i32 = arith.constant 0 : i32
    %c0_i32_0 = arith.constant 0 : i32
    %c0_i32_1 = arith.constant 0 : i32
    return %c0_i32, %c0_i32_0 : i32, i32
  }
  func.func @transform_5(%arg0: i32) -> (i32, i32) {
    %c0_i32 = arith.constant 0 : i32
    %c0_i32_0 = arith.constant 0 : i32
    %c0_i32_1 = arith.constant 0 : i32
    return %c0_i32, %c0_i32_0 : i32, i32
  }
  func.func @transform_6(%arg0: i32) -> (i32, i32) {
    %c0_i32 = arith.constant 0 : i32
    %c0_i32_0 = arith.constant 0 : i32
    %c0_i32_1 = arith.constant 0 : i32
    return %c0_i32, %c0_i32_0 : i32, i32
  }
  func.func @transform_7(%arg0: i32) -> (i32, i32) {
    %c0_i32 = arith.constant 0 : i32
    %c0_i32_0 = arith.constant 0 : i32
    %c0_i32_1 = arith.constant 0 : i32
    return %c0_i32, %c0_i32_0 : i32, i32
  }
  func.func @transform_8(%arg0: i32) -> (i32, i32) {
    %c0_i32 = arith.constant 0 : i32
    %c0_i32_0 = arith.constant 0 : i32
    %c0_i32_1 = arith.constant 0 : i32
    return %c0_i32, %c0_i32_0 : i32, i32
  }
  func.func @transform_9(%arg0: i32) -> (i32, i32, i32) {
    %c0_i32 = arith.constant 0 : i32
    %c0_i32_0 = arith.constant 0 : i32
    %c0_i32_1 = arith.constant 0 : i32
    %c0_i32_2 = arith.constant 0 : i32
    return %c0_i32, %c0_i32_0, %c0_i32_1 : i32, i32, i32
  }
  func.func @transform_10(%arg0: i32) -> (i32, i32) {
    %c0_i32 = arith.constant 0 : i32
    %c0_i32_0 = arith.constant 0 : i32
    %c0_i32_1 = arith.constant 0 : i32
    return %c0_i32, %c0_i32_0 : i32, i32
  }
  func.func @transform_11(%arg0: i32) -> (i32, i32) {
    %c0_i32 = arith.constant 0 : i32
    %c0_i32_0 = arith.constant 0 : i32
    %c0_i32_1 = arith.constant 0 : i32
    return %c0_i32, %c0_i32_0 : i32, i32
  }
  func.func @transform_12(%arg0: i32) -> (i32, i32) {
    %c0_i32 = arith.constant 0 : i32
    %c0_i32_0 = arith.constant 0 : i32
    return %arg0, %c0_i32 : i32, i32
  }
  func.func @transform_13(%arg0: i32) -> (i32, i32) {
    %c0_i32 = arith.constant 0 : i32
    %c0_i32_0 = arith.constant 0 : i32
    return %arg0, %c0_i32 : i32, i32
  }
  func.func @transform_14(%arg0: i32) -> (i32, i32) {
    %c0_i32 = arith.constant 0 : i32
    %c0_i32_0 = arith.constant 0 : i32
    return %arg0, %c0_i32 : i32, i32
  }
}

</mosaic_0001>

<bundles_post_ra>
// kernel: _forward.1
= control target key start
LH: loop header
LB: loop body
LE: loop exit
PB: predicated region body
PF: predicated region fallthrough
CT: control target
= control target key end

     0   :  { %20 = vsyncpa [#allocation3], 0  ;;  %s13946_s0 = inlined_call_operand.vmem [shape: bf16[8,128], index: 0, kind: input, shape index: {}]   ;;  %s13947_s1 = inlined_call_operand.vmem [shape: f32[8,256], index: 1, kind: input, shape index: {}, may-alias: {1,13}]   ;;  %s13948_s2 = inlined_call_operand.vmem [shape: f32[8,256], index: 2, kind: input, shape index: {}, may-alias: {2,14}]   ;;  %s13949_s3 = inlined_call_operand.hbm [shape: bf16[128,1024], index: 3, kind: input, shape index: {}]   ;;  %s13950_s4 = inlined_call_operand.hbm [shape: bf16[256,1024], index: 4, kind: input, shape index: {}]   ;;  %s13951_s5 = inlined_call_operand.hbm [shape: f32[1,1024], index: 5, kind: input, shape index: {}]   ;;  %s13952_s6 = inlined_call_operand.hbm [shape: bf16[128,5120], index: 6, kind: input, shape index: {}]   ;;  %s13953_s7 = inlined_call_operand.hbm [shape: bf16[256,1024], index: 7, kind: input, shape index: {}]   ;;  %s13954_s8 = inlined_call_operand.hbm [shape: f32[1,5120], index: 8, kind: input, shape index: {}]   ;;  %s13955_s9 = inlined_call_operand.hbm [shape: bf16[5,256,128], index: 9, kind: input, shape index: {}]   ;;  %s13956_s10 = inlined_call_operand.hbm [shape: bf16[256,128], index: 10, kind: input, shape index: {}]   ;;  %s13957_s11 = inlined_call_operand.hbm [shape: f32[1,128], index: 11, kind: input, shape index: {}]   ;;  %s13958_s12 = inlined_call_operand.vmem [shape: f32[8,128], index: 12, kind: output, shape index: {0}]   ;;  %s13959_s13 = inlined_call_operand.vmem [shape: f32[8,256], index: 13, kind: output, shape index: {1}, may-alias: {1,13}]   ;;  %s13960_s14 = inlined_call_operand.vmem [shape: f32[8,256], index: 14, kind: output, shape index: {2}, may-alias: {2,14}]  }
   0x1   :  { %21 = vsyncpa [#allocation5], 0 }
   0x2   :  { %22 = vsyncpa [#allocation8], 0 }
   0x3   :  { %23 = vsyncpa [#allocation11], 0 }
   0x4   :  { %24 = vsyncpa [#allocation14], 0  ;;  %s48_s15 = sshll.u32 %s13950_s4, 4  ;;  %s11936_s16 = smov [#allocation4]   ;;  %s49_s15 = int_to_ptr.hbm [resolvable:$true] %s48_s15 }
   0x5   :  { %s50_s17 = sshll.u32 %s11936_s16, 4  ;;  %s72_s20 = sshll.u32 %s13952_s6, 4  ;;  %s51_s17 = int_to_ptr.vmem [resolvable:$true] %s50_s17  ;;  %s73_s20 = int_to_ptr.hbm [resolvable:$true] %s72_s20 }
   0x6   :  { %s11937_s21 = smov 512   ;;  %s11938_s22 = smov 32  }
   0x7   :  { %56 = dma.hbm_to_vmem [thread:$0]  %s49_s15, 16384, %s51_s17, [#allocation5], %s11937_s21, %s11937_s21, %s11938_s22  }
   0x8   :  { %s11939_s23 = smov [#allocation7]   ;;  %s11940_s25 = smov 2560  }
   0x9   :  { %s74_s24 = sshll.u32 %s11939_s23, 4  ;;  %s11941_s4 = smov 160   ;;  %s75_s24 = int_to_ptr.vmem [resolvable:$true] %s74_s24 }
   0xa   :  { %80 = dma.hbm_to_vmem [thread:$0]  %s73_s20, 40960, %s75_s24, [#allocation8], %s11940_s25, %s11940_s25, %s11941_s4  }
   0xb   :  { %s99_s28 = sshll.u32 %s13954_s8, 4  ;;  %s11942_s29 = smov [#allocation10]   ;;  %s100_s28 = int_to_ptr.hbm [resolvable:$true] %s99_s28 }
   0xc   :  { %s101_s6 = sshll.u32 %s11942_s29, 4  ;;  %s122_s15 = sshll.u32 %s13956_s10, 4  ;;  %s102_s6 = int_to_ptr.vmem [resolvable:$true] %s101_s6  ;;  %s123_s15 = int_to_ptr.hbm [resolvable:$true] %s122_s15 }
   0xd   :  { %104 = dma.hbm_to_vmem [thread:$0]  %s100_s28, 640, %s102_s6, [#allocation11]  }
   0xe   :  { %s11943_s17 = smov [#allocation13]   ;;  %s35_s20 = sshll.u32 %s13949_s3, 4  ;;  %s36_s20 = int_to_ptr.hbm [resolvable:$true] %s35_s20 }
   0xf   :  { %s124_s18 = sshll.u32 %s11943_s17, 4  ;;  %s11944_s24 = smov 64   ;;  %s125_s18 = int_to_ptr.vmem [resolvable:$true] %s124_s18 }
  0x10   :  { %s11945_s8 = smov 4   ;;  %s62_s26 = sshll.u32 %s13951_s5, 4  ;;  %s63_s26 = int_to_ptr.hbm [resolvable:$true] %s62_s26 }
  0x11   :  { %130 = dma.hbm_to_vmem [thread:$0]  %s123_s15, 2048, %s125_s18, [#allocation14], %s11944_s24, %s11944_s24, %s11945_s8  }
  0x12   :  { %s11946_s27 = smov [#allocation2]   ;;  %s11947_s10 = smov [#allocation6]  }
  0x13   :  { %s37_s28 = sshll.u32 %s11946_s27, 4  ;;  %s64_s29 = sshll.u32 %s11947_s10, 4  ;;  %s38_s28 = int_to_ptr.vmem [resolvable:$true] %s37_s28  ;;  %s65_s29 = int_to_ptr.vmem [resolvable:$true] %s64_s29 }
  0x14   :  { %43 = dma.hbm_to_vmem [thread:$0]  %s36_s20, 8192, %s38_s28, [#allocation3], %s11937_s21, %s11937_s21, %s11938_s22  }
  0x15   :  { %s85_s30 = sshll.u32 %s13953_s7, 4  ;;  %s109_s5 = sshll.u32 %s13955_s9, 4  ;;  %s86_s30 = int_to_ptr.hbm [resolvable:$true] %s85_s30  ;;  %s110_s5 = int_to_ptr.hbm [resolvable:$true] %s109_s5 }
  0x16   :  { %67 = dma.hbm_to_vmem [thread:$0]  %s63_s26, 128, %s65_s29, [#allocation5]  }
  0x17   :  { %s11948_s17 = smov [#allocation9]   ;;  %s11949_s19 = smov [#allocation12]  }
  0x18   :  { %s87_s18 = sshll.u32 %s11948_s17, 4  ;;  %s111_s23 = sshll.u32 %s11949_s19, 4  ;;  %s88_s18 = int_to_ptr.vmem [resolvable:$true] %s87_s18  ;;  %s112_s23 = int_to_ptr.vmem [resolvable:$true] %s111_s23 }
  0x19   :  { %93 = dma.hbm_to_vmem [thread:$0]  %s86_s30, 16384, %s88_s18, [#allocation8], %s11937_s21, %s11937_s21, %s11938_s22  }
  0x1a   :  { %s136_s7 = sshll.u32 %s13957_s11, 4  ;;  %s11950_s4 = smov [#allocation15]   ;;  %s137_s7 = int_to_ptr.hbm [resolvable:$true] %s136_s7 }
  0x1b   :  { %117 = dma.hbm_to_vmem [thread:$0]  %s110_s5, 10240, %s112_s23, [#allocation11], %s11944_s24, %s11944_s24, %s11945_s8  }
  0x1c   :  { %s138_s26 = sshll.u32 %s11950_s4, 4  ;;  %s139_s26 = int_to_ptr.vmem [resolvable:$true] %s138_s26 }
  0x1d   :  { %141 = dma.hbm_to_vmem [thread:$0]  %s137_s7, 16, %s139_s26, [#allocation14]  }
  0x1e   :  { %11926 = dma.done.wait [#allocation3], 8192  }
  0x1f   :  { %11927 = vsyncadd [#allocation3], 4294959104 }
  0x20   :  { %11928 = dma.done.wait [#allocation5], 16512  }
  0x21   :  { %11929 = vsyncadd [#allocation5], 4294950784 }
  0x22   :  { %11930 = dma.done.wait [#allocation8], 57344  }
  0x23   :  { %11931 = vsyncadd [#allocation8], 4294909952 }
  0x24   :  { %11932 = dma.done.wait [#allocation11], 10880  }
  0x25   :  { %11933 = vsyncadd [#allocation11], 4294956416 }
  0x26   :  { %11934 = dma.done.wait [#allocation14], 2064  }
  0x27   :  { %11935 = vsyncadd [#allocation14], 4294965232  ;;  %v8007_v0 = vld [vmem:[#allocation4 + $0x1c0] sm:$0xf]  ;;  %v10881_v5 = vld [vmem:[#allocation4 + $0x1c4] sm:$0xf] }
  0x28   :  { %v10885_v1 = vld [vmem:[#allocation4 + $0x1dc] sm:$0xf0]  ;;  %v8009_v6 = vld [vmem:[#allocation4 + $0x1e0] sm:$0xf0] }
  0x29   :  { %v8263_v2 = vld [vmem:[#allocation4 + $0x3c0] sm:$0xf]  ;;  %v8008_v3 = vor.u32 %v10885_v1, %v8007_v0  ;;  %v8012_v8 = vor.u32 %v10881_v5, %v8009_v6  ;;  %v10945_v9 = vld [vmem:[#allocation4 + $0x3c4] sm:$0xf] }
  0x2a   :  { %v10949_v4 = vld [vmem:[#allocation4 + $0x3dc] sm:$0xf0]  ;;  %v8265_v10 = vld [vmem:[#allocation4 + $0x3e0] sm:$0xf0] }
  0x2b   :  { %v8264_v7 = vor.u32 %v10949_v4, %v8263_v2  ;;  %v7975_v11 = vld [vmem:[#allocation4 + $0x180] sm:$0xf]  ;;  %1018 = vmatpush.bf16.msra.mxu0 %v8008_v3  ;;  %v8268_v12 = vor.u32 %v10945_v9, %v8265_v10  ;;  %1044 = vmatpush.bf16.msra.mxu2 %v8012_v8  ;;  %v10873_v18 = vld [vmem:[#allocation4 + $0x184] sm:$0xf] }
  0x2c   :  { %v10877_v13 = vld [vmem:[#allocation4 + $0x19c] sm:$0xf0]  ;;  %v7977_v19 = vld [vmem:[#allocation4 + $0x1a0] sm:$0xf0] }
  0x2d   :  { %v8231_v14 = vld [vmem:[#allocation4 + $0x380] sm:$0xf]  ;;  %1031 = vmatpush.bf16.msra.mxu1 %v8264_v7  ;;  %v7976_v16 = vor.u32 %v10877_v13, %v7975_v11  ;;  %v10937_v20 = vld [vmem:[#allocation4 + $0x384] sm:$0xf]  ;;  %1057 = vmatpush.bf16.msra.mxu3 %v8268_v12  ;;  %v7980_v21 = vor.u32 %v10873_v18, %v7977_v19 }
  0x2e   :  { %v10941_v15 = vld [vmem:[#allocation4 + $0x39c] sm:$0xf0]  ;;  %v8233_v22 = vld [vmem:[#allocation4 + $0x3a0] sm:$0xf0] }
  0x2f   :  { %v8232_v17 = vor.u32 %v10941_v15, %v8231_v14  ;;  %v7943_v23 = vld [vmem:[#allocation4 + $0x140] sm:$0xf]  ;;  %v8236_v25 = vor.u32 %v10937_v20, %v8233_v22  ;;  %v10865_v28 = vld [vmem:[#allocation4 + $0x144] sm:$0xf]  ;;  %1019 = vmatpush.bf16.msra.mxu0 %v7976_v16  ;;  %1045 = vmatpush.bf16.msra.mxu2 %v7980_v21 }
  0x30   :  { %v10869_v24 = vld [vmem:[#allocation4 + $0x15c] sm:$0xf0]  ;;  %v7945_v30 = vld [vmem:[#allocation4 + $0x160] sm:$0xf0] }
  0x31   :  { %v8199_v26 = vld [vmem:[#allocation4 + $0x340] sm:$0xf]  ;;  %v7944_v29 = vor.u32 %v10869_v24, %v7943_v23  ;;  %v10929_v31 = vld [vmem:[#allocation4 + $0x344] sm:$0xf]  ;;  %1032 = vmatpush.bf16.msra.mxu1 %v8232_v17  ;;  %v7948_v34 = vor.u32 %v10865_v28, %v7945_v30  ;;  %1058 = vmatpush.bf16.msra.mxu3 %v8236_v25  ;;  %v8015_v28 = vld [vmem:[#allocation4 + $0x1c8] sm:$0xf] }
  0x32   :  { %v10933_v27 = vld [vmem:[#allocation4 + $0x35c] sm:$0xf0]  ;;  %v8201_v32 = vld [vmem:[#allocation4 + $0x360] sm:$0xf0]  ;;  %v8271_v30 = vld [vmem:[#allocation4 + $0x3c8] sm:$0xf] }
  0x33   :  { %v8200_v33 = vor.u32 %v10933_v27, %v8199_v26  ;;  %v7911_v35 = vld [vmem:[#allocation4 + $0x100] sm:$0xf]  ;;  %v8204_v38 = vor.u32 %v10929_v31, %v8201_v32  ;;  %v10857_v40 = vld [vmem:[#allocation4 + $0x104] sm:$0xf]  ;;  %1020 = vmatpush.bf16.msra.mxu0 %v7944_v29  ;;  %1046 = vmatpush.bf16.msra.mxu2 %v7948_v34  ;;  %v10886_v29 = vld [vmem:[#allocation4 + $0x1e4] sm:$0xf0] }
  0x34   :  { %v10861_v36 = vld [vmem:[#allocation4 + $0x11c] sm:$0xf0]  ;;  %v7913_v41 = vld [vmem:[#allocation4 + $0x120] sm:$0xf0]  ;;  %v10950_v32 = vld [vmem:[#allocation4 + $0x3e4] sm:$0xf0] }
  0x35   :  { %v8167_v37 = vld [vmem:[#allocation4 + $0x300] sm:$0xf]  ;;  %v10921_v42 = vld [vmem:[#allocation4 + $0x304] sm:$0xf]  ;;  %v7912_v44 = vor.u32 %v10861_v36, %v7911_v35  ;;  %1033 = vmatpush.bf16.msra.mxu1 %v8200_v33  ;;  %v7916_v46 = vor.u32 %v10857_v40, %v7913_v41  ;;  %1059 = vmatpush.bf16.msra.mxu3 %v8204_v38  ;;  %v10882_v33 = vld [vmem:[#allocation4 + $0x1cc] sm:$0xf]  ;;  %v8016_v40 = vor.u32 %v10886_v29, %v8015_v28 }
  0x36   :  { %v10925_v39 = vld [vmem:[#allocation4 + $0x31c] sm:$0xf0]  ;;  %v8169_v43 = vld [vmem:[#allocation4 + $0x320] sm:$0xf0]  ;;  %v8017_v34 = vld [vmem:[#allocation4 + $0x1e8] sm:$0xf0]  ;;  %v8272_v41 = vor.u32 %v10950_v32, %v8271_v30 }
  0x37   :  { %v8168_v45 = vor.u32 %v10925_v39, %v8167_v37  ;;  %v7879_v47 = vld [vmem:[#allocation4 + $0xc0] sm:$0xf]  ;;  %v8172_v50 = vor.u32 %v10921_v42, %v8169_v43  ;;  %v10849_v52 = vld [vmem:[#allocation4 + $0xc4] sm:$0xf]  ;;  %1021 = vmatpush.bf16.msra.mxu0 %v7912_v44  ;;  %1047 = vmatpush.bf16.msra.mxu2 %v7916_v46  ;;  %v10946_v37 = vld [vmem:[#allocation4 + $0x3cc] sm:$0xf]  ;;  %v8020_v42 = vor.u32 %v10882_v33, %v8017_v34 }
  0x38   :  { %v10853_v48 = vld [vmem:[#allocation4 + $0xdc] sm:$0xf0]  ;;  %v7881_v53 = vld [vmem:[#allocation4 + $0xe0] sm:$0xf0]  ;;  %v8273_v38 = vld [vmem:[#allocation4 + $0x3e8] sm:$0xf0] }
  0x39   :  { %v8135_v49 = vld [vmem:[#allocation4 + $0x2c0] sm:$0xf]  ;;  %v10913_v54 = vld [vmem:[#allocation4 + $0x2c4] sm:$0xf]  ;;  %v7880_v56 = vor.u32 %v10853_v48, %v7879_v47  ;;  %1034 = vmatpush.bf16.msra.mxu1 %v8168_v45  ;;  %v7884_v58 = vor.u32 %v10849_v52, %v7881_v53  ;;  %1060 = vmatpush.bf16.msra.mxu3 %v8172_v50  ;;  %v7983_v43 = vld [vmem:[#allocation4 + $0x188] sm:$0xf]  ;;  %v8276_v46 = vor.u32 %v10946_v37, %v8273_v38 }
  0x3a   :  { %v10917_v51 = vld [vmem:[#allocation4 + $0x2dc] sm:$0xf0]  ;;  %v8137_v55 = vld [vmem:[#allocation4 + $0x2e0] sm:$0xf0]  ;;  %v10878_v44 = vld [vmem:[#allocation4 + $0x1a4] sm:$0xf0] }
  0x3b   :  { %v8136_v57 = vor.u32 %v10917_v51, %v8135_v49  ;;  %v7847_v59 = vld [vmem:[#allocation4 + $0x80] sm:$0xf]  ;;  %v8140_v62 = vor.u32 %v10913_v54, %v8137_v55  ;;  %v10841_v0 = vld [vmem:[#allocation4 + $0x84] sm:$0xf]  ;;  %1022 = vmatpush.bf16.msra.mxu0 %v7880_v56  ;;  %1048 = vmatpush.bf16.msra.mxu2 %v7884_v58  ;;  %v8239_v45 = vld [vmem:[#allocation4 + $0x388] sm:$0xf]  ;;  %v7984_v52 = vor.u32 %v10878_v44, %v7983_v43 }
  0x3c   :  { %v10845_v60 = vld [vmem:[#allocation4 + $0x9c] sm:$0xf0]  ;;  %v7849_v1 = vld [vmem:[#allocation4 + $0xa0] sm:$0xf0]  ;;  %v10942_v47 = vld [vmem:[#allocation4 + $0x3a4] sm:$0xf0] }
  0x3d   :  { %v8103_v61 = vld [vmem:[#allocation4 + $0x280] sm:$0xf]  ;;  %v10905_v2 = vld [vmem:[#allocation4 + $0x284] sm:$0xf]  ;;  %v7848_v4 = vor.u32 %v10845_v60, %v7847_v59  ;;  %1035 = vmatpush.bf16.msra.mxu1 %v8136_v57  ;;  %v7852_v6 = vor.u32 %v10841_v0, %v7849_v1  ;;  %1061 = vmatpush.bf16.msra.mxu3 %v8140_v62  ;;  %v10874_v48 = vld [vmem:[#allocation4 + $0x18c] sm:$0xf]  ;;  %v8240_v54 = vor.u32 %v10942_v47, %v8239_v45 }
  0x3e   :  { %v10909_v63 = vld [vmem:[#allocation4 + $0x29c] sm:$0xf0]  ;;  %v8105_v3 = vld [vmem:[#allocation4 + $0x2a0] sm:$0xf0]  ;;  %v7985_v49 = vld [vmem:[#allocation4 + $0x1a8] sm:$0xf0] }
  0x3f   :  { %v8104_v5 = vor.u32 %v10909_v63, %v8103_v61  ;;  %v7815_v7 = vld [vmem:[#allocation4 + $0x40] sm:$0xf]  ;;  %v8108_v10 = vor.u32 %v10905_v2, %v8105_v3  ;;  %v10833_v12 = vld [vmem:[#allocation4 + $0x44] sm:$0xf]  ;;  %1023 = vmatpush.bf16.msra.mxu0 %v7848_v4  ;;  %1049 = vmatpush.bf16.msra.mxu2 %v7852_v6  ;;  %v10938_v50 = vld [vmem:[#allocation4 + $0x38c] sm:$0xf]  ;;  %v7988_v55 = vor.u32 %v10874_v48, %v7985_v49 }
  0x40   :  { %v10837_v8 = vld [vmem:[#allocation4 + $0x5c] sm:$0xf0]  ;;  %v7817_v13 = vld [vmem:[#allocation4 + $0x60] sm:$0xf0]  ;;  %v8241_v51 = vld [vmem:[#allocation4 + $0x3a8] sm:$0xf0] }
  0x41   :  { %v8071_v9 = vld [vmem:[#allocation4 + $0x240] sm:$0xf]  ;;  %v10897_v14 = vld [vmem:[#allocation4 + $0x244] sm:$0xf]  ;;  %v7816_v16 = vor.u32 %v10837_v8, %v7815_v7  ;;  %1036 = vmatpush.bf16.msra.mxu1 %v8104_v5  ;;  %v7820_v20 = vor.u32 %v10833_v12, %v7817_v13  ;;  %1062 = vmatpush.bf16.msra.mxu3 %v8108_v10  ;;  %v7951_v53 = vld [vmem:[#allocation4 + $0x148] sm:$0xf]  ;;  %v8244_v59 = vor.u32 %v10938_v50, %v8241_v51 }
  0x42   :  { %v10901_v11 = vld [vmem:[#allocation4 + $0x25c] sm:$0xf0]  ;;  %v8073_v15 = vld [vmem:[#allocation4 + $0x260] sm:$0xf0]  ;;  %v10870_v56 = vld [vmem:[#allocation4 + $0x164] sm:$0xf0] }
  0x43   :  { %v7783_v17 = vld [vmem:[#allocation4] sm:$0xf]  ;;  %v8072_v19 = vor.u32 %v10901_v11, %v8071_v9  ;;  %v10825_v23 = vld [vmem:[#allocation4 + $0x4] sm:$0xf]  ;;  %v8076_v24 = vor.u32 %v10897_v14, %v8073_v15  ;;  %1024 = vmatpush.bf16.msra.mxu0 %v7816_v16  ;;  %1050 = vmatpush.bf16.msra.mxu2 %v7820_v20  ;;  %v8207_v57 = vld [vmem:[#allocation4 + $0x348] sm:$0xf]  ;;  %v7952_v0 = vor.u32 %v10870_v56, %v7951_v53 }
  0x44   :  { %v10829_v18 = vld [vmem:[#allocation4 + $0x1c] sm:$0xf0]  ;;  %v7785_v25 = vld [vmem:[#allocation4 + $0x20] sm:$0xf0]  ;;  %v10934_v58 = vld [vmem:[#allocation4 + $0x364] sm:$0xf0] }
  0x45   :  { %v8039_v21 = vld [vmem:[#allocation4 + $0x200] sm:$0xf]  ;;  %v10889_v26 = vld [vmem:[#allocation4 + $0x204] sm:$0xf]  ;;  %v7784_v31 = vor.u32 %v10829_v18, %v7783_v17  ;;  %1037 = vmatpush.bf16.msra.mxu1 %v8072_v19  ;;  %v7788_v36 = vor.u32 %v10825_v23, %v7785_v25  ;;  %1063 = vmatpush.bf16.msra.mxu3 %v8076_v24  ;;  %v10866_v60 = vld [vmem:[#allocation4 + $0x14c] sm:$0xf]  ;;  %v8208_v1 = vor.u32 %v10934_v58, %v8207_v57 }
  0x46   :  { %v10893_v22 = vld [vmem:[#allocation4 + $0x21c] sm:$0xf0]  ;;  %v8041_v27 = vld [vmem:[#allocation4 + $0x220] sm:$0xf0]  ;;  %v7953_v61 = vld [vmem:[#allocation4 + $0x168] sm:$0xf0] }
  0x47   :  { %v8040_v35 = vor.u32 %v10893_v22, %v8039_v21  ;;  %v8044_v39 = vor.u32 %v10889_v26, %v8041_v27  ;;  %1025 = vmatpush.bf16.msra.mxu0 %v7784_v31  ;;  %1051 = vmatpush.bf16.msra.mxu2 %v7788_v36  ;;  %v10930_v62 = vld [vmem:[#allocation4 + $0x34c] sm:$0xf]  ;;  %v180_v2 = vld [vmem:[%s13947_s1] sm:$0xff]  ;;  %v7956_v4 = vor.u32 %v10866_v60, %v7953_v61  ;;  %v7919_v5 = vld [vmem:[#allocation4 + $0x108] sm:$0xf] }
  0x48   :  { %v8209_v63 = vld [vmem:[#allocation4 + $0x368] sm:$0xf0]  ;;  %v10862_v6 = vld [vmem:[#allocation4 + $0x124] sm:$0xf0]  ;;  %v12069_v8 = vpack.c.bf16 %v180_v2, %v180_v2  ;;  %v8279_v2 = vld [vmem:[#allocation4 + $0x3d0] sm:$0xf] }
  0x49   :  { %1038 = vmatpush.bf16.msra.mxu1 %v8040_v35  ;;  %1064 = vmatpush.bf16.msra.mxu3 %v8044_v39  ;;  %v181_v3 = vld [vmem:[%s13947_s1 + $0x8] sm:$0xff]  ;;  %v8212_v10 = vor.u32 %v10930_v62, %v8209_v63  ;;  %v7920_v16 = vor.u32 %v10862_v6, %v7919_v5  ;;  %v10883_v5 = vld [vmem:[#allocation4 + $0x1d4] sm:$0xf] }
  0x4a   :  { %v8175_v7 = vld [vmem:[#allocation4 + $0x308] sm:$0xf]  ;;  %v12071_v9 = vpack.c.bf16 %v181_v3, %v181_v3  ;;  %v10858_v12 = vld [vmem:[#allocation4 + $0x10c] sm:$0xf]  ;;  %1052 = vmatmul.bf16.vlgmr.msra.gmra.mxu2 %v12069_v8  ;;  %1026 = vmatmul.bf16.vlgmr.msra.gmra.mxu0 %v12069_v8  ;;  %v8025_v6 = vld [vmem:[#allocation4 + $0x1f0] sm:$0xf0] }
  0x4b   :  { %1070 = vmatpush.bf16.msrb.mxu0 %v8016_v40  ;;  %1096 = vmatpush.bf16.msrb.mxu2 %v8020_v42  ;;  %v10926_v11 = vld [vmem:[#allocation4 + $0x324] sm:$0xf0]  ;;  %v7921_v13 = vld [vmem:[#allocation4 + $0x128] sm:$0xf0] }
  0x4c   :  { %v10922_v14 = vld [vmem:[#allocation4 + $0x30c] sm:$0xf]  ;;  %1065 = vmatmul.bf16.vlgmr.msra.gmra.mxu3 %v12071_v9  ;;  %1039 = vmatmul.bf16.vlgmr.msra.gmra.mxu1 %v12071_v9  ;;  %v8176_v17 = vor.u32 %v10926_v11, %v8175_v7  ;;  %v7924_v18 = vor.u32 %v10858_v12, %v7921_v13  ;;  %v7887_v19 = vld [vmem:[#allocation4 + $0xc8] sm:$0xf]  ;;  %v10947_v11 = vld [vmem:[#allocation4 + $0x3d4] sm:$0xf] }
  0x4d   :  { %1083 = vmatpush.bf16.msrb.mxu1 %v8272_v41  ;;  %1109 = vmatpush.bf16.msrb.mxu3 %v8276_v46  ;;  %v8177_v15 = vld [vmem:[#allocation4 + $0x328] sm:$0xf0]  ;;  %v10854_v20 = vld [vmem:[#allocation4 + $0xe4] sm:$0xf0]  ;;  %v8281_v12 = vld [vmem:[#allocation4 + $0x3f0] sm:$0xf0] }
  0x4e   :  { %v8143_v21 = vld [vmem:[#allocation4 + $0x2c8] sm:$0xf]  ;;  %v8180_v22 = vor.u32 %v10922_v14, %v8177_v15  ;;  %v10850_v24 = vld [vmem:[#allocation4 + $0xcc] sm:$0xf]  ;;  %v7888_v28 = vor.u32 %v10854_v20, %v7887_v19  ;;  %v8247_v19 = vld [vmem:[#allocation4 + $0x390] sm:$0xf]  ;;  %v8284_v20 = vor.u32 %v10947_v11, %v8281_v12 }
  0x4f   :  { %1071 = vmatpush.bf16.msrb.mxu0 %v7984_v52  ;;  %1097 = vmatpush.bf16.msrb.mxu2 %v7988_v55  ;;  %v10918_v23 = vld [vmem:[#allocation4 + $0x2e4] sm:$0xf0]  ;;  %v7889_v25 = vld [vmem:[#allocation4 + $0xe8] sm:$0xf0]  ;;  %v8121_v11 = vld [vmem:[#allocation4 + $0x2b0] sm:$0xf0] }
  0x50   :  { %v10914_v26 = vld [vmem:[#allocation4 + $0x2cc] sm:$0xf]  ;;  %v8144_v29 = vor.u32 %v10918_v23, %v8143_v21  ;;  %v7892_v30 = vor.u32 %v10850_v24, %v7889_v25  ;;  %v7855_v31 = vld [vmem:[#allocation4 + $0x88] sm:$0xf]  ;;  %v10943_v21 = vld [vmem:[#allocation4 + $0x3ac] sm:$0xf0] }
  0x51   :  { %1084 = vmatpush.bf16.msrb.mxu1 %v8240_v54  ;;  %1110 = vmatpush.bf16.msrb.mxu3 %v8244_v59  ;;  %v8145_v27 = vld [vmem:[#allocation4 + $0x2e8] sm:$0xf0]  ;;  %v10846_v32 = vld [vmem:[#allocation4 + $0xa4] sm:$0xf0]  ;;  %v7993_v23 = vld [vmem:[#allocation4 + $0x1b0] sm:$0xf0] }
  0x52   :  { %v8111_v33 = vld [vmem:[#allocation4 + $0x288] sm:$0xf]  ;;  %v8148_v34 = vor.u32 %v10914_v26, %v8145_v27  ;;  %v10842_v36 = vld [vmem:[#allocation4 + $0x8c] sm:$0xf]  ;;  %v7856_v40 = vor.u32 %v10846_v32, %v7855_v31  ;;  %v10939_v24 = vld [vmem:[#allocation4 + $0x394] sm:$0xf]  ;;  %v8248_v27 = vor.u32 %v10943_v21, %v8247_v19 }
  0x53   :  { %1072 = vmatpush.bf16.msrb.mxu0 %v7952_v0  ;;  %1098 = vmatpush.bf16.msrb.mxu2 %v7956_v4  ;;  %v10910_v35 = vld [vmem:[#allocation4 + $0x2a4] sm:$0xf0]  ;;  %v7857_v37 = vld [vmem:[#allocation4 + $0xa8] sm:$0xf0]  ;;  %v8023_v0 = vld [vmem:[#allocation4 + $0x1d0] sm:$0xf] }
  0x54   :  { %v10906_v38 = vld [vmem:[#allocation4 + $0x28c] sm:$0xf]  ;;  %v8112_v41 = vor.u32 %v10910_v35, %v8111_v33  ;;  %v7860_v42 = vor.u32 %v10842_v36, %v7857_v37  ;;  %v7823_v43 = vld [vmem:[#allocation4 + $0x48] sm:$0xf]  ;;  %v10951_v4 = vld [vmem:[#allocation4 + $0x3ec] sm:$0xf0] }
  0x55   :  { %1085 = vmatpush.bf16.msrb.mxu1 %v8208_v1  ;;  %1111 = vmatpush.bf16.msrb.mxu3 %v8212_v10  ;;  %v8113_v39 = vld [vmem:[#allocation4 + $0x2a8] sm:$0xf0]  ;;  %v10838_v44 = vld [vmem:[#allocation4 + $0x64] sm:$0xf0]  ;;  %v10887_v1 = vld [vmem:[#allocation4 + $0x1ec] sm:$0xf0]  ;;  %v8280_v15 = vor.u32 %v10951_v4, %v8279_v2 }
  0x56   :  { %v8079_v45 = vld [vmem:[#allocation4 + $0x248] sm:$0xf]  ;;  %v8116_v46 = vor.u32 %v10906_v38, %v8113_v39  ;;  %v10834_v48 = vld [vmem:[#allocation4 + $0x4c] sm:$0xf]  ;;  %v7824_v52 = vor.u32 %v10838_v44, %v7823_v43  ;;  %v8024_v14 = vor.u32 %v10887_v1, %v8023_v0  ;;  %v8249_v25 = vld [vmem:[#allocation4 + $0x3b0] sm:$0xf0] }
  0x57   :  { %1073 = vmatpush.bf16.msrb.mxu0 %v7920_v16  ;;  %1099 = vmatpush.bf16.msrb.mxu2 %v7924_v18  ;;  %v10902_v47 = vld [vmem:[#allocation4 + $0x264] sm:$0xf0]  ;;  %v7825_v49 = vld [vmem:[#allocation4 + $0x68] sm:$0xf0]  ;;  %v8028_v16 = vor.u32 %v10883_v5, %v8025_v6  ;;  %v10879_v18 = vld [vmem:[#allocation4 + $0x1ac] sm:$0xf0]  ;;  %v8252_v32 = vor.u32 %v10939_v24, %v8249_v25 }
  0x58   :  { %v10898_v50 = vld [vmem:[#allocation4 + $0x24c] sm:$0xf]  ;;  %v7791_v53 = vld [vmem:[#allocation4 + $0x8] sm:$0xf]  ;;  %v8080_v55 = vor.u32 %v10902_v47, %v8079_v45  ;;  %v7828_v56 = vor.u32 %v10834_v48, %v7825_v49  ;;  %v8215_v31 = vld [vmem:[#allocation4 + $0x350] sm:$0xf] }
  0x59   :  { %1086 = vmatpush.bf16.msrb.mxu1 %v8176_v17  ;;  %1112 = vmatpush.bf16.msrb.mxu3 %v8180_v22  ;;  %v8081_v51 = vld [vmem:[#allocation4 + $0x268] sm:$0xf0]  ;;  %v10830_v54 = vld [vmem:[#allocation4 + $0x24] sm:$0xf0]  ;;  %v7991_v17 = vld [vmem:[#allocation4 + $0x190] sm:$0xf] }
  0x5a   :  { %v8047_v57 = vld [vmem:[#allocation4 + $0x208] sm:$0xf]  ;;  %v10826_v59 = vld [vmem:[#allocation4 + $0xc] sm:$0xf]  ;;  %v8084_v60 = vor.u32 %v10898_v50, %v8081_v51  ;;  %v7792_v3 = vor.u32 %v10830_v54, %v7791_v53  ;;  %v10875_v22 = vld [vmem:[#allocation4 + $0x194] sm:$0xf]  ;;  %v7992_v26 = vor.u32 %v10879_v18, %v7991_v17 }
  0x5b   :  { %1074 = vmatpush.bf16.msrb.mxu0 %v7888_v28  ;;  %1100 = vmatpush.bf16.msrb.mxu2 %v7892_v30  ;;  %v10894_v58 = vld [vmem:[#allocation4 + $0x224] sm:$0xf0]  ;;  %v7793_v61 = vld [vmem:[#allocation4 + $0x28] sm:$0xf0]  ;;  %v7996_v28 = vor.u32 %v10875_v22, %v7993_v23  ;;  %v10871_v30 = vld [vmem:[#allocation4 + $0x16c] sm:$0xf0] }
  0x5c   :  { %v10890_v62 = vld [vmem:[#allocation4 + $0x20c] sm:$0xf]  ;;  %v8048_v7 = vor.u32 %v10894_v58, %v8047_v57  ;;  %v7796_v10 = vor.u32 %v10826_v59, %v7793_v61  ;;  %v10935_v33 = vld [vmem:[#allocation4 + $0x36c] sm:$0xf0]  ;;  %v7961_v35 = vld [vmem:[#allocation4 + $0x170] sm:$0xf0] }
  0x5d   :  { %1087 = vmatpush.bf16.msrb.mxu1 %v8144_v29  ;;  %1113 = vmatpush.bf16.msrb.mxu3 %v8148_v34  ;;  %v8049_v63 = vld [vmem:[#allocation4 + $0x228] sm:$0xf0]  ;;  %v7959_v29 = vld [vmem:[#allocation4 + $0x150] sm:$0xf]  ;;  %v10867_v34 = vld [vmem:[#allocation4 + $0x154] sm:$0xf]  ;;  %v8216_v39 = vor.u32 %v10935_v33, %v8215_v31 }
  0x5e   :  { %v8052_v13 = vor.u32 %v10890_v62, %v8049_v63  ;;  %v10931_v36 = vld [vmem:[#allocation4 + $0x354] sm:$0xf]  ;;  %v7960_v38 = vor.u32 %v10871_v30, %v7959_v29  ;;  %v8183_v43 = vld [vmem:[#allocation4 + $0x310] sm:$0xf] }
  0x5f   :  { %1075 = vmatpush.bf16.msrb.mxu0 %v7856_v40  ;;  %1101 = vmatpush.bf16.msrb.mxu2 %v7860_v42  ;;  %v8217_v37 = vld [vmem:[#allocation4 + $0x370] sm:$0xf0]  ;;  %v7964_v40 = vor.u32 %v10867_v34, %v7961_v35  ;;  %v10863_v42 = vld [vmem:[#allocation4 + $0x12c] sm:$0xf0] }
  0x60   :  { %v8220_v44 = vor.u32 %v10931_v36, %v8217_v37  ;;  %v10927_v45 = vld [vmem:[#allocation4 + $0x32c] sm:$0xf0]  ;;  %v7929_v47 = vld [vmem:[#allocation4 + $0x130] sm:$0xf0]  ;;  %v8031_v36 = vld [vmem:[#allocation4 + $0x1d8] sm:$0xf] }
  0x61   :  { %1088 = vmatpush.bf16.msrb.mxu1 %v8112_v41  ;;  %1114 = vmatpush.bf16.msrb.mxu3 %v8116_v46  ;;  %v7927_v41 = vld [vmem:[#allocation4 + $0x110] sm:$0xf]  ;;  %v10859_v46 = vld [vmem:[#allocation4 + $0x114] sm:$0xf]  ;;  %v8184_v51 = vor.u32 %v10927_v45, %v8183_v43  ;;  %v10888_v37 = vld [vmem:[#allocation4 + $0x1f4] sm:$0xf0] }
  0x62   :  { %v10923_v48 = vld [vmem:[#allocation4 + $0x314] sm:$0xf]  ;;  %v7928_v50 = vor.u32 %v10863_v42, %v7927_v41  ;;  %v7895_v53 = vld [vmem:[#allocation4 + $0xd0] sm:$0xf]  ;;  %v10884_v41 = vld [vmem:[#allocation4 + $0x1dc] sm:$0xf] }
  0x63   :  { %1076 = vmatpush.bf16.msrb.mxu0 %v7824_v52  ;;  %1102 = vmatpush.bf16.msrb.mxu2 %v7828_v56  ;;  %v8185_v49 = vld [vmem:[#allocation4 + $0x330] sm:$0xf0]  ;;  %v7932_v52 = vor.u32 %v10859_v46, %v7929_v47  ;;  %v10855_v54 = vld [vmem:[#allocation4 + $0xec] sm:$0xf0]  ;;  %v8033_v42 = vld [vmem:[#allocation4 + $0x1f8] sm:$0xf0] }
  0x64   :  { %v8188_v56 = vor.u32 %v10923_v48, %v8185_v49  ;;  %v10919_v57 = vld [vmem:[#allocation4 + $0x2ec] sm:$0xf0]  ;;  %v10851_v58 = vld [vmem:[#allocation4 + $0xd4] sm:$0xf]  ;;  %v7896_v62 = vor.u32 %v10855_v54, %v7895_v53  ;;  %v10948_v45 = vld [vmem:[#allocation4 + $0x3dc] sm:$0xf]  ;;  %v8032_v48 = vor.u32 %v10888_v37, %v8031_v36 }
  0x65   :  { %1089 = vmatpush.bf16.msrb.mxu1 %v8080_v55  ;;  %1115 = vmatpush.bf16.msrb.mxu3 %v8084_v60  ;;  %v8151_v55 = vld [vmem:[#allocation4 + $0x2d0] sm:$0xf]  ;;  %v7897_v59 = vld [vmem:[#allocation4 + $0xf0] sm:$0xf0]  ;;  %v8289_v46 = vld [vmem:[#allocation4 + $0x3f8] sm:$0xf0] }
  0x66   :  { %v10915_v60 = vld [vmem:[#allocation4 + $0x2d4] sm:$0xf]  ;;  %v8152_v63 = vor.u32 %v10919_v57, %v8151_v55  ;;  %v7900_v0 = vor.u32 %v10851_v58, %v7897_v59  ;;  %v7863_v1 = vld [vmem:[#allocation4 + $0x90] sm:$0xf]  ;;  %v8255_v53 = vld [vmem:[#allocation4 + $0x398] sm:$0xf]  ;;  %v8292_v54 = vor.u32 %v10948_v45, %v8289_v46 }
  0x67   :  { %1077 = vmatpush.bf16.msrb.mxu0 %v7792_v3  ;;  %1103 = vmatpush.bf16.msrb.mxu2 %v7796_v10  ;;  %v8153_v61 = vld [vmem:[#allocation4 + $0x2f0] sm:$0xf0]  ;;  %v10847_v2 = vld [vmem:[#allocation4 + $0xac] sm:$0xf0]  ;;  %v10944_v55 = vld [vmem:[#allocation4 + $0x3b4] sm:$0xf0] }
  0x68   :  { %v8119_v3 = vld [vmem:[#allocation4 + $0x290] sm:$0xf]  ;;  %v8156_v4 = vor.u32 %v10915_v60, %v8153_v61  ;;  %v10843_v6 = vld [vmem:[#allocation4 + $0x94] sm:$0xf]  ;;  %v7864_v12 = vor.u32 %v10847_v2, %v7863_v1  ;;  %v8001_v57 = vld [vmem:[#allocation4 + $0x1b8] sm:$0xf0]  ;;  %v8256_v61 = vor.u32 %v10944_v55, %v8255_v53 }
  0x69   :  { %1090 = vmatpush.bf16.msrb.mxu1 %v8048_v7  ;;  %1116 = vmatpush.bf16.msrb.mxu3 %v8052_v13  ;;  %v10911_v5 = vld [vmem:[#allocation4 + $0x2ac] sm:$0xf0]  ;;  %v7865_v7 = vld [vmem:[#allocation4 + $0xb0] sm:$0xf0]  ;;  %v10940_v58 = vld [vmem:[#allocation4 + $0x39c] sm:$0xf] }
  0x6a   :  { %1104 = vmatmul.bf16.vlgmr.msrb.gmra.mxu2 %v12069_v8  ;;  %1078 = vmatmul.bf16.vlgmr.msrb.gmra.mxu0 %v12069_v8  ;;  %v10907_v10 = vld [vmem:[#allocation4 + $0x294] sm:$0xf]  ;;  %v8120_v13 = vor.u32 %v10911_v5, %v8119_v3  ;;  %v8087_v17 = vld [vmem:[#allocation4 + $0x250] sm:$0xf]  ;;  %v8257_v59 = vld [vmem:[#allocation4 + $0x3b8] sm:$0xf0] }
  0x6b   :  { %1122 = vmatpush.bf16.msra.mxu0 %v8024_v14  ;;  %1148 = vmatpush.bf16.msra.mxu2 %v8028_v16  ;;  %v7868_v14 = vor.u32 %v10843_v6, %v7865_v7  ;;  %v10839_v16 = vld [vmem:[#allocation4 + $0x6c] sm:$0xf0]  ;;  %v8124_v18 = vor.u32 %v10907_v10, %v8121_v11  ;;  %v7833_v21 = vld [vmem:[#allocation4 + $0x70] sm:$0xf0]  ;;  %v8223_v1 = vld [vmem:[#allocation4 + $0x358] sm:$0xf]  ;;  %v8260_v2 = vor.u32 %v10940_v58, %v8257_v59 }
  0x6c   :  { %1117 = vmatmul.bf16.vlgmr.msrb.gmra.mxu3 %v12071_v9  ;;  %1091 = vmatmul.bf16.vlgmr.msrb.gmra.mxu1 %v12071_v9  ;;  %v10903_v19 = vld [vmem:[#allocation4 + $0x26c] sm:$0xf0]  ;;  %v10899_v22 = vld [vmem:[#allocation4 + $0x254] sm:$0xf]  ;;  %v10936_v3 = vld [vmem:[#allocation4 + $0x374] sm:$0xf0] }
  0x6d   :  { %1135 = vmatpush.bf16.msra.mxu1 %v8280_v15  ;;  %1161 = vmatpush.bf16.msra.mxu3 %v8284_v20  ;;  %v7831_v15 = vld [vmem:[#allocation4 + $0x50] sm:$0xf]  ;;  %v10835_v20 = vld [vmem:[#allocation4 + $0x54] sm:$0xf]  ;;  %v7969_v5 = vld [vmem:[#allocation4 + $0x178] sm:$0xf0]  ;;  %v8224_v11 = vor.u32 %v10936_v3, %v8223_v1 }
  0x6e   :  { %v8089_v23 = vld [vmem:[#allocation4 + $0x270] sm:$0xf0]  ;;  %v7832_v24 = vor.u32 %v10839_v16, %v7831_v15  ;;  %v7799_v25 = vld [vmem:[#allocation4 + $0x10] sm:$0xf]  ;;  %v10932_v6 = vld [vmem:[#allocation4 + $0x35c] sm:$0xf] }
  0x6f   :  { %1123 = vmatpush.bf16.msra.mxu0 %v7992_v26  ;;  %1149 = vmatpush.bf16.msra.mxu2 %v7996_v28  ;;  %v10831_v26 = vld [vmem:[#allocation4 + $0x2c] sm:$0xf0]  ;;  %v7836_v28 = vor.u32 %v10835_v20, %v7833_v21  ;;  %v10827_v31 = vld [vmem:[#allocation4 + $0x14] sm:$0xf]  ;;  %v8225_v7 = vld [vmem:[#allocation4 + $0x378] sm:$0xf0] }
  0x70   :  { %v8055_v29 = vld [vmem:[#allocation4 + $0x210] sm:$0xf]  ;;  %v7801_v33 = vld [vmem:[#allocation4 + $0x30] sm:$0xf0]  ;;  %v8191_v15 = vld [vmem:[#allocation4 + $0x318] sm:$0xf]  ;;  %v8228_v16 = vor.u32 %v10932_v6, %v8225_v7 }
  0x71   :  { %1136 = vmatpush.bf16.msra.mxu1 %v8248_v27  ;;  %1162 = vmatpush.bf16.msra.mxu3 %v8252_v32  ;;  %v8088_v27 = vor.u32 %v10903_v19, %v8087_v17  ;;  %v10895_v30 = vld [vmem:[#allocation4 + $0x22c] sm:$0xf0]  ;;  %v8092_v32 = vor.u32 %v10899_v22, %v8089_v23  ;;  %v10891_v34 = vld [vmem:[#allocation4 + $0x214] sm:$0xf]  ;;  %v10928_v17 = vld [vmem:[#allocation4 + $0x334] sm:$0xf0] }
  0x72   :  { %v8057_v35 = vld [vmem:[#allocation4 + $0x230] sm:$0xf0]  ;;  %v8056_v43 = vor.u32 %v10895_v30, %v8055_v29  ;;  %v7937_v19 = vld [vmem:[#allocation4 + $0x138] sm:$0xf0]  ;;  %v8192_v23 = vor.u32 %v10928_v17, %v8191_v15  ;;  %v10920_v29 = vld [vmem:[#allocation4 + $0x2f4] sm:$0xf0] }
  0x73   :  { %1124 = vmatpush.bf16.msra.mxu0 %v7960_v38  ;;  %1150 = vmatpush.bf16.msra.mxu2 %v7964_v40  ;;  %v8287_v38 = vld [vmem:[#allocation4 + $0x3d8] sm:$0xf]  ;;  %v8060_v47 = vor.u32 %v10891_v34, %v8057_v35  ;;  %v10924_v20 = vld [vmem:[#allocation4 + $0x31c] sm:$0xf]  ;;  %v8519_v6 = vld [vmem:[#allocation2 + $0x1c0] sm:$0xf] }
  0x74   :  { %v10952_v40 = vld [vmem:[#allocation4 + $0x3f4] sm:$0xf0]  ;;  %v8193_v21 = vld [vmem:[#allocation4 + $0x338] sm:$0xf0]  ;;  %v10821_v7 = vld [vmem:[#allocation2 + $0x1dc] sm:$0xf0] }
  0x75   :  { %1137 = vmatpush.bf16.msra.mxu1 %v8216_v39  ;;  %1163 = vmatpush.bf16.msra.mxu3 %v8220_v44  ;;  %v7800_v39 = vor.u32 %v10831_v26, %v7799_v25  ;;  %v7804_v44 = vor.u32 %v10827_v31, %v7801_v33  ;;  %v8288_v49 = vor.u32 %v10952_v40, %v8287_v38  ;;  %v7903_v25 = vld [vmem:[#allocation4 + $0xd8] sm:$0xf]  ;;  %v10852_v30 = vld [vmem:[#allocation4 + $0xdc] sm:$0xf]  ;;  %v10818_v17 = vld [vmem:[#allocation2 + $0x1cc] sm:$0xf] }
  0x76   :  { %v10856_v26 = vld [vmem:[#allocation4 + $0xf4] sm:$0xf0]  ;;  %v7905_v31 = vld [vmem:[#allocation4 + $0xf8] sm:$0xf0] }
  0x77   :  { %1125 = vmatpush.bf16.msra.mxu0 %v7928_v50  ;;  %1151 = vmatpush.bf16.msra.mxu2 %v7932_v52  ;;  %v8036_v50 = vor.u32 %v10884_v41, %v8033_v42  ;;  %v10880_v52 = vld [vmem:[#allocation4 + $0x1b4] sm:$0xf0]  ;;  %v8161_v33 = vld [vmem:[#allocation4 + $0x2f8] sm:$0xf0]  ;;  %v7904_v34 = vor.u32 %v10856_v26, %v7903_v25  ;;  %v7908_v36 = vor.u32 %v10852_v30, %v7905_v31  ;;  %v10809_v25 = vld [vmem:[#allocation2 + $0x184] sm:$0xf] }
  0x78   :  { %v7871_v37 = vld [vmem:[#allocation4 + $0x98] sm:$0xf]  ;;  %v10844_v42 = vld [vmem:[#allocation4 + $0x9c] sm:$0xf]  ;;  %v10810_v30 = vld [vmem:[#allocation2 + $0x18c] sm:$0xf] }
  0x79   :  { %1138 = vmatpush.bf16.msra.mxu1 %v8184_v51  ;;  %1164 = vmatpush.bf16.msra.mxu3 %v8188_v56  ;;  %v7999_v51 = vld [vmem:[#allocation4 + $0x198] sm:$0xf]  ;;  %v10876_v56 = vld [vmem:[#allocation4 + $0x19c] sm:$0xf]  ;;  %v8497_v31 = vld [vmem:[#allocation2 + $0x1a8] sm:$0xf0] }
  0x7a   :  { %v8000_v60 = vor.u32 %v10880_v52, %v7999_v51  ;;  %v10848_v38 = vld [vmem:[#allocation4 + $0xb4] sm:$0xf0]  ;;  %v8129_v45 = vld [vmem:[#allocation4 + $0x2b8] sm:$0xf0] }
  0x7b   :  { %1126 = vmatpush.bf16.msra.mxu0 %v7896_v62  ;;  %1152 = vmatpush.bf16.msra.mxu2 %v7900_v0  ;;  %v8004_v62 = vor.u32 %v10876_v56, %v8001_v57  ;;  %v10872_v0 = vld [vmem:[#allocation4 + $0x174] sm:$0xf0]  ;;  %v7872_v46 = vor.u32 %v10848_v38, %v7871_v37  ;;  %v7841_v55 = vld [vmem:[#allocation4 + $0x78] sm:$0xf0]  ;;  %v10801_v37 = vld [vmem:[#allocation2 + $0x144] sm:$0xf]  ;;  %v8500_v38 = vor.u32 %v10810_v30, %v8497_v31 }
  0x7c   :  { %v10912_v41 = vld [vmem:[#allocation4 + $0x2b4] sm:$0xf0]  ;;  %v10900_v56 = vld [vmem:[#allocation4 + $0x25c] sm:$0xf]  ;;  %v10765_v30 = vld [vmem:[#allocation2 + $0x1c] sm:$0xf0] }
  0x7d   :  { %1139 = vmatpush.bf16.msra.mxu1 %v8152_v63  ;;  %1165 = vmatpush.bf16.msra.mxu3 %v8156_v4  ;;  %v7967_v63 = vld [vmem:[#allocation4 + $0x158] sm:$0xf]  ;;  %v10868_v4 = vld [vmem:[#allocation4 + $0x15c] sm:$0xf] }
  0x7e   :  { %v7968_v10 = vor.u32 %v10872_v0, %v7967_v63  ;;  %v8095_v51 = vld [vmem:[#allocation4 + $0x258] sm:$0xf]  ;;  %v8097_v57 = vld [vmem:[#allocation4 + $0x278] sm:$0xf0] }
  0x7f   :  { %1127 = vmatpush.bf16.msra.mxu0 %v7864_v12  ;;  %1153 = vmatpush.bf16.msra.mxu2 %v7868_v14  ;;  %v7972_v12 = vor.u32 %v10868_v4, %v7969_v5  ;;  %v10864_v14 = vld [vmem:[#allocation4 + $0x134] sm:$0xf0]  ;;  %v10828_v1 = vld [vmem:[#allocation4 + $0x1c] sm:$0xf] }
  0x80   :  { %v10904_v53 = vld [vmem:[#allocation4 + $0x274] sm:$0xf0]  ;;  %v7809_v3 = vld [vmem:[#allocation4 + $0x38] sm:$0xf0] }
  0x81   :  { %1140 = vmatpush.bf16.msra.mxu1 %v8120_v13  ;;  %1166 = vmatpush.bf16.msra.mxu3 %v8124_v18  ;;  %v7935_v13 = vld [vmem:[#allocation4 + $0x118] sm:$0xf]  ;;  %v10860_v18 = vld [vmem:[#allocation4 + $0x11c] sm:$0xf] }
  0x82   :  { %v7936_v22 = vor.u32 %v10864_v14, %v7935_v13  ;;  %v7807_v59 = vld [vmem:[#allocation4 + $0x18] sm:$0xf]  ;;  %v10892_v4 = vld [vmem:[#allocation4 + $0x21c] sm:$0xf]  ;;  %v8527_v13 = vld [vmem:[#allocation2 + $0x1c8] sm:$0xf] }
  0x83   :  { %1128 = vmatpush.bf16.msra.mxu0 %v7832_v24  ;;  %1154 = vmatpush.bf16.msra.mxu2 %v7836_v28  ;;  %v7940_v24 = vor.u32 %v10860_v18, %v7937_v19  ;;  %v8196_v28 = vor.u32 %v10924_v20, %v8193_v21  ;;  %v8063_v63 = vld [vmem:[#allocation4 + $0x218] sm:$0xf]  ;;  %v8065_v5 = vld [vmem:[#allocation4 + $0x238] sm:$0xf0]  ;;  %v10822_v14 = vld [vmem:[#allocation2 + $0x1e4] sm:$0xf0]  ;;  %v8520_v20 = vor.u32 %v10821_v7, %v8519_v6 }
  0x84   :  { %v10896_v0 = vld [vmem:[#allocation4 + $0x234] sm:$0xf0]  ;;  %v8529_v18 = vld [vmem:[#allocation2 + $0x1e8] sm:$0xf0]  ;;  %v8068_v19 = vor.u32 %v10892_v4, %v8065_v5  ;;  %v8359_v5 = vld [vmem:[#allocation2 + $0x80] sm:$0xf] }
  0x85   :  { %1141 = vmatpush.bf16.msra.mxu1 %v8088_v27  ;;  %1167 = vmatpush.bf16.msra.mxu3 %v8092_v32  ;;  %v8159_v27 = vld [vmem:[#allocation4 + $0x2d8] sm:$0xf]  ;;  %v10916_v32 = vld [vmem:[#allocation4 + $0x2dc] sm:$0xf]  ;;  %v8064_v15 = vor.u32 %v10896_v0, %v8063_v63  ;;  %v8532_v26 = vor.u32 %v10818_v17, %v8529_v18  ;;  %v10790_v63 = vld [vmem:[#allocation2 + $0xe4] sm:$0xf0] }
  0x86   :  { %v8160_v35 = vor.u32 %v10920_v29, %v8159_v27  ;;  %v8164_v40 = vor.u32 %v10916_v32, %v8161_v33  ;;  %v8489_v27 = vld [vmem:[#allocation2 + $0x1a0] sm:$0xf0]  ;;  %v10814_v29 = vld [vmem:[#allocation2 + $0x1a4] sm:$0xf0]  ;;  %v10786_v0 = vld [vmem:[#allocation2 + $0xcc] sm:$0xf] }
  0x87   :  { %1129 = vmatpush.bf16.msra.mxu0 %v7800_v39  ;;  %1155 = vmatpush.bf16.msra.mxu2 %v7804_v44  ;;  %v8127_v39 = vld [vmem:[#allocation4 + $0x298] sm:$0xf]  ;;  %v10908_v44 = vld [vmem:[#allocation4 + $0x29c] sm:$0xf]  ;;  %v8492_v33 = vor.u32 %v10809_v25, %v8489_v27  ;;  %v10781_v6 = vld [vmem:[#allocation2 + $0x9c] sm:$0xf0] }
  0x88   :  { %v8132_v52 = vor.u32 %v10908_v44, %v8129_v45  ;;  %v10777_v7 = vld [vmem:[#allocation2 + $0x84] sm:$0xf]  ;;  %v10774_v25 = vld [vmem:[#allocation2 + $0x64] sm:$0xf0]  ;;  %v8337_v27 = vld [vmem:[#allocation2 + $0x68] sm:$0xf0] }
  0x89   :  { %1142 = vmatpush.bf16.msra.mxu1 %v8056_v43  ;;  %1168 = vmatpush.bf16.msra.mxu3 %v8060_v47  ;;  %v7873_v43 = vld [vmem:[#allocation4 + $0xb8] sm:$0xf0]  ;;  %v8128_v47 = vor.u32 %v10912_v41, %v8127_v39  ;;  %v8457_v39 = vld [vmem:[#allocation2 + $0x160] sm:$0xf0]  ;;  %v10806_v41 = vld [vmem:[#allocation2 + $0x164] sm:$0xf0] }
  0x8a   :  { %1156 = vmatmul.bf16.vlgmr.msra.gmra.mxu2 %v12069_v8  ;;  %1130 = vmatmul.bf16.vlgmr.msra.gmra.mxu0 %v12069_v8  ;;  %v8460_v45 = vor.u32 %v10801_v37, %v8457_v39  ;;  %v10766_v37 = vld [vmem:[#allocation2 + $0x24] sm:$0xf0]  ;;  %v8305_v39 = vld [vmem:[#allocation2 + $0x28] sm:$0xf0] }
  0x8b   :  { %1174 = vmatpush.bf16.msrb.mxu0 %v8032_v48  ;;  %1200 = vmatpush.bf16.msrb.mxu2 %v8036_v50  ;;  %v7876_v48 = vor.u32 %v10844_v42, %v7873_v43  ;;  %v10840_v50 = vld [vmem:[#allocation4 + $0x74] sm:$0xf0]  ;;  %v10802_v42 = vld [vmem:[#allocation2 + $0x14c] sm:$0xf] }
  0x8c   :  { %1169 = vmatmul.bf16.vlgmr.msra.gmra.mxu3 %v12071_v9  ;;  %1143 = vmatmul.bf16.vlgmr.msra.gmra.mxu1 %v12071_v9  ;;  %v8465_v43 = vld [vmem:[#allocation2 + $0x168] sm:$0xf0] }
  0x8d   :  { %1187 = vmatpush.bf16.msrb.mxu1 %v8288_v49  ;;  %1213 = vmatpush.bf16.msrb.mxu3 %v8292_v54  ;;  %v7839_v49 = vld [vmem:[#allocation4 + $0x58] sm:$0xf]  ;;  %v10836_v54 = vld [vmem:[#allocation4 + $0x5c] sm:$0xf] }
  0x8e   :  { %v7840_v58 = vor.u32 %v10840_v50, %v7839_v49  ;;  %v10793_v49 = vld [vmem:[#allocation2 + $0x104] sm:$0xf]  ;;  %v8468_v50 = vor.u32 %v10802_v42, %v8465_v43  ;;  %v10819_v42 = vld [vmem:[#allocation2 + $0x1d4] sm:$0xf] }
  0x8f   :  { %1175 = vmatpush.bf16.msrb.mxu0 %v8000_v60  ;;  %1201 = vmatpush.bf16.msrb.mxu2 %v8004_v62  ;;  %v10832_v60 = vld [vmem:[#allocation4 + $0x34] sm:$0xf0]  ;;  %v7844_v62 = vor.u32 %v10836_v54, %v7841_v55  ;;  %v10794_v54 = vld [vmem:[#allocation2 + $0x10c] sm:$0xf] }
  0x90   :  { %v8433_v55 = vld [vmem:[#allocation2 + $0x128] sm:$0xf0] }
  0x91   :  { %1188 = vmatpush.bf16.msrb.mxu1 %v8256_v61  ;;  %1214 = vmatpush.bf16.msrb.mxu3 %v8260_v2  ;;  %v8096_v61 = vor.u32 %v10904_v53, %v8095_v51  ;;  %v8100_v2 = vor.u32 %v10900_v56, %v8097_v57  ;;  %v8425_v51 = vld [vmem:[#allocation2 + $0x120] sm:$0xf0]  ;;  %v10798_v53 = vld [vmem:[#allocation2 + $0x124] sm:$0xf0]  ;;  %v8391_v57 = vld [vmem:[#allocation2 + $0xc0] sm:$0xf] }
  0x92   :  { %v8428_v56 = vor.u32 %v10793_v49, %v8425_v51  ;;  %v10820_v49 = vld [vmem:[#allocation2 + $0x1dc] sm:$0xf] }
  0x93   :  { %1176 = vmatpush.bf16.msrb.mxu0 %v7968_v10  ;;  %1202 = vmatpush.bf16.msrb.mxu2 %v7972_v12  ;;  %v10817_v10 = vld [vmem:[#allocation2 + $0x1c4] sm:$0xf] }
  0x94   :  { %v8521_v12 = vld [vmem:[#allocation2 + $0x1e0] sm:$0xf0] }
  0x95   :  { %1189 = vmatpush.bf16.msrb.mxu1 %v8224_v11  ;;  %1215 = vmatpush.bf16.msrb.mxu3 %v8228_v16  ;;  %v7808_v11 = vor.u32 %v10832_v60, %v7807_v59  ;;  %v7812_v16 = vor.u32 %v10828_v1, %v7809_v3  ;;  %v8524_v21 = vor.u32 %v10817_v10, %v8521_v12  ;;  %v10785_v59 = vld [vmem:[#allocation2 + $0xc4] sm:$0xf]  ;;  %v8401_v1 = vld [vmem:[#allocation2 + $0xe8] sm:$0xf0]  ;;  %v8367_v12 = vld [vmem:[#allocation2 + $0x88] sm:$0xf] }
  0x96   :  { %v8436_v60 = vor.u32 %v10794_v54, %v8433_v55  ;;  %v8404_v10 = vor.u32 %v10786_v0, %v8401_v1  ;;  %v8503_v55 = vld [vmem:[#allocation2 + $0x190] sm:$0xf] }
  0x97   :  { %1177 = vmatpush.bf16.msrb.mxu0 %v7936_v22  ;;  %1203 = vmatpush.bf16.msrb.mxu2 %v7940_v24  ;;  %v8528_v22 = vor.u32 %v10822_v14, %v8527_v13  ;;  %v10813_v24 = vld [vmem:[#allocation2 + $0x19c] sm:$0xf0]  ;;  %v10782_v13 = vld [vmem:[#allocation2 + $0xa4] sm:$0xf0]  ;;  %v10778_v14 = vld [vmem:[#allocation2 + $0x8c] sm:$0xf] }
  0x98   :  { %v8368_v18 = vor.u32 %v10782_v13, %v8367_v12  ;;  %v8481_v12 = vld [vmem:[#allocation2 + $0x178] sm:$0xf0] }
  0x99   :  { %1190 = vmatpush.bf16.msrb.mxu1 %v8192_v23  ;;  %1216 = vmatpush.bf16.msrb.mxu3 %v8196_v28  ;;  %v8487_v23 = vld [vmem:[#allocation2 + $0x180] sm:$0xf]  ;;  %v8495_v28 = vld [vmem:[#allocation2 + $0x188] sm:$0xf] }
  0x9a   :  { %v8488_v32 = vor.u32 %v10813_v24, %v8487_v23  ;;  %v8329_v23 = vld [vmem:[#allocation2 + $0x60] sm:$0xf0]  ;;  %v8335_v24 = vld [vmem:[#allocation2 + $0x48] sm:$0xf] }
  0x9b   :  { %1178 = vmatpush.bf16.msrb.mxu0 %v7904_v34  ;;  %1204 = vmatpush.bf16.msrb.mxu2 %v7908_v36  ;;  %v8496_v34 = vor.u32 %v10814_v29, %v8495_v28  ;;  %v10805_v36 = vld [vmem:[#allocation2 + $0x15c] sm:$0xf0] }
  0x9c   :  { %v8295_v29 = vld [vmem:[#allocation2] sm:$0xf] }
  0x9d   :  { %1191 = vmatpush.bf16.msrb.mxu1 %v8160_v35  ;;  %1217 = vmatpush.bf16.msrb.mxu3 %v8164_v40  ;;  %v8455_v35 = vld [vmem:[#allocation2 + $0x140] sm:$0xf]  ;;  %v8463_v40 = vld [vmem:[#allocation2 + $0x148] sm:$0xf]  ;;  %v8296_v43 = vor.u32 %v10765_v30, %v8295_v29  ;;  %v10791_v29 = vld [vmem:[#allocation2 + $0xec] sm:$0xf0] }
  0x9e   :  { %v8456_v44 = vor.u32 %v10805_v36, %v8455_v35  ;;  %v8303_v35 = vld [vmem:[#allocation2 + $0x8] sm:$0xf]  ;;  %v10787_v30 = vld [vmem:[#allocation2 + $0xd4] sm:$0xf] }
  0x9f   :  { %1179 = vmatpush.bf16.msrb.mxu0 %v7872_v46  ;;  %1205 = vmatpush.bf16.msrb.mxu2 %v7876_v48  ;;  %v8464_v46 = vor.u32 %v10806_v41, %v8463_v40  ;;  %v10797_v48 = vld [vmem:[#allocation2 + $0x11c] sm:$0xf0]  ;;  %v8535_v40 = vld [vmem:[#allocation2 + $0x1d0] sm:$0xf] }
  0xa0   :  { %v10823_v41 = vld [vmem:[#allocation2 + $0x1ec] sm:$0xf0] }
  0xa1   :  { %1192 = vmatpush.bf16.msrb.mxu1 %v8128_v47  ;;  %1218 = vmatpush.bf16.msrb.mxu3 %v8132_v52  ;;  %v8423_v47 = vld [vmem:[#allocation2 + $0x100] sm:$0xf]  ;;  %v8431_v52 = vld [vmem:[#allocation2 + $0x108] sm:$0xf] }
  0xa3   :  { %1180 = vmatpush.bf16.msrb.mxu0 %v7840_v58  ;;  %1206 = vmatpush.bf16.msrb.mxu2 %v7844_v62  ;;  %v10789_v58 = vld [vmem:[#allocation2 + $0xdc] sm:$0xf0]  ;;  %v8399_v62 = vld [vmem:[#allocation2 + $0xc8] sm:$0xf] }
  0xa4   :  { %v8400_v4 = vor.u32 %v10790_v63, %v8399_v62  ;;  %v8513_v62 = vld [vmem:[#allocation2 + $0x1b8] sm:$0xf0] }
  0xa5   :  { %1193 = vmatpush.bf16.msrb.mxu1 %v8096_v61  ;;  %1219 = vmatpush.bf16.msrb.mxu3 %v8100_v2  ;;  %v8393_v61 = vld [vmem:[#allocation2 + $0xe0] sm:$0xf0]  ;;  %v8392_v2 = vor.u32 %v10789_v58, %v8391_v57  ;;  %v8505_v57 = vld [vmem:[#allocation2 + $0x1b0] sm:$0xf0]  ;;  %v8511_v58 = vld [vmem:[#allocation2 + $0x198] sm:$0xf] }
  0xa6   :  { %v8396_v3 = vor.u32 %v10785_v59, %v8393_v61  ;;  %v10816_v59 = vld [vmem:[#allocation2 + $0x1b4] sm:$0xf0]  ;;  %v10812_v61 = vld [vmem:[#allocation2 + $0x19c] sm:$0xf] }
  0xa7   :  { %1181 = vmatpush.bf16.msrb.mxu0 %v7808_v11  ;;  %1207 = vmatpush.bf16.msrb.mxu2 %v7812_v16  ;;  %v8361_v11 = vld [vmem:[#allocation2 + $0xa0] sm:$0xf0]  ;;  %v8360_v16 = vor.u32 %v10781_v6, %v8359_v5  ;;  %v8512_v1 = vor.u32 %v10816_v59, %v8511_v58  ;;  %v8516_v5 = vor.u32 %v10812_v61, %v8513_v62  ;;  %v8473_v6 = vld [vmem:[#allocation2 + $0x170] sm:$0xf0]  ;;  %v8351_v58 = vld [vmem:[#allocation2 + $0x58] sm:$0xf] }
  0xa8   :  { %v8364_v17 = vor.u32 %v10777_v7, %v8361_v11  ;;  %v8479_v7 = vld [vmem:[#allocation2 + $0x158] sm:$0xf]  ;;  %v10804_v11 = vld [vmem:[#allocation2 + $0x15c] sm:$0xf] }
  0xa9   :  { %1194 = vmatpush.bf16.msrb.mxu1 %v8064_v15  ;;  %1220 = vmatpush.bf16.msrb.mxu3 %v8068_v19  ;;  %v8369_v15 = vld [vmem:[#allocation2 + $0xa8] sm:$0xf0]  ;;  %v8327_v19 = vld [vmem:[#allocation2 + $0x40] sm:$0xf]  ;;  %v10776_v59 = vld [vmem:[#allocation2 + $0x74] sm:$0xf0] }
  0xaa   :  { %1182 = vmatmul.bf16.vlgmr.msrb.gmra.mxu0 %v12069_v8  ;;  %1208 = vmatmul.bf16.vlgmr.msrb.gmra.mxu2 %v12069_v8  ;;  %v8424_v8 = vor.u32 %v10797_v48, %v8423_v47  ;;  %v8304_v48 = vor.u32 %v10766_v37, %v8303_v35  ;;  %v10788_v35 = vld [vmem:[#allocation2 + $0xdc] sm:$0xf] }
  0xab   :  { %1546 = vmatpush.bf16.msra.mxu0 %v8520_v20  ;;  %1572 = vmatpush.bf16.msra.mxu2 %v8528_v22  ;;  %v10773_v20 = vld [vmem:[#allocation2 + $0x5c] sm:$0xf0]  ;;  %v8372_v22 = vor.u32 %v10778_v14, %v8369_v15 }
  0xac   :  { %1195 = vmatmul.bf16.vlgmr.msrb.gmra.mxu1 %v12071_v9  ;;  %1221 = vmatmul.bf16.vlgmr.msrb.gmra.mxu3 %v12071_v9  ;;  %v8432_v9 = vor.u32 %v10798_v53, %v8431_v52  ;;  %v8328_v28 = vor.u32 %v10773_v20, %v8327_v19  ;;  %v8536_v52 = vor.u32 %v10823_v41, %v8535_v40  ;;  %v8441_v20 = vld [vmem:[#allocation2 + $0x130] sm:$0xf0]  ;;  %v8375_v40 = vld [vmem:[#allocation2 + $0x90] sm:$0xf] }
  0xad   :  { %1559 = vmatpush.bf16.msra.mxu1 %v8524_v21  ;;  %1585 = vmatpush.bf16.msra.mxu3 %v8532_v26  ;;  %v10769_v21 = vld [vmem:[#allocation2 + $0x44] sm:$0xf]  ;;  %v10770_v26 = vld [vmem:[#allocation2 + $0x4c] sm:$0xf]  ;;  %v8484_v19 = vor.u32 %v10804_v11, %v8481_v12  ;;  %v10783_v41 = vld [vmem:[#allocation2 + $0xac] sm:$0xf0] }
  0xae   :  { %v8332_v31 = vor.u32 %v10769_v21, %v8329_v23  ;;  %v8340_v36 = vor.u32 %v10770_v26, %v8337_v27  ;;  %v8447_v21 = vld [vmem:[#allocation2 + $0x118] sm:$0xf]  ;;  %v10796_v23 = vld [vmem:[#allocation2 + $0x11c] sm:$0xf] }
  0xaf   :  { %1547 = vmatpush.bf16.msra.mxu0 %v8488_v32  ;;  %1573 = vmatpush.bf16.msra.mxu2 %v8496_v34  ;;  %v8336_v32 = vor.u32 %v10774_v25, %v8335_v24  ;;  %v8297_v34 = vld [vmem:[#allocation2 + $0x20] sm:$0xf0]  ;;  %v8449_v24 = vld [vmem:[#allocation2 + $0x138] sm:$0xf0]  ;;  %v8319_v12 = vld [vmem:[#allocation2 + $0x18] sm:$0xf] }
  0xb1   :  { %1560 = vmatpush.bf16.msra.mxu1 %v8492_v33  ;;  %1586 = vmatpush.bf16.msra.mxu3 %v8500_v38  ;;  %v10761_v33 = vld [vmem:[#allocation2 + $0x4] sm:$0xf]  ;;  %v10762_v38 = vld [vmem:[#allocation2 + $0xc] sm:$0xf] }
  0xb2   :  { %v8300_v47 = vor.u32 %v10761_v33, %v8297_v34  ;;  %v8308_v51 = vor.u32 %v10762_v38, %v8305_v39  ;;  %v8415_v33 = vld [vmem:[#allocation2 + $0xd8] sm:$0xf] }
  0xb3   :  { %1548 = vmatpush.bf16.msra.mxu0 %v8456_v44  ;;  %1574 = vmatpush.bf16.msra.mxu2 %v8464_v46  ;;  %v8537_v44 = vld [vmem:[#allocation2 + $0x1f0] sm:$0xf0]  ;;  %v10824_v46 = vld [vmem:[#allocation2 + $0x1f4] sm:$0xf0] }
  0xb4   :  { %v8540_v53 = vor.u32 %v10819_v42, %v8537_v44  ;;  %v10792_v34 = vld [vmem:[#allocation2 + $0xf4] sm:$0xf0]  ;;  %v10779_v42 = vld [vmem:[#allocation2 + $0x94] sm:$0xf] }
  0xb5   :  { %1561 = vmatpush.bf16.msra.mxu1 %v8460_v45  ;;  %1587 = vmatpush.bf16.msra.mxu3 %v8468_v50  ;;  %v8543_v45 = vld [vmem:[#allocation2 + $0x1d8] sm:$0xf]  ;;  %v8545_v50 = vld [vmem:[#allocation2 + $0x1f8] sm:$0xf0]  ;;  %v8416_v39 = vor.u32 %v10792_v34, %v8415_v33  ;;  %v8377_v44 = vld [vmem:[#allocation2 + $0xb0] sm:$0xf0] }
  0xb6   :  { %v8544_v54 = vor.u32 %v10824_v46, %v8543_v45  ;;  %v8383_v45 = vld [vmem:[#allocation2 + $0x98] sm:$0xf]  ;;  %v9583_v33 = vld [vmem:[#allocation7 + $0x820] sm:$0xf0] }
  0xb7   :  { %1549 = vmatpush.bf16.msra.mxu0 %v8424_v8  ;;  %1575 = vmatpush.bf16.msra.mxu2 %v8432_v9  ;;  %v10815_v8 = vld [vmem:[#allocation2 + $0x1ac] sm:$0xf0]  ;;  %v8548_v9 = vor.u32 %v10820_v49, %v8545_v50  ;;  %v10784_v46 = vld [vmem:[#allocation2 + $0xb4] sm:$0xf0] }
  0xb8   :  { %v8504_v63 = vor.u32 %v10815_v8, %v8503_v55  ;;  %v8343_v55 = vld [vmem:[#allocation2 + $0x50] sm:$0xf] }
  0xb9   :  { %1562 = vmatpush.bf16.msra.mxu1 %v8428_v56  ;;  %1588 = vmatpush.bf16.msra.mxu3 %v8436_v60  ;;  %v10811_v56 = vld [vmem:[#allocation2 + $0x194] sm:$0xf]  ;;  %v12092_v60 = vld [vmem:[%s13946_s0] sm:$0xf]  ;;  %v10775_v8 = vld [vmem:[#allocation2 + $0x6c] sm:$0xf0] }
  0xba   :  { %v8508_v0 = vor.u32 %v10811_v56, %v8505_v57  ;;  %v10771_v56 = vld [vmem:[#allocation2 + $0x54] sm:$0xf] }
  0xbb   :  { %1550 = vmatpush.bf16.msra.mxu0 %v8392_v2  ;;  %1576 = vmatpush.bf16.msra.mxu2 %v8400_v4  ;;  %v8471_v2 = vld [vmem:[#allocation2 + $0x150] sm:$0xf]  ;;  %v10803_v4 = vld [vmem:[#allocation2 + $0x154] sm:$0xf] }
  0xbc   :  { %v8476_v14 = vor.u32 %v10803_v4, %v8473_v6  ;;  %v8345_v57 = vld [vmem:[#allocation2 + $0x70] sm:$0xf0]  ;;  %v10767_v6 = vld [vmem:[#allocation2 + $0x2c] sm:$0xf0] }
  0xbd   :  { %1563 = vmatpush.bf16.msra.mxu1 %v8396_v3  ;;  %1589 = vmatpush.bf16.msra.mxu3 %v8404_v10  ;;  %v10807_v3 = vld [vmem:[#allocation2 + $0x16c] sm:$0xf0]  ;;  %v10808_v10 = vld [vmem:[#allocation2 + $0x174] sm:$0xf0]  ;;  %v8348_v4 = vor.u32 %v10771_v56, %v8345_v57  ;;  %v8943_v57 = vld [vmem:[#allocation7 + $0x320] sm:$0xf0] }
  0xbe   :  { %v8472_v13 = vor.u32 %v10807_v3, %v8471_v2  ;;  %v8480_v15 = vor.u32 %v10808_v10, %v8479_v7  ;;  %v8344_v2 = vor.u32 %v10775_v8, %v8343_v55  ;;  %v8311_v3 = vld [vmem:[#allocation2 + $0x10] sm:$0xf]  ;;  %v10763_v7 = vld [vmem:[#allocation2 + $0x14] sm:$0xf]  ;;  %v8941_v55 = vld [vmem:[#allocation7 + $0x280] sm:$0xf] }
  0xbf   :  { %1551 = vmatpush.bf16.msra.mxu0 %v8360_v16  ;;  %1577 = vmatpush.bf16.msra.mxu2 %v8368_v18  ;;  %v8439_v16 = vld [vmem:[#allocation2 + $0x110] sm:$0xf]  ;;  %v10795_v18 = vld [vmem:[#allocation2 + $0x114] sm:$0xf]  ;;  %v11069_v8 = vld [vmem:[#allocation7 + $0x31c] sm:$0xf0] }
  0xc0   :  { %v8444_v26 = vor.u32 %v10795_v18, %v8441_v20  ;;  %v8313_v10 = vld [vmem:[#allocation2 + $0x30] sm:$0xf0]  ;;  %v8312_v20 = vor.u32 %v10767_v6, %v8311_v3  ;;  %v8781_v3 = vld [vmem:[#allocation7 + $0x140] sm:$0xf]  ;;  %v8783_v6 = vld [vmem:[#allocation7 + $0x1e0] sm:$0xf0] }
  0xc1   :  { %1564 = vmatpush.bf16.msra.mxu1 %v8364_v17  ;;  %1590 = vmatpush.bf16.msra.mxu3 %v8372_v22  ;;  %v10799_v17 = vld [vmem:[#allocation2 + $0x12c] sm:$0xf0]  ;;  %v10800_v22 = vld [vmem:[#allocation2 + $0x134] sm:$0xf0] }
  0xc2   :  { %v8440_v25 = vor.u32 %v10799_v17, %v8439_v16  ;;  %v8448_v27 = vor.u32 %v10800_v22, %v8447_v21  ;;  %v9741_v16 = vld [vmem:[#allocation7 + $0x8c0] sm:$0xf]  ;;  %v11249_v21 = vld [vmem:[#allocation7 + $0x8c4] sm:$0xf] }
  0xc3   :  { %1552 = vmatpush.bf16.msra.mxu0 %v8328_v28  ;;  %1578 = vmatpush.bf16.msra.mxu2 %v8336_v32  ;;  %v8407_v28 = vld [vmem:[#allocation2 + $0xd0] sm:$0xf]  ;;  %v8409_v32 = vld [vmem:[#allocation2 + $0xf0] sm:$0xf0]  ;;  %v11269_v17 = vld [vmem:[#allocation7 + $0x95c] sm:$0xf0] }
  0xc4   :  { %v8408_v37 = vor.u32 %v10791_v29, %v8407_v28  ;;  %v8412_v38 = vor.u32 %v10787_v30, %v8409_v32  ;;  %v9743_v22 = vld [vmem:[#allocation7 + $0x960] sm:$0xf0]  ;;  %v9581_v30 = vld [vmem:[#allocation7 + $0x780] sm:$0xf] }
  0xc5   :  { %1565 = vmatpush.bf16.msra.mxu1 %v8332_v31  ;;  %1591 = vmatpush.bf16.msra.mxu3 %v8340_v36  ;;  %v8452_v31 = vor.u32 %v10796_v23, %v8449_v24  ;;  %v8417_v36 = vld [vmem:[#allocation2 + $0xf8] sm:$0xf0]  ;;  %v8316_v23 = vor.u32 %v10763_v7, %v8313_v10  ;;  %v9746_v29 = vor.u32 %v11249_v21, %v9743_v22  ;;  %v11209_v32 = vld [vmem:[#allocation7 + $0x784] sm:$0xf] }
  0xc6   :  { %v9759_v21 = vld [vmem:[#allocation7 + $0x970] sm:$0xf0] }
  0xc7   :  { %1553 = vmatpush.bf16.msra.mxu0 %v8296_v43  ;;  %1579 = vmatpush.bf16.msra.mxu2 %v8304_v48  ;;  %v8420_v43 = vor.u32 %v10788_v35, %v8417_v36  ;;  %v8385_v48 = vld [vmem:[#allocation2 + $0xb8] sm:$0xf0]  ;;  %v1027_v49 = vpop.f32.mrf.mxu0  ;;  %v9586_v35 = vor.u32 %v11209_v32, %v9583_v33  ;;  %v9421_v36 = vld [vmem:[#allocation7 + $0x640] sm:$0xf]  ;;  %v9437_v33 = vld [vmem:[#allocation7 + $0x650] sm:$0xf] }
  0xc9   :  { %1566 = vmatpush.bf16.msra.mxu1 %v8300_v47  ;;  %1592 = vmatpush.bf16.msra.mxu3 %v8308_v51  ;;  %v10780_v47 = vld [vmem:[#allocation2 + $0x9c] sm:$0xf]  ;;  %v1040_v50 = vpop.f32.mrf.mxu1  ;;  %v8376_v51 = vor.u32 %v10783_v41, %v8375_v40 }
  0xca   :  { %1554 = vmatmul.bf16.vlgmr.msra.gmra.mxu0 %v12092_v60  ;;  %1580 = vmatmul.bf16.vlgmr.msra.gmra.mxu2 %v12092_v60 }
  0xcb   :  { %1598 = vmatpush.bf16.msrb.mxu0 %v8536_v52  ;;  %1624 = vmatpush.bf16.msrb.mxu2 %v8544_v54  ;;  %v12098_v52 = vadd.f32 %v1040_v50, %v1027_v49  ;;  %v8384_v54 = vor.u32 %v10784_v46, %v8383_v45  ;;  %v9263_v45 = vld [vmem:[#allocation7 + $0x5a0] sm:$0xf0]  ;;  %v11109_v49 = vld [vmem:[#allocation7 + $0x45c] sm:$0xf0] }
  0xcc   :  { %1567 = vmatmul.bf16.vlgmr.msra.gmra.mxu1 %v12092_v60  ;;  %1593 = vmatmul.bf16.vlgmr.msra.gmra.mxu3 %v12092_v60  ;;  %v11089_v50 = vld [vmem:[#allocation7 + $0x3c4] sm:$0xf] }
  0xcd   :  { %1611 = vmatpush.bf16.msrb.mxu1 %v8540_v53  ;;  %1637 = vmatpush.bf16.msrb.mxu3 %v8548_v9  ;;  %v8380_v53 = vor.u32 %v10779_v42, %v8377_v44  ;;  %v8388_v9 = vor.u32 %v10780_v47, %v8385_v48  ;;  %v1053_v61 = vpop.f32.mrf.mxu2  ;;  %v9261_v42 = vld [vmem:[#allocation7 + $0x500] sm:$0xf]  ;;  %v11129_v44 = vld [vmem:[#allocation7 + $0x504] sm:$0xf] }
  0xce   :  { %v9266_v47 = vor.u32 %v11129_v44, %v9263_v45  ;;  %v9101_v48 = vld [vmem:[#allocation7 + $0x3c0] sm:$0xf]  ;;  %v9117_v45 = vld [vmem:[#allocation7 + $0x3d0] sm:$0xf] }
  0xcf   :  { %1599 = vmatpush.bf16.msrb.mxu0 %v8504_v63  ;;  %1625 = vmatpush.bf16.msrb.mxu2 %v8512_v1  ;;  %v1066_v62 = vpop.f32.mrf.mxu3  ;;  %v10772_v63 = vld [vmem:[#allocation2 + $0x5c] sm:$0xf]  ;;  %v1029_v18 = vpop.f32.mrf.mxu0 }
  0xd0   :  { %v12100_v1 = vadd.f32 %v1066_v62, %v1053_v61 }
  0xd1   :  { %1612 = vmatpush.bf16.msrb.mxu1 %v8508_v0  ;;  %1638 = vmatpush.bf16.msrb.mxu3 %v8516_v5  ;;  %v8353_v0 = vld [vmem:[#allocation2 + $0x78] sm:$0xf0]  ;;  %v8352_v5 = vor.u32 %v10776_v59, %v8351_v58 }
  0xd2   :  { %v8356_v11 = vor.u32 %v10772_v63, %v8353_v0  ;;  %v8942_v63 = vor.u32 %v11069_v8, %v8941_v55  ;;  %v8957_v55 = vld [vmem:[#allocation7 + $0x290] sm:$0xf] }
  0xd3   :  { %1600 = vmatpush.bf16.msrb.mxu0 %v8472_v13  ;;  %1626 = vmatpush.bf16.msrb.mxu2 %v8480_v15  ;;  %v10768_v13 = vld [vmem:[#allocation2 + $0x34] sm:$0xf0]  ;;  %v8321_v15 = vld [vmem:[#allocation2 + $0x38] sm:$0xf0] }
  0xd4   :  { %v8320_v24 = vor.u32 %v10768_v13, %v8319_v12  ;;  %v10989_v12 = vld [vmem:[#allocation7 + $0x9c] sm:$0xf0]  ;;  %v10969_v13 = vld [vmem:[#allocation7 + $0x4] sm:$0xf]  ;;  %v11071_v8 = vld [vmem:[#allocation7 + $0x32c] sm:$0xf0] }
  0xd5   :  { %1613 = vmatpush.bf16.msrb.mxu1 %v8476_v14  ;;  %1639 = vmatpush.bf16.msrb.mxu3 %v8484_v19  ;;  %v10764_v14 = vld [vmem:[#allocation2 + $0x1c] sm:$0xf]  ;;  %v1042_v19 = vpop.f32.mrf.mxu1 }
  0xd7   :  { %1601 = vmatpush.bf16.msrb.mxu0 %v8440_v25  ;;  %1627 = vmatpush.bf16.msrb.mxu2 %v8448_v27  ;;  %v8324_v25 = vor.u32 %v10764_v14, %v8321_v15  ;;  %v1055_v27 = vpop.f32.mrf.mxu2  ;;  %v1068_v28 = vpop.f32.mrf.mxu3  ;;  %v8623_v15 = vld [vmem:[#allocation7 + $0xa0] sm:$0xf0] }
  0xd8   :  { %v9597_v27 = vld [vmem:[#allocation7 + $0x790] sm:$0xf] }
  0xd9   :  { %1614 = vmatpush.bf16.msrb.mxu1 %v8444_v26  ;;  %1640 = vmatpush.bf16.msrb.mxu3 %v8452_v31  ;;  %v9742_v26 = vor.u32 %v11269_v17, %v9741_v16  ;;  %v11229_v31 = vld [vmem:[#allocation7 + $0x81c] sm:$0xf0]  ;;  %v9757_v16 = vld [vmem:[#allocation7 + $0x8d0] sm:$0xf] }
  0xda   :  { %v9582_v34 = vor.u32 %v11229_v31, %v9581_v30  ;;  %v11271_v17 = vld [vmem:[#allocation7 + $0x96c] sm:$0xf0]  ;;  %v9599_v30 = vld [vmem:[#allocation7 + $0x830] sm:$0xf0] }
  0xdb   :  { %1602 = vmatpush.bf16.msrb.mxu0 %v8408_v37  ;;  %1628 = vmatpush.bf16.msrb.mxu2 %v8416_v39  ;;  %v11189_v37 = vld [vmem:[#allocation7 + $0x6dc] sm:$0xf0]  ;;  %v9423_v39 = vld [vmem:[#allocation7 + $0x6e0] sm:$0xf0]  ;;  %v11231_v28 = vld [vmem:[#allocation7 + $0x82c] sm:$0xf0] }
  0xdc   :  { %v9422_v40 = vor.u32 %v11189_v37, %v9421_v36  ;;  %v9598_v31 = vor.u32 %v11231_v28, %v9597_v27  ;;  %v9439_v36 = vld [vmem:[#allocation7 + $0x6f0] sm:$0xf0]  ;;  %v11233_v27 = vld [vmem:[#allocation7 + $0x83c] sm:$0xf0]  ;;  %v11213_v28 = vld [vmem:[#allocation7 + $0x7a4] sm:$0xf] }
  0xdd   :  { %1615 = vmatpush.bf16.msrb.mxu1 %v8412_v38  ;;  %1641 = vmatpush.bf16.msrb.mxu3 %v8420_v43  ;;  %v11169_v38 = vld [vmem:[#allocation7 + $0x644] sm:$0xf]  ;;  %v11149_v43 = vld [vmem:[#allocation7 + $0x59c] sm:$0xf0] }
  0xde   :  { %v9426_v41 = vor.u32 %v11169_v38, %v9423_v39  ;;  %v9262_v46 = vor.u32 %v11149_v43, %v9261_v42  ;;  %v9277_v39 = vld [vmem:[#allocation7 + $0x510] sm:$0xf]  ;;  %v9279_v42 = vld [vmem:[#allocation7 + $0x5b0] sm:$0xf0] }
  0xdf   :  { %1603 = vmatpush.bf16.msrb.mxu0 %v8376_v51  ;;  %1629 = vmatpush.bf16.msrb.mxu2 %v8384_v54  ;;  %v9103_v51 = vld [vmem:[#allocation7 + $0x460] sm:$0xf0] }
  0xe0   :  { %v9106_v54 = vor.u32 %v11089_v50, %v9103_v51 }
  0xe1   :  { %1616 = vmatpush.bf16.msrb.mxu1 %v8380_v53  ;;  %1642 = vmatpush.bf16.msrb.mxu3 %v8388_v9  ;;  %v9102_v53 = vor.u32 %v11109_v49, %v9101_v48  ;;  %v11049_v9 = vld [vmem:[#allocation7 + $0x284] sm:$0xf]  ;;  %v11091_v48 = vld [vmem:[#allocation7 + $0x3d4] sm:$0xf] }
  0xe2   :  { %v9119_v49 = vld [vmem:[#allocation7 + $0x470] sm:$0xf0] }
  0xe3   :  { %1604 = vmatpush.bf16.msrb.mxu0 %v8344_v2  ;;  %1630 = vmatpush.bf16.msrb.mxu2 %v8352_v5  ;;  %v8946_v2 = vor.u32 %v11049_v9, %v8943_v57  ;;  %v11009_v5 = vld [vmem:[#allocation7 + $0x144] sm:$0xf]  ;;  %v8959_v9 = vld [vmem:[#allocation7 + $0x330] sm:$0xf0] }
  0xe4   :  { %v8786_v10 = vor.u32 %v11009_v5, %v8783_v6  ;;  %v11011_v5 = vld [vmem:[#allocation7 + $0x154] sm:$0xf] }
  0xe5   :  { %1617 = vmatpush.bf16.msrb.mxu1 %v8348_v4  ;;  %1643 = vmatpush.bf16.msrb.mxu3 %v8356_v11  ;;  %v11029_v4 = vld [vmem:[#allocation7 + $0x1dc] sm:$0xf0]  ;;  %v8799_v6 = vld [vmem:[#allocation7 + $0x1f0] sm:$0xf0] }
  0xe6   :  { %v8782_v7 = vor.u32 %v11029_v4, %v8781_v3  ;;  %v8621_v11 = vld [vmem:[#allocation7] sm:$0xf]  ;;  %v11031_v3 = vld [vmem:[#allocation7 + $0x1ec] sm:$0xf0] }
  0xe7   :  { %1605 = vmatpush.bf16.msrb.mxu0 %v8312_v20  ;;  %1631 = vmatpush.bf16.msrb.mxu2 %v8320_v24  ;;  %v1079_v59 = vpop.f32.mrf.mxu0  ;;  %v11251_v20 = vld [vmem:[#allocation7 + $0x8d4] sm:$0xf]  ;;  %v8626_v24 = vor.u32 %v10969_v13, %v8623_v15  ;;  %v10991_v13 = vld [vmem:[#allocation7 + $0xac] sm:$0xf0] }
  0xe8   :  { %v8639_v15 = vld [vmem:[#allocation7 + $0xb0] sm:$0xf0] }
  0xe9   :  { %1618 = vmatpush.bf16.msrb.mxu1 %v8316_v23  ;;  %1644 = vmatpush.bf16.msrb.mxu3 %v8324_v25  ;;  %v1092_v62 = vpop.f32.mrf.mxu1  ;;  %v8622_v23 = vor.u32 %v10989_v12, %v8621_v11  ;;  %v9758_v25 = vor.u32 %v11271_v17, %v9757_v16  ;;  %v8802_v11 = vor.u32 %v11011_v5, %v8799_v6  ;;  %v8637_v12 = vld [vmem:[#allocation7 + $0x10] sm:$0xf]  ;;  %v9773_v16 = vld [vmem:[#allocation7 + $0x8e0] sm:$0xf]  ;;  %v8815_v5 = vld [vmem:[#allocation7 + $0x200] sm:$0xf0] }
  0xea   :  { %1606 = vmatmul.bf16.vlgmr.msrb.gmra.mxu0 %v12092_v60  ;;  %1632 = vmatmul.bf16.vlgmr.msrb.gmra.mxu2 %v12092_v60  ;;  %v12108_v0 = vadd.f32 %v1092_v62, %v1079_v59  ;;  %v8958_v59 = vor.u32 %v11071_v8, %v8957_v55  ;;  %v11273_v17 = vld [vmem:[#allocation7 + $0x97c] sm:$0xf0]  ;;  %v11053_v8 = vld [vmem:[#allocation7 + $0x2a4] sm:$0xf] }
  0xeb   :  { %3976 = vmatpush.bf16.msra.mxu2 %v9742_v26  ;;  %v9762_v26 = vor.u32 %v11251_v20, %v9759_v21  ;;  %v9775_v20 = vld [vmem:[#allocation7 + $0x980] sm:$0xf0]  ;;  %v11073_v55 = vld [vmem:[#allocation7 + $0x33c] sm:$0xf0] }
  0xec   :  { %1619 = vmatmul.bf16.vlgmr.msrb.gmra.mxu1 %v12092_v60  ;;  %1645 = vmatmul.bf16.vlgmr.msrb.gmra.mxu3 %v12092_v60 }
  0xed   :  { %3989 = vmatpush.bf16.msra.mxu3 %v9746_v29  ;;  %v1105_v56 = vpop.f32.mrf.mxu2  ;;  %v11211_v29 = vld [vmem:[#allocation7 + $0x794] sm:$0xf] }
  0xee   :  { %v9602_v32 = vor.u32 %v11211_v29, %v9599_v30  ;;  %v9615_v29 = vld [vmem:[#allocation7 + $0x840] sm:$0xf0] }
  0xef   :  { %3977 = vmatpush.bf16.msra.mxu2 %v9582_v34  ;;  %v1118_v58 = vpop.f32.mrf.mxu3  ;;  %v1081_v19 = vpop.f32.mrf.mxu0  ;;  %v11191_v34 = vld [vmem:[#allocation7 + $0x6ec] sm:$0xf0] }
  0xf0   :  { %v12106_v61 = vadd.f32 %v1118_v58, %v1105_v56  ;;  %v9438_v37 = vor.u32 %v11191_v34, %v9437_v33  ;;  %v11051_v56 = vld [vmem:[#allocation7 + $0x294] sm:$0xf]  ;;  %v11253_v19 = vld [vmem:[#allocation7 + $0x8e4] sm:$0xf]  ;;  %v11193_v33 = vld [vmem:[#allocation7 + $0x6fc] sm:$0xf0] }
  0xf1   :  { %3990 = vmatpush.bf16.msra.mxu3 %v9586_v35  ;;  %v1094_v22 = vpop.f32.mrf.mxu1  ;;  %v11171_v35 = vld [vmem:[#allocation7 + $0x654] sm:$0xf]  ;;  %v11173_v34 = vld [vmem:[#allocation7 + $0x664] sm:$0xf] }
  0xf2   :  { %v9442_v38 = vor.u32 %v11171_v35, %v9439_v36  ;;  %v8638_v22 = vor.u32 %v10991_v13, %v8637_v12  ;;  %v9455_v35 = vld [vmem:[#allocation7 + $0x700] sm:$0xf0] }
  0xf3   :  { %3978 = vmatpush.bf16.msra.mxu2 %v9422_v40  ;;  %v11151_v40 = vld [vmem:[#allocation7 + $0x5ac] sm:$0xf0]  ;;  %v10973_v13 = vld [vmem:[#allocation7 + $0x24] sm:$0xf] }
  0xf4   :  { %v9278_v43 = vor.u32 %v11151_v40, %v9277_v39  ;;  %v11153_v39 = vld [vmem:[#allocation7 + $0x5bc] sm:$0xf0]  ;;  %v11133_v40 = vld [vmem:[#allocation7 + $0x524] sm:$0xf] }
  0xf5   :  { %3991 = vmatpush.bf16.msra.mxu3 %v9426_v41  ;;  %v1107_v14 = vpop.f32.mrf.mxu2  ;;  %v11131_v41 = vld [vmem:[#allocation7 + $0x514] sm:$0xf] }
  0xf6   :  { %v9282_v44 = vor.u32 %v11131_v41, %v9279_v42  ;;  %v10971_v14 = vld [vmem:[#allocation7 + $0x14] sm:$0xf]  ;;  %v9295_v41 = vld [vmem:[#allocation7 + $0x5c0] sm:$0xf0] }
  0xf7   :  { %3979 = vmatpush.bf16.msra.mxu2 %v9262_v46  ;;  %v1120_v18 = vpop.f32.mrf.mxu3  ;;  %v11111_v46 = vld [vmem:[#allocation7 + $0x46c] sm:$0xf0] }
  0xf9   :  { %3992 = vmatpush.bf16.msra.mxu3 %v9266_v47 }
  0xfb   :  { %3980 = vmatpush.bf16.msra.mxu2 %v9102_v53  ;;  %v9118_v53 = vor.u32 %v11111_v46, %v9117_v45  ;;  %v11113_v45 = vld [vmem:[#allocation7 + $0x47c] sm:$0xf0] }
  0xfd   :  { %3993 = vmatpush.bf16.msra.mxu3 %v9106_v54  ;;  %v9122_v54 = vor.u32 %v11091_v48, %v9119_v49  ;;  %v9135_v48 = vld [vmem:[#allocation7 + $0x480] sm:$0xf0] }
  0xff   :  { %3981 = vmatpush.bf16.msra.mxu2 %v8942_v63  ;;  %v8962_v63 = vor.u32 %v11051_v56, %v8959_v9  ;;  %v8975_v56 = vld [vmem:[#allocation7 + $0x340] sm:$0xf0] }
 0x101   :  { %3994 = vmatpush.bf16.msra.mxu3 %v8946_v2  ;;  %v8797_v2 = vld [vmem:[#allocation7 + $0x150] sm:$0xf] }
 0x103   :  { %3982 = vmatpush.bf16.msra.mxu2 %v8782_v7 }
 0x105   :  { %3995 = vmatpush.bf16.msra.mxu3 %v8786_v10  ;;  %v8798_v10 = vor.u32 %v11031_v3, %v8797_v2 }
 0x107   :  { %3983 = vmatpush.bf16.msra.mxu2 %v8622_v23  ;;  %v1131_v47 = vpop.f32.mrf.mxu0  ;;  %v8642_v23 = vor.u32 %v10971_v14, %v8639_v15  ;;  %v10960_v14 = vld [vmem:[#allocation13 + $0x38] sm:$0xff] }
 0x108   :  { %v10968_v15 = vld [vmem:[#allocation13 + $0x78] sm:$0xff]  ;;  %1940 = vmatpush.bf16.msra.mxu0 %v10960_v14  ;;  %v11075_v14 = vld [vmem:[#allocation7 + $0x34c] sm:$0xf0] }
 0x109   :  { %3996 = vmatpush.bf16.msra.mxu3 %v8626_v24  ;;  %v1144_v50 = vpop.f32.mrf.mxu1  ;;  %v9774_v24 = vor.u32 %v11273_v17, %v9773_v16  ;;  %v8655_v16 = vld [vmem:[#allocation7 + $0xc0] sm:$0xf0]  ;;  %v9789_v17 = vld [vmem:[#allocation7 + $0x8f0] sm:$0xf]  ;;  %1953 = vmatpush.bf16.msra.mxu1 %v10968_v15  ;;  %v11055_v15 = vld [vmem:[#allocation7 + $0x2b4] sm:$0xf] }
 0x10a   :  { %3984 = vmatmul.bf16.vlgmr.msra.gmra.mxu2 %v12092_v60  ;;  %v12112_v51 = vadd.f32 %v1144_v50, %v1131_v47  ;;  %v11093_v47 = vld [vmem:[#allocation7 + $0x3e4] sm:$0xf] }
 0x10b   :  { %4028 = vmatpush.bf16.msrb.mxu2 %v9758_v25  ;;  %v9778_v25 = vor.u32 %v11253_v19, %v9775_v20  ;;  %v11255_v19 = vld [vmem:[#allocation7 + $0x8f4] sm:$0xf] }
 0x10c   :  { %3997 = vmatmul.bf16.vlgmr.msra.gmra.mxu3 %v12092_v60  ;;  %v9791_v20 = vld [vmem:[#allocation7 + $0x990] sm:$0xf0] }
 0x10d   :  { %4041 = vmatpush.bf16.msrb.mxu3 %v9762_v26  ;;  %v1157_v57 = vpop.f32.mrf.mxu2  ;;  %v9613_v26 = vld [vmem:[#allocation7 + $0x7a0] sm:$0xf] }
 0x10e   :  { %v9614_v30 = vor.u32 %v11233_v27, %v9613_v26  ;;  %v10959_v26 = vld [vmem:[#allocation13 + $0x30] sm:$0xff] }
 0x10f   :  { %4029 = vmatpush.bf16.msrb.mxu2 %v9598_v31  ;;  %v1170_v58 = vpop.f32.mrf.mxu3  ;;  %v1133_v4 = vpop.f32.mrf.mxu0  ;;  %v9618_v31 = vor.u32 %v11213_v28, %v9615_v29  ;;  %v10967_v27 = vld [vmem:[#allocation13 + $0x70] sm:$0xff]  ;;  %v9794_v28 = vor.u32 %v11255_v19, %v9791_v20  ;;  %v9629_v29 = vld [vmem:[#allocation7 + $0x7b0] sm:$0xf]  ;;  %1941 = vmatpush.bf16.msra.mxu0 %v10959_v26 }
 0x110   :  { %v12114_v62 = vadd.f32 %v1170_v58, %v1157_v57  ;;  %v8978_v58 = vor.u32 %v11053_v8, %v8975_v56  ;;  %v11013_v4 = vld [vmem:[#allocation7 + $0x164] sm:$0xf]  ;;  %1954 = vmatpush.bf16.msra.mxu1 %v10967_v27  ;;  %v9149_v8 = vld [vmem:[#allocation7 + $0x3f0] sm:$0xf]  ;;  %v10963_v19 = vld [vmem:[#allocation13 + $0x50] sm:$0xff] }
 0x111   :  { %4042 = vmatpush.bf16.msrb.mxu3 %v9602_v32  ;;  %v1146_v7 = vpop.f32.mrf.mxu1  ;;  %v9453_v32 = vld [vmem:[#allocation7 + $0x660] sm:$0xf]  ;;  %v8818_v12 = vor.u32 %v11013_v4, %v8815_v5  ;;  %v11115_v56 = vld [vmem:[#allocation7 + $0x48c] sm:$0xf0]  ;;  %v11015_v27 = vld [vmem:[#allocation7 + $0x174] sm:$0xf] }
 0x112   :  { %v9454_v36 = vor.u32 %v11193_v33, %v9453_v32  ;;  %v9631_v32 = vld [vmem:[#allocation7 + $0x850] sm:$0xf0]  ;;  %v10964_v4 = vld [vmem:[#allocation13 + $0x58] sm:$0xff]  ;;  %v11035_v26 = vld [vmem:[#allocation7 + $0x20c] sm:$0xf0] }
 0x113   :  { %4030 = vmatpush.bf16.msrb.mxu2 %v9438_v37  ;;  %v9458_v37 = vor.u32 %v11173_v34, %v9455_v35  ;;  %v10958_v34 = vld [vmem:[#allocation13 + $0x28] sm:$0xff] }
 0x114   :  { %v10966_v35 = vld [vmem:[#allocation13 + $0x68] sm:$0xff]  ;;  %1942 = vmatpush.bf16.msra.mxu0 %v10958_v34 }
 0x115   :  { %4043 = vmatpush.bf16.msrb.mxu3 %v9442_v38  ;;  %v1159_v18 = vpop.f32.mrf.mxu2  ;;  %v9293_v38 = vld [vmem:[#allocation7 + $0x520] sm:$0xf]  ;;  %1955 = vmatpush.bf16.msra.mxu1 %v10966_v35  ;;  %v8669_v35 = vld [vmem:[#allocation7 + $0x30] sm:$0xf] }
 0x116   :  { %v9294_v42 = vor.u32 %v11153_v39, %v9293_v38  ;;  %v11275_v18 = vld [vmem:[#allocation7 + $0x98c] sm:$0xf0]  ;;  %v11175_v39 = vld [vmem:[#allocation7 + $0x674] sm:$0xf] }
 0x117   :  { %4031 = vmatpush.bf16.msrb.mxu2 %v9278_v43  ;;  %v1172_v21 = vpop.f32.mrf.mxu3  ;;  %v9298_v43 = vor.u32 %v11133_v40, %v9295_v41  ;;  %v11195_v38 = vld [vmem:[#allocation7 + $0x70c] sm:$0xf0]  ;;  %v9471_v40 = vld [vmem:[#allocation7 + $0x710] sm:$0xf0] }
 0x119   :  { %4044 = vmatpush.bf16.msrb.mxu3 %v9282_v44  ;;  %v9133_v44 = vld [vmem:[#allocation7 + $0x3e0] sm:$0xf] }
 0x11a   :  { %v9134_v50 = vor.u32 %v11113_v45, %v9133_v44  ;;  %v9474_v44 = vor.u32 %v11175_v39, %v9471_v40  ;;  %v12128_v45 = vld [vmem:[#allocation6] sm:$0xff]  ;;  %v10995_v39 = vld [vmem:[#allocation7 + $0xcc] sm:$0xf0]  ;;  %v10975_v40 = vld [vmem:[#allocation7 + $0x34] sm:$0xf] }
 0x11b   :  { %4032 = vmatpush.bf16.msrb.mxu2 %v9118_v53  ;;  %v9138_v53 = vor.u32 %v11093_v47, %v9135_v48  ;;  %v9309_v47 = vld [vmem:[#allocation7 + $0x530] sm:$0xf] }
 0x11c   :  { %v11155_v48 = vld [vmem:[#allocation7 + $0x5cc] sm:$0xf0] }
 0x11d   :  { %4045 = vmatpush.bf16.msrb.mxu3 %v9122_v54  ;;  %v8973_v54 = vld [vmem:[#allocation7 + $0x2a0] sm:$0xf] }
 0x11e   :  { %v8974_v9 = vor.u32 %v11073_v55, %v8973_v54  ;;  %v1652_v54 = vperm.slane %v12128_v45, 0  ;;  %v9310_v55 = vor.u32 %v11155_v48, %v9309_v47  ;;  %v12138_v47 = vld [vmem:[#allocation7 + $0x904] sm:$0xf] }
 0x11f   :  { %4033 = vmatpush.bf16.msrb.mxu2 %v8958_v59  ;;  %v8813_v59 = vld [vmem:[#allocation7 + $0x160] sm:$0xf] }
 0x121   :  { %4046 = vmatpush.bf16.msrb.mxu3 %v8962_v63  ;;  %v11033_v63 = vld [vmem:[#allocation7 + $0x1fc] sm:$0xf0] }
 0x122   :  { %v8814_v7 = vor.u32 %v11033_v63, %v8813_v59  ;;  %v1653_v59 = vperm.slane %v12128_v45, 1  ;;  %v9151_v63 = vld [vmem:[#allocation7 + $0x490] sm:$0xf0] }
 0x123   :  { %4034 = vmatpush.bf16.msrb.mxu2 %v8798_v10  ;;  %v8653_v10 = vld [vmem:[#allocation7 + $0x20] sm:$0xf] }
 0x125   :  { %4047 = vmatpush.bf16.msrb.mxu3 %v8802_v11  ;;  %v10993_v11 = vld [vmem:[#allocation7 + $0xbc] sm:$0xf0] }
 0x126   :  { %v8654_v21 = vor.u32 %v10993_v11, %v8653_v10  ;;  %v9150_v10 = vor.u32 %v11115_v56, %v9149_v8  ;;  %v9749_v8 = vld [vmem:[#allocation7 + $0x8c8] sm:$0xf] }
 0x127   :  { %4035 = vmatpush.bf16.msrb.mxu2 %v8638_v22  ;;  %v12118_v46 = vpop.f32.mrf.mxu0  ;;  %v11270_v56 = vld [vmem:[#allocation7 + $0x964] sm:$0xf0] }
 0x129   :  { %4048 = vmatpush.bf16.msrb.mxu3 %v8642_v23  ;;  %v12120_v49 = vpop.f32.mrf.mxu1  ;;  %v8658_v23 = vor.u32 %v10973_v13, %v8655_v16  ;;  %v8989_v13 = vld [vmem:[#allocation7 + $0x2b0] sm:$0xf] }
 0x12a   :  { %4036 = vmatmul.bf16.vlgmr.msrb.gmra.mxu2 %v12092_v60 }
 0x12b   :  { %4080 = vmatpush.bf16.msra.mxu2 %v9774_v24  ;;  %v9790_v24 = vor.u32 %v11275_v18, %v9789_v17  ;;  %v8991_v17 = vld [vmem:[#allocation7 + $0x350] sm:$0xf0]  ;;  %v10955_v18 = vld [vmem:[#allocation13 + $0x10] sm:$0xff] }
 0x12c   :  { %4049 = vmatmul.bf16.vlgmr.msrb.gmra.mxu3 %v12092_v60 }
 0x12d   :  { %4093 = vmatpush.bf16.msra.mxu3 %v9778_v25  ;;  %v12122_v57 = vpop.f32.mrf.mxu2 }
 0x12f   :  { %4081 = vmatpush.bf16.msra.mxu2 %v9614_v30  ;;  %v12124_v2 = vpop.f32.mrf.mxu3  ;;  %v1185_v3 = vpop.f32.mrf.mxu0  ;;  %v11235_v30 = vld [vmem:[#allocation7 + $0x84c] sm:$0xf0] }
 0x130   :  { %v9630_v33 = vor.u32 %v11235_v30, %v9629_v29  ;;  %v10956_v3 = vld [vmem:[#allocation13 + $0x18] sm:$0xff]  ;;  %v8831_v30 = vld [vmem:[#allocation7 + $0x210] sm:$0xf0] }
 0x131   :  { %4094 = vmatpush.bf16.msra.mxu3 %v9618_v31  ;;  %v1198_v6 = vpop.f32.mrf.mxu1  ;;  %v11215_v31 = vld [vmem:[#allocation7 + $0x7b4] sm:$0xf] }
 0x133   :  { %4082 = vmatpush.bf16.msra.mxu2 %v9454_v36  ;;  %v9634_v36 = vor.u32 %v11215_v31, %v9631_v32  ;;  %v10954_v32 = vld [vmem:[#allocation13 + $0x8] sm:$0xff] }
 0x135   :  { %4095 = vmatpush.bf16.msra.mxu3 %v9458_v37  ;;  %v1211_v22 = vpop.f32.mrf.mxu2  ;;  %v9469_v37 = vld [vmem:[#allocation7 + $0x670] sm:$0xf] }
 0x136   :  { %v9470_v41 = vor.u32 %v11195_v38, %v9469_v37  ;;  %v8990_v22 = vor.u32 %v11075_v14, %v8989_v13  ;;  %v12150_v13 = vld [vmem:[#allocation7 + $0x860] sm:$0xf0]  ;;  %v12152_v14 = vld [vmem:[#allocation7 + $0x680] sm:$0xf] }
 0x137   :  { %4083 = vmatpush.bf16.msra.mxu2 %v9294_v42  ;;  %v1224_v25 = vpop.f32.mrf.mxu3  ;;  %v10957_v42 = vld [vmem:[#allocation13 + $0x20] sm:$0xff] }
 0x138   :  { %1943 = vmatpush.bf16.msra.mxu0 %v10957_v42  ;;  %v8829_v25 = vld [vmem:[#allocation7 + $0x170] sm:$0xf] }
 0x139   :  { %4096 = vmatpush.bf16.msra.mxu3 %v9298_v43  ;;  %v10965_v43 = vld [vmem:[#allocation13 + $0x60] sm:$0xff]  ;;  %v8830_v38 = vor.u32 %v11035_v26, %v8829_v25  ;;  %v12173_v25 = vld [vmem:[#allocation7 + $0x400] sm:$0xf] }
 0x13a   :  { %1956 = vmatpush.bf16.msra.mxu1 %v10965_v43  ;;  %v8834_v43 = vor.u32 %v11015_v27, %v8831_v30  ;;  %v12175_v26 = vld [vmem:[#allocation7 + $0x49c] sm:$0xf0]  ;;  %v9589_v27 = vld [vmem:[#allocation7 + $0x788] sm:$0xf] }
 0x13b   :  { %4084 = vmatpush.bf16.msra.mxu2 %v9134_v50  ;;  %v11135_v50 = vld [vmem:[#allocation7 + $0x534] sm:$0xf] }
 0x13c   :  { %1944 = vmatpush.bf16.msra.mxu0 %v10956_v3  ;;  %v12144_v3 = vld [vmem:[#allocation7 + $0x85c] sm:$0xf0] }
 0x13d   :  { %4097 = vmatpush.bf16.msra.mxu3 %v9138_v53  ;;  %v9311_v53 = vld [vmem:[#allocation7 + $0x5d0] sm:$0xf0] }
 0x13e   :  { %1957 = vmatpush.bf16.msra.mxu1 %v10964_v4  ;;  %v9750_v4 = vor.u32 %v11270_v56, %v9749_v8  ;;  %v12229_v8 = vld [vmem:[#allocation7 + $0x184] sm:$0xf] }
 0x13f   :  { %4085 = vmatpush.bf16.msra.mxu2 %v8974_v9  ;;  %v11095_v9 = vld [vmem:[#allocation7 + $0x3f4] sm:$0xf] }
 0x140   :  { %1945 = vmatpush.bf16.msra.mxu0 %v10955_v18 }
 0x141   :  { %4098 = vmatpush.bf16.msra.mxu3 %v8978_v58 }
 0x142   :  { %1958 = vmatpush.bf16.msra.mxu1 %v10963_v19  ;;  %v12158_v19 = vld [vmem:[#allocation7 + $0x684] sm:$0xf] }
 0x143   :  { %4086 = vmatpush.bf16.msra.mxu2 %v8814_v7 }
 0x144   :  { %1946 = vmatpush.bf16.msra.mxu0 %v10954_v32  ;;  %v12185_v32 = vld [vmem:[#allocation7 + $0x4a0] sm:$0xf0] }
 0x145   :  { %4099 = vmatpush.bf16.msra.mxu3 %v8818_v12  ;;  %v9154_v12 = vor.u32 %v11095_v9, %v9151_v63  ;;  %v12142_v63 = vld [vmem:[#allocation7 + $0x7c0] sm:$0xf] }
 0x146   :  { %v9646_v30 = vor.u32 %v12144_v3, %v12142_v63  ;;  %v12239_v3 = vld [vmem:[#allocation7 + $0x220] sm:$0xf0] }
 0x147   :  { %4087 = vmatpush.bf16.msra.mxu2 %v8654_v21  ;;  %v1555_v58 = vpop.f32.mrf.mxu0 }
 0x148   :  { %v1556_v5 = vadd.f32 %v1555_v58, %v12098_v52  ;;  %v1654_v52 = vperm.slane %v12128_v45, 2 }
 0x149   :  { %4100 = vmatpush.bf16.msra.mxu3 %v8658_v23  ;;  %v1568_v6 = vpop.f32.mrf.mxu1 }
 0x14a   :  { %4088 = vmatmul.bf16.vlgmr.msra.gmra.mxu2 %v12092_v60  ;;  %v1569_v7 = vadd.f32 %v1568_v6, %v12100_v1  ;;  %v1668_v11 = vadd.f32 %v1652_v54, %v1556_v5  ;;  %v1655_v1 = vperm.slane %v12128_v45, 3  ;;  %v11250_v5 = vld [vmem:[#allocation7 + $0x8cc] sm:$0xf] }
 0x14b   :  { %4132 = vmatpush.bf16.msrb.mxu2 %v9790_v24  ;;  %v8994_v24 = vor.u32 %v11055_v15, %v8991_v17  ;;  %v9751_v6 = vld [vmem:[#allocation7 + $0x968] sm:$0xf0]  ;;  %v12154_v15 = vld [vmem:[#allocation7 + $0x71c] sm:$0xf0] }
 0x14c   :  { %4101 = vmatmul.bf16.vlgmr.msra.gmra.mxu3 %v12092_v60  ;;  %v9314_v60 = vor.u32 %v11135_v50, %v9311_v53  ;;  %v1669_v16 = vadd.f32 %v1653_v59, %v1569_v7  ;;  %v8549_v20 = vmul.f32 -1.442695, %v1668_v11  ;;  %v9807_v50 = vld [vmem:[#allocation7 + $0x9a0] sm:$0xf0]  ;;  %v10961_v53 = vld [vmem:[#allocation13 + $0x40] sm:$0xff] }
 0x14d   :  { %4145 = vmatpush.bf16.msrb.mxu3 %v9794_v28  ;;  %v1581_v23 = vpop.f32.mrf.mxu2  ;;  %v9810_v17 = vor.u32 %v12138_v47, %v9807_v50  ;;  %v12210_v47 = vld [vmem:[#allocation7 + $0x180] sm:$0xf] }
 0x14e   :  { %v8550_v21 = vmul.f32 -1.442695, %v1669_v16  ;;  %11514 = vpow2.f32 %v8549_v20  ;;  %v1582_v28 = vadd.f32 %v1581_v23, %v12108_v0  ;;  %v9805_v0 = vld [vmem:[#allocation7 + $0x900] sm:$0xf]  ;;  %v9754_v16 = vor.u32 %v11250_v5, %v9751_v6  ;;  %v12160_v20 = vld [vmem:[#allocation7 + $0x720] sm:$0xf0] }
 0x14f   :  { %4133 = vmatpush.bf16.msrb.mxu2 %v9630_v33  ;;  %v1594_v29 = vpop.f32.mrf.mxu3  ;;  %v1557_v31 = vpop.f32.mrf.mxu0  ;;  %v10962_v33 = vld [vmem:[#allocation13 + $0x48] sm:$0xff]  ;;  %v12169_v23 = vld [vmem:[#allocation7 + $0x544] sm:$0xf] }
 0x150   :  { %11516 = vpow2.f32 %v8550_v21  ;;  %v1595_v34 = vadd.f32 %v1594_v29, %v12106_v61  ;;  %v1670_v37 = vadd.f32 %v1654_v52, %v1582_v28  ;;  %1959 = vmatpush.bf16.msra.mxu1 %v10962_v33  ;;  %v10953_v61 = vld [vmem:[#allocation13] sm:$0xff]  ;;  %v12162_v21 = vld [vmem:[#allocation7 + $0x540] sm:$0xf]  ;;  %v12179_v29 = vadd.f32 %v12120_v49, %v12118_v46  ;;  %v12183_v31 = vld [vmem:[#allocation7 + $0x404] sm:$0xf] }
 0x151   :  { %4146 = vmatpush.bf16.msrb.mxu3 %v9634_v36  ;;  %v1570_v36 = vpop.f32.mrf.mxu1  ;;  %1947 = vmatpush.bf16.msra.mxu0 %v10953_v61  ;;  %v12164_v52 = vld [vmem:[#allocation7 + $0x5dc] sm:$0xf0]  ;;  %v11230_v28 = vld [vmem:[#allocation7 + $0x824] sm:$0xf0]  ;;  %v9486_v49 = vor.u32 %v12154_v15, %v12152_v14  ;;  %v9170_v6 = vor.u32 %v12183_v31, %v12185_v32 }
 0x152   :  { %v1671_v42 = vadd.f32 %v1655_v1, %v1595_v34  ;;  %v8551_v48 = vmul.f32 -1.442695, %v1670_v37  ;;  %v1656_v1 = vperm.slane %v12128_v45, 4  ;;  %v9590_v33 = vor.u32 %v11230_v28, %v9589_v27  ;;  %v11210_v34 = vld [vmem:[#allocation7 + $0x78c] sm:$0xf] }
 0x153   :  { %4134 = vmatpush.bf16.msrb.mxu2 %v9470_v41  ;;  %v8671_v41 = vld [vmem:[#allocation7 + $0xd0] sm:$0xf0]  ;;  %v12189_v37 = vadd.f32 %v12124_v2, %v12122_v57  ;;  %v9490_v57 = vor.u32 %v12158_v19, %v12160_v20  ;;  %v9326_v2 = vor.u32 %v12164_v52, %v12162_v21  ;;  %v8850_v20 = vor.u32 %v12229_v8, %v12239_v3  ;;  %v9269_v27 = vld [vmem:[#allocation7 + $0x508] sm:$0xf] }
 0x154   :  { %v11515_v54 = vpop.eup %11514  ;;  %11518 = vpow2.f32 %v8551_v48  ;;  %v8674_v59 = vor.u32 %v10975_v40, %v8671_v41  ;;  %1960 = vmatpush.bf16.msra.mxu1 %v10961_v53  ;;  %v12199_v40 = vld [vmem:[#allocation7 + $0x2c4] sm:$0xf]  ;;  %v12215_v48 = vld [vmem:[%s13946_s0] sm:$0xf]  ;;  %v11219_v8 = vld [vmem:[#allocation7 + $0x7d4] sm:$0xf] }
 0x155   :  { %4147 = vmatpush.bf16.msrb.mxu3 %v9474_v44  ;;  %v11277_v44 = vld [vmem:[#allocation7 + $0x99c] sm:$0xf0]  ;;  %v12140_v58 = vadd.f32 1.0, %v11515_v54  ;;  %v1583_v11 = vpop.f32.mrf.mxu2  ;;  %4002 = vmatpush.bf16.msrb.mxu0 %v9750_v4  ;;  %v9166_v54 = vor.u32 %v12175_v26, %v12173_v25  ;;  %v9429_v4 = vld [vmem:[#allocation7 + $0x648] sm:$0xf] }
 0x156   :  { %v11517_v9 = vpop.eup %11516  ;;  %v11190_v11 = vld [vmem:[#allocation7 + $0x6e4] sm:$0xf0]  ;;  %v9663_v3 = vld [vmem:[#allocation7 + $0x870] sm:$0xf0] }
 0x157   :  { %4135 = vmatpush.bf16.msrb.mxu2 %v9310_v55  ;;  %v8552_v55 = vmul.f32 -1.442695, %v1671_v42  ;;  %v12146_v7 = vadd.f32 1.0, %v11517_v9  ;;  %v1596_v18 = vpop.f32.mrf.mxu3  ;;  %v1693_v15 = vand.u32 2147483647, %v12140_v58  ;;  %vm1689_vm0 = vweird.f32 %v12140_v58 }
 0x158   :  { %4015 = vmatpush.bf16.msrb.mxu1 %v9754_v16 }
 0x159   :  { %4148 = vmatpush.bf16.msrb.mxu3 %v9314_v60  ;;  %v8670_v60 = vor.u32 %v10995_v39, %v8669_v35  ;;  %11520 = vpow2.f32 %v8552_v55  ;;  %v9591_v35 = vld [vmem:[#allocation7 + $0x828] sm:$0xf0]  ;;  %v12197_v39 = vld [vmem:[#allocation7 + $0x35c] sm:$0xf0]  ;;  %4003 = vmatpush.bf16.msrb.mxu0 %v9590_v33  ;;  %v1659_v55 = vperm.slane %v12128_v45, 7  ;;  %v1710_v63 = vand.u32 2147483648, %v12146_v7 }
 0x15a   :  { %11522 = vrcp.f32 %v12140_v58  ;;  %v11519_v36 = vpop.eup %11518  ;;  %v9594_v41 = vor.u32 %v11210_v34, %v9591_v35  ;;  %v1708_v19 = vand.u32 2147483647, %v12146_v7  ;;  %vm1704_vm1 = vweird.f32 %v12146_v7  ;;  %v11150_v34 = vld [vmem:[#allocation7 + $0x5a4] sm:$0xf0]  ;;  %v11130_v35 = vld [vmem:[#allocation7 + $0x50c] sm:$0xf] }
 0x15b   :  { %4136 = vmatpush.bf16.msrb.mxu2 %v9150_v10  ;;  %v9806_v10 = vor.u32 %v11277_v44, %v9805_v0  ;;  %11524 = vrcp.f32 %v12146_v7  ;;  %v1658_v0 = vperm.slane %v12128_v45, 6  ;;  %v12208_v44 = vld [vmem:[#allocation7 + $0x360] sm:$0xf0]  ;;  %vm12276_vm5 = vcmp.eq.f32.partialorder %v1693_v15, 8.507059e+37  ;;  %v11110_v15 = vld [vmem:[#allocation7 + $0x464] sm:$0xf0] }
 0x15c   :  { %4016 = vmatpush.bf16.msrb.mxu1 %v9594_v41  ;;  %v9010_v16 = vor.u32 %v12199_v40, %v12208_v44  ;;  %v12263_v41 = vor.u32 1.1754944e-38, %v1710_v63  ;;  %vm12285_vm7 = vcmp.eq.f32.partialorder %v1708_v19, 8.507059e+37  ;;  %v11090_v19 = vld [vmem:[#allocation7 + $0x3cc] sm:$0xf] }
 0x15d   :  { %4149 = vmatpush.bf16.msrb.mxu3 %v9154_v12  ;;  %v12148_v12 = vld [vmem:[#allocation7 + $0x7c4] sm:$0xf] }
 0x15e   :  { %v9650_v46 = vor.u32 %v12148_v12, %v12150_v13  ;;  %v11170_v12 = vld [vmem:[#allocation7 + $0x64c] sm:$0xf] }
 0x15f   :  { %4137 = vmatpush.bf16.msrb.mxu2 %v8990_v22  ;;  %v1657_v22 = vperm.slane %v12128_v45, 5  ;;  %v11521_v42 = vpop.eup %11520  ;;  %v9431_v13 = vld [vmem:[#allocation7 + $0x6e8] sm:$0xf0] }
 0x160   :  { %v12218_v50 = vpop.eup %11522  ;;  %v12220_v61 = vadd.f32 1.0, %v11521_v42  ;;  %v9434_v33 = vor.u32 %v11170_v12, %v9431_v13  ;;  %v9271_v42 = vld [vmem:[#allocation7 + $0x5a8] sm:$0xf0] }
 0x161   :  { %4150 = vmatpush.bf16.msrb.mxu3 %v8994_v24  ;;  %v12171_v24 = vld [vmem:[#allocation7 + $0x5e0] sm:$0xf0]  ;;  %v12232_v56 = vpop.eup %11524  ;;  %v1685_v9 = vmul.f32 %v12218_v50, %v12140_v58  ;;  %vm1690_vm4 = vweird.f32 %v12218_v50 }
 0x162   :  { %v9330_v53 = vor.u32 %v12169_v23, %v12171_v24  ;;  %v1700_v5 = vmul.f32 %v12232_v56, %v12146_v7  ;;  %vm1742_vm3 = vweird.f32 %v12220_v61  ;;  %4017 = vmatpush.bf16.msrb.mxu1 %v9434_v33  ;;  %v1748_v63 = vand.u32 2147483648, %v12220_v61  ;;  %vm12305_vm8 = vmor %vm1689_vm0, %vm1690_vm4  ;;  %v12312_v23 = vld [vmem:[#allocation7 + $0x288] sm:$0xf] }
 0x163   :  { %4138 = vmatpush.bf16.msrb.mxu2 %v8830_v38  ;;  %v12195_v38 = vld [vmem:[#allocation7 + $0x2c0] sm:$0xf]  ;;  %v1686_v14 = vsub.f32 1.0, %v1685_v9  ;;  %vm1705_vm6 = vweird.f32 %v12232_v56 }
 0x164   :  { %v1701_v18 = vsub.f32 1.0, %v1700_v5  ;;  %v9274_v5 = vor.u32 %v11130_v35, %v9271_v42  ;;  %vm12322_vm11 = vmor %vm1704_vm1, %vm1705_vm6 }
 0x165   :  { %4151 = vmatpush.bf16.msrb.mxu3 %v8834_v43  ;;  %v12201_v43 = vadd.f32 1.0, %v11519_v36  ;;  %v1687_v36 = vmul.f32 %v12218_v50, %v1686_v14 }
 0x166   :  { %4018 = vmatpush.bf16.msrb.mxu1 %v9274_v5  ;;  %v182_v5 = vld [vmem:[%s13948_s2] sm:$0xff] }
 0x167   :  { %4139 = vmatpush.bf16.msrb.mxu2 %v8670_v60  ;;  %v12227_v60 = vld [vmem:[#allocation7 + $0x21c] sm:$0xf0]  ;;  %11526 = vrcp.f32 %v12201_v43  ;;  %vm1727_vm2 = vweird.f32 %v12201_v43  ;;  %v1688_v42 = vadd.f32 %v12218_v50, %v1687_v36  ;;  %v11050_v36 = vld [vmem:[#allocation7 + $0x28c] sm:$0xf] }
 0x168   :  { %11528 = vrcp.f32 %v12220_v61 }
 0x169   :  { %4152 = vmatpush.bf16.msrb.mxu3 %v8674_v59  ;;  %v1695_v59 = vand.u32 2147483648, %v12140_v58  ;;  %v1620_v14 = vpop.f32.mrf.mxu1  ;;  %v11070_v58 = vld [vmem:[#allocation7 + $0x324] sm:$0xf0] }
 0x16a   :  { %4140 = vmatmul.bf16.vlgmr.msrb.gmra.mxu2 %v12215_v48  ;;  %v8950_v26 = vor.u32 %v11070_v58, %v12312_v23  ;;  %v11259_v23 = vld [vmem:[#allocation7 + $0x914] sm:$0xf]  ;;  %v10990_v58 = vld [vmem:[#allocation7 + $0xa4] sm:$0xf0] }
 0x16b   :  { %4184 = vmatpush.bf16.msra.mxu2 %v9806_v10  ;;  %v9006_v10 = vor.u32 %v12197_v39, %v12195_v38  ;;  %v12257_v28 = vor.u32 1.1754944e-38, %v1695_v59  ;;  %v1607_v59 = vpop.f32.mrf.mxu0  ;;  %v11279_v38 = vld [vmem:[#allocation7 + $0x9ac] sm:$0xf0] }
 0x16c   :  { %4153 = vmatmul.bf16.vlgmr.msrb.gmra.mxu3 %v12215_v48  ;;  %v1608_v12 = vadd.f32 %v1607_v59, %v12112_v51  ;;  %v9109_v51 = vld [vmem:[#allocation7 + $0x3c8] sm:$0xf]  ;;  %v9111_v59 = vld [vmem:[#allocation7 + $0x468] sm:$0xf0] }
 0x16d   :  { %4197 = vmatpush.bf16.msra.mxu3 %v9810_v17  ;;  %v8846_v17 = vor.u32 %v12227_v60, %v12210_v47  ;;  %v12265_v9 = vpop.eup %11526  ;;  %v1633_v25 = vpop.f32.mrf.mxu2 }
 0x16e   :  { %v1672_v35 = vadd.f32 %v1656_v1, %v1608_v12  ;;  %vm1728_vm9 = vweird.f32 %v12265_v9  ;;  %v1634_v31 = vadd.f32 %v1633_v25, %v12179_v29  ;;  %v9666_v25 = vor.u32 %v11219_v8, %v9663_v3  ;;  %v9767_v3 = vld [vmem:[#allocation7 + $0x978] sm:$0xf0] }
 0x16f   :  { %4185 = vmatpush.bf16.msra.mxu2 %v9646_v30  ;;  %v9430_v30 = vor.u32 %v11190_v11, %v9429_v4  ;;  %v9270_v4 = vor.u32 %v11150_v34, %v9269_v27  ;;  %v12269_v11 = vpop.eup %11528  ;;  %v1731_v27 = vand.u32 2147483647, %v12201_v43  ;;  %vm12348_vm12 = vmor %vm1727_vm2, %vm1728_vm9  ;;  %v1646_v32 = vpop.f32.mrf.mxu3 }
 0x170   :  { %11530 = vtanh.f32 %v1672_v35  ;;  %vm1743_vm10 = vweird.f32 %v12269_v11  ;;  %v1647_v29 = vadd.f32 %v1646_v32, %v12189_v37  ;;  %v11010_v35 = vld [vmem:[#allocation7 + $0x14c] sm:$0xf]  ;;  %v8685_v37 = vld [vmem:[#allocation7 + $0x40] sm:$0xf] }
 0x171   :  { %4198 = vmatpush.bf16.msra.mxu3 %v9650_v46  ;;  %v1702_v46 = vmul.f32 %v12232_v56, %v1701_v18  ;;  %4004 = vmatpush.bf16.msrb.mxu0 %v9430_v30  ;;  %v1738_v18 = vmul.f32 %v12269_v11, %v12220_v61  ;;  %v1621_v30 = vadd.f32 %v1620_v14, %v12114_v62  ;;  %vm12361_vm13 = vmor %vm1742_vm3, %vm1743_vm10  ;;  %vm1732_vm14 = vcmp.eq.f32.partialorder %v1731_v27, 8.507059e+37  ;;  %v10977_v27 = vld [vmem:[#allocation7 + $0x44] sm:$0xf] }
 0x173   :  { %4186 = vmatpush.bf16.msra.mxu2 %v9486_v49  ;;  %v1733_v49 = vand.u32 2147483648, %v12201_v43  ;;  %v12296_v62 = vadd.f32 %v12232_v56, %v1702_v46  ;;  %v1739_v21 = vsub.f32 1.0, %v1738_v18  ;;  %v1673_v1 = vadd.f32 %v1657_v22, %v1621_v30  ;;  %v8951_v46 = vld [vmem:[#allocation7 + $0x328] sm:$0xf0] }
 0x174   :  { %v8954_v30 = vor.u32 %v11050_v36, %v8951_v46  ;;  %v8631_v36 = vld [vmem:[#allocation7 + $0xa8] sm:$0xf0] }
 0x175   :  { %4199 = vmatpush.bf16.msra.mxu3 %v9490_v57  ;;  %v1723_v57 = vmul.f32 %v12265_v9, %v12201_v43  ;;  %v1734_v14 = vor.u32 1.1754944e-38, %v1733_v49  ;;  %4005 = vmatpush.bf16.msrb.mxu0 %v9270_v4  ;;  %v1740_v49 = vmul.f32 %v12269_v11, %v1739_v21  ;;  %11532 = vtanh.f32 %v1673_v1  ;;  %v11030_v43 = vld [vmem:[#allocation7 + $0x1e4] sm:$0xf0] }
 0x176   :  { %v9114_v4 = vor.u32 %v11090_v19, %v9111_v59  ;;  %v1707_v12 = vsel %vm12322_vm11, %v12232_v56, %v12296_v62  ;;  %v183_v56 = vld [vmem:[%s13948_s2 + $0x8] sm:$0xff]  ;;  %v1674_v59 = vadd.f32 %v1658_v0, %v1634_v31  ;;  %v11531_v21 = vpop.eup %11530  ;;  %v9503_v31 = vld [vmem:[#allocation7 + $0x730] sm:$0xf0] }
 0x177   :  { %4187 = vmatpush.bf16.msra.mxu2 %v9326_v2  ;;  %v1724_v34 = vsub.f32 1.0, %v1723_v57  ;;  %v1746_v2 = vand.u32 2147483647, %v12220_v61  ;;  %v1692_v57 = vsel %vm12305_vm8, %v12218_v50, %v1688_v42  ;;  %v1741_v18 = vadd.f32 %v12269_v11, %v1740_v49  ;;  %v8791_v42 = vld [vmem:[#allocation7 + $0x1e8] sm:$0xf0]  ;;  %v1635_v49 = vpop.f32.mrf.mxu2  ;;  %v1648_v47 = vpop.f32.mrf.mxu3 }
 0x178   :  { %4019 = vmatpush.bf16.msrb.mxu1 %v9114_v4  ;;  %v1697_v62 = vsel %vm12276_vm5, %v12257_v28, %v1692_v57  ;;  %v1712_v28 = vsel %vm12285_vm7, %v12263_v41, %v1707_v12  ;;  %v8687_v0 = vld [vmem:[#allocation7 + $0xe0] sm:$0xf0]  ;;  %v8794_v41 = vor.u32 %v11010_v35, %v8791_v42  ;;  %v11199_v50 = vld [vmem:[#allocation7 + $0x72c] sm:$0xf0]  ;;  %v11272_v47 = vld [vmem:[#allocation7 + $0x974] sm:$0xf0] }
 0x179   :  { %4200 = vmatpush.bf16.msra.mxu3 %v9330_v53  ;;  %v1725_v24 = vmul.f32 %v12265_v9, %v1724_v34  ;;  %v9110_v53 = vor.u32 %v11110_v15, %v9109_v51  ;;  %v8789_v51 = vld [vmem:[#allocation7 + $0x148] sm:$0xf]  ;;  %vm1747_vm15 = vcmp.eq.f32.partialorder %v1746_v2, 8.507059e+37  ;;  %v1622_v34 = vpop.f32.mrf.mxu1  ;;  %v1745_v19 = vsel %vm12361_vm13, %v12269_v11, %v1741_v18  ;;  %v9821_v11 = vld [vmem:[#allocation7 + $0x910] sm:$0xf] }
 0x17a   :  { %v8790_v39 = vor.u32 %v11030_v43, %v8789_v51  ;;  %v1794_v1 = vmul.f32 %v11531_v21, %v1697_v62  ;;  %v8553_v2 = vmul.f32 -1.442695, %v1674_v59  ;;  %v8690_v22 = vor.u32 %v10977_v27, %v8687_v0  ;;  %v11179_v18 = vld [vmem:[#allocation7 + $0x694] sm:$0xf]  ;;  %v9341_v51 = vld [vmem:[#allocation7 + $0x550] sm:$0xf] }
 0x17b   :  { %4188 = vmatpush.bf16.msra.mxu2 %v9166_v54  ;;  %v1726_v7 = vadd.f32 %v12265_v9, %v1725_v24  ;;  %v1749_v54 = vor.u32 1.1754944e-38, %v1748_v63  ;;  %4006 = vmatpush.bf16.msrb.mxu0 %v9110_v53  ;;  %v9823_v24 = vld [vmem:[#allocation7 + $0x9b0] sm:$0xf0]  ;;  %v8629_v53 = vld [vmem:[#allocation7 + $0x8] sm:$0xf]  ;;  %v9822_v4 = vor.u32 %v11279_v38, %v9821_v11 }
 0x17c   :  { %4020 = vmatpush.bf16.msrb.mxu1 %v8954_v30  ;;  %11534 = vpow2.f32 %v8553_v2  ;;  %v9826_v60 = vor.u32 %v11259_v23, %v9823_v24  ;;  %v8630_v57 = vor.u32 %v10990_v58, %v8629_v53  ;;  %v9506_v30 = vor.u32 %v11179_v18, %v9503_v31  ;;  %v11159_v43 = vld [vmem:[#allocation7 + $0x5ec] sm:$0xf0]  ;;  %v11139_v63 = vld [vmem:[#allocation7 + $0x554] sm:$0xf]  ;;  %v9605_v31 = vld [vmem:[#allocation7 + $0x798] sm:$0xf] }
 0x17d   :  { %4201 = vmatpush.bf16.msra.mxu3 %v9170_v6  ;;  %v1609_v6 = vpop.f32.mrf.mxu0  ;;  %v1730_v15 = vsel %vm12348_vm12, %v12265_v9, %v1726_v7  ;;  %v10997_v9 = vld [vmem:[#allocation7 + $0xdc] sm:$0xf0]  ;;  %v1750_v13 = vsel %vm1747_vm15, %v1749_v54, %v1745_v19  ;;  %v9181_v35 = vld [vmem:[#allocation7 + $0x410] sm:$0xf]  ;;  %v9183_v19 = vld [vmem:[#allocation7 + $0x4b0] sm:$0xf0] }
 0x17e   :  { %v1735_v61 = vsel %vm1732_vm14, %v1734_v14, %v1730_v15  ;;  %v1675_v14 = vadd.f32 %v1659_v55, %v1647_v29  ;;  %v1793_v33 = vmul.f32 %v1750_v13, %v183_v56  ;;  %v8686_v44 = vor.u32 %v10997_v9, %v8685_v37  ;;  %v9343_v15 = vld [vmem:[#allocation7 + $0x5f0] sm:$0xf0]  ;;  %v11119_v42 = vld [vmem:[#allocation7 + $0x4ac] sm:$0xf0] }
 0x17f   :  { %4189 = vmatpush.bf16.msra.mxu2 %v9006_v10  ;;  %v11533_v10 = vpop.eup %11532  ;;  %v1792_v52 = vmul.f32 %v1735_v61, %v182_v5  ;;  %4007 = vmatpush.bf16.msrb.mxu0 %v8950_v26  ;;  %v11239_v5 = vld [vmem:[#allocation7 + $0x86c] sm:$0xf0]  ;;  %v9342_v29 = vor.u32 %v11159_v43, %v9341_v51  ;;  %v9346_v34 = vor.u32 %v11139_v63, %v9343_v15  ;;  %v11099_v61 = vld [vmem:[#allocation7 + $0x414] sm:$0xf]  ;;  %v11232_v43 = vld [vmem:[#allocation7 + $0x834] sm:$0xf0] }
 0x180   :  { %v1795_v45 = vmul.f32 %v11533_v10, %v1712_v28  ;;  %v8554_v55 = vmul.f32 -1.442695, %v1675_v14  ;;  %4021 = vmatpush.bf16.msrb.mxu1 %v8794_v41  ;;  %v9501_v26 = vld [vmem:[#allocation7 + $0x690] sm:$0xf]  ;;  %v9182_v27 = vor.u32 %v11119_v42, %v9181_v35  ;;  %v9186_v28 = vor.u32 %v11099_v61, %v9183_v19  ;;  %v11059_v11 = vld [vmem:[#allocation7 + $0x2d4] sm:$0xf] }
 0x181   :  { %4202 = vmatpush.bf16.msra.mxu3 %v9010_v16  ;;  %v12388_v40 = vadd.f32 %v1794_v1, %v1792_v52  ;;  %v10970_v16 = vld [vmem:[#allocation7 + $0xc] sm:$0xf]  ;;  %v9502_v6 = vor.u32 %v11199_v50, %v9501_v26  ;;  %v9021_v13 = vld [vmem:[#allocation7 + $0x2d0] sm:$0xf]  ;;  %v9023_v38 = vld [vmem:[#allocation7 + $0x370] sm:$0xf0]  ;;  %v9606_v19 = vor.u32 %v11232_v43, %v9605_v31 }
 0x182   :  { %v12393_v46 = vadd.f32 %v1795_v45, %v1793_v33  ;;  %11536 = vpow2.f32 %v8554_v55  ;;  %v11535_v12 = vpop.eup %11534  ;;  %v11079_v14 = vld [vmem:[#allocation7 + $0x36c] sm:$0xf0]  ;;  %v9026_v41 = vor.u32 %v11059_v11, %v9023_v38  ;;  %v11019_v55 = vld [vmem:[#allocation7 + $0x194] sm:$0xf]  ;;  %v11261_v63 = vld [vmem:[#allocation7 + $0x924] sm:$0xf] }
 0x183   :  { %4190 = vmatpush.bf16.msra.mxu2 %v8846_v17  ;;  %1804 = vst [vmem:[%s13960_s14] sm:$0xff] %v12388_v40  ;;  %v9661_v17 = vld [vmem:[#allocation7 + $0x7d0] sm:$0xf]  ;;  %4008 = vmatpush.bf16.msrb.mxu0 %v8790_v39  ;;  %v12406_v56 = vadd.f32 1.0, %v11535_v12  ;;  %v9022_v2 = vor.u32 %v11079_v14, %v9021_v13  ;;  %v8863_v58 = vld [vmem:[#allocation7 + $0x230] sm:$0xf0] }
 0x184   :  { %1805 = vst [vmem:[%s13960_s14 + $0x8] sm:$0xff] %v12393_v46  ;;  %v9662_v7 = vor.u32 %v11239_v5, %v9661_v17  ;;  %v8861_v33 = vld [vmem:[#allocation7 + $0x190] sm:$0xf]  ;;  %v10979_v50 = vld [vmem:[#allocation7 + $0x54] sm:$0xf] }
 0x185   :  { %4203 = vmatpush.bf16.msra.mxu3 %v8850_v20  ;;  %v8634_v20 = vor.u32 %v10970_v16, %v8631_v36  ;;  %11538 = vrcp.f32 %v12406_v56  ;;  %v1773_v39 = vand.u32 2147483648, %v12406_v56  ;;  %v1771_v52 = vand.u32 2147483647, %v12406_v56  ;;  %v11039_v45 = vld [vmem:[#allocation7 + $0x22c] sm:$0xf0] }
 0x186   :  { %vm1767_vm2 = vweird.f32 %v12406_v56  ;;  %v9765_v36 = vld [vmem:[#allocation7 + $0x8d8] sm:$0xf]  ;;  %v8862_v5 = vor.u32 %v11039_v45, %v8861_v33  ;;  %v10999_v26 = vld [vmem:[#allocation7 + $0xec] sm:$0xf0]  ;;  %v9839_v15 = vld [vmem:[#allocation7 + $0x9c0] sm:$0xf0] }
 0x187   :  { %4191 = vmatpush.bf16.msra.mxu2 %v8686_v44  ;;  %4009 = vmatpush.bf16.msrb.mxu0 %v8630_v57  ;;  %v1774_v44 = vor.u32 1.1754944e-38, %v1773_v39  ;;  %vm1772_vm5 = vcmp.eq.f32.partialorder %v1771_v52, 8.507059e+37  ;;  %v9766_v18 = vor.u32 %v11272_v47, %v9765_v36  ;;  %v11212_v35 = vld [vmem:[#allocation7 + $0x79c] sm:$0xf]  ;;  %v11221_v13 = vld [vmem:[#allocation7 + $0x7e4] sm:$0xf] }
 0x188   :  { %v11537_v54 = vpop.eup %11536  ;;  %4022 = vmatpush.bf16.msrb.mxu1 %v8634_v20  ;;  %v8701_v20 = vld [vmem:[#allocation7 + $0x50] sm:$0xf]  ;;  %v9607_v42 = vld [vmem:[#allocation7 + $0x838] sm:$0xf0]  ;;  %v9679_v14 = vld [vmem:[#allocation7 + $0x880] sm:$0xf0] }
 0x189   :  { %4204 = vmatpush.bf16.msra.mxu3 %v8690_v22  ;;  %v12409_v32 = vadd.f32 1.0, %v11537_v54  ;;  %v8703_v54 = vld [vmem:[#allocation7 + $0xf0] sm:$0xf0]  ;;  %v9447_v11 = vld [vmem:[#allocation7 + $0x6f8] sm:$0xf0] }
 0x18a   :  { %4192 = vmatmul.bf16.vlgmr.msra.gmra.mxu2 %v12215_v48  ;;  %v9285_v52 = vld [vmem:[#allocation7 + $0x518] sm:$0xf]  ;;  %v9519_v33 = vld [vmem:[#allocation7 + $0x740] sm:$0xf0]  ;;  %v11132_v45 = vld [vmem:[#allocation7 + $0x51c] sm:$0xf] }
 0x18b   :  { %4236 = vmatpush.bf16.msrb.mxu2 %v9822_v4  ;;  %11540 = vrcp.f32 %v12409_v32  ;;  %v11539_v62 = vpop.eup %11538  ;;  %v1788_v1 = vand.u32 2147483648, %v12409_v32  ;;  %v1786_v24 = vand.u32 2147483647, %v12409_v32  ;;  %vm1782_vm4 = vweird.f32 %v12409_v32  ;;  %v11161_v36 = vld [vmem:[#allocation7 + $0x5fc] sm:$0xf0] }
 0x18c   :  { %4205 = vmatmul.bf16.vlgmr.msra.gmra.mxu3 %v12215_v48  ;;  %v1763_v37 = vmul.f32 %v11539_v62, %v12406_v56  ;;  %11542 = vtanh.f32 %v12388_v40  ;;  %vm1768_vm0 = vweird.f32 %v11539_v62  ;;  %v11141_v22 = vld [vmem:[#allocation7 + $0x564] sm:$0xf]  ;;  %v11092_v47 = vld [vmem:[#allocation7 + $0x3dc] sm:$0xf]  ;;  %v11032_v43 = vld [vmem:[#allocation7 + $0x1f4] sm:$0xf0] }
 0x18d   :  { %4249 = vmatpush.bf16.msrb.mxu3 %v9826_v60  ;;  %11544 = vtanh.f32 %v12393_v46  ;;  %vm12424_vm3 = vmor %vm1767_vm2, %vm1768_vm0  ;;  %v1789_v4 = vor.u32 1.1754944e-38, %v1788_v1  ;;  %v11252_v60 = vld [vmem:[#allocation7 + $0x8dc] sm:$0xf]  ;;  %vm1787_vm7 = vcmp.eq.f32.partialorder %v1786_v24, 8.507059e+37  ;;  %v9517_v1 = vld [vmem:[#allocation7 + $0x6a0] sm:$0xf] }
 0x18e   :  { %v1764_v21 = vsub.f32 1.0, %v1763_v37  ;;  %v9770_v51 = vor.u32 %v11252_v60, %v9767_v3  ;;  %v9445_v37 = vld [vmem:[#allocation7 + $0x658] sm:$0xf]  ;;  %v9127_v60 = vld [vmem:[#allocation7 + $0x478] sm:$0xf0] }
 0x18f   :  { %4237 = vmatpush.bf16.msrb.mxu2 %v9662_v7  ;;  %v8866_v7 = vor.u32 %v11019_v55, %v8863_v58  ;;  %v11152_v24 = vld [vmem:[#allocation7 + $0x5b4] sm:$0xf0]  ;;  %v9287_v55 = vld [vmem:[#allocation7 + $0x5b8] sm:$0xf0]  ;;  %v9197_v3 = vld [vmem:[#allocation7 + $0x420] sm:$0xf] }
 0x190   :  { %v1765_v10 = vmul.f32 %v11539_v62, %v1764_v21  ;;  %v9610_v21 = vor.u32 %v11212_v35, %v9607_v42  ;;  %v9286_v58 = vor.u32 %v11152_v24, %v9285_v52  ;;  %v8645_v42 = vld [vmem:[#allocation7 + $0x18] sm:$0xf]  ;;  %v8719_v24 = vld [vmem:[#allocation7 + $0x100] sm:$0xf0] }
 0x191   :  { %4250 = vmatpush.bf16.msrb.mxu3 %v9666_v25  ;;  %v11541_v59 = vpop.eup %11540 }
 0x192   :  { %v1778_v9 = vmul.f32 %v11541_v59, %v12409_v32  ;;  %vm1783_vm1 = vweird.f32 %v11541_v59  ;;  %v1766_v53 = vadd.f32 %v11539_v62, %v1765_v10  ;;  %v11543_v46 = vpop.eup %11542  ;;  %v9837_v32 = vld [vmem:[#allocation7 + $0x920] sm:$0xf]  ;;  %v9682_v10 = vor.u32 %v11221_v13, %v9679_v14  ;;  %v8647_v13 = vld [vmem:[#allocation7 + $0xb8] sm:$0xf0]  ;;  %v9781_v14 = vld [vmem:[#allocation7 + $0x8e8] sm:$0xf] }
 0x193   :  { %4238 = vmatpush.bf16.msrb.mxu2 %v9502_v6  ;;  %vm12432_vm6 = vmor %vm1782_vm4, %vm1783_vm1  ;;  %v11545_v17 = vpop.eup %11544  ;;  %v11281_v6 = vld [vmem:[#allocation7 + $0x9bc] sm:$0xf0] }
 0x194   :  { %v1779_v0 = vsub.f32 1.0, %v1778_v9  ;;  %v1770_v49 = vsel %vm12424_vm3, %v11539_v62, %v1766_v53  ;;  %v8706_v62 = vor.u32 %v10979_v50, %v8703_v54  ;;  %v9838_v61 = vor.u32 %v11281_v6, %v9837_v32  ;;  %v9677_v9 = vld [vmem:[#allocation7 + $0x7e0] sm:$0xf]  ;;  %v11052_v50 = vld [vmem:[#allocation7 + $0x29c] sm:$0xf] }
 0x195   :  { %4251 = vmatpush.bf16.msrb.mxu3 %v9506_v30  ;;  %v1775_v57 = vsel %vm1772_vm5, %v1774_v44, %v1770_v49  ;;  %v9125_v44 = vld [vmem:[#allocation7 + $0x3d8] sm:$0xf]  ;;  %v8967_v54 = vld [vmem:[#allocation7 + $0x338] sm:$0xf0]  ;;  %v9037_v6 = vld [vmem:[#allocation7 + $0x2e0] sm:$0xf] }
 0x196   :  { %v1780_v23 = vmul.f32 %v11541_v59, %v1779_v0  ;;  %v1800_v12 = vmul.f32 %v11543_v46, %v1775_v57  ;;  %v11172_v0 = vld [vmem:[#allocation7 + $0x65c] sm:$0xf]  ;;  %v9290_v46 = vor.u32 %v11132_v45, %v9287_v55  ;;  %v11112_v49 = vld [vmem:[#allocation7 + $0x474] sm:$0xf0]  ;;  %v9621_v45 = vld [vmem:[#allocation7 + $0x7a8] sm:$0xf] }
 0x197   :  { %4239 = vmatpush.bf16.msrb.mxu2 %v9342_v29  ;;  %v8805_v32 = vld [vmem:[#allocation7 + $0x158] sm:$0xf]  ;;  %v9853_v55 = vld [vmem:[#allocation7 + $0x930] sm:$0xf] }
 0x198   :  { %v1781_v16 = vadd.f32 %v11541_v59, %v1780_v23  ;;  %1802 = vst [vmem:[%s13959_s13] sm:$0xff] %v1800_v12  ;;  %v1806_v30 = vpack.c.bf16 %v1800_v12, %v1800_v12  ;;  %v9450_v23 = vor.u32 %v11172_v0, %v9447_v11  ;;  %v11072_v12 = vld [vmem:[#allocation7 + $0x334] sm:$0xf0]  ;;  %v11274_v0 = vld [vmem:[#allocation7 + $0x984] sm:$0xf0] }
 0x199   :  { %4252 = vmatpush.bf16.msrb.mxu3 %v9346_v34  ;;  %v8702_v34 = vor.u32 %v10999_v26, %v8701_v20  ;;  %v11121_v20 = vld [vmem:[#allocation7 + $0x4bc] sm:$0xf0]  ;;  %v9199_v26 = vld [vmem:[#allocation7 + $0x4c0] sm:$0xf0] }
 0x19a   :  { %v1785_v8 = vsel %vm12432_vm6, %v11541_v59, %v1781_v16  ;;  %1948 = vmatmul.bf16.vlgmr.msra.gmra.mxu0 %v1806_v30  ;;  %v9842_v59 = vor.u32 %v11261_v63, %v9839_v15  ;;  %v9357_v16 = vld [vmem:[#allocation7 + $0x560] sm:$0xf]  ;;  %v11061_v63 = vld [vmem:[#allocation7 + $0x2e4] sm:$0xf] }
 0x19b   :  { %4240 = vmatpush.bf16.msrb.mxu2 %v9182_v27  ;;  %v1790_v25 = vsel %vm1787_vm7, %v1789_v4, %v1785_v8  ;;  %4054 = vmatpush.bf16.msra.mxu0 %v9766_v18  ;;  %v11241_v27 = vld [vmem:[#allocation7 + $0x87c] sm:$0xf0]  ;;  %v9359_v4 = vld [vmem:[#allocation7 + $0x600] sm:$0xf0]  ;;  %v8965_v8 = vld [vmem:[#allocation7 + $0x298] sm:$0xf] }
 0x19c   :  { %v1801_v56 = vmul.f32 %v11545_v17, %v1790_v25  ;;  %v9678_v38 = vor.u32 %v11241_v27, %v9677_v9  ;;  %v9358_v17 = vor.u32 %v11161_v36, %v9357_v16  ;;  %v9362_v57 = vor.u32 %v11141_v22, %v9359_v4  ;;  %v11101_v25 = vld [vmem:[#allocation7 + $0x424] sm:$0xf]  ;;  %v11081_v30 = vld [vmem:[#allocation7 + $0x37c] sm:$0xf0]  ;;  %v10972_v27 = vld [vmem:[#allocation7 + $0x1c] sm:$0xf] }
 0x19d   :  { %4253 = vmatpush.bf16.msrb.mxu3 %v9186_v28  ;;  %v11192_v28 = vld [vmem:[#allocation7 + $0x6f4] sm:$0xf0]  ;;  %v8966_v18 = vor.u32 %v11072_v12, %v8965_v8  ;;  %v9202_v31 = vor.u32 %v11101_v25, %v9199_v26  ;;  %v9039_v15 = vld [vmem:[#allocation7 + $0x380] sm:$0xf0]  ;;  %v9038_v35 = vor.u32 %v11081_v30, %v9037_v6  ;;  %v9855_v16 = vld [vmem:[#allocation7 + $0x9d0] sm:$0xf0] }
 0x19e   :  { %1803 = vst [vmem:[%s13959_s13 + $0x8] sm:$0xff] %v1801_v56  ;;  %v1807_v29 = vpack.c.bf16 %v1801_v56, %v1801_v56  ;;  %v9446_v39 = vor.u32 %v11192_v28, %v9445_v37  ;;  %v9198_v56 = vor.u32 %v11121_v20, %v9197_v3  ;;  %v11041_v37 = vld [vmem:[#allocation7 + $0x23c] sm:$0xf0]  ;;  %v8879_v28 = vld [vmem:[#allocation7 + $0x240] sm:$0xf0] }
 0x19f   :  { %4241 = vmatpush.bf16.msrb.mxu2 %v9022_v2  ;;  %4055 = vmatpush.bf16.msra.mxu0 %v9606_v19  ;;  %v11201_v2 = vld [vmem:[#allocation7 + $0x73c] sm:$0xf0]  ;;  %v10992_v19 = vld [vmem:[#allocation7 + $0xb4] sm:$0xf0]  ;;  %v11194_v3 = vld [vmem:[#allocation7 + $0x704] sm:$0xf0] }
 0x1a0   :  { %1961 = vmatmul.bf16.vlgmr.msra.gmra.mxu1 %v1807_v29  ;;  %v9518_v53 = vor.u32 %v11201_v2, %v9517_v1  ;;  %v11012_v29 = vld [vmem:[#allocation7 + $0x15c] sm:$0xf]  ;;  %v8646_v52 = vor.u32 %v10992_v19, %v8645_v42  ;;  %v11001_v2 = vld [vmem:[#allocation7 + $0xfc] sm:$0xf0]  ;;  %v11223_v20 = vld [vmem:[#allocation7 + $0x7f4] sm:$0xf] }
 0x1a1   :  { %4254 = vmatpush.bf16.msrb.mxu3 %v9026_v41  ;;  %4067 = vmatpush.bf16.msra.mxu1 %v9770_v51  ;;  %v11181_v41 = vld [vmem:[#allocation7 + $0x6a4] sm:$0xf]  ;;  %v8970_v51 = vor.u32 %v11052_v50, %v8967_v54  ;;  %v11174_v12 = vld [vmem:[#allocation7 + $0x66c] sm:$0xf]  ;;  %v11154_v6 = vld [vmem:[#allocation7 + $0x5c4] sm:$0xf0] }
 0x1a2   :  { %v9522_v40 = vor.u32 %v11181_v41, %v9519_v33  ;;  %v8650_v41 = vor.u32 %v10972_v27, %v8647_v13  ;;  %v9782_v33 = vor.u32 %v11274_v0, %v9781_v14  ;;  %v9463_v25 = vld [vmem:[#allocation7 + $0x708] sm:$0xf0]  ;;  %v11183_v30 = vld [vmem:[#allocation7 + $0x6b4] sm:$0xf]  ;;  %v9373_v42 = vld [vmem:[#allocation7 + $0x570] sm:$0xf] }
 0x1a3   :  { %4242 = vmatpush.bf16.msrb.mxu2 %v8862_v5  ;;  %4056 = vmatpush.bf16.msra.mxu0 %v9446_v39  ;;  %v9126_v5 = vor.u32 %v11112_v49, %v9125_v44  ;;  %v9783_v39 = vld [vmem:[#allocation7 + $0x988] sm:$0xf0]  ;;  %v11263_v44 = vld [vmem:[#allocation7 + $0x934] sm:$0xf]  ;;  %v11114_v19 = vld [vmem:[#allocation7 + $0x484] sm:$0xf0] }
 0x1a4   :  { %v9623_v49 = vld [vmem:[#allocation7 + $0x848] sm:$0xf0]  ;;  %v8981_v13 = vld [vmem:[#allocation7 + $0x2a8] sm:$0xf]  ;;  %v9213_v14 = vld [vmem:[#allocation7 + $0x430] sm:$0xf] }
 0x1a5   :  { %4255 = vmatpush.bf16.msrb.mxu3 %v8866_v7  ;;  %4068 = vmatpush.bf16.msra.mxu1 %v9610_v21  ;;  %v9130_v7 = vor.u32 %v11092_v47, %v9127_v60  ;;  %v11021_v21 = vld [vmem:[#allocation7 + $0x1a4] sm:$0xf]  ;;  %v9858_v60 = vor.u32 %v11263_v44, %v9855_v16  ;;  %v9143_v27 = vld [vmem:[#allocation7 + $0x488] sm:$0xf0]  ;;  %v11123_v0 = vld [vmem:[#allocation7 + $0x4cc] sm:$0xf0] }
 0x1a6   :  { %v8882_v1 = vor.u32 %v11021_v21, %v8879_v28  ;;  %v11014_v44 = vld [vmem:[#allocation7 + $0x16c] sm:$0xf] }
 0x1a7   :  { %4243 = vmatpush.bf16.msrb.mxu2 %v8702_v34  ;;  %4057 = vmatpush.bf16.msra.mxu0 %v9286_v58  ;;  %v8807_v34 = vld [vmem:[#allocation7 + $0x1f8] sm:$0xf0]  ;;  %v8823_v16 = vld [vmem:[#allocation7 + $0x208] sm:$0xf0] }
 0x1a8   :  { %v8810_v9 = vor.u32 %v11012_v29, %v8807_v34 }
 0x1a9   :  { %4256 = vmatpush.bf16.msrb.mxu3 %v8706_v62  ;;  %4069 = vmatpush.bf16.msra.mxu1 %v9450_v23  ;;  %v8806_v62 = vor.u32 %v11032_v43, %v8805_v32  ;;  %v10981_v23 = vld [vmem:[#allocation7 + $0x64] sm:$0xf]  ;;  %v9466_v32 = vor.u32 %v11174_v12, %v9463_v25  ;;  %v11134_v43 = vld [vmem:[#allocation7 + $0x52c] sm:$0xf]  ;;  %v11256_v25 = vld [vmem:[#allocation7 + $0x8fc] sm:$0xf] }
 0x1aa   :  { %4244 = vmatmul.bf16.vlgmr.msrb.gmra.mxu2 %v12215_v48  ;;  %4010 = vmatmul.bf16.vlgmr.msrb.gmra.mxu0 %v12215_v48  ;;  %v8722_v22 = vor.u32 %v10981_v23, %v8719_v24 }
 0x1ab   :  { %4288 = vmatpush.bf16.msra.mxu2 %v9838_v61  ;;  %4058 = vmatpush.bf16.msra.mxu0 %v9126_v5  ;;  %v9042_v61 = vor.u32 %v11061_v63, %v9039_v15  ;;  %v9693_v5 = vld [vmem:[#allocation7 + $0x7f0] sm:$0xf]  ;;  %v9303_v63 = vld [vmem:[#allocation7 + $0x5c8] sm:$0xf0] }
 0x1ac   :  { %4257 = vmatmul.bf16.vlgmr.msrb.gmra.mxu3 %v12215_v48 }
 0x1ad   :  { %4301 = vmatpush.bf16.msra.mxu3 %v9842_v59  ;;  %4070 = vmatpush.bf16.msra.mxu1 %v9290_v46  ;;  %v8877_v59 = vld [vmem:[#allocation7 + $0x1a0] sm:$0xf]  ;;  %v11214_v46 = vld [vmem:[#allocation7 + $0x7ac] sm:$0xf] }
 0x1ae   :  { %v8878_v11 = vor.u32 %v11041_v37, %v8877_v59  ;;  %v9626_v8 = vor.u32 %v11214_v46, %v9623_v49  ;;  %v11143_v59 = vld [vmem:[#allocation7 + $0x574] sm:$0xf]  ;;  %v8661_v46 = vld [vmem:[#allocation7 + $0x28] sm:$0xf] }
 0x1af   :  { %4289 = vmatpush.bf16.msra.mxu2 %v9678_v38  ;;  %4059 = vmatpush.bf16.msra.mxu0 %v8966_v18  ;;  %v11254_v38 = vld [vmem:[#allocation7 + $0x8ec] sm:$0xf]  ;;  %v9533_v18 = vld [vmem:[#allocation7 + $0x6b0] sm:$0xf]  ;;  %v9375_v37 = vld [vmem:[#allocation7 + $0x610] sm:$0xf0] }
 0x1b0   :  { %4023 = vmatmul.bf16.vlgmr.msrb.gmra.mxu1 %v12215_v48  ;;  %v9786_v58 = vor.u32 %v11254_v38, %v9783_v39  ;;  %v9378_v28 = vor.u32 %v11143_v59, %v9375_v37  ;;  %v11074_v38 = vld [vmem:[#allocation7 + $0x344] sm:$0xf0]  ;;  %v11103_v39 = vld [vmem:[#allocation7 + $0x434] sm:$0xf] }
 0x1b1   :  { %4302 = vmatpush.bf16.msra.mxu3 %v9682_v10  ;;  %4071 = vmatpush.bf16.msra.mxu1 %v9130_v7  ;;  %v8717_v10 = vld [vmem:[#allocation7 + $0x60] sm:$0xf]  ;;  %v9695_v7 = vld [vmem:[#allocation7 + $0x890] sm:$0xf0]  ;;  %v8982_v23 = vor.u32 %v11074_v38, %v8981_v13  ;;  %v11196_v13 = vld [vmem:[#allocation7 + $0x714] sm:$0xf0] }
 0x1b2   :  { %v8718_v36 = vor.u32 %v11001_v2, %v8717_v10  ;;  %v9698_v54 = vor.u32 %v11223_v20, %v9695_v7  ;;  %v9215_v10 = vld [vmem:[#allocation7 + $0x4d0] sm:$0xf0]  ;;  %v9214_v2 = vor.u32 %v11123_v0, %v9213_v14  ;;  %v9797_v20 = vld [vmem:[#allocation7 + $0x8f8] sm:$0xf]  ;;  %v11225_v14 = vld [vmem:[#allocation7 + $0x804] sm:$0xf] }
 0x1b3   :  { %4290 = vmatpush.bf16.msra.mxu2 %v9518_v53  ;;  %4060 = vmatpush.bf16.msra.mxu0 %v8806_v62  ;;  %v11283_v53 = vld [vmem:[#allocation7 + $0x9cc] sm:$0xf0]  ;;  %v9218_v24 = vor.u32 %v11103_v39, %v9215_v10  ;;  %v11276_v7 = vld [vmem:[#allocation7 + $0x994] sm:$0xf0]  ;;  %v9711_v0 = vld [vmem:[#allocation7 + $0x8a0] sm:$0xf0] }
 0x1b4   :  { %v9854_v4 = vor.u32 %v11283_v53, %v9853_v55  ;;  %v11163_v62 = vld [vmem:[#allocation7 + $0x60c] sm:$0xf0]  ;;  %v11034_v53 = vld [vmem:[#allocation7 + $0x204] sm:$0xf0]  ;;  %v9479_v38 = vld [vmem:[#allocation7 + $0x718] sm:$0xf0] }
 0x1b5   :  { %4303 = vmatpush.bf16.msra.mxu3 %v9522_v40  ;;  %4072 = vmatpush.bf16.msra.mxu1 %v8970_v51  ;;  %v11234_v40 = vld [vmem:[#allocation7 + $0x844] sm:$0xf0]  ;;  %v9535_v51 = vld [vmem:[#allocation7 + $0x750] sm:$0xf0]  ;;  %v9374_v21 = vor.u32 %v11163_v62, %v9373_v42  ;;  %v11216_v62 = vld [vmem:[#allocation7 + $0x7bc] sm:$0xf] }
 0x1b6   :  { %v9622_v47 = vor.u32 %v11234_v40, %v9621_v45  ;;  %v9538_v34 = vor.u32 %v11183_v30, %v9535_v51  ;;  %v11083_v45 = vld [vmem:[#allocation7 + $0x38c] sm:$0xf0]  ;;  %v9055_v40 = vld [vmem:[#allocation7 + $0x390] sm:$0xf0]  ;;  %v9798_v30 = vor.u32 %v11276_v7, %v9797_v20  ;;  %v9637_v51 = vld [vmem:[#allocation7 + $0x7b8] sm:$0xf] }
 0x1b7   :  { %4291 = vmatpush.bf16.msra.mxu2 %v9358_v17  ;;  %4061 = vmatpush.bf16.msra.mxu0 %v8646_v52  ;;  %v9461_v17 = vld [vmem:[#allocation7 + $0x668] sm:$0xf]  ;;  %v11054_v52 = vld [vmem:[#allocation7 + $0x2ac] sm:$0xf]  ;;  %v12455_v39 = vld [vmem:[%s13946_s0] sm:$0xf] }
 0x1b8   :  { %v9462_v50 = vor.u32 %v11194_v3, %v9461_v17  ;;  %v8826_v17 = vor.u32 %v11014_v44, %v8823_v16  ;;  %v8663_v3 = vld [vmem:[#allocation7 + $0xc8] sm:$0xf0]  ;;  %v8997_v20 = vld [vmem:[#allocation7 + $0x2b8] sm:$0xf]  ;;  %v9229_v7 = vld [vmem:[#allocation7 + $0x440] sm:$0xf] }
 0x1b9   :  { %4304 = vmatpush.bf16.msra.mxu3 %v9362_v57  ;;  %4073 = vmatpush.bf16.msra.mxu1 %v8810_v9  ;;  %v11243_v57 = vld [vmem:[#allocation7 + $0x88c] sm:$0xf0]  ;;  %v11094_v9 = vld [vmem:[#allocation7 + $0x3ec] sm:$0xf] }
 0x1ba   :  { %4062 = vmatmul.bf16.vlgmr.msra.gmra.mxu0 %v12215_v48  ;;  %v9694_v26 = vor.u32 %v11243_v57, %v9693_v5  ;;  %v10974_v5 = vld [vmem:[#allocation7 + $0x2c] sm:$0xf]  ;;  %v11023_v57 = vld [vmem:[#allocation7 + $0x1b4] sm:$0xf] }
 0x1bb   :  { %4292 = vmatpush.bf16.msra.mxu2 %v9198_v56  ;;  %4106 = vmatpush.bf16.msrb.mxu0 %v9782_v33  ;;  %v9301_v56 = vld [vmem:[#allocation7 + $0x528] sm:$0xf]  ;;  %v9053_v33 = vld [vmem:[#allocation7 + $0x2f0] sm:$0xf] }
 0x1bc   :  { %v9302_v29 = vor.u32 %v11154_v6, %v9301_v56  ;;  %v8666_v6 = vor.u32 %v10974_v5, %v8663_v3  ;;  %v9159_v5 = vld [vmem:[#allocation7 + $0x498] sm:$0xf0] }
 0x1bd   :  { %4305 = vmatpush.bf16.msra.mxu3 %v9202_v31  ;;  %4074 = vmatpush.bf16.msra.mxu1 %v8650_v41  ;;  %v11203_v31 = vld [vmem:[#allocation7 + $0x74c] sm:$0xf0]  ;;  %v8821_v41 = vld [vmem:[#allocation7 + $0x168] sm:$0xf] }
 0x1be   :  { %v9534_v15 = vor.u32 %v11203_v31, %v9533_v18  ;;  %v8822_v49 = vor.u32 %v11034_v53, %v8821_v41  ;;  %v11003_v18 = vld [vmem:[#allocation7 + $0x10c] sm:$0xf0]  ;;  %v10983_v31 = vld [vmem:[#allocation7 + $0x74] sm:$0xf]  ;;  %v11136_v53 = vld [vmem:[#allocation7 + $0x53c] sm:$0xf] }
 0x1bf   :  { %4293 = vmatpush.bf16.msra.mxu2 %v9038_v35  ;;  %4107 = vmatpush.bf16.msrb.mxu0 %v9622_v47  ;;  %v9141_v35 = vld [vmem:[#allocation7 + $0x3e8] sm:$0xf]  ;;  %v8893_v47 = vld [vmem:[#allocation7 + $0x1b0] sm:$0xf] }
 0x1c0   :  { %4075 = vmatmul.bf16.vlgmr.msra.gmra.mxu1 %v12215_v48 }
 0x1c1   :  { %4306 = vmatpush.bf16.msra.mxu3 %v9042_v61  ;;  %4119 = vmatpush.bf16.msrb.mxu1 %v9786_v58  ;;  %v9306_v61 = vor.u32 %v11134_v43, %v9303_v63  ;;  %v11063_v58 = vld [vmem:[#allocation7 + $0x2f4] sm:$0xf]  ;;  %v9869_v43 = vld [vmem:[#allocation7 + $0x940] sm:$0xf] }
 0x1c2   :  { %v11285_v63 = vld [vmem:[#allocation7 + $0x9dc] sm:$0xf0] }
 0x1c3   :  { %4294 = vmatpush.bf16.msra.mxu2 %v8878_v11  ;;  %4108 = vmatpush.bf16.msrb.mxu0 %v9462_v50  ;;  %v9146_v11 = vor.u32 %v11094_v9, %v9143_v27  ;;  %v8733_v50 = vld [vmem:[#allocation7 + $0x70] sm:$0xf]  ;;  %v9870_v59 = vor.u32 %v11285_v63, %v9869_v43  ;;  %v9477_v27 = vld [vmem:[#allocation7 + $0x678] sm:$0xf]  ;;  %v11085_v43 = vld [vmem:[#allocation7 + $0x39c] sm:$0xf0] }
 0x1c4   :  { %v8734_v42 = vor.u32 %v11003_v18, %v8733_v50  ;;  %v11105_v50 = vld [vmem:[#allocation7 + $0x444] sm:$0xf]  ;;  %v8999_v18 = vld [vmem:[#allocation7 + $0x358] sm:$0xf0] }
 0x1c5   :  { %4307 = vmatpush.bf16.msra.mxu3 %v8882_v1  ;;  %4120 = vmatpush.bf16.msrb.mxu1 %v9626_v8  ;;  %v8983_v1 = vld [vmem:[#allocation7 + $0x348] sm:$0xf0]  ;;  %v8895_v8 = vld [vmem:[#allocation7 + $0x250] sm:$0xf0] }
 0x1c6   :  { %v8986_v55 = vor.u32 %v11054_v52, %v8983_v1  ;;  %v8898_v56 = vor.u32 %v11023_v57, %v8895_v8  ;;  %v9478_v52 = vor.u32 %v11196_v13, %v9477_v27  ;;  %v9714_v1 = vor.u32 %v11225_v14, %v9711_v0  ;;  %v11045_v27 = vld [vmem:[#allocation7 + $0x25c] sm:$0xf0]  ;;  %v8911_v13 = vld [vmem:[#allocation7 + $0x260] sm:$0xf0]  ;;  %v8679_v14 = vld [vmem:[#allocation7 + $0xd8] sm:$0xf0] }
 0x1c7   :  { %4295 = vmatpush.bf16.msra.mxu2 %v8718_v36  ;;  %4109 = vmatpush.bf16.msrb.mxu0 %v9302_v29  ;;  %v9054_v36 = vor.u32 %v11083_v45, %v9053_v33  ;;  %v11236_v29 = vld [vmem:[#allocation7 + $0x854] sm:$0xf0]  ;;  %v11185_v45 = vld [vmem:[#allocation7 + $0x6c4] sm:$0xf]  ;;  %v9813_v0 = vld [vmem:[#allocation7 + $0x908] sm:$0xf] }
 0x1c8   :  { %v9638_v37 = vor.u32 %v11236_v29, %v9637_v51  ;;  %v11156_v33 = vld [vmem:[#allocation7 + $0x5d4] sm:$0xf0]  ;;  %v9069_v51 = vld [vmem:[#allocation7 + $0x300] sm:$0xf]  ;;  %v11065_v29 = vld [vmem:[#allocation7 + $0x304] sm:$0xf] }
 0x1c9   :  { %4308 = vmatpush.bf16.msra.mxu3 %v8722_v22  ;;  %4121 = vmatpush.bf16.msrb.mxu1 %v9466_v32  ;;  %v9058_v22 = vor.u32 %v11063_v58, %v9055_v40  ;;  %v8735_v32 = vld [vmem:[#allocation7 + $0x110] sm:$0xf0]  ;;  %v9319_v58 = vld [vmem:[#allocation7 + $0x5d8] sm:$0xf0] }
 0x1ca   :  { %4296 = vmatmul.bf16.vlgmr.msra.gmra.mxu2 %v12215_v48 }
 0x1cb   :  { %4340 = vmatpush.bf16.msrb.mxu2 %v9854_v4  ;;  %v10994_v4 = vld [vmem:[#allocation7 + $0xc4] sm:$0xf0] }
 0x1cc   :  { %4309 = vmatmul.bf16.vlgmr.msra.gmra.mxu3 %v12215_v48  ;;  %v9142_v48 = vor.u32 %v11114_v19, %v9141_v35  ;;  %v9871_v35 = vld [vmem:[#allocation7 + $0x9e0] sm:$0xf0]  ;;  %v8738_v19 = vor.u32 %v10983_v31, %v8735_v32 }
 0x1cd   :  { %4353 = vmatpush.bf16.msrb.mxu3 %v9858_v60  ;;  %4122 = vmatpush.bf16.msrb.mxu1 %v9306_v61  ;;  %v11043_v60 = vld [vmem:[#allocation7 + $0x24c] sm:$0xf0]  ;;  %v9639_v61 = vld [vmem:[#allocation7 + $0x858] sm:$0xf0] }
 0x1ce   :  { %4110 = vmatpush.bf16.msrb.mxu0 %v9142_v48  ;;  %v8894_v12 = vor.u32 %v11043_v60, %v8893_v47  ;;  %v11245_v48 = vld [vmem:[#allocation7 + $0x89c] sm:$0xf0]  ;;  %v11145_v47 = vld [vmem:[#allocation7 + $0x584] sm:$0xf] }
 0x1cf   :  { %4341 = vmatpush.bf16.msrb.mxu2 %v9694_v26  ;;  %v9799_v26 = vld [vmem:[#allocation7 + $0x998] sm:$0xf0]  ;;  %v9391_v60 = vld [vmem:[#allocation7 + $0x620] sm:$0xf0] }
 0x1d0   :  { %v9394_v3 = vor.u32 %v11145_v47, %v9391_v60 }
 0x1d1   :  { %4354 = vmatpush.bf16.msrb.mxu3 %v9698_v54  ;;  %4123 = vmatpush.bf16.msrb.mxu1 %v9146_v11  ;;  %v8662_v54 = vor.u32 %v10994_v4, %v8661_v46  ;;  %v11176_v11 = vld [vmem:[#allocation7 + $0x67c] sm:$0xf]  ;;  %v9389_v46 = vld [vmem:[#allocation7 + $0x580] sm:$0xf]  ;;  %v11116_v4 = vld [vmem:[#allocation7 + $0x494] sm:$0xf0] }
 0x1d2   :  { %4111 = vmatpush.bf16.msrb.mxu0 %v8982_v23  ;;  %v9549_v23 = vld [vmem:[#allocation7 + $0x6c0] sm:$0xf]  ;;  %v9482_v41 = vor.u32 %v11176_v11, %v9479_v38  ;;  %v11278_v11 = vld [vmem:[#allocation7 + $0x9a4] sm:$0xf0] }
 0x1d3   :  { %4342 = vmatpush.bf16.msrb.mxu2 %v9534_v15  ;;  %v9802_v15 = vor.u32 %v11256_v25, %v9799_v26  ;;  %v11076_v26 = vld [vmem:[#allocation7 + $0x354] sm:$0xf0] }
 0x1d4   :  { %v8998_v32 = vor.u32 %v11076_v26, %v8997_v20  ;;  %v11178_v26 = vld [vmem:[#allocation7 + $0x68c] sm:$0xf] }
 0x1d5   :  { %4355 = vmatpush.bf16.msrb.mxu3 %v9538_v34  ;;  %4124 = vmatpush.bf16.msrb.mxu1 %v8986_v55  ;;  %v11265_v34 = vld [vmem:[#allocation7 + $0x944] sm:$0xf] }
 0x1d6   :  { %4112 = vmatpush.bf16.msrb.mxu0 %v8822_v49  ;;  %v9874_v9 = vor.u32 %v11265_v34, %v9871_v35  ;;  %v9551_v55 = vld [vmem:[#allocation7 + $0x760] sm:$0xf0]  ;;  %v11165_v49 = vld [vmem:[#allocation7 + $0x61c] sm:$0xf0]  ;;  %v11016_v35 = vld [vmem:[#allocation7 + $0x17c] sm:$0xf] }
 0x1d7   :  { %4343 = vmatpush.bf16.msrb.mxu2 %v9374_v21  ;;  %v9709_v21 = vld [vmem:[#allocation7 + $0x800] sm:$0xf]  ;;  %v9554_v16 = vor.u32 %v11185_v45, %v9551_v55  ;;  %v9390_v57 = vor.u32 %v11165_v49, %v9389_v46  ;;  %v9071_v34 = vld [vmem:[#allocation7 + $0x3a0] sm:$0xf0]  ;;  %v9814_v55 = vor.u32 %v11278_v11, %v9813_v0  ;;  %v9887_v46 = vld [vmem:[#allocation7 + $0x9f0] sm:$0xf0] }
 0x1d8   :  { %v9710_v10 = vor.u32 %v11245_v48, %v9709_v21  ;;  %v10976_v48 = vld [vmem:[#allocation7 + $0x3c] sm:$0xf]  ;;  %v11098_v0 = vld [vmem:[#allocation7 + $0x40c] sm:$0xf] }
 0x1d9   :  { %4356 = vmatpush.bf16.msrb.mxu3 %v9378_v28  ;;  %4125 = vmatpush.bf16.msrb.mxu1 %v8826_v17  ;;  %v9642_v28 = vor.u32 %v11216_v62, %v9639_v61  ;;  %v11096_v17 = vld [vmem:[#allocation7 + $0x3fc] sm:$0xf]  ;;  %v9070_v62 = vor.u32 %v11085_v43, %v9069_v51  ;;  %v8677_v61 = vld [vmem:[#allocation7 + $0x38] sm:$0xf]  ;;  %v8682_v45 = vor.u32 %v10976_v48, %v8679_v14  ;;  %v9333_v51 = vld [vmem:[#allocation7 + $0x548] sm:$0xf] }
 0x1da   :  { %4113 = vmatpush.bf16.msrb.mxu0 %v8662_v54  ;;  %v9162_v25 = vor.u32 %v11096_v17, %v9159_v5  ;;  %v9231_v54 = vld [vmem:[#allocation7 + $0x4e0] sm:$0xf0]  ;;  %v9565_v43 = vld [vmem:[#allocation7 + $0x6d0] sm:$0xf]  ;;  %v9407_v14 = vld [vmem:[#allocation7 + $0x630] sm:$0xf0] }
 0x1db   :  { %4344 = vmatpush.bf16.msrb.mxu2 %v9214_v2  ;;  %v9317_v2 = vld [vmem:[#allocation7 + $0x538] sm:$0xf]  ;;  %v9175_v11 = vld [vmem:[#allocation7 + $0x4a8] sm:$0xf0] }
 0x1dc   :  { %v9318_v44 = vor.u32 %v11156_v33, %v9317_v2  ;;  %v8751_v33 = vld [vmem:[#allocation7 + $0x120] sm:$0xf0] }
 0x1dd   :  { %4357 = vmatpush.bf16.msrb.mxu3 %v9218_v24  ;;  %4126 = vmatpush.bf16.msrb.mxu1 %v8666_v6  ;;  %v11205_v24 = vld [vmem:[#allocation7 + $0x75c] sm:$0xf0]  ;;  %v9234_v6 = vor.u32 %v11105_v50, %v9231_v54  ;;  %v9495_v50 = vld [vmem:[#allocation7 + $0x728] sm:$0xf0] }
 0x1de   :  { %4158 = vmatpush.bf16.msra.mxu0 %v9798_v30  ;;  %v9550_v40 = vor.u32 %v11205_v24, %v9549_v23  ;;  %v8837_v30 = vld [vmem:[#allocation7 + $0x178] sm:$0xf]  ;;  %v11005_v24 = vld [vmem:[#allocation7 + $0x11c] sm:$0xf0] }
 0x1df   :  { %4345 = vmatpush.bf16.msrb.mxu2 %v9054_v36  ;;  %4114 = vmatmul.bf16.vlgmr.msrb.gmra.mxu0 %v12455_v39  ;;  %v9157_v36 = vld [vmem:[#allocation7 + $0x3f8] sm:$0xf]  ;;  %v12462_v54 = vld [vmem:[#allocation10] sm:$0xff] }
 0x1e0   :  { %4127 = vmatmul.bf16.vlgmr.msrb.gmra.mxu1 %v12455_v39  ;;  %v9158_v8 = vor.u32 %v11116_v4, %v9157_v36  ;;  %v11267_v36 = vld [vmem:[#allocation7 + $0x954] sm:$0xf]  ;;  %v9655_v4 = vld [vmem:[#allocation7 + $0x868] sm:$0xf0] }
 0x1e1   :  { %4358 = vmatpush.bf16.msrb.mxu3 %v9058_v22  ;;  %4171 = vmatpush.bf16.msra.mxu1 %v9802_v15  ;;  %v9322_v22 = vor.u32 %v11136_v53, %v9319_v58  ;;  %v11036_v15 = vld [vmem:[#allocation7 + $0x214] sm:$0xf0]  ;;  %v9653_v53 = vld [vmem:[#allocation7 + $0x7c8] sm:$0xf]  ;;  %v9885_v58 = vld [vmem:[#allocation7 + $0x950] sm:$0xf]  ;;  %v9890_v5 = vor.u32 %v11267_v36, %v9887_v46 }
 0x1e2   :  { %4159 = vmatpush.bf16.msra.mxu0 %v9638_v37  ;;  %v10996_v37 = vld [vmem:[#allocation7 + $0xd4] sm:$0xf0]  ;;  %v8853_v46 = vld [vmem:[#allocation7 + $0x188] sm:$0xf] }
 0x1e3   :  { %4346 = vmatpush.bf16.msrb.mxu2 %v8894_v12  ;;  %v11125_v12 = vld [vmem:[#allocation7 + $0x4dc] sm:$0xf0]  ;;  %v8678_v2 = vor.u32 %v10996_v37, %v8677_v61  ;;  %v9335_v61 = vld [vmem:[#allocation7 + $0x5e8] sm:$0xf0] }
 0x1e4   :  { %v9230_v31 = vor.u32 %v11125_v12, %v9229_v7  ;;  %v11198_v7 = vld [vmem:[#allocation7 + $0x724] sm:$0xf0]  ;;  %v11227_v12 = vld [vmem:[#allocation7 + $0x814] sm:$0xf] }
 0x1e5   :  { %4359 = vmatpush.bf16.msrb.mxu3 %v8898_v56  ;;  %4172 = vmatpush.bf16.msra.mxu1 %v9642_v28  ;;  %v11056_v56 = vld [vmem:[#allocation7 + $0x2bc] sm:$0xf]  ;;  %v11025_v28 = vld [vmem:[#allocation7 + $0x1c4] sm:$0xf] }
 0x1e6   :  { %4160 = vmatpush.bf16.msra.mxu0 %v9478_v52  ;;  %v9002_v63 = vor.u32 %v11056_v56, %v8999_v18  ;;  %v9815_v52 = vld [vmem:[#allocation7 + $0x9a8] sm:$0xf0]  ;;  %v8914_v23 = vor.u32 %v11025_v28, %v8911_v13  ;;  %v12464_v56 = vpop.f32.mrf.mxu2  ;;  %v3998_v18 = vpop.f32.mrf.mxu3  ;;  %v11118_v28 = vld [vmem:[#allocation7 + $0x4a4] sm:$0xf0]  ;;  %v11147_v13 = vld [vmem:[#allocation7 + $0x594] sm:$0xf] }
 0x1e7   :  { %4347 = vmatpush.bf16.msrb.mxu2 %v8734_v42  ;;  %v8839_v42 = vld [vmem:[#allocation7 + $0x218] sm:$0xf0] }
 0x1e8   :  { %v8842_v21 = vor.u32 %v11016_v35, %v8839_v42  ;;  %v9567_v35 = vld [vmem:[#allocation7 + $0x770] sm:$0xf0] }
 0x1e9   :  { %4360 = vmatpush.bf16.msrb.mxu3 %v8738_v19  ;;  %4173 = vmatpush.bf16.msra.mxu1 %v9482_v41  ;;  %v8838_v19 = vor.u32 %v11036_v15, %v8837_v30  ;;  %v10985_v41 = vld [vmem:[#allocation7 + $0x84] sm:$0xf]  ;;  %v9498_v15 = vor.u32 %v11178_v26, %v9495_v50  ;;  %v10998_v50 = vld [vmem:[#allocation7 + $0xe4] sm:$0xf0] }
 0x1ea   :  { %4348 = vmatmul.bf16.vlgmr.msrb.gmra.mxu2 %v12455_v39  ;;  %4161 = vmatpush.bf16.msra.mxu0 %v9318_v44  ;;  %v8754_v47 = vor.u32 %v10985_v41, %v8751_v33  ;;  %v11127_v41 = vld [vmem:[#allocation7 + $0x4ec] sm:$0xf0]  ;;  %v9178_v33 = vor.u32 %v11098_v0, %v9175_v11  ;;  %v11240_v11 = vld [vmem:[#allocation7 + $0x874] sm:$0xf0] }
 0x1eb   :  { %4392 = vmatpush.bf16.msra.mxu2 %v9870_v59  ;;  %v9074_v59 = vor.u32 %v11065_v29, %v9071_v34  ;;  %v11158_v29 = vld [vmem:[#allocation7 + $0x5e4] sm:$0xf0]  ;;  %v11187_v34 = vld [vmem:[#allocation7 + $0x6d4] sm:$0xf] }
 0x1ec   :  { %4361 = vmatmul.bf16.vlgmr.msrb.gmra.mxu3 %v12455_v39  ;;  %v9570_v37 = vor.u32 %v11187_v34, %v9567_v35  ;;  %v11260_v35 = vld [vmem:[#allocation7 + $0x91c] sm:$0xf] }
 0x1ed   :  { %4405 = vmatpush.bf16.msra.mxu3 %v9874_v9  ;;  %4174 = vmatpush.bf16.msra.mxu1 %v9322_v22  ;;  %v8909_v9 = vld [vmem:[#allocation7 + $0x1c0] sm:$0xf]  ;;  %v11218_v22 = vld [vmem:[#allocation7 + $0x7cc] sm:$0xf] }
 0x1ee   :  { %4162 = vmatpush.bf16.msra.mxu0 %v9158_v8  ;;  %v8910_v38 = vor.u32 %v11045_v27, %v8909_v9  ;;  %v9725_v8 = vld [vmem:[#allocation7 + $0x810] sm:$0xf]  ;;  %v9658_v20 = vor.u32 %v11218_v22, %v9655_v4  ;;  %v9173_v9 = vld [vmem:[#allocation7 + $0x408] sm:$0xf] }
 0x1ef   :  { %4393 = vmatpush.bf16.msra.mxu2 %v9710_v10  ;;  %v11258_v10 = vld [vmem:[#allocation7 + $0x90c] sm:$0xf]  ;;  %v9405_v27 = vld [vmem:[#allocation7 + $0x590] sm:$0xf] }
 0x1f0   :  { %v9818_v44 = vor.u32 %v11258_v10, %v9815_v52  ;;  %v4000_v10 = vpop.f32.mrf.mxu3  ;;  %v11087_v22 = vld [vmem:[#allocation7 + $0x3ac] sm:$0xf0] }
 0x1f1   :  { %4406 = vmatpush.bf16.msra.mxu3 %v9714_v1  ;;  %4175 = vmatpush.bf16.msra.mxu1 %v9162_v25  ;;  %v8749_v1 = vld [vmem:[#allocation7 + $0x80] sm:$0xf]  ;;  %v9727_v25 = vld [vmem:[#allocation7 + $0x8b0] sm:$0xf0] }
 0x1f2   :  { %4163 = vmatpush.bf16.msra.mxu0 %v8998_v32  ;;  %v8750_v49 = vor.u32 %v11005_v24, %v8749_v1  ;;  %v2297_v32 = vperm.slane %v12462_v54, 1  ;;  %v9730_v30 = vor.u32 %v11227_v12, %v9727_v25  ;;  %v9174_v1 = vor.u32 %v11118_v28, %v9173_v9  ;;  %v9245_v24 = vld [vmem:[#allocation7 + $0x450] sm:$0xf]  ;;  %v8693_v12 = vld [vmem:[#allocation7 + $0x48] sm:$0xf] }
 0x1f3   :  { %4394 = vmatpush.bf16.msra.mxu2 %v9550_v40  ;;  %v11287_v40 = vld [vmem:[#allocation7 + $0x9ec] sm:$0xf0]  ;;  %v10987_v9 = vld [vmem:[#allocation7 + $0x94] sm:$0xf]  ;;  %v9669_v28 = vld [vmem:[#allocation7 + $0x7d8] sm:$0xf] }
 0x1f4   :  { %v9886_v60 = vor.u32 %v11287_v40, %v9885_v58  ;;  %v12468_v42 = vadd.f32 %v3998_v18, %v2297_v32  ;;  %v11058_v58 = vld [vmem:[#allocation7 + $0x2cc] sm:$0xf]  ;;  %v8925_v18 = vld [vmem:[#allocation7 + $0x1d0] sm:$0xf]  ;;  %v11413_v10 = vld [vmem:[#allocation9 + $0x3dc] sm:$0xf0] }
 0x1f5   :  { %4407 = vmatpush.bf16.msra.mxu3 %v9554_v16  ;;  %4176 = vmatpush.bf16.msra.mxu1 %v9002_v63  ;;  %v11238_v16 = vld [vmem:[#allocation7 + $0x864] sm:$0xf0]  ;;  %v11207_v63 = vld [vmem:[#allocation7 + $0x76c] sm:$0xf0]  ;;  %v9015_v40 = vld [vmem:[#allocation7 + $0x368] sm:$0xf0] }
 0x1f6   :  { %4164 = vmatpush.bf16.msra.mxu0 %v8838_v19  ;;  %v9654_v17 = vor.u32 %v11238_v16, %v9653_v53  ;;  %14263 = vst [vmem:[#allocation21_spill] sm:$0xff] %v12468_v42  ;;  %v9566_v19 = vor.u32 %v11207_v63, %v9565_v43  ;;  %v9247_v53 = vld [vmem:[#allocation7 + $0x4f0] sm:$0xf0]  ;;  %v9018_v4 = vor.u32 %v11058_v58, %v9015_v40  ;;  %v8695_v63 = vld [vmem:[#allocation7 + $0xe8] sm:$0xf0] }
 0x1f7   :  { %4395 = vmatpush.bf16.msra.mxu2 %v9390_v57  ;;  %v9493_v57 = vld [vmem:[#allocation7 + $0x688] sm:$0xf]  ;;  %v8927_v43 = vld [vmem:[#allocation7 + $0x270] sm:$0xf0]  ;;  %v10093_v58 = vld [vmem:[#allocation9 + $0x180] sm:$0xf] }
 0x1f8   :  { %v11341_v40 = vld [vmem:[#allocation9 + $0x19c] sm:$0xf0]  ;;  %v10367_v42 = vld [vmem:[#allocation9 + $0x3b0] sm:$0xf0] }
 0x1f9   :  { %4408 = vmatpush.bf16.msra.mxu3 %v9394_v3  ;;  %4177 = vmatpush.bf16.msra.mxu1 %v8842_v21  ;;  %v11247_v3 = vld [vmem:[#allocation7 + $0x8ac] sm:$0xf0] }
 0x1fa   :  { %4165 = vmatpush.bf16.msra.mxu0 %v8678_v2  ;;  %v11167_v21 = vld [vmem:[#allocation7 + $0x62c] sm:$0xf0]  ;;  %v9410_v2 = vor.u32 %v11147_v13, %v9407_v14  ;;  %v10125_v13 = vld [vmem:[#allocation9 + $0x1c0] sm:$0xf] }
 0x1fb   :  { %4396 = vmatpush.bf16.msra.mxu2 %v9230_v31  ;;  %v9726_v31 = vor.u32 %v11247_v3, %v9725_v8  ;;  %v9406_v52 = vor.u32 %v11167_v21, %v9405_v27  ;;  %v2301_v3 = vperm.slane %v12462_v54, 5  ;;  %v8767_v27 = vld [vmem:[#allocation7 + $0x130] sm:$0xf0]  ;;  %v11349_v14 = vld [vmem:[#allocation9 + $0x1dc] sm:$0xf0] }
 0x1fd   :  { %4409 = vmatpush.bf16.msra.mxu3 %v9234_v6  ;;  %4178 = vmatpush.bf16.msra.mxu1 %v8682_v45  ;;  %v9494_v6 = vor.u32 %v11198_v7, %v9493_v57  ;;  %v11078_v45 = vld [vmem:[#allocation7 + $0x364] sm:$0xf0]  ;;  %v8855_v57 = vld [vmem:[#allocation7 + $0x228] sm:$0xf0] }
 0x1fe   :  { %4210 = vmatpush.bf16.msrb.mxu0 %v9814_v55  ;;  %v11107_v55 = vld [vmem:[#allocation7 + $0x454] sm:$0xf] }
 0x1ff   :  { %4397 = vmatpush.bf16.msra.mxu2 %v9070_v62  ;;  %4166 = vmatmul.bf16.vlgmr.msra.gmra.mxu0 %v12455_v39  ;;  %v11138_v62 = vld [vmem:[#allocation7 + $0x54c] sm:$0xf]  ;;  %v9250_v36 = vor.u32 %v11107_v55, %v9247_v53  ;;  %v9509_v53 = vld [vmem:[#allocation7 + $0x698] sm:$0xf] }
 0x200   :  { %4179 = vmatmul.bf16.vlgmr.msra.gmra.mxu1 %v12455_v39  ;;  %v9338_v48 = vor.u32 %v11138_v62, %v9335_v61  ;;  %v9831_v62 = vld [vmem:[#allocation7 + $0x9b8] sm:$0xf0]  ;;  %v8765_v61 = vld [vmem:[#allocation7 + $0x90] sm:$0xf] }
 0x201   :  { %4410 = vmatpush.bf16.msra.mxu3 %v9074_v59  ;;  %4223 = vmatpush.bf16.msrb.mxu1 %v9818_v44  ;;  %v9334_v59 = vor.u32 %v11158_v29, %v9333_v51  ;;  %v9246_v44 = vor.u32 %v11127_v41, %v9245_v24  ;;  %v11027_v51 = vld [vmem:[#allocation7 + $0x1d4] sm:$0xf]  ;;  %v11280_v29 = vld [vmem:[#allocation7 + $0x9b4] sm:$0xf0]  ;;  %v9834_v0 = vor.u32 %v11260_v35, %v9831_v62  ;;  %v9671_v24 = vld [vmem:[#allocation7 + $0x878] sm:$0xf0] }
 0x202   :  { %4211 = vmatpush.bf16.msrb.mxu0 %v9654_v17  ;;  %v9087_v17 = vld [vmem:[#allocation7 + $0x3b0] sm:$0xf0]  ;;  %v8770_v41 = vor.u32 %v10987_v9, %v8767_v27  ;;  %v9191_v9 = vld [vmem:[#allocation7 + $0x4b8] sm:$0xf0] }
 0x203   :  { %4398 = vmatpush.bf16.msra.mxu2 %v8910_v38  ;;  %v3987_v38 = vpop.f32.mrf.mxu2 }
 0x204   :  { %v10381_v38 = vld [vmem:[#allocation9 + $0x3c0] sm:$0xf] }
 0x205   :  { %4411 = vmatpush.bf16.msra.mxu3 %v8914_v23  ;;  %4224 = vmatpush.bf16.msrb.mxu1 %v9658_v20  ;;  %v9013_v23 = vld [vmem:[#allocation7 + $0x2c8] sm:$0xf]  ;;  %v4050_v20 = vpop.f32.mrf.mxu3  ;;  %v12479_v55 = vor.u32 %v11413_v10, %v10381_v38  ;;  %v11080_v38 = vld [vmem:[#allocation7 + $0x374] sm:$0xf0]  ;;  %v10253_v10 = vld [vmem:[#allocation9 + $0x2c0] sm:$0xf] }
 0x206   :  { %4212 = vmatpush.bf16.msrb.mxu0 %v9494_v6  ;;  %v9014_v16 = vor.u32 %v11078_v45, %v9013_v23  ;;  %v12475_v32 = vadd.f32 %v4050_v20, %v2301_v3  ;;  %v11220_v23 = vld [vmem:[#allocation7 + $0x7dc] sm:$0xf]  ;;  %v9670_v45 = vor.u32 %v11240_v11, %v9669_v28  ;;  %v11333_v3 = vld [vmem:[#allocation9 + $0x15c] sm:$0xf0] }
 0x207   :  { %4399 = vmatpush.bf16.msra.mxu2 %v8750_v49  ;;  %v9085_v49 = vld [vmem:[#allocation7 + $0x310] sm:$0xf]  ;;  %14266 = vst [vmem:[#allocation24_spill] sm:$0xff] %v12479_v55 }
 0x208   :  { %v9086_v7 = vor.u32 %v11087_v22, %v9085_v49  ;;  %14264 = vst [vmem:[#allocation22_spill] sm:$0xff] %v12475_v32  ;;  %v11180_v49 = vld [vmem:[#allocation7 + $0x69c] sm:$0xf]  ;;  %v11399_v32 = vld [vmem:[#allocation9 + $0x36c] sm:$0xf0] }
 0x209   :  { %4412 = vmatpush.bf16.msra.mxu3 %v8754_v47  ;;  %4225 = vmatpush.bf16.msrb.mxu1 %v9498_v15  ;;  %v11038_v47 = vld [vmem:[#allocation7 + $0x224] sm:$0xf0]  ;;  %v9829_v15 = vld [vmem:[#allocation7 + $0x918] sm:$0xf]  ;;  %v9511_v22 = vld [vmem:[#allocation7 + $0x738] sm:$0xf0] }
 0x20a   :  { %4400 = vmatmul.bf16.vlgmr.msra.gmra.mxu2 %v12455_v39  ;;  %4213 = vmatpush.bf16.msrb.mxu0 %v9334_v59  ;;  %v8854_v25 = vor.u32 %v11038_v47, %v8853_v46  ;;  %v8930_v59 = vor.u32 %v11027_v51, %v8927_v43  ;;  %v11405_v46 = vld [vmem:[#allocation9 + $0x39c] sm:$0xf0]  ;;  %v11513_v47 = vld [vmem:[#allocation15] ss:$0 sm:$0xff]  ;;  %v9514_v20 = vor.u32 %v11180_v49, %v9511_v22  ;;  %v11040_v49 = vld [vmem:[#allocation7 + $0x234] sm:$0xf0] }
 0x20b   :  { %4444 = vmatpush.bf16.msrb.mxu2 %v9886_v60  ;;  %v11067_v60 = vld [vmem:[#allocation7 + $0x314] sm:$0xf]  ;;  %v12472_v8 = vpop.f32.mrf.mxu2  ;;  %v10221_v22 = vld [vmem:[#allocation9 + $0x280] sm:$0xf] }
 0x20c   :  { %4413 = vmatmul.bf16.vlgmr.msra.gmra.mxu3 %v12455_v39  ;;  %v9090_v26 = vor.u32 %v11067_v60, %v9087_v17 }
 0x20d   :  { %4457 = vmatpush.bf16.msrb.mxu3 %v9890_v5  ;;  %4226 = vmatpush.bf16.msrb.mxu1 %v9338_v48  ;;  %v11018_v5 = vld [vmem:[#allocation7 + $0x18c] sm:$0xf]  ;;  %v9830_v48 = vor.u32 %v11280_v29, %v9829_v15  ;;  %v10029_v15 = vld [vmem:[#allocation9 + $0x100] sm:$0xf] }
 0x20e   :  { %4214 = vmatpush.bf16.msrb.mxu0 %v9174_v1  ;;  %v8858_v6 = vor.u32 %v11018_v5, %v8855_v57  ;;  %v4052_v1 = vpop.f32.mrf.mxu3  ;;  %v9349_v5 = vld [vmem:[#allocation7 + $0x558] sm:$0xf]  ;;  %v10061_v57 = vld [vmem:[#allocation9 + $0x140] sm:$0xf] }
 0x20f   :  { %4445 = vmatpush.bf16.msrb.mxu2 %v9726_v31  ;;  %v11047_v31 = vld [vmem:[#allocation7 + $0x26c] sm:$0xf0]  ;;  %v11325_v29 = vld [vmem:[#allocation9 + $0x11c] sm:$0xf0]  ;;  %v11060_v1 = vld [vmem:[#allocation7 + $0x2dc] sm:$0xf] }
 0x210   :  { %v8926_v34 = vor.u32 %v11047_v31, %v8925_v18 }
 0x211   :  { %4458 = vmatpush.bf16.msrb.mxu3 %v9730_v30  ;;  %4227 = vmatpush.bf16.msrb.mxu1 %v9178_v33  ;;  %v10978_v30 = vld [vmem:[#allocation7 + $0x4c] sm:$0xf]  ;;  %v12477_v33 = vor.u32 %v11349_v14, %v10125_v13  ;;  %v9029_v13 = vld [vmem:[#allocation7 + $0x2d8] sm:$0xf]  ;;  %v9997_v14 = vld [vmem:[#allocation9 + $0xc0] sm:$0xf] }
 0x212   :  { %4215 = vmatpush.bf16.msrb.mxu0 %v9014_v16  ;;  %v8698_v21 = vor.u32 %v10978_v30, %v8695_v63  ;;  %v11200_v16 = vld [vmem:[#allocation7 + $0x734] sm:$0xf0] }
 0x213   :  { %4446 = vmatpush.bf16.msrb.mxu2 %v9566_v19  ;;  %v8694_v19 = vor.u32 %v10998_v50, %v8693_v12  ;;  %14265 = vst [vmem:[#allocation23_spill] sm:$0xff] %v12477_v33  ;;  %v9510_v60 = vor.u32 %v11200_v16, %v9509_v53  ;;  %v10317_v12 = vld [vmem:[#allocation9 + $0x340] sm:$0xf]  ;;  %v9351_v50 = vld [vmem:[#allocation7 + $0x5f8] sm:$0xf0]  ;;  %v9030_v53 = vor.u32 %v11080_v38, %v9029_v13 }
 0x214   :  { %v9189_v63 = vld [vmem:[#allocation7 + $0x418] sm:$0xf]  ;;  %v11309_v16 = vld [vmem:[#allocation9 + $0x9c] sm:$0xf0] }
 0x215   :  { %4459 = vmatpush.bf16.msrb.mxu3 %v9570_v37  ;;  %4228 = vmatpush.bf16.msrb.mxu1 %v9018_v4  ;;  %v11007_v37 = vld [vmem:[#allocation7 + $0x12c] sm:$0xf0]  ;;  %v12483_v4 = vor.u32 %v11341_v40, %v10093_v58  ;;  %v8869_v40 = vld [vmem:[#allocation7 + $0x198] sm:$0xf]  ;;  %v11357_v38 = vld [vmem:[#allocation9 + $0x21c] sm:$0xf0] }
 0x216   :  { %4216 = vmatpush.bf16.msrb.mxu0 %v8854_v25  ;;  %v11397_v25 = vld [vmem:[#allocation9 + $0x35c] sm:$0xf0]  ;;  %v12493_v31 = vpop.f32.mrf.mxu3 }
 0x217   :  { %4447 = vmatpush.bf16.msrb.mxu2 %v9406_v52  ;;  %v4039_v52 = vpop.f32.mrf.mxu2  ;;  %14267 = vst [vmem:[#allocation25_spill] sm:$0xff] %v12483_v4  ;;  %v1949_v30 = vpop.f32.mrf.mxu0  ;;  %v12499_v43 = vor.u32 %v11397_v25, %v10317_v12  ;;  %v10980_v25 = vld [vmem:[#allocation7 + $0x5c] sm:$0xf] }
 0x218   :  { %14270 = vst [vmem:[#allocation28_spill] sm:$0xff] %v12493_v31  ;;  %v11381_v52 = vld [vmem:[#allocation9 + $0x2dc] sm:$0xf0]  ;;  %v10141_v31 = vld [vmem:[#allocation9 + $0x1d0] sm:$0xf] }
 0x219   :  { %4460 = vmatpush.bf16.msrb.mxu3 %v9410_v2  ;;  %4229 = vmatpush.bf16.msrb.mxu1 %v8858_v6  ;;  %v8766_v2 = vor.u32 %v11007_v37, %v8765_v61  ;;  %v12496_v6 = vor.u32 %v11333_v3, %v10061_v57  ;;  %14272 = vst [vmem:[#allocation30_spill] sm:$0xff] %v12499_v43  ;;  %v11120_v61 = vld [vmem:[#allocation7 + $0x4b4] sm:$0xf0]  ;;  %v11100_v37 = vld [vmem:[#allocation7 + $0x41c] sm:$0xf] }
 0x21a   :  { %4217 = vmatpush.bf16.msrb.mxu0 %v8694_v19  ;;  %v10285_v19 = vld [vmem:[#allocation9 + $0x300] sm:$0xf]  ;;  %v9194_v11 = vor.u32 %v11100_v37, %v9191_v9  ;;  %v12513_v58 = vor.u32 %v11381_v52, %v10253_v10  ;;  %v8709_v3 = vld [vmem:[#allocation7 + $0x58] sm:$0xf]  ;;  %v2299_v37 = vperm.slane %v12462_v54, 3 }
 0x21b   :  { %4448 = vmatpush.bf16.msrb.mxu2 %v9246_v44  ;;  %v9674_v44 = vor.u32 %v11220_v23, %v9671_v24  ;;  %14271 = vst [vmem:[#allocation29_spill] sm:$0xff] %v12496_v6  ;;  %v9901_v9 = vld [vmem:[#allocation9] sm:$0xf] }
 0x21c   :  { %14277 = vst [vmem:[#allocation35_spill] sm:$0xff] %v12513_v58 }
 0x21d   :  { %4461 = vmatpush.bf16.msrb.mxu3 %v9250_v36  ;;  %4230 = vmatpush.bf16.msrb.mxu1 %v8698_v21  ;;  %v10349_v36 = vld [vmem:[#allocation9 + $0x380] sm:$0xf]  ;;  %v1962_v35 = vpop.f32.mrf.mxu1  ;;  %v12504_v21 = vor.u32 %v11325_v29, %v10029_v15  ;;  %v9845_v29 = vld [vmem:[#allocation7 + $0x928] sm:$0xf] }
 0x21e   :  { %4262 = vmatpush.bf16.msra.mxu0 %v9830_v48  ;;  %v12486_v17 = vor.u32 %v11405_v46, %v10349_v36  ;;  %v9190_v48 = vor.u32 %v11120_v61, %v9189_v63  ;;  %v4104_v24 = vpop.f32.mrf.mxu3  ;;  %v10189_v63 = vld [vmem:[#allocation9 + $0x240] sm:$0xf] }
 0x21f   :  { %4449 = vmatpush.bf16.msrb.mxu2 %v9086_v7  ;;  %4218 = vmatmul.bf16.vlgmr.msrb.gmra.mxu0 %v12455_v39  ;;  %v11160_v7 = vld [vmem:[#allocation7 + $0x5f4] sm:$0xf0]  ;;  %v12491_v18 = vpop.f32.mrf.mxu2  ;;  %14274 = vst [vmem:[#allocation32_spill] sm:$0xff] %v12504_v21  ;;  %v11365_v15 = vld [vmem:[#allocation9 + $0x25c] sm:$0xf0] }
 0x220   :  { %14268 = vst [vmem:[#allocation26_spill] sm:$0xff] %v12486_v17  ;;  %4231 = vmatmul.bf16.vlgmr.msrb.gmra.mxu1 %v12455_v39  ;;  %v9350_v51 = vor.u32 %v11160_v7, %v9349_v5  ;;  %v8871_v5 = vld [vmem:[#allocation7 + $0x238] sm:$0xf0]  ;;  %v8870_v7 = vor.u32 %v11040_v49, %v8869_v40  ;;  %v12530_v13 = vor.u32 %v11365_v15, %v10189_v63  ;;  %v11414_v40 = vld [vmem:[#allocation9 + $0x3e4] sm:$0xf0] }
 0x221   :  { %4462 = vmatpush.bf16.msrb.mxu3 %v9090_v26  ;;  %4275 = vmatpush.bf16.msra.mxu1 %v9834_v0  ;;  %v11140_v26 = vld [vmem:[#allocation7 + $0x55c] sm:$0xf]  ;;  %14269 = vst [vmem:[#allocation27_spill] sm:$0xff] %v12491_v18  ;;  %v11317_v0 = vld [vmem:[#allocation9 + $0xdc] sm:$0xf0] }
 0x222   :  { %4263 = vmatpush.bf16.msra.mxu0 %v9670_v45  ;;  %v9354_v62 = vor.u32 %v11140_v26, %v9351_v50  ;;  %v1951_v45 = vpop.f32.mrf.mxu0  ;;  %v9933_v26 = vld [vmem:[#allocation9 + $0x40] sm:$0xf]  ;;  %14283 = vst [vmem:[#allocation41_spill] sm:$0xff] %v12530_v13  ;;  %v11182_v15 = vld [vmem:[#allocation7 + $0x6ac] sm:$0xf] }
 0x223   :  { %4450 = vmatpush.bf16.msrb.mxu2 %v8926_v34  ;;  %v1950_v34 = vadd.f32 %v11513_v47, %v1949_v30  ;;  %v11373_v47 = vld [vmem:[#allocation9 + $0x29c] sm:$0xf0]  ;;  %v11242_v45 = vld [vmem:[#allocation7 + $0x884] sm:$0xf0]  ;;  %v10397_v18 = vld [vmem:[#allocation9 + $0x3d0] sm:$0xf] }
 0x224   :  { %v12519_v12 = vor.u32 %v11373_v47, %v10221_v22  ;;  %v11301_v50 = vld [vmem:[#allocation9 + $0x5c] sm:$0xf0] }
 0x225   :  { %4463 = vmatpush.bf16.msrb.mxu3 %v8930_v59  ;;  %4276 = vmatpush.bf16.msra.mxu1 %v9674_v44  ;;  %v11389_v59 = vld [vmem:[#allocation9 + $0x31c] sm:$0xf0]  ;;  %v12501_v27 = vadd.f32 %v1962_v35, %v1950_v34  ;;  %v1964_v36 = vpop.f32.mrf.mxu1  ;;  %v11282_v34 = vld [vmem:[#allocation7 + $0x9c4] sm:$0xf0]  ;;  %v11262_v35 = vld [vmem:[#allocation7 + $0x92c] sm:$0xf] }
 0x226   :  { %4264 = vmatpush.bf16.msra.mxu0 %v9510_v60  ;;  %v12507_v28 = vor.u32 %v11389_v59, %v10285_v19  ;;  %v9965_v44 = vld [vmem:[#allocation9 + $0x80] sm:$0xf]  ;;  %v11020_v60 = vld [vmem:[#allocation7 + $0x19c] sm:$0xf]  ;;  %14279 = vst [vmem:[#allocation37_spill] sm:$0xff] %v12519_v12  ;;  %v12523_v61 = vpop.f32.mrf.mxu3  ;;  %v12526_v19 = vor.u32 %v11301_v50, %v9933_v26  ;;  %v9846_v52 = vor.u32 %v11282_v34, %v9845_v29 }
 0x227   :  { %4451 = vmatpush.bf16.msrb.mxu2 %v8766_v2  ;;  %14273 = vst [vmem:[#allocation31_spill] sm:$0xff] %v12501_v27  ;;  %v9031_v2 = vld [vmem:[#allocation7 + $0x378] sm:$0xf0]  ;;  %v4091_v23 = vpop.f32.mrf.mxu2  ;;  %v12516_v57 = vor.u32 %v11309_v16, %v9965_v44  ;;  %v8874_v30 = vor.u32 %v11020_v60, %v8871_v5  ;;  %v9847_v59 = vld [vmem:[#allocation7 + $0x9c8] sm:$0xf0] }
 0x228   :  { %14275 = vst [vmem:[#allocation33_spill] sm:$0xff] %v12507_v28  ;;  %v9034_v46 = vor.u32 %v11060_v1, %v9031_v2  ;;  %v9685_v1 = vld [vmem:[#allocation7 + $0x7e8] sm:$0xf]  ;;  %v9850_v24 = vor.u32 %v11262_v35, %v9847_v59  ;;  %v11222_v36 = vld [vmem:[#allocation7 + $0x7ec] sm:$0xf] }
 0x229   :  { %4464 = vmatpush.bf16.msrb.mxu3 %v8770_v41  ;;  %4277 = vmatpush.bf16.msra.mxu1 %v9514_v20  ;;  %v12510_v41 = vor.u32 %v11317_v0, %v9997_v14  ;;  %14278 = vst [vmem:[#allocation36_spill] sm:$0xff] %v12516_v57  ;;  %v11000_v20 = vld [vmem:[#allocation7 + $0xf4] sm:$0xf0]  ;;  %v11293_v0 = vld [vmem:[#allocation9 + $0x1c] sm:$0xf0]  ;;  %v9686_v60 = vor.u32 %v11242_v45, %v9685_v1 }
 0x22a   :  { %4452 = vmatmul.bf16.vlgmr.msrb.gmra.mxu2 %v12455_v39  ;;  %4265 = vmatpush.bf16.msra.mxu0 %v9350_v51  ;;  %v8711_v51 = vld [vmem:[#allocation7 + $0xf8] sm:$0xf0]  ;;  %14281 = vst [vmem:[#allocation39_spill] sm:$0xff] %v12523_v61  ;;  %v12532_v14 = vpop.f32.mrf.mxu0  ;;  %v10133_v2 = vld [vmem:[#allocation9 + $0x1c8] sm:$0xf]  ;;  %v12535_v16 = vor.u32 %v11293_v0, %v9901_v9 }
 0x22b   :  { %5264 = vmatpush.bf16.msra.mxu2 %v12477_v33  ;;  %14276 = vst [vmem:[#allocation34_spill] sm:$0xff] %v12510_v41  ;;  %v8714_v10 = vor.u32 %v10980_v25, %v8711_v51  ;;  %v11350_v23 = vld [vmem:[#allocation9 + $0x1e4] sm:$0xf0]  ;;  %v9527_v29 = vld [vmem:[#allocation7 + $0x748] sm:$0xf0] }
 0x22c   :  { %4465 = vmatmul.bf16.vlgmr.msrb.gmra.mxu3 %v12455_v39  ;;  %14282 = vst [vmem:[#allocation40_spill] sm:$0xff] %v12526_v19  ;;  %v12542_v47 = vor.u32 %v11350_v23, %v10133_v2  ;;  %v11202_v26 = vld [vmem:[#allocation7 + $0x744] sm:$0xf0]  ;;  %v11142_v23 = vld [vmem:[#allocation7 + $0x56c] sm:$0xf] }
 0x22d   :  { %5277 = vmatpush.bf16.msra.mxu3 %v12479_v55  ;;  %4278 = vmatpush.bf16.msra.mxu1 %v9354_v62  ;;  %v4024_v44 = vpop.f32.mrf.mxu1  ;;  %14284 = vst [vmem:[#allocation42_spill] sm:$0xff] %v12535_v16  ;;  %v10357_v50 = vld [vmem:[#allocation9 + $0x388] sm:$0xf] }
 0x22e   :  { %4266 = vmatpush.bf16.msra.mxu0 %v9190_v48  ;;  %v8710_v48 = vor.u32 %v11000_v20, %v8709_v3  ;;  %v12538_v49 = vadd.f32 %v4024_v44, %v2299_v37  ;;  %14287 = vst [vmem:[#allocation45_spill] sm:$0xff] %v12542_v47  ;;  %v9525_v3 = vld [vmem:[#allocation7 + $0x6a8] sm:$0xf]  ;;  %v4156_v63 = vpop.f32.mrf.mxu3 }
 0x22f   :  { %5265 = vmatpush.bf16.msra.mxu2 %v12483_v4  ;;  %v12521_v62 = vpop.f32.mrf.mxu2  ;;  %v10101_v20 = vld [vmem:[#allocation9 + $0x188] sm:$0xf]  ;;  %v9526_v59 = vor.u32 %v11202_v26, %v9525_v3  ;;  %v11102_v26 = vld [vmem:[#allocation7 + $0x42c] sm:$0xf] }
 0x230   :  { %14280 = vst [vmem:[#allocation38_spill] sm:$0xff] %v12521_v62  ;;  %v9365_v9 = vld [vmem:[#allocation7 + $0x568] sm:$0xf]  ;;  %v9701_v62 = vld [vmem:[#allocation7 + $0x7f8] sm:$0xf] }
 0x231   :  { %5278 = vmatpush.bf16.msra.mxu3 %v12486_v17  ;;  %4279 = vmatpush.bf16.msra.mxu1 %v9194_v11  ;;  %v10157_v11 = vld [vmem:[#allocation9 + $0x200] sm:$0xf]  ;;  %14285 = vst [vmem:[#allocation43_spill] sm:$0xff] %v12538_v49  ;;  %v11334_v0 = vld [vmem:[#allocation9 + $0x164] sm:$0xf0] }
 0x232   :  { %4267 = vmatpush.bf16.msra.mxu0 %v9030_v53  ;;  %v10389_v53 = vld [vmem:[#allocation9 + $0x3c8] sm:$0xf]  ;;  %v12540_v22 = vor.u32 %v11357_v38, %v10157_v11  ;;  %v4013_v35 = vpop.f32.mrf.mxu0  ;;  %v13961_v11 = vmov 0   ;;  %v9530_v38 = vor.u32 %v11182_v15, %v9527_v29  ;;  %v9223_v49 = vld [vmem:[#allocation7 + $0x4d8] sm:$0xf0] }
 0x233   :  { %5266 = vmatpush.bf16.msra.mxu2 %v12496_v6  ;;  %v12544_v5 = vor.u32 %v11414_v40, %v10389_v53  ;;  %v11398_v1 = vld [vmem:[#allocation9 + $0x364] sm:$0xf0] }
 0x234   :  { %14286 = vst [vmem:[#allocation44_spill] sm:$0xff] %v12540_v22  ;;  %v9205_v44 = vld [vmem:[#allocation7 + $0x428] sm:$0xf] }
 0x235   :  { %5279 = vmatpush.bf16.msra.mxu3 %v12499_v43  ;;  %4280 = vmatpush.bf16.msra.mxu1 %v9034_v46  ;;  %v9687_v46 = vld [vmem:[#allocation7 + $0x888] sm:$0xf0]  ;;  %14288 = vst [vmem:[#allocation46_spill] sm:$0xff] %v12544_v5  ;;  %v4026_v2 = vpop.f32.mrf.mxu1  ;;  %v11122_v3 = vld [vmem:[#allocation7 + $0x4c4] sm:$0xf0] }
 0x236   :  { %4268 = vmatpush.bf16.msra.mxu0 %v8870_v7  ;;  %v11342_v7 = vld [vmem:[#allocation9 + $0x1a4] sm:$0xf0]  ;;  %v9690_v25 = vor.u32 %v11222_v36, %v9687_v46  ;;  %v9206_v15 = vor.u32 %v11122_v3, %v9205_v44 }
 0x237   :  { %5267 = vmatpush.bf16.msra.mxu2 %v12504_v21  ;;  %v4143_v51 = vpop.f32.mrf.mxu2  ;;  %v12550_v34 = vor.u32 %v11342_v7, %v10101_v20  ;;  %v10037_v36 = vld [vmem:[#allocation9 + $0x108] sm:$0xf] }
 0x238   :  { %v11326_v46 = vld [vmem:[#allocation9 + $0x124] sm:$0xf0] }
 0x239   :  { %5280 = vmatpush.bf16.msra.mxu3 %v12507_v28  ;;  %4281 = vmatpush.bf16.msra.mxu1 %v8874_v30  ;;  %v11406_v30 = vld [vmem:[#allocation9 + $0x3a4] sm:$0xf0]  ;;  %14289 = vst [vmem:[#allocation47_spill] sm:$0xff] %v12550_v34 }
 0x23a   :  { %4269 = vmatpush.bf16.msra.mxu0 %v8710_v48  ;;  %v12553_v37 = vor.u32 %v11406_v30, %v10357_v50  ;;  %v10069_v48 = vld [vmem:[#allocation9 + $0x148] sm:$0xf]  ;;  %v9207_v50 = vld [vmem:[#allocation7 + $0x4c8] sm:$0xf0]  ;;  %v12569_v30 = vor.u32 %v11326_v46, %v10037_v36  ;;  %v12571_v63 = vpop.f32.mrf.mxu0 }
 0x23b   :  { %5268 = vmatpush.bf16.msra.mxu2 %v12510_v41  ;;  %v12559_v45 = vor.u32 %v11334_v0, %v10069_v48  ;;  %v10293_v20 = vld [vmem:[#allocation9 + $0x308] sm:$0xf]  ;;  %v9210_v48 = vor.u32 %v11102_v26, %v9207_v50 }
 0x23c   :  { %14290 = vst [vmem:[#allocation48_spill] sm:$0xff] %v12553_v37  ;;  %v11390_v7 = vld [vmem:[#allocation9 + $0x324] sm:$0xf0] }
 0x23d   :  { %5281 = vmatpush.bf16.msra.mxu3 %v12513_v58  ;;  %4282 = vmatpush.bf16.msra.mxu1 %v8714_v10  ;;  %v11162_v10 = vld [vmem:[#allocation7 + $0x604] sm:$0xf0]  ;;  %14291 = vst [vmem:[#allocation49_spill] sm:$0xff] %v12559_v45  ;;  %v12574_v29 = vor.u32 %v11390_v7, %v10293_v20 }
 0x23e   :  { %4314 = vmatpush.bf16.msrb.mxu0 %v9846_v52  ;;  %v10325_v52 = vld [vmem:[#allocation9 + $0x348] sm:$0xf]  ;;  %v9366_v53 = vor.u32 %v11162_v10, %v9365_v9  ;;  %14295 = vst [vmem:[#allocation53_spill] sm:$0xff] %v12569_v30  ;;  %v2303_v9 = vperm.slane %v12462_v54, 7 }
 0x23f   :  { %5269 = vmatpush.bf16.msra.mxu2 %v12516_v57  ;;  %4270 = vmatmul.bf16.vlgmr.msra.gmra.mxu0 %v12455_v39  ;;  %v12562_v40 = vor.u32 %v11398_v1, %v10325_v52  ;;  %v9045_v51 = vld [vmem:[#allocation7 + $0x2e8] sm:$0xf]  ;;  %14296 = vst [vmem:[#allocation54_spill] sm:$0xff] %v12574_v29  ;;  %v11062_v52 = vld [vmem:[#allocation7 + $0x2ec] sm:$0xf] }
 0x240   :  { %4283 = vmatmul.bf16.vlgmr.msra.gmra.mxu1 %v12455_v39  ;;  %v12566_v39 = vpop.f32.mrf.mxu3  ;;  %v10005_v35 = vld [vmem:[#allocation9 + $0xc8] sm:$0xf]  ;;  %v9047_v1 = vld [vmem:[#allocation7 + $0x388] sm:$0xf0] }
 0x241   :  { %5282 = vmatpush.bf16.msra.mxu3 %v12519_v12  ;;  %4327 = vmatpush.bf16.msrb.mxu1 %v9850_v24  ;;  %v9367_v24 = vld [vmem:[#allocation7 + $0x608] sm:$0xf0]  ;;  %14292 = vst [vmem:[#allocation50_spill] sm:$0xff] %v12562_v40  ;;  %v11082_v0 = vld [vmem:[#allocation7 + $0x384] sm:$0xf0] }
 0x242   :  { %4315 = vmatpush.bf16.msrb.mxu0 %v9686_v60  ;;  %v9370_v60 = vor.u32 %v11142_v23, %v9367_v24  ;;  %14294 = vst [vmem:[#allocation52_spill] sm:$0xff] %v12566_v39  ;;  %v11382_v10 = vld [vmem:[#allocation9 + $0x2e4] sm:$0xf0]  ;;  %v4076_v23 = vpop.f32.mrf.mxu1  ;;  %v9046_v24 = vor.u32 %v11082_v0, %v9045_v51  ;;  %v4065_v0 = vpop.f32.mrf.mxu0  ;;  %v9861_v39 = vld [vmem:[#allocation7 + $0x938] sm:$0xf] }
 0x243   :  { %5270 = vmatpush.bf16.msra.mxu2 %v12526_v19  ;;  %v8885_v44 = vld [vmem:[#allocation7 + $0x1a8] sm:$0xf]  ;;  %v12583_v46 = vadd.f32 %v4076_v23, %v2303_v9  ;;  %v10982_v23 = vld [vmem:[#allocation7 + $0x6c] sm:$0xf]  ;;  %v9863_v0 = vld [vmem:[#allocation7 + $0x9d8] sm:$0xf0] }
 0x244   :  { %v9973_v54 = vld [vmem:[#allocation9 + $0x88] sm:$0xf] }
 0x245   :  { %5283 = vmatpush.bf16.msra.mxu3 %v12530_v13  ;;  %4328 = vmatpush.bf16.msrb.mxu1 %v9690_v25  ;;  %v12564_v25 = vpop.f32.mrf.mxu2  ;;  %v11310_v36 = vld [vmem:[#allocation9 + $0xa4] sm:$0xf0]  ;;  %14299 = vst [vmem:[#allocation57_spill] sm:$0xff] %v12583_v46  ;;  %v11415_v46 = vld [vmem:[#allocation9 + $0x3ec] sm:$0xf0] }
 0x246   :  { %4316 = vmatpush.bf16.msrb.mxu0 %v9526_v59  ;;  %14293 = vst [vmem:[#allocation51_spill] sm:$0xff] %v12564_v25  ;;  %v11318_v59 = vld [vmem:[#allocation9 + $0xe4] sm:$0xf0] }
 0x247   :  { %5271 = vmatpush.bf16.msra.mxu2 %v12535_v16  ;;  %v12578_v2 = vor.u32 %v11318_v59, %v10005_v35  ;;  %v11042_v3 = vld [vmem:[#allocation7 + $0x244] sm:$0xf0]  ;;  %v11022_v35 = vld [vmem:[#allocation7 + $0x1ac] sm:$0xf] }
 0x248   :  { %v10229_v20 = vld [vmem:[#allocation9 + $0x288] sm:$0xf]  ;;  %v4208_v50 = vpop.f32.mrf.mxu3  ;;  %v8887_v59 = vld [vmem:[#allocation7 + $0x248] sm:$0xf0]  ;;  %v8886_v9 = vor.u32 %v11042_v3, %v8885_v44 }
 0x249   :  { %5284 = vmatpush.bf16.msra.mxu3 %v12540_v22  ;;  %4329 = vmatpush.bf16.msrb.mxu1 %v9530_v38  ;;  %v10261_v38 = vld [vmem:[#allocation9 + $0x2c8] sm:$0xf]  ;;  %14297 = vst [vmem:[#allocation55_spill] sm:$0xff] %v12578_v2 }
 0x24a   :  { %5272 = vmatmul.bf16.vlgmr.msra.gmra.mxu2 %v13961_v11  ;;  %4317 = vmatpush.bf16.msrb.mxu0 %v9366_v53  ;;  %v12581_v53 = vor.u32 %v11382_v10, %v10261_v38  ;;  %v11374_v7 = vld [vmem:[#allocation9 + $0x2a4] sm:$0xf0]  ;;  %v4078_v3 = vpop.f32.mrf.mxu1 }
 0x24b   :  { %5316 = vmatpush.bf16.msrb.mxu2 %v12542_v47  ;;  %v8725_v51 = vld [vmem:[#allocation7 + $0x68] sm:$0xf]  ;;  %v12589_v38 = vor.u32 %v11374_v7, %v10229_v20 }
 0x24c   :  { %5285 = vmatmul.bf16.vlgmr.msra.gmra.mxu3 %v13961_v11  ;;  %14298 = vst [vmem:[#allocation56_spill] sm:$0xff] %v12581_v53  ;;  %v9941_v10 = vld [vmem:[#allocation9 + $0x48] sm:$0xf]  ;;  %v8727_v11 = vld [vmem:[#allocation7 + $0x108] sm:$0xf0] }
 0x24d   :  { %5329 = vmatpush.bf16.msrb.mxu3 %v12544_v5  ;;  %4330 = vmatpush.bf16.msrb.mxu1 %v9370_v60  ;;  %v9050_v60 = vor.u32 %v11062_v52, %v9047_v1  ;;  %v4195_v26 = vpop.f32.mrf.mxu2  ;;  %14301 = vst [vmem:[#allocation59_spill] sm:$0xff] %v12589_v38  ;;  %v11302_v52 = vld [vmem:[#allocation9 + $0x64] sm:$0xf0]  ;;  %v8890_v1 = vor.u32 %v11022_v35, %v8887_v59 }
 0x24e   :  { %4318 = vmatpush.bf16.msrb.mxu0 %v9206_v15  ;;  %v12586_v15 = vor.u32 %v11310_v36, %v9973_v54  ;;  %v10197_v26 = vld [vmem:[#allocation9 + $0x248] sm:$0xf]  ;;  %v11284_v54 = vld [vmem:[#allocation7 + $0x9d4] sm:$0xf0]  ;;  %v12592_v36 = vor.u32 %v11302_v52, %v9941_v10  ;;  %v8730_v25 = vor.u32 %v10982_v23, %v8727_v11  ;;  %v11351_v10 = vld [vmem:[#allocation9 + $0x1ec] sm:$0xf0]  ;;  %v12609_v23 = vor.u32 %v11415_v46, %v10397_v18 }
 0x24f   :  { %5317 = vmatpush.bf16.msrb.mxu2 %v12550_v34  ;;  %v11366_v50 = vld [vmem:[#allocation9 + $0x264] sm:$0xf0]  ;;  %v9862_v61 = vor.u32 %v11284_v54, %v9861_v39  ;;  %v12607_v39 = vor.u32 %v11351_v10, %v10141_v31  ;;  %v10109_v54 = vld [vmem:[#allocation9 + $0x190] sm:$0xf]  ;;  %v12615_v31 = vld [vmem:[%s13946_s0] sm:$0xf] }
 0x250   :  { %14300 = vst [vmem:[#allocation58_spill] sm:$0xff] %v12586_v15  ;;  %v9909_v44 = vld [vmem:[#allocation9 + $0x8] sm:$0xf]  ;;  %v12599_v27 = vpop.f32.mrf.mxu3  ;;  %v10077_v46 = vld [vmem:[#allocation9 + $0x150] sm:$0xf] }
 0x251   :  { %5330 = vmatpush.bf16.msrb.mxu3 %v12553_v37  ;;  %4331 = vmatpush.bf16.msrb.mxu1 %v9210_v48  ;;  %v11002_v48 = vld [vmem:[#allocation7 + $0x104] sm:$0xf0]  ;;  %14302 = vst [vmem:[#allocation60_spill] sm:$0xff] %v12592_v36 }
 0x252   :  { %4319 = vmatpush.bf16.msrb.mxu0 %v9046_v24  ;;  %v11264_v24 = vld [vmem:[#allocation7 + $0x93c] sm:$0xf]  ;;  %v8726_v20 = vor.u32 %v11002_v48, %v8725_v51  ;;  %v11294_v7 = vld [vmem:[#allocation9 + $0x24] sm:$0xf0]  ;;  %14305 = vst [vmem:[#allocation63_spill] sm:$0xff] %v12599_v27 }
 0x253   :  { %5318 = vmatpush.bf16.msrb.mxu2 %v12559_v45  ;;  %v10165_v35 = vld [vmem:[#allocation9 + $0x208] sm:$0xf]  ;;  %v9866_v3 = vor.u32 %v11264_v24, %v9863_v0  ;;  %v12602_v51 = vor.u32 %v11294_v7, %v9909_v44  ;;  %v11224_v48 = vld [vmem:[#allocation7 + $0x7fc] sm:$0xf]  ;;  %14308 = vst [vmem:[#allocation66_spill] sm:$0xff] %v12607_v39 }
 0x254   :  { %v11358_v59 = vld [vmem:[#allocation9 + $0x224] sm:$0xf0]  ;;  %14309 = vst [vmem:[#allocation67_spill] sm:$0xff] %v12609_v23  ;;  %v11343_v24 = vld [vmem:[#allocation9 + $0x1ac] sm:$0xf0] }
 0x255   :  { %5331 = vmatpush.bf16.msrb.mxu3 %v12562_v40  ;;  %4332 = vmatpush.bf16.msrb.mxu1 %v9050_v60  ;;  %v12595_v60 = vor.u32 %v11366_v50, %v10197_v26  ;;  %v12597_v52 = vpop.f32.mrf.mxu2  ;;  %14306 = vst [vmem:[#allocation64_spill] sm:$0xff] %v12602_v51  ;;  %v9703_v26 = vld [vmem:[#allocation7 + $0x898] sm:$0xf0]  ;;  %v12605_v11 = vor.u32 %v11358_v59, %v10165_v35  ;;  %v9541_v50 = vld [vmem:[#allocation7 + $0x6b8] sm:$0xf] }
 0x256   :  { %4320 = vmatpush.bf16.msrb.mxu0 %v8886_v9  ;;  %14304 = vst [vmem:[#allocation62_spill] sm:$0xff] %v12597_v52  ;;  %v11244_v9 = vld [vmem:[#allocation7 + $0x894] sm:$0xf0]  ;;  %v9706_v0 = vor.u32 %v11224_v48, %v9703_v26  ;;  %v10365_v7 = vld [vmem:[#allocation9 + $0x390] sm:$0xf]  ;;  %v12620_v18 = vor.u32 %v11343_v24, %v10109_v54 }
 0x257   :  { %5319 = vmatpush.bf16.msrb.mxu2 %v12569_v30  ;;  %14303 = vst [vmem:[#allocation61_spill] sm:$0xff] %v12595_v60  ;;  %v11204_v44 = vld [vmem:[#allocation7 + $0x754] sm:$0xf0]  ;;  %v11407_v27 = vld [vmem:[#allocation9 + $0x3ac] sm:$0xf0] }
 0x258   :  { %14307 = vst [vmem:[#allocation65_spill] sm:$0xff] %v12605_v11  ;;  %v9543_v35 = vld [vmem:[#allocation7 + $0x758] sm:$0xf0]  ;;  %v11335_v59 = vld [vmem:[#allocation9 + $0x16c] sm:$0xf0] }
 0x259   :  { %5332 = vmatpush.bf16.msrb.mxu3 %v12574_v29  ;;  %4333 = vmatpush.bf16.msrb.mxu1 %v8890_v1  ;;  %v9702_v1 = vor.u32 %v11244_v9, %v9701_v62  ;;  %14310 = vst [vmem:[#allocation68_spill] sm:$0xff] %v12620_v18  ;;  %v9542_v62 = vor.u32 %v11204_v44, %v9541_v50  ;;  %v14312_v9 = vmov 0   ;;  %v11164_v26 = vld [vmem:[#allocation7 + $0x614] sm:$0xf0]  ;;  %v10333_v52 = vld [vmem:[#allocation9 + $0x350] sm:$0xf] }
 0x25a   :  { %4321 = vmatpush.bf16.msrb.mxu0 %v8726_v20  ;;  %v11184_v20 = vld [vmem:[#allocation7 + $0x6bc] sm:$0xf]  ;;  %v12632_v24 = vor.u32 %v11399_v32, %v10333_v52  ;;  %v10045_v44 = vld [vmem:[#allocation9 + $0x110] sm:$0xf] }
 0x25b   :  { %5320 = vmatpush.bf16.msrb.mxu2 %v12578_v2  ;;  %v9546_v48 = vor.u32 %v11184_v20, %v9543_v35  ;;  %v9383_v54 = vld [vmem:[#allocation7 + $0x618] sm:$0xf0]  ;;  %v11124_v35 = vld [vmem:[#allocation7 + $0x4d4] sm:$0xf0]  ;;  %v11418_v29 = vld [vmem:[#allocation12 + $0x8] sm:$0xff] }
 0x25c   :  { %14314 = vst [vmem:[#allocation71_spill] sm:$0xff] %v12632_v24  ;;  %v10151_v30 = vld [vmem:[#allocation9 + $0x1f8] sm:$0xf0] }
 0x25d   :  { %5333 = vmatpush.bf16.msrb.mxu3 %v12581_v53  ;;  %4334 = vmatpush.bf16.msrb.mxu1 %v8730_v25  ;;  %v9381_v25 = vld [vmem:[#allocation7 + $0x578] sm:$0xf]  ;;  %v4247_v10 = vpop.f32.mrf.mxu2  ;;  %v11347_v53 = vld [vmem:[#allocation9 + $0x1d4] sm:$0xf] }
 0x25e   :  { %4366 = vmatpush.bf16.msra.mxu0 %v9862_v61  ;;  %v12623_v61 = vor.u32 %v11407_v27, %v10365_v7  ;;  %v12629_v27 = vor.u32 %v11335_v59, %v10077_v46  ;;  %v9382_v50 = vor.u32 %v11164_v26, %v9381_v25  ;;  %v11327_v7 = vld [vmem:[#allocation9 + $0x12c] sm:$0xf0]  ;;  %v9061_v25 = vld [vmem:[#allocation7 + $0x2f8] sm:$0xf] }
 0x25f   :  { %5321 = vmatpush.bf16.msrb.mxu2 %v12586_v15  ;;  %4322 = vmatmul.bf16.vlgmr.msrb.gmra.mxu0 %v12615_v31  ;;  %v10301_v10 = vld [vmem:[#allocation9 + $0x310] sm:$0xf]  ;;  %v12635_v46 = vor.u32 %v11327_v7, %v10045_v44  ;;  %v10167_v15 = vld [vmem:[#allocation9 + $0x228] sm:$0xf0] }
 0x260   :  { %14311 = vst [vmem:[#allocation69_spill] sm:$0xff] %v12623_v61  ;;  %4335 = vmatmul.bf16.vlgmr.msrb.gmra.mxu1 %v12615_v31  ;;  %v10013_v59 = vld [vmem:[#allocation9 + $0xd0] sm:$0xf] }
 0x261   :  { %5334 = vmatpush.bf16.msrb.mxu3 %v12589_v38  ;;  %4379 = vmatpush.bf16.msra.mxu1 %v9866_v3  ;;  %v4260_v3 = vpop.f32.mrf.mxu3  ;;  %14313 = vst [vmem:[#allocation70_spill] sm:$0xff] %v12629_v27  ;;  %v10269_v44 = vld [vmem:[#allocation9 + $0x2d0] sm:$0xf]  ;;  %v11416_v38 = vld [vmem:[#allocation9 + $0x3f4] sm:$0xf0] }
 0x262   :  { %4367 = vmatpush.bf16.msra.mxu0 %v9702_v1  ;;  %v11144_v1 = vld [vmem:[#allocation7 + $0x57c] sm:$0xf]  ;;  %v11391_v3 = vld [vmem:[#allocation9 + $0x32c] sm:$0xf0]  ;;  %14315 = vst [vmem:[#allocation72_spill] sm:$0xff] %v12635_v46 }
 0x263   :  { %5322 = vmatpush.bf16.msrb.mxu2 %v12592_v36  ;;  %v9386_v20 = vor.u32 %v11144_v1, %v9383_v54  ;;  %v12640_v52 = vor.u32 %v11391_v3, %v10301_v10  ;;  %v11383_v7 = vld [vmem:[#allocation9 + $0x2ec] sm:$0xf0]  ;;  %v8901_v3 = vld [vmem:[#allocation7 + $0x1b8] sm:$0xf] }
 0x264   :  { %v12652_v10 = vor.u32 %v11383_v7, %v10269_v44  ;;  %v11004_v44 = vld [vmem:[#allocation7 + $0x114] sm:$0xf0] }
 0x265   :  { %5335 = vmatpush.bf16.msrb.mxu3 %v12595_v60  ;;  %4380 = vmatpush.bf16.msra.mxu1 %v9706_v0  ;;  %v9221_v0 = vld [vmem:[#allocation7 + $0x438] sm:$0xf]  ;;  %14317 = vst [vmem:[#allocation74_spill] sm:$0xff] %v12640_v52  ;;  %v12642_v26 = vpop.f32.mrf.mxu2  ;;  %v11246_v60 = vld [vmem:[#allocation7 + $0x8a4] sm:$0xf0] }
 0x266   :  { %4368 = vmatpush.bf16.msra.mxu0 %v9542_v62  ;;  %v12637_v62 = vpop.f32.mrf.mxu0  ;;  %v9222_v32 = vor.u32 %v11124_v35, %v9221_v0  ;;  %14318 = vst [vmem:[#allocation75_spill] sm:$0xff] %v12642_v26  ;;  %v12649_v0 = vpop.f32.mrf.mxu1  ;;  %v10237_v26 = vld [vmem:[#allocation9 + $0x290] sm:$0xf]  ;;  %v10405_v36 = vld [vmem:[#allocation9 + $0x3d8] sm:$0xf] }
 0x267   :  { %5323 = vmatpush.bf16.msrb.mxu2 %v12602_v51  ;;  %14316 = vst [vmem:[#allocation73_spill] sm:$0xff] %v12637_v62  ;;  %v9063_v62 = vld [vmem:[#allocation7 + $0x398] sm:$0xf0]  ;;  %v9717_v51 = vld [vmem:[#allocation7 + $0x808] sm:$0xf] }
 0x268   :  { %14321 = vst [vmem:[#allocation78_spill] sm:$0xff] %v12649_v0 }
 0x269   :  { %5336 = vmatpush.bf16.msrb.mxu3 %v12605_v11  ;;  %4381 = vmatpush.bf16.msra.mxu1 %v9546_v48  ;;  %v11319_v48 = vld [vmem:[#allocation9 + $0xec] sm:$0xf0]  ;;  %v12644_v1 = vpop.f32.mrf.mxu3  ;;  %14322 = vst [vmem:[#allocation79_spill] sm:$0xff] %v12652_v10 }
 0x26a   :  { %5324 = vmatmul.bf16.vlgmr.msrb.gmra.mxu2 %v14312_v9  ;;  %4369 = vmatpush.bf16.msra.mxu0 %v9382_v50  ;;  %14319 = vst [vmem:[#allocation76_spill] sm:$0xff] %v12644_v1  ;;  %v12647_v50 = vor.u32 %v11319_v48, %v10013_v59  ;;  %v11044_v1 = vld [vmem:[#allocation7 + $0x254] sm:$0xf0]  ;;  %v10205_v11 = vld [vmem:[#allocation9 + $0x250] sm:$0xf] }
 0x26b   :  { %5368 = vmatpush.bf16.msra.mxu2 %v12607_v39  ;;  %v11286_v39 = vld [vmem:[#allocation7 + $0x9e4] sm:$0xf0] }
 0x26c   :  { %5337 = vmatmul.bf16.vlgmr.msrb.gmra.mxu3 %v14312_v9  ;;  %14320 = vst [vmem:[#allocation77_spill] sm:$0xff] %v12647_v50 }
 0x26d   :  { %5381 = vmatpush.bf16.msra.mxu3 %v12609_v23  ;;  %v11104_v23 = vld [vmem:[#allocation7 + $0x43c] sm:$0xf]  ;;  %4382 = vmatpush.bf16.msra.mxu1 %v9386_v20  ;;  %v9981_v20 = vld [vmem:[#allocation9 + $0x90] sm:$0xf] }
 0x26e   :  { %v9226_v54 = vor.u32 %v11104_v23, %v9223_v49  ;;  %4370 = vmatpush.bf16.msra.mxu0 %v9222_v32  ;;  %v11311_v49 = vld [vmem:[#allocation9 + $0xac] sm:$0xf0]  ;;  %v8741_v32 = vld [vmem:[#allocation7 + $0x78] sm:$0xf]  ;;  %v4117_v48 = vpop.f32.mrf.mxu0 }
 0x26f   :  { %5369 = vmatpush.bf16.msra.mxu2 %v12620_v18  ;;  %v11024_v18 = vld [vmem:[#allocation7 + $0x1bc] sm:$0xf]  ;;  %v12655_v59 = vor.u32 %v11311_v49, %v9981_v20  ;;  %v9877_v49 = vld [vmem:[#allocation7 + $0x948] sm:$0xf]  ;;  %v8742_v48 = vor.u32 %v11004_v44, %v8741_v32  ;;  %v11226_v32 = vld [vmem:[#allocation7 + $0x80c] sm:$0xf]  ;;  %v9718_v44 = vor.u32 %v11246_v60, %v9717_v51 }
 0x270   :  { %v8743_v20 = vld [vmem:[#allocation7 + $0x118] sm:$0xf0]  ;;  %v9397_v51 = vld [vmem:[#allocation7 + $0x588] sm:$0xf] }
 0x271   :  { %5382 = vmatpush.bf16.msra.mxu3 %v12623_v61  ;;  %v11084_v61 = vld [vmem:[#allocation7 + $0x394] sm:$0xf0]  ;;  %4383 = vmatpush.bf16.msra.mxu1 %v9226_v54  ;;  %14323 = vst [vmem:[#allocation80_spill] sm:$0xff] %v12655_v59  ;;  %v9949_v54 = vld [vmem:[#allocation9 + $0x50] sm:$0xf]  ;;  %v4312_v7 = vpop.f32.mrf.mxu3 }
 0x272   :  { %v9062_v35 = vor.u32 %v11084_v61, %v9061_v25  ;;  %v8902_v61 = vor.u32 %v11044_v1, %v8901_v3  ;;  %v11266_v1 = vld [vmem:[#allocation7 + $0x94c] sm:$0xf]  ;;  %v4130_v3 = vpop.f32.mrf.mxu1 }
 0x273   :  { %5370 = vmatpush.bf16.msra.mxu2 %v12629_v27  ;;  %v11064_v27 = vld [vmem:[#allocation7 + $0x2fc] sm:$0xf]  ;;  %v11206_v3 = vld [vmem:[#allocation7 + $0x764] sm:$0xf0] }
 0x274   :  { %v9066_v23 = vor.u32 %v11064_v27, %v9063_v62  ;;  %4371 = vmatpush.bf16.msra.mxu0 %v9062_v35  ;;  %v11303_v27 = vld [vmem:[#allocation9 + $0x6c] sm:$0xf0]  ;;  %v4299_v62 = vpop.f32.mrf.mxu2 }
 0x275   :  { %5383 = vmatpush.bf16.msra.mxu3 %v12632_v24  ;;  %v11375_v24 = vld [vmem:[#allocation9 + $0x2ac] sm:$0xf0]  ;;  %v12661_v35 = vor.u32 %v11303_v27, %v9949_v54  ;;  %v11352_v54 = vld [vmem:[#allocation9 + $0x1f4] sm:$0xf0] }
 0x276   :  { %v12658_v25 = vor.u32 %v11375_v24, %v10237_v26  ;;  %4384 = vmatpush.bf16.msra.mxu1 %v9066_v23  ;;  %v9879_v24 = vld [vmem:[#allocation7 + $0x9e8] sm:$0xf0]  ;;  %v9917_v26 = vld [vmem:[#allocation9 + $0x10] sm:$0xf] }
 0x277   :  { %5371 = vmatpush.bf16.msra.mxu2 %v12635_v46  ;;  %v8903_v46 = vld [vmem:[#allocation7 + $0x258] sm:$0xf0]  ;;  %14325 = vst [vmem:[#allocation82_spill] sm:$0xff] %v12661_v35  ;;  %v11359_v62 = vld [vmem:[#allocation9 + $0x22c] sm:$0xf0]  ;;  %v9882_v27 = vor.u32 %v11266_v1, %v9879_v24 }
 0x278   :  { %14324 = vst [vmem:[#allocation81_spill] sm:$0xff] %v12658_v25  ;;  %v8906_v0 = vor.u32 %v11024_v18, %v8903_v46  ;;  %4372 = vmatpush.bf16.msra.mxu0 %v8902_v61  ;;  %v11295_v18 = vld [vmem:[#allocation9 + $0x2c] sm:$0xf0]  ;;  %v10117_v1 = vld [vmem:[#allocation9 + $0x198] sm:$0xf] }
 0x279   :  { %5384 = vmatpush.bf16.msra.mxu3 %v12640_v52  ;;  %v10984_v52 = vld [vmem:[#allocation7 + $0x7c] sm:$0xf]  ;;  %v10173_v46 = vld [vmem:[#allocation9 + $0x210] sm:$0xf]  ;;  %v12667_v61 = vor.u32 %v11295_v18, %v9917_v26  ;;  %v11344_v24 = vld [vmem:[#allocation9 + $0x1b4] sm:$0xf0] }
 0x27a   :  { %4385 = vmatpush.bf16.msra.mxu1 %v8906_v0  ;;  %v8746_v7 = vor.u32 %v10984_v52, %v8743_v20  ;;  %v12676_v0 = vpop.f32.mrf.mxu3  ;;  %v12678_v20 = vor.u32 %v11416_v38, %v10405_v36  ;;  %v11408_v18 = vld [vmem:[#allocation9 + $0x3b4] sm:$0xf0]  ;;  %v12684_v38 = vor.u32 %v11344_v24, %v10117_v1  ;;  %v9399_v1 = vld [vmem:[#allocation7 + $0x628] sm:$0xf0] }
 0x27b   :  { %5372 = vmatpush.bf16.msra.mxu2 %v12647_v50  ;;  %v11367_v50 = vld [vmem:[#allocation9 + $0x26c] sm:$0xf0]  ;;  %14327 = vst [vmem:[#allocation84_spill] sm:$0xff] %v12667_v61 }
 0x27c   :  { %v12664_v23 = vor.u32 %v11367_v50, %v10205_v11  ;;  %v9719_v11 = vld [vmem:[#allocation7 + $0x8a8] sm:$0xf0]  ;;  %4373 = vmatpush.bf16.msra.mxu0 %v8742_v48  ;;  %v12670_v50 = vor.u32 %v11359_v62, %v10173_v46  ;;  %14331 = vst [vmem:[#allocation88_spill] sm:$0xff] %v12676_v0  ;;  %v10373_v48 = vld [vmem:[#allocation9 + $0x398] sm:$0xf] }
 0x27d   :  { %5385 = vmatpush.bf16.msra.mxu3 %v12652_v10  ;;  %v9878_v10 = vor.u32 %v11286_v39, %v9877_v49  ;;  %v12674_v39 = vpop.f32.mrf.mxu2  ;;  %14332 = vst [vmem:[#allocation89_spill] sm:$0xff] %v12678_v20  ;;  %v9557_v49 = vld [vmem:[#allocation7 + $0x6c8] sm:$0xf]  ;;  %v9722_v26 = vor.u32 %v11226_v32, %v9719_v11  ;;  %v9559_v46 = vld [vmem:[#allocation7 + $0x768] sm:$0xf0]  ;;  %v12687_v60 = vor.u32 %v11408_v18, %v10373_v48 }
 0x27e   :  { %14326 = vst [vmem:[#allocation83_spill] sm:$0xff] %v12664_v23  ;;  %4386 = vmatpush.bf16.msra.mxu1 %v8746_v7  ;;  %v9558_v36 = vor.u32 %v11206_v3, %v9557_v49  ;;  %v11336_v62 = vld [vmem:[#allocation9 + $0x174] sm:$0xf0]  ;;  %v11146_v11 = vld [vmem:[#allocation7 + $0x58c] sm:$0xf] }
 0x27f   :  { %5373 = vmatpush.bf16.msra.mxu2 %v12655_v59  ;;  %v10149_v59 = vld [vmem:[#allocation9 + $0x1d8] sm:$0xf]  ;;  %14328 = vst [vmem:[#allocation85_spill] sm:$0xff] %v12670_v50  ;;  %4374 = vmatmul.bf16.vlgmr.msra.gmra.mxu0 %v12615_v31  ;;  %v9237_v48 = vld [vmem:[#allocation7 + $0x448] sm:$0xf] }
 0x280   :  { %v12672_v52 = vor.u32 %v11352_v54, %v10149_v59  ;;  %14330 = vst [vmem:[#allocation87_spill] sm:$0xff] %v12674_v39  ;;  %4418 = vmatpush.bf16.msrb.mxu0 %v9878_v10  ;;  %v11186_v59 = vld [vmem:[#allocation7 + $0x6cc] sm:$0xf]  ;;  %v10085_v10 = vld [vmem:[#allocation9 + $0x158] sm:$0xf] }
 0x281   :  { %5386 = vmatpush.bf16.msra.mxu3 %v12658_v25  ;;  %14333 = vst [vmem:[#allocation90_spill] sm:$0xff] %v12684_v38  ;;  %v9562_v7 = vor.u32 %v11186_v59, %v9559_v46  ;;  %v11166_v54 = vld [vmem:[#allocation7 + $0x624] sm:$0xf0]  ;;  %v11400_v32 = vld [vmem:[#allocation9 + $0x374] sm:$0xf0]  ;;  %4387 = vmatmul.bf16.vlgmr.msra.gmra.mxu1 %v12615_v31  ;;  %v9402_v46 = vor.u32 %v11146_v11, %v9399_v1 }
 0x282   :  { %14329 = vst [vmem:[#allocation86_spill] sm:$0xff] %v12672_v52  ;;  %4431 = vmatpush.bf16.msrb.mxu1 %v9882_v27  ;;  %v10341_v27 = vld [vmem:[#allocation9 + $0x358] sm:$0xf]  ;;  %v4364_v24 = vpop.f32.mrf.mxu3  ;;  %v11126_v0 = vld [vmem:[#allocation7 + $0x4e4] sm:$0xf0] }
 0x283   :  { %5374 = vmatpush.bf16.msra.mxu2 %v12661_v35  ;;  %14334 = vst [vmem:[#allocation91_spill] sm:$0xff] %v12687_v60  ;;  %v12696_v3 = vor.u32 %v11400_v32, %v10341_v27  ;;  %v10053_v18 = vld [vmem:[#allocation9 + $0x118] sm:$0xf]  ;;  %v11086_v11 = vld [vmem:[#allocation7 + $0x3a4] sm:$0xf0] }
 0x284   :  { %4419 = vmatpush.bf16.msrb.mxu0 %v9718_v44  ;;  %v12693_v44 = vor.u32 %v11336_v62, %v10085_v10  ;;  %v11328_v59 = vld [vmem:[#allocation9 + $0x134] sm:$0xf0]  ;;  %v11066_v24 = vld [vmem:[#allocation7 + $0x30c] sm:$0xf] }
 0x285   :  { %5387 = vmatpush.bf16.msra.mxu3 %v12664_v23  ;;  %v4351_v49 = vpop.f32.mrf.mxu2  ;;  %14336 = vst [vmem:[#allocation93_spill] sm:$0xff] %v12696_v3  ;;  %v10309_v39 = vld [vmem:[#allocation9 + $0x318] sm:$0xf]  ;;  %v9239_v23 = vld [vmem:[#allocation7 + $0x4e8] sm:$0xf0]  ;;  %v12699_v10 = vor.u32 %v11328_v59, %v10053_v18 }
 0x286   :  { %4432 = vmatpush.bf16.msrb.mxu1 %v9722_v26  ;;  %14335 = vst [vmem:[#allocation92_spill] sm:$0xff] %v12693_v44  ;;  %v9398_v26 = vor.u32 %v11166_v54, %v9397_v51  ;;  %v9238_v51 = vor.u32 %v11126_v0, %v9237_v48  ;;  %v9077_v54 = vld [vmem:[#allocation7 + $0x308] sm:$0xf]  ;;  %v11320_v27 = vld [vmem:[#allocation9 + $0xf4] sm:$0xf0] }
 0x287   :  { %5375 = vmatpush.bf16.msra.mxu2 %v12667_v61  ;;  %14337 = vst [vmem:[#allocation94_spill] sm:$0xff] %v12699_v10  ;;  %v10277_v1 = vld [vmem:[#allocation9 + $0x2d8] sm:$0xf]  ;;  %v11046_v59 = vld [vmem:[#allocation7 + $0x264] sm:$0xf0] }
 0x288   :  { %4420 = vmatpush.bf16.msrb.mxu0 %v9558_v36  ;;  %v12701_v36 = vpop.f32.mrf.mxu0  ;;  %v11384_v49 = vld [vmem:[#allocation9 + $0x2f4] sm:$0xf0]  ;;  %v8919_v25 = vld [vmem:[#allocation7 + $0x268] sm:$0xf0] }
 0x289   :  { %5388 = vmatpush.bf16.msra.mxu3 %v12670_v50  ;;  %v11106_v50 = vld [vmem:[#allocation7 + $0x44c] sm:$0xf]  ;;  %14338 = vst [vmem:[#allocation95_spill] sm:$0xff] %v12701_v36  ;;  %v12712_v0 = vor.u32 %v11384_v49, %v10277_v1  ;;  %v9989_v48 = vld [vmem:[#allocation9 + $0x98] sm:$0xf] }
 0x28a   :  { %5376 = vmatmul.bf16.vlgmr.msra.gmra.mxu2 %v14312_v9  ;;  %4433 = vmatpush.bf16.msrb.mxu1 %v9562_v7  ;;  %v10021_v7 = vld [vmem:[#allocation9 + $0xd8] sm:$0xf]  ;;  %v9242_v32 = vor.u32 %v11106_v50, %v9239_v23  ;;  %v11006_v1 = vld [vmem:[#allocation7 + $0x124] sm:$0xf0] }
 0x28b   :  { %5420 = vmatpush.bf16.msrb.mxu2 %v12672_v52  ;;  %v12707_v18 = vor.u32 %v11320_v27, %v10021_v7  ;;  %14342 = vst [vmem:[#allocation99_spill] sm:$0xff] %v12712_v0  ;;  %v11312_v23 = vld [vmem:[#allocation9 + $0xb4] sm:$0xf0] }
 0x28c   :  { %5389 = vmatmul.bf16.vlgmr.msra.gmra.mxu3 %v14312_v9  ;;  %4421 = vmatpush.bf16.msrb.mxu0 %v9398_v26  ;;  %v12709_v26 = vpop.f32.mrf.mxu1  ;;  %v11376_v36 = vld [vmem:[#allocation9 + $0x2b4] sm:$0xf0]  ;;  %v12715_v7 = vor.u32 %v11312_v23, %v9989_v48  ;;  %v8759_v23 = vld [vmem:[#allocation7 + $0x128] sm:$0xf0] }
 0x28d   :  { %5433 = vmatpush.bf16.msrb.mxu3 %v12678_v20  ;;  %v11392_v20 = vld [vmem:[#allocation9 + $0x334] sm:$0xf0]  ;;  %14340 = vst [vmem:[#allocation97_spill] sm:$0xff] %v12707_v18  ;;  %v12720_v49 = vpop.f32.mrf.mxu2 }
 0x28e   :  { %v12704_v62 = vor.u32 %v11392_v20, %v10309_v39  ;;  %4434 = vmatpush.bf16.msrb.mxu1 %v9402_v46  ;;  %14341 = vst [vmem:[#allocation98_spill] sm:$0xff] %v12709_v26  ;;  %v9078_v39 = vor.u32 %v11086_v11, %v9077_v54  ;;  %v8917_v20 = vld [vmem:[#allocation7 + $0x1c8] sm:$0xf]  ;;  %v10245_v46 = vld [vmem:[#allocation9 + $0x298] sm:$0xf] }
 0x28f   :  { %5421 = vmatpush.bf16.msrb.mxu2 %v12684_v38  ;;  %14343 = vst [vmem:[#allocation100_spill] sm:$0xff] %v12715_v7  ;;  %v8918_v54 = vor.u32 %v11046_v59, %v8917_v20  ;;  %v12718_v11 = vor.u32 %v11376_v36, %v10245_v46  ;;  %v10986_v26 = vld [vmem:[#allocation7 + $0x8c] sm:$0xf]  ;;  %v12722_v48 = vpop.f32.mrf.mxu3  ;;  %v11268_v36 = vld [vmem:[#allocation7 + $0x95c] sm:$0xf] }
 0x290   :  { %14339 = vst [vmem:[#allocation96_spill] sm:$0xff] %v12704_v62  ;;  %4422 = vmatpush.bf16.msrb.mxu0 %v9238_v51  ;;  %v8757_v51 = vld [vmem:[#allocation7 + $0x88] sm:$0xf]  ;;  %v4169_v27 = vpop.f32.mrf.mxu0  ;;  %v9895_v59 = vld [vmem:[#allocation7 + $0x9f8] sm:$0xf0] }
 0x291   :  { %5434 = vmatpush.bf16.msrb.mxu3 %v12687_v60  ;;  %v9079_v60 = vld [vmem:[#allocation7 + $0x3a8] sm:$0xf0]  ;;  %14344 = vst [vmem:[#allocation101_spill] sm:$0xff] %v12718_v11  ;;  %v9893_v27 = vld [vmem:[#allocation7 + $0x958] sm:$0xf]  ;;  %v9898_v38 = vor.u32 %v11268_v36, %v9895_v59 }
 0x292   :  { %4435 = vmatpush.bf16.msrb.mxu1 %v9242_v32  ;;  %v9082_v50 = vor.u32 %v11066_v24, %v9079_v60  ;;  %v9957_v32 = vld [vmem:[#allocation9 + $0x58] sm:$0xf]  ;;  %14345 = vst [vmem:[#allocation102_spill] sm:$0xff] %v12720_v49 }
 0x293   :  { %5422 = vmatpush.bf16.msrb.mxu2 %v12693_v44  ;;  %v11304_v60 = vld [vmem:[#allocation9 + $0x74] sm:$0xf0]  ;;  %14346 = vst [vmem:[#allocation103_spill] sm:$0xff] %v12722_v48  ;;  %v8762_v48 = vor.u32 %v10986_v26, %v8759_v23 }
 0x294   :  { %4423 = vmatpush.bf16.msrb.mxu0 %v9078_v39  ;;  %v11288_v39 = vld [vmem:[#allocation7 + $0x9f4] sm:$0xf0]  ;;  %v12725_v20 = vor.u32 %v11304_v60, %v9957_v32  ;;  %v4182_v46 = vpop.f32.mrf.mxu1 }
 0x295   :  { %5435 = vmatpush.bf16.msrb.mxu3 %v12696_v3  ;;  %v11026_v3 = vld [vmem:[#allocation7 + $0x1cc] sm:$0xf]  ;;  %v11296_v49 = vld [vmem:[#allocation9 + $0x34] sm:$0xf0]  ;;  %v9735_v46 = vld [vmem:[#allocation7 + $0x8b8] sm:$0xf0] }
 0x296   :  { %4436 = vmatpush.bf16.msrb.mxu1 %v9082_v50  ;;  %v8922_v24 = vor.u32 %v11026_v3, %v8919_v25  ;;  %14347 = vst [vmem:[#allocation104_spill] sm:$0xff] %v12725_v20  ;;  %v8758_v50 = vor.u32 %v11006_v1, %v8757_v51  ;;  %v9925_v3 = vld [vmem:[#allocation9 + $0x18] sm:$0xf] }
 0x297   :  { %5423 = vmatpush.bf16.msrb.mxu2 %v12699_v10  ;;  %v10181_v10 = vld [vmem:[#allocation9 + $0x218] sm:$0xf]  ;;  %v12731_v60 = vor.u32 %v11296_v49, %v9925_v3  ;;  %v4416_v51 = vpop.f32.mrf.mxu3  ;;  %v11188_v49 = vld [vmem:[#allocation7 + $0x6dc] sm:$0xf] }
 0x298   :  { %4424 = vmatpush.bf16.msrb.mxu0 %v8918_v54  ;;  %v11360_v44 = vld [vmem:[#allocation9 + $0x234] sm:$0xf0]  ;;  %v11228_v54 = vld [vmem:[#allocation7 + $0x81c] sm:$0xf] }
 0x299   :  { %5436 = vmatpush.bf16.msrb.mxu3 %v12704_v62  ;;  %v10213_v62 = vld [vmem:[#allocation9 + $0x258] sm:$0xf]  ;;  %14349 = vst [vmem:[#allocation106_spill] sm:$0xff] %v12731_v60  ;;  %v9738_v1 = vor.u32 %v11228_v54, %v9735_v46  ;;  %v11108_v3 = vld [vmem:[#allocation7 + $0x45c] sm:$0xf] }
 0x29a   :  { %4437 = vmatpush.bf16.msrb.mxu1 %v8922_v24  ;;  %v11248_v32 = vld [vmem:[#allocation7 + $0x8b4] sm:$0xf0] }
 0x29b   :  { %5424 = vmatpush.bf16.msrb.mxu2 %v12707_v18  ;;  %v11368_v18 = vld [vmem:[#allocation9 + $0x274] sm:$0xf0] }
 0x29c   :  { %v12728_v25 = vor.u32 %v11368_v18, %v10213_v62  ;;  %4425 = vmatpush.bf16.msrb.mxu0 %v8758_v50  ;;  %v12734_v62 = vor.u32 %v11360_v44, %v10181_v10  ;;  %v4403_v18 = vpop.f32.mrf.mxu2  ;;  %v9573_v24 = vld [vmem:[#allocation7 + $0x6d8] sm:$0xf]  ;;  %v12742_v54 = vpop.f32.mrf.mxu0 }
 0x29d   :  { %5437 = vmatpush.bf16.msrb.mxu3 %v12712_v0  ;;  %v9894_v0 = vor.u32 %v11288_v39, %v9893_v27  ;;  %v11208_v23 = vld [vmem:[#allocation7 + $0x774] sm:$0xf0]  ;;  %v9575_v27 = vld [vmem:[#allocation7 + $0x778] sm:$0xf0]  ;;  %14351 = vst [vmem:[#allocation108_spill] sm:$0xff] %v12742_v54 }
 0x29e   :  { %14348 = vst [vmem:[#allocation105_spill] sm:$0xff] %v12728_v25  ;;  %4438 = vmatpush.bf16.msrb.mxu1 %v8762_v48  ;;  %v9574_v44 = vor.u32 %v11208_v23, %v9573_v24  ;;  %v9578_v10 = vor.u32 %v11188_v49, %v9575_v27  ;;  %v9415_v48 = vld [vmem:[#allocation7 + $0x638] sm:$0xf0]  ;;  %v9253_v59 = vld [vmem:[#allocation7 + $0x458] sm:$0xf]  ;;  %v12744_v23 = vpop.f32.mrf.mxu1 }
 0x29f   :  { %5425 = vmatpush.bf16.msrb.mxu2 %v12715_v7  ;;  %v9733_v7 = vld [vmem:[#allocation7 + $0x818] sm:$0xf]  ;;  %14350 = vst [vmem:[#allocation107_spill] sm:$0xff] %v12734_v62  ;;  %4426 = vmatmul.bf16.vlgmr.msrb.gmra.mxu0 %v12615_v31  ;;  %v9095_v24 = vld [vmem:[#allocation7 + $0x3b8] sm:$0xf0] }
 0x2a0   :  { %4470 = vmatpush.bf16.msra.mxu0 %v9894_v0  ;;  %v9734_v26 = vor.u32 %v11248_v32, %v9733_v7  ;;  %v11168_v0 = vld [vmem:[#allocation7 + $0x634] sm:$0xf0]  ;;  %v11148_v7 = vld [vmem:[#allocation7 + $0x59c] sm:$0xf]  ;;  %14352 = vst [vmem:[#allocation109_spill] sm:$0xff] %v12744_v23 }
 0x2a1   :  { %5438 = vmatpush.bf16.msrb.mxu3 %v12718_v11  ;;  %4439 = vmatmul.bf16.vlgmr.msrb.gmra.mxu1 %v12615_v31  ;;  %v9418_v36 = vor.u32 %v11148_v7, %v9415_v48  ;;  %v11128_v50 = vld [vmem:[#allocation7 + $0x4f4] sm:$0xf0]  ;;  %v9255_v32 = vld [vmem:[#allocation7 + $0x4f8] sm:$0xf0]  ;;  %v10191_v54 = vld [vmem:[#allocation9 + $0x260] sm:$0xf0] }
 0x2a2   :  { %4483 = vmatpush.bf16.msra.mxu1 %v9898_v38  ;;  %v9413_v38 = vld [vmem:[#allocation7 + $0x598] sm:$0xf]  ;;  %v9254_v46 = vor.u32 %v11128_v50, %v9253_v59  ;;  %v9258_v18 = vor.u32 %v11108_v3, %v9255_v32  ;;  %v10988_v3 = vld [vmem:[#allocation7 + $0x9c] sm:$0xf]  ;;  %v11353_v11 = vld [vmem:[#allocation9 + $0x204] sm:$0xf] }
 0x2a3   :  { %5426 = vmatpush.bf16.msrb.mxu2 %v12725_v20  ;;  %v9414_v39 = vor.u32 %v11168_v0, %v9413_v38  ;;  %v11088_v51 = vld [vmem:[#allocation7 + $0x3b4] sm:$0xf0]  ;;  %v11028_v38 = vld [vmem:[#allocation7 + $0x1dc] sm:$0xf]  ;;  %v10135_v20 = vld [vmem:[#allocation9 + $0x1e8] sm:$0xf0] }
 0x2a4   :  { %4471 = vmatpush.bf16.msra.mxu0 %v9734_v26  ;;  %v9093_v26 = vld [vmem:[#allocation7 + $0x318] sm:$0xf]  ;;  %v8935_v0 = vld [vmem:[#allocation7 + $0x278] sm:$0xf0]  ;;  %v4221_v7 = vpop.f32.mrf.mxu0 }
 0x2a5   :  { %5439 = vmatpush.bf16.msrb.mxu3 %v12728_v25  ;;  %v9094_v49 = vor.u32 %v11088_v51, %v9093_v26  ;;  %v8773_v59 = vld [vmem:[#allocation7 + $0x98] sm:$0xf]  ;;  %v11345_v26 = vld [vmem:[#allocation9 + $0x1c4] sm:$0xf] }
 0x2a6   :  { %4484 = vmatpush.bf16.msra.mxu1 %v9738_v1  ;;  %v11068_v1 = vld [vmem:[#allocation7 + $0x31c] sm:$0xf]  ;;  %v11008_v50 = vld [vmem:[#allocation7 + $0x134] sm:$0xf0]  ;;  %v11409_v51 = vld [vmem:[#allocation9 + $0x3c4] sm:$0xf] }
 0x2a7   :  { %5427 = vmatpush.bf16.msrb.mxu2 %v12731_v60  ;;  %v9098_v27 = vor.u32 %v11068_v1, %v9095_v24  ;;  %v10383_v1 = vld [vmem:[#allocation9 + $0x3e0] sm:$0xf0]  ;;  %v4234_v24 = vpop.f32.mrf.mxu1  ;;  %v8774_v23 = vor.u32 %v11008_v50, %v8773_v59 }
 0x2a8   :  { %4472 = vmatpush.bf16.msra.mxu0 %v9574_v44  ;;  %v8933_v44 = vld [vmem:[#allocation7 + $0x1d8] sm:$0xf]  ;;  %v10351_v7 = vld [vmem:[#allocation9 + $0x3a0] sm:$0xf0] }
 0x2a9   :  { %5440 = vmatpush.bf16.msrb.mxu3 %v12734_v62  ;;  %v10063_v59 = vld [vmem:[#allocation9 + $0x160] sm:$0xf0] }
 0x2aa   :  { %5428 = vmatmul.bf16.vlgmr.msrb.gmra.mxu2 %v14312_v9  ;;  %4485 = vmatpush.bf16.msra.mxu1 %v9578_v10  ;;  %v11048_v10 = vld [vmem:[#allocation7 + $0x274] sm:$0xf0]  ;;  %v11393_v50 = vld [vmem:[#allocation9 + $0x344] sm:$0xf] }
 0x2ab   :  { %v8934_v48 = vor.u32 %v11048_v10, %v8933_v44  ;;  %v12752_v10 = vor.u32 %v11409_v51, %v10383_v1  ;;  %v10287_v51 = vld [vmem:[#allocation9 + $0x320] sm:$0xf0] }
 0x2ac   :  { %5441 = vmatmul.bf16.vlgmr.msrb.gmra.mxu3 %v14312_v9  ;;  %4473 = vmatpush.bf16.msra.mxu0 %v9414_v39  ;;  %v10159_v60 = vld [vmem:[#allocation9 + $0x220] sm:$0xf0] }
 0x2ad   :  { %v12746_v39 = vpop.f32.mrf.mxu2  ;;  %14356 = vst [vmem:[#allocation113_spill] sm:$0xff] %v12752_v10 }
 0x2ae   :  { %4486 = vmatpush.bf16.msra.mxu1 %v9418_v36  ;;  %14353 = vst [vmem:[#allocation110_spill] sm:$0xff] %v12746_v39  ;;  %v8938_v36 = vor.u32 %v11028_v38, %v8935_v0  ;;  %v10095_v38 = vld [vmem:[#allocation9 + $0x1a0] sm:$0xf0] }
 0x2af   :  { %v12748_v32 = vpop.f32.mrf.mxu3  ;;  %v11401_v0 = vld [vmem:[#allocation9 + $0x384] sm:$0xf] }
 0x2b0   :  { %4474 = vmatpush.bf16.msra.mxu0 %v9254_v46  ;;  %14354 = vst [vmem:[#allocation111_spill] sm:$0xff] %v12748_v32  ;;  %v8775_v46 = vld [vmem:[#allocation7 + $0x138] sm:$0xf0] }
 0x2b2   :  { %4487 = vmatpush.bf16.msra.mxu1 %v9258_v18  ;;  %v10127_v18 = vld [vmem:[#allocation9 + $0x1e0] sm:$0xf0] }
 0x2b3   :  { %v12750_v44 = vor.u32 %v11345_v26, %v10127_v18  ;;  %v10031_v26 = vld [vmem:[#allocation9 + $0x120] sm:$0xf0] }
 0x2b4   :  { %4475 = vmatpush.bf16.msra.mxu0 %v9094_v49  ;;  %v8778_v49 = vor.u32 %v10988_v3, %v8775_v46  ;;  %v10319_v3 = vld [vmem:[#allocation9 + $0x360] sm:$0xf0] }
 0x2b5   :  { %14355 = vst [vmem:[#allocation112_spill] sm:$0xff] %v12750_v44  ;;  %v4455_v32 = vpop.f32.mrf.mxu2  ;;  %v11321_v46 = vld [vmem:[#allocation9 + $0x104] sm:$0xf] }
 0x2b6   :  { %4488 = vmatpush.bf16.msra.mxu1 %v9098_v27  ;;  %v11337_v27 = vld [vmem:[#allocation9 + $0x184] sm:$0xf]  ;;  %v12766_v32 = vor.u32 %v11393_v50, %v10319_v3  ;;  %v12769_v1 = vor.u32 %v11321_v46, %v10031_v26 }
 0x2b7   :  { %v12755_v39 = vor.u32 %v11337_v27, %v10095_v38  ;;  %v4468_v24 = vpop.f32.mrf.mxu3  ;;  %v11385_v18 = vld [vmem:[#allocation9 + $0x304] sm:$0xf] }
 0x2b8   :  { %4476 = vmatpush.bf16.msra.mxu0 %v8934_v48  ;;  %v12758_v48 = vor.u32 %v11401_v0, %v10351_v7  ;;  %14360 = vst [vmem:[#allocation117_spill] sm:$0xff] %v12766_v32  ;;  %v9999_v27 = vld [vmem:[#allocation9 + $0xe0] sm:$0xf0] }
 0x2b9   :  { %14357 = vst [vmem:[#allocation114_spill] sm:$0xff] %v12755_v39  ;;  %v11377_v38 = vld [vmem:[#allocation9 + $0x2c4] sm:$0xf] }
 0x2ba   :  { %4489 = vmatpush.bf16.msra.mxu1 %v8938_v36  ;;  %14358 = vst [vmem:[#allocation115_spill] sm:$0xff] %v12758_v48  ;;  %v11329_v36 = vld [vmem:[#allocation9 + $0x144] sm:$0xf] }
 0x2bb   :  { %14361 = vst [vmem:[#allocation118_spill] sm:$0xff] %v12769_v1  ;;  %v10255_v0 = vld [vmem:[#allocation9 + $0x2e0] sm:$0xf0] }
 0x2bc   :  { %4477 = vmatpush.bf16.msra.mxu0 %v8774_v23  ;;  %v12763_v23 = vor.u32 %v11329_v36, %v10063_v59  ;;  %v12774_v7 = vpop.f32.mrf.mxu0  ;;  %v12780_v36 = vor.u32 %v11377_v38, %v10255_v0  ;;  %v11305_v59 = vld [vmem:[#allocation9 + $0x84] sm:$0xf] }
 0x2bd   :  { %14363 = vst [vmem:[#allocation120_spill] sm:$0xff] %v12774_v7  ;;  %v9967_v50 = vld [vmem:[#allocation9 + $0xa0] sm:$0xf0]  ;;  %v12782_v26 = vpop.f32.mrf.mxu1 }
 0x2be   :  { %4490 = vmatpush.bf16.msra.mxu1 %v8778_v49  ;;  %14359 = vst [vmem:[#allocation116_spill] sm:$0xff] %v12763_v23  ;;  %v12772_v49 = vor.u32 %v11385_v18, %v10287_v51  ;;  %v11369_v3 = vld [vmem:[#allocation9 + $0x284] sm:$0xf]  ;;  %v12785_v18 = vor.u32 %v11305_v59, %v9967_v50 }
 0x2bf   :  { %4478 = vmatmul.bf16.vlgmr.msra.gmra.mxu0 %v12615_v31  ;;  %14365 = vst [vmem:[#allocation122_spill] sm:$0xff] %v12780_v36  ;;  %v10223_v46 = vld [vmem:[#allocation9 + $0x2a0] sm:$0xf0] }
 0x2c0   :  { %5290 = vmatpush.bf16.msrb.mxu0 %v12750_v44  ;;  %14362 = vst [vmem:[#allocation119_spill] sm:$0xff] %v12772_v49  ;;  %v12788_v51 = vor.u32 %v11369_v3, %v10223_v46  ;;  %v12790_v7 = vld [vmem:[#allocation10] sm:$0xff] }
 0x2c1   :  { %4491 = vmatmul.bf16.vlgmr.msra.gmra.mxu1 %v12615_v31  ;;  %v11313_v31 = vld [vmem:[#allocation9 + $0xc4] sm:$0xf]  ;;  %14366 = vst [vmem:[#allocation123_spill] sm:$0xff] %v12782_v26  ;;  %v2296_v38 = vperm.slane %v12790_v7, 0 }
 0x2c2   :  { %5303 = vmatpush.bf16.msrb.mxu1 %v12752_v10  ;;  %v12777_v24 = vor.u32 %v11313_v31, %v9999_v27  ;;  %14367 = vst [vmem:[#allocation124_spill] sm:$0xff] %v12785_v18  ;;  %v11297_v31 = vld [vmem:[#allocation9 + $0x44] sm:$0xf] }
 0x2c3   :  { %14368 = vst [vmem:[#allocation125_spill] sm:$0xff] %v12788_v51  ;;  %v9935_v27 = vld [vmem:[#allocation9 + $0x60] sm:$0xf0] }
 0x2c4   :  { %5291 = vmatpush.bf16.msrb.mxu0 %v12755_v39  ;;  %14364 = vst [vmem:[#allocation121_spill] sm:$0xff] %v12777_v24  ;;  %v11361_v0 = vld [vmem:[#allocation9 + $0x244] sm:$0xf]  ;;  %v4273_v62 = vpop.f32.mrf.mxu0  ;;  %v12794_v25 = vor.u32 %v11297_v31, %v9935_v27 }
 0x2c5   :  { %v12797_v50 = vor.u32 %v11361_v0, %v10191_v54  ;;  %v11289_v3 = vld [vmem:[#allocation9 + $0x4] sm:$0xf]  ;;  %v11410_v62 = vld [vmem:[#allocation9 + $0x3cc] sm:$0xf]  ;;  %v4286_v10 = vpop.f32.mrf.mxu1  ;;  %v12804_v54 = vor.u32 %v11353_v11, %v10159_v60 }
 0x2c6   :  { %5304 = vmatpush.bf16.msrb.mxu1 %v12758_v48  ;;  %14369 = vst [vmem:[#allocation126_spill] sm:$0xff] %v12794_v25  ;;  %v9903_v46 = vld [vmem:[#allocation9 + $0x20] sm:$0xf0]  ;;  %v10391_v48 = vld [vmem:[#allocation9 + $0x3e8] sm:$0xf0] }
 0x2c7   :  { %14370 = vst [vmem:[#allocation127_spill] sm:$0xff] %v12797_v50  ;;  %v12801_v31 = vor.u32 %v11289_v3, %v9903_v46  ;;  %v12808_v0 = vor.u32 %v11410_v62, %v10391_v48  ;;  %v10071_v60 = vld [vmem:[#allocation9 + $0x168] sm:$0xf0] }
 0x2c8   :  { %5292 = vmatpush.bf16.msrb.mxu0 %v12763_v23  ;;  %14372 = vst [vmem:[#allocation129_spill] sm:$0xff] %v12804_v54  ;;  %v11394_v48 = vld [vmem:[#allocation9 + $0x34c] sm:$0xf] }
 0x2c9   :  { %14371 = vst [vmem:[#allocation128_spill] sm:$0xff] %v12801_v31  ;;  %v11322_v62 = vld [vmem:[#allocation9 + $0x10c] sm:$0xf] }
 0x2ca   :  { %5305 = vmatpush.bf16.msrb.mxu1 %v12766_v32  ;;  %v11346_v32 = vld [vmem:[#allocation9 + $0x1cc] sm:$0xf]  ;;  %14374 = vst [vmem:[#allocation131_spill] sm:$0xff] %v12808_v0 }
 0x2cb   :  { %v12806_v27 = vor.u32 %v11346_v32, %v10135_v20  ;;  %v11330_v20 = vld [vmem:[#allocation9 + $0x14c] sm:$0xf] }
 0x2cc   :  { %5293 = vmatpush.bf16.msrb.mxu0 %v12769_v1  ;;  %v10327_v32 = vld [vmem:[#allocation9 + $0x368] sm:$0xf0]  ;;  %v12821_v3 = vor.u32 %v11330_v20, %v10071_v60 }
 0x2cd   :  { %v5273_v26 = vpop.f32.mrf.mxu2  ;;  %14373 = vst [vmem:[#allocation130_spill] sm:$0xff] %v12806_v27  ;;  %v12824_v46 = vor.u32 %v11394_v48, %v10327_v32  ;;  %v11378_v20 = vld [vmem:[#allocation9 + $0x2cc] sm:$0xf] }
 0x2ce   :  { %5306 = vmatpush.bf16.msrb.mxu1 %v12772_v49  ;;  %14377 = vst [vmem:[#allocation134_spill] sm:$0xff] %v12821_v3  ;;  %v10263_v60 = vld [vmem:[#allocation9 + $0x2e8] sm:$0xf0] }
 0x2cf   :  { %v5286_v59 = vpop.f32.mrf.mxu3  ;;  %14378 = vst [vmem:[#allocation135_spill] sm:$0xff] %v12824_v46  ;;  %v12838_v32 = vor.u32 %v11378_v20, %v10263_v60  ;;  %v2298_v20 = vperm.slane %v12790_v7, 2  ;;  %v11362_v60 = vld [vmem:[#allocation9 + $0x24c] sm:$0xf] }
 0x2d0   :  { %5294 = vmatpush.bf16.msrb.mxu0 %v12777_v24  ;;  %v5287_v49 = vadd.f32 %v5286_v59, %v5273_v26  ;;  %v10103_v26 = vld [vmem:[#allocation9 + $0x1a8] sm:$0xf0] }
 0x2d1   :  { %v10359_v59 = vld [vmem:[#allocation9 + $0x3a8] sm:$0xf0]  ;;  %14383 = vst [vmem:[#allocation140_spill] sm:$0xff] %v12838_v32  ;;  %v4012_v61 = vadd.f32 %v12532_v14, %v2298_v20 }
 0x2d2   :  { %5307 = vmatpush.bf16.msrb.mxu1 %v12780_v36  ;;  %v3986_v36 = vadd.f32 %v12464_v56, %v2296_v38  ;;  %v11338_v56 = vld [vmem:[#allocation9 + $0x18c] sm:$0xf] }
 0x2d3   :  { %v11402_v38 = vld [vmem:[#allocation9 + $0x38c] sm:$0xf] }
 0x2d4   :  { %5295 = vmatpush.bf16.msrb.mxu0 %v12785_v18  ;;  %v5472_v52 = vadd.f32 %v5287_v49, %v3986_v36  ;;  %v12813_v49 = vor.u32 %v11338_v56, %v10103_v26  ;;  %v12816_v11 = vor.u32 %v11402_v38, %v10359_v59  ;;  %v10039_v56 = vld [vmem:[#allocation9 + $0x128] sm:$0xf0] }
 0x2d5   :  { %v5275_v10 = vpop.f32.mrf.mxu2  ;;  %v11386_v26 = vld [vmem:[#allocation9 + $0x30c] sm:$0xf]  ;;  %v12827_v59 = vor.u32 %v11322_v62, %v10039_v56 }
 0x2d6   :  { %5308 = vmatpush.bf16.msrb.mxu1 %v12788_v51  ;;  %14375 = vst [vmem:[#allocation132_spill] sm:$0xff] %v12813_v49  ;;  %v10295_v38 = vld [vmem:[#allocation9 + $0x328] sm:$0xf0] }
 0x2d7   :  { %v5288_v36 = vpop.f32.mrf.mxu3  ;;  %14376 = vst [vmem:[#allocation133_spill] sm:$0xff] %v12816_v11  ;;  %v12830_v10 = vor.u32 %v11386_v26, %v10295_v38  ;;  %v11306_v62 = vld [vmem:[#allocation9 + $0x8c] sm:$0xf]  ;;  %v10411_v26 = vmul.f32 -1.442695, %v5472_v52 }
 0x2d8   :  { %5296 = vmatpush.bf16.msrb.mxu0 %v12794_v25  ;;  %14379 = vst [vmem:[#allocation136_spill] sm:$0xff] %v12827_v59  ;;  %v11314_v36 = vld [vmem:[#allocation9 + $0xcc] sm:$0xf] }
 0x2d9   :  { %14380 = vst [vmem:[#allocation137_spill] sm:$0xff] %v12830_v10  ;;  %v9975_v56 = vld [vmem:[#allocation9 + $0xa8] sm:$0xf0]  ;;  %11546 = vpow2.f32 %v10411_v26  ;;  %v10143_v26 = vld [vmem:[#allocation9 + $0x1f0] sm:$0xf0] }
 0x2da   :  { %5309 = vmatpush.bf16.msrb.mxu1 %v12797_v50  ;;  %v12843_v50 = vor.u32 %v11306_v62, %v9975_v56 }
 0x2dc   :  { %5297 = vmatpush.bf16.msrb.mxu0 %v12801_v31  ;;  %14385 = vst [vmem:[#allocation142_spill] sm:$0xff] %v12843_v50 }
 0x2dd   :  { %v12840_v38 = vpop.f32.mrf.mxu1 }
 0x2de   :  { %5310 = vmatpush.bf16.msrb.mxu1 %v12804_v54  ;;  %v12832_v54 = vpop.f32.mrf.mxu0  ;;  %14384 = vst [vmem:[#allocation141_spill] sm:$0xff] %v12840_v38 }
 0x2df   :  { %5298 = vmatmul.bf16.vlgmr.msrb.gmra.mxu0 %v14312_v9  ;;  %14381 = vst [vmem:[#allocation138_spill] sm:$0xff] %v12832_v54 }
 0x2e0   :  { %5342 = vmatpush.bf16.msra.mxu0 %v12806_v27 }
 0x2e1   :  { %5311 = vmatmul.bf16.vlgmr.msrb.gmra.mxu1 %v14312_v9 }
 0x2e2   :  { %5355 = vmatpush.bf16.msra.mxu1 %v12808_v0  ;;  %v10007_v0 = vld [vmem:[#allocation9 + $0xe8] sm:$0xf0] }
 0x2e3   :  { %v12835_v48 = vor.u32 %v11314_v36, %v10007_v0  ;;  %v11298_v0 = vld [vmem:[#allocation9 + $0x4c] sm:$0xf] }
 0x2e4   :  { %5343 = vmatpush.bf16.msra.mxu0 %v12813_v49  ;;  %v9943_v36 = vld [vmem:[#allocation9 + $0x68] sm:$0xf0] }
 0x2e5   :  { %14382 = vst [vmem:[#allocation139_spill] sm:$0xff] %v12835_v48  ;;  %v12850_v38 = vor.u32 %v11298_v0, %v9943_v36  ;;  %v11547_v36 = vpop.eup %11546 }
 0x2e6   :  { %5356 = vmatpush.bf16.msra.mxu1 %v12816_v11  ;;  %v11370_v11 = vld [vmem:[#allocation9 + $0x28c] sm:$0xf]  ;;  %v4325_v51 = vpop.f32.mrf.mxu0 }
 0x2e7   :  { %14387 = vst [vmem:[#allocation144_spill] sm:$0xff] %v12850_v38  ;;  %v11411_v51 = vld [vmem:[#allocation9 + $0x3d4] sm:$0xf] }
 0x2e8   :  { %5344 = vmatpush.bf16.msra.mxu0 %v12821_v3 }
 0x2ea   :  { %5357 = vmatpush.bf16.msra.mxu1 %v12824_v46  ;;  %v10231_v46 = vld [vmem:[#allocation9 + $0x2a8] sm:$0xf0] }
 0x2eb   :  { %v12846_v54 = vor.u32 %v11370_v11, %v10231_v46  ;;  %v11290_v11 = vld [vmem:[#allocation9 + $0xc] sm:$0xf] }
 0x2ec   :  { %5345 = vmatpush.bf16.msra.mxu0 %v12827_v59  ;;  %v9911_v46 = vld [vmem:[#allocation9 + $0x28] sm:$0xf0]  ;;  %v10175_v59 = vld [vmem:[#allocation9 + $0x230] sm:$0xf0] }
 0x2ed   :  { %14386 = vst [vmem:[#allocation143_spill] sm:$0xff] %v12846_v54  ;;  %v5325_v52 = vpop.f32.mrf.mxu2  ;;  %v12857_v0 = vor.u32 %v11290_v11, %v9911_v46  ;;  %v11423_v11 = vld [vmem:[#allocation12 + $0x30] sm:$0xff]  ;;  %v11395_v46 = vld [vmem:[#allocation9 + $0x354] sm:$0xf] }
 0x2ee   :  { %5358 = vmatpush.bf16.msra.mxu1 %v12830_v10  ;;  %v10199_v10 = vld [vmem:[#allocation9 + $0x268] sm:$0xf0] }
 0x2ef   :  { %v5338_v62 = vpop.f32.mrf.mxu3  ;;  %v12853_v56 = vor.u32 %v11362_v60, %v10199_v10  ;;  %14389 = vst [vmem:[#allocation146_spill] sm:$0xff] %v12857_v0  ;;  %v12862_v60 = vor.u32 %v11347_v53, %v10143_v26  ;;  %v10335_v26 = vld [vmem:[#allocation9 + $0x370] sm:$0xf0] }
 0x2f0   :  { %5346 = vmatpush.bf16.msra.mxu0 %v12835_v48  ;;  %v5339_v35 = vadd.f32 %v5338_v62, %v5325_v52  ;;  %v10399_v48 = vld [vmem:[#allocation9 + $0x3f0] sm:$0xf0] }
 0x2f1   :  { %14388 = vst [vmem:[#allocation145_spill] sm:$0xff] %v12853_v56  ;;  %v12864_v20 = vor.u32 %v11411_v51, %v10399_v48  ;;  %v11339_v52 = vld [vmem:[#allocation9 + $0x194] sm:$0xf] }
 0x2f2   :  { %5359 = vmatpush.bf16.msra.mxu1 %v12838_v32  ;;  %v11354_v32 = vld [vmem:[#allocation9 + $0x20c] sm:$0xf]  ;;  %v5474_v2 = vadd.f32 %v5339_v35, %v4012_v61  ;;  %14391 = vst [vmem:[#allocation148_spill] sm:$0xff] %v12862_v60  ;;  %v10111_v62 = vld [vmem:[#allocation9 + $0x1b0] sm:$0xf0]  ;;  %v12866_v35 = vadd.f32 1.0, %v11547_v36 }
 0x2f3   :  { %v12860_v10 = vor.u32 %v11354_v32, %v10167_v15  ;;  %14392 = vst [vmem:[#allocation149_spill] sm:$0xff] %v12864_v20  ;;  %v12871_v53 = vor.u32 %v11339_v52, %v10111_v62  ;;  %v11331_v48 = vld [vmem:[#allocation9 + $0x154] sm:$0xf] }
 0x2f4   :  { %5347 = vmatpush.bf16.msra.mxu0 %v12843_v50  ;;  %v4338_v50 = vpop.f32.mrf.mxu1  ;;  %v10413_v14 = vmul.f32 -1.442695, %v5474_v2  ;;  %v10079_v32 = vld [vmem:[#allocation9 + $0x170] sm:$0xf0]  ;;  %vm5493_vm12 = vweird.f32 %v12866_v35 }
 0x2f5   :  { %14390 = vst [vmem:[#allocation147_spill] sm:$0xff] %v12860_v10  ;;  %v11424_v50 = vld [vmem:[#allocation12 + $0x38] sm:$0xff]  ;;  %v5327_v61 = vpop.f32.mrf.mxu2  ;;  %v12880_v51 = vor.u32 %v11331_v48, %v10079_v32  ;;  %v11422_v52 = vld [vmem:[#allocation12 + $0x28] sm:$0xff] }
 0x2f6   :  { %5360 = vmatpush.bf16.msra.mxu1 %v12846_v54  ;;  %v11403_v54 = vld [vmem:[#allocation9 + $0x394] sm:$0xf]  ;;  %11548 = vpow2.f32 %v10413_v14  ;;  %14393 = vst [vmem:[#allocation150_spill] sm:$0xff] %v12871_v53  ;;  %5736 = vmatpush.bf16.msra.mxu2 %v11424_v50 }
 0x2f7   :  { %v5340_v2 = vpop.f32.mrf.mxu3  ;;  %v12874_v15 = vor.u32 %v11403_v54, %v10367_v42  ;;  %11550 = vrcp.f32 %v12866_v35  ;;  %14395 = vst [vmem:[#allocation152_spill] sm:$0xff] %v12880_v51  ;;  %v12883_v42 = vor.u32 %v11395_v46, %v10335_v26  ;;  %v11323_v54 = vld [vmem:[#allocation9 + $0x114] sm:$0xf] }
 0x2f8   :  { %5348 = vmatpush.bf16.msra.mxu0 %v12850_v38  ;;  %v10047_v14 = vld [vmem:[#allocation9 + $0x130] sm:$0xf0] }
 0x2f9   :  { %14394 = vst [vmem:[#allocation151_spill] sm:$0xff] %v12874_v15  ;;  %v11387_v50 = vld [vmem:[#allocation9 + $0x314] sm:$0xf]  ;;  %v12889_v2 = vor.u32 %v11323_v54, %v10047_v14 }
 0x2fa   :  { %5361 = vmatpush.bf16.msra.mxu1 %v12853_v56  ;;  %14396 = vst [vmem:[#allocation153_spill] sm:$0xff] %v12883_v42  ;;  %5737 = vmatpush.bf16.msra.mxu2 %v11423_v11  ;;  %v10303_v61 = vld [vmem:[#allocation9 + $0x330] sm:$0xf0]  ;;  %v11421_v11 = vld [vmem:[#allocation12 + $0x20] sm:$0xff] }
 0x2fb   :  { %14397 = vst [vmem:[#allocation154_spill] sm:$0xff] %v12889_v2  ;;  %v12894_v32 = vor.u32 %v11387_v50, %v10303_v61  ;;  %v11315_v46 = vld [vmem:[#allocation9 + $0xd4] sm:$0xf] }
 0x2fc   :  { %5349 = vmatpush.bf16.msra.mxu0 %v12857_v0  ;;  %v11549_v36 = vpop.eup %11548  ;;  %v10015_v26 = vld [vmem:[#allocation9 + $0xf0] sm:$0xf0] }
 0x2fd   :  { %v12885_v62 = vadd.f32 1.0, %v11549_v36  ;;  %v12891_v48 = vpop.eup %11550  ;;  %14398 = vst [vmem:[#allocation155_spill] sm:$0xff] %v12894_v32  ;;  %v11379_v36 = vld [vmem:[#allocation9 + $0x2d4] sm:$0xf]  ;;  %v12901_v54 = vor.u32 %v11315_v46, %v10015_v26 }
 0x2fe   :  { %5362 = vmatpush.bf16.msra.mxu1 %v12860_v10  ;;  %5738 = vmatpush.bf16.msra.mxu2 %v11422_v52  ;;  %v5489_v10 = vmul.f32 %v12891_v48, %v12866_v35  ;;  %v11307_v50 = vld [vmem:[#allocation9 + $0x94] sm:$0xf]  ;;  %v11420_v52 = vld [vmem:[#allocation12 + $0x18] sm:$0xff]  ;;  %vm5494_vm8 = vweird.f32 %v12891_v48 }
 0x2ff   :  { %5350 = vmatmul.bf16.vlgmr.msra.gmra.mxu0 %v14312_v9  ;;  %11552 = vrcp.f32 %v12885_v62  ;;  %14400 = vst [vmem:[#allocation157_spill] sm:$0xff] %v12901_v54  ;;  %v9983_v61 = vld [vmem:[#allocation9 + $0xb0] sm:$0xf0]  ;;  %vm5531_vm10 = vweird.f32 %v12885_v62  ;;  %vm12959_vm13 = vmor %vm5493_vm12, %vm5494_vm8 }
 0x300   :  { %5394 = vmatpush.bf16.msrb.mxu0 %v12862_v60  ;;  %v11371_v56 = vld [vmem:[#allocation9 + $0x294] sm:$0xf]  ;;  %v12913_v46 = vor.u32 %v11307_v50, %v9983_v61  ;;  %v2300_v60 = vperm.slane %v12790_v7, 4 }
 0x301   :  { %5363 = vmatmul.bf16.vlgmr.msra.gmra.mxu1 %v14312_v9  ;;  %v11363_v0 = vld [vmem:[#allocation9 + $0x254] sm:$0xf] }
 0x302   :  { %5407 = vmatpush.bf16.msrb.mxu1 %v12864_v20  ;;  %v12896_v20 = vpop.f32.mrf.mxu0  ;;  %5739 = vmatpush.bf16.msra.mxu2 %v11421_v11  ;;  %14403 = vst [vmem:[#allocation160_spill] sm:$0xff] %v12913_v46  ;;  %v11299_v11 = vld [vmem:[#allocation9 + $0x54] sm:$0xf] }
 0x303   :  { %14399 = vst [vmem:[#allocation156_spill] sm:$0xff] %v12896_v20  ;;  %v10207_v38 = vld [vmem:[#allocation9 + $0x270] sm:$0xf0] }
 0x304   :  { %5395 = vmatpush.bf16.msrb.mxu0 %v12871_v53  ;;  %v12910_v53 = vpop.f32.mrf.mxu1 }
 0x305   :  { %14402 = vst [vmem:[#allocation159_spill] sm:$0xff] %v12910_v53 }
 0x306   :  { %5408 = vmatpush.bf16.msrb.mxu1 %v12874_v15  ;;  %v10271_v15 = vld [vmem:[#allocation9 + $0x2f0] sm:$0xf0]  ;;  %5740 = vmatpush.bf16.msra.mxu2 %v11420_v52  ;;  %v12925_v52 = vor.u32 %v11363_v0, %v10207_v38  ;;  %v5537_v0 = vand.u32 2147483648, %v12885_v62 }
 0x307   :  { %v12904_v14 = vor.u32 %v11379_v36, %v10271_v15  ;;  %v9951_v36 = vld [vmem:[#allocation9 + $0x70] sm:$0xf0] }
 0x308   :  { %5396 = vmatpush.bf16.msrb.mxu0 %v12880_v51  ;;  %v10239_v51 = vld [vmem:[#allocation9 + $0x2b0] sm:$0xf0]  ;;  %v12922_v61 = vor.u32 %v11299_v11, %v9951_v36  ;;  %14406 = vst [vmem:[#allocation163_spill] sm:$0xff] %v12925_v52  ;;  %v11412_v11 = vld [vmem:[#allocation9 + $0x3dc] sm:$0xf] }
 0x309   :  { %14401 = vst [vmem:[#allocation158_spill] sm:$0xff] %v12904_v14  ;;  %v12916_v26 = vor.u32 %v11371_v56, %v10239_v51  ;;  %v11291_v56 = vld [vmem:[#allocation9 + $0x14] sm:$0xf]  ;;  %v10407_v36 = vld [vmem:[#allocation9 + $0x3f8] sm:$0xf0] }
 0x30a   :  { %5409 = vmatpush.bf16.msrb.mxu1 %v12883_v42  ;;  %v12906_v42 = vpop.eup %11552  ;;  %14405 = vst [vmem:[#allocation162_spill] sm:$0xff] %v12922_v61 }
 0x30b   :  { %v5527_v20 = vmul.f32 %v12906_v42, %v12885_v62  ;;  %14404 = vst [vmem:[#allocation161_spill] sm:$0xff] %v12916_v26  ;;  %vm5532_vm9 = vweird.f32 %v12906_v42 }
 0x30c   :  { %5397 = vmatpush.bf16.msrb.mxu0 %v12889_v2  ;;  %v5490_v2 = vsub.f32 1.0, %v5489_v10  ;;  %v4377_v10 = vpop.f32.mrf.mxu0  ;;  %v4390_v38 = vpop.f32.mrf.mxu1  ;;  %vm12946_vm11 = vmor %vm5531_vm10, %vm5532_vm9 }
 0x30d   :  { %v5528_v15 = vsub.f32 1.0, %v5527_v20  ;;  %v5377_v50 = vpop.f32.mrf.mxu2 }
 0x30e   :  { %5410 = vmatpush.bf16.msrb.mxu1 %v12894_v32  ;;  %v11419_v32 = vld [vmem:[#allocation12 + $0x10] sm:$0xff]  ;;  %v5491_v20 = vmul.f32 %v12891_v48, %v5490_v2 }
 0x30f   :  { %v5529_v53 = vmul.f32 %v12906_v42, %v5528_v15  ;;  %v5390_v51 = vpop.f32.mrf.mxu3  ;;  %5741 = vmatpush.bf16.msra.mxu2 %v11419_v32  ;;  %v4038_v15 = vadd.f32 %v12472_v8, %v2300_v60  ;;  %v5535_v60 = vand.u32 2147483647, %v12885_v62  ;;  %v10119_v62 = vld [vmem:[#allocation9 + $0x1b8] sm:$0xf0] }
 0x310   :  { %5398 = vmatpush.bf16.msrb.mxu0 %v12901_v54  ;;  %v11355_v54 = vld [vmem:[#allocation9 + $0x214] sm:$0xf]  ;;  %v5391_v10 = vadd.f32 %v5390_v51, %v5377_v50  ;;  %v5492_v32 = vadd.f32 %v12891_v48, %v5491_v20  ;;  %v11340_v51 = vld [vmem:[#allocation9 + $0x19c] sm:$0xf] }
 0x311   :  { %v5530_v2 = vadd.f32 %v12906_v42, %v5529_v53  ;;  %v12939_v53 = vor.u32 %v11355_v54, %v10175_v59  ;;  %v11404_v59 = vld [vmem:[#allocation9 + $0x39c] sm:$0xf]  ;;  %vm5536_vm14 = vcmp.eq.f32.partialorder %v5535_v60, 8.507059e+37 }
 0x312   :  { %5411 = vmatpush.bf16.msrb.mxu1 %v12904_v14  ;;  %v9919_v14 = vld [vmem:[#allocation9 + $0x30] sm:$0xf0]  ;;  %v10375_v54 = vld [vmem:[#allocation9 + $0x3b8] sm:$0xf0] }
 0x313   :  { %v12934_v8 = vor.u32 %v11291_v56, %v9919_v14  ;;  %14408 = vst [vmem:[#allocation165_spill] sm:$0xff] %v12939_v53  ;;  %5742 = vmatpush.bf16.msra.mxu2 %v11418_v29  ;;  %v12950_v14 = vor.u32 %v11412_v11, %v10407_v36  ;;  %v11417_v56 = vld [vmem:[#allocation12] sm:$0xff]  ;;  %v5534_v29 = vsel %vm12946_vm11, %v12906_v42, %v5530_v2  ;;  %v10087_v20 = vld [vmem:[#allocation9 + $0x178] sm:$0xf0] }
 0x314   :  { %5399 = vmatpush.bf16.msrb.mxu0 %v12913_v46  ;;  %v11348_v46 = vld [vmem:[#allocation9 + $0x1dc] sm:$0xf]  ;;  %v12969_v42 = vor.u32 %v11340_v51, %v10119_v62  ;;  %v12972_v38 = vor.u32 %v11404_v59, %v10375_v54 }
 0x315   :  { %14407 = vst [vmem:[#allocation164_spill] sm:$0xff] %v12934_v8  ;;  %v12941_v50 = vor.u32 %v11348_v46, %v10151_v30  ;;  %v5497_v30 = vand.u32 2147483647, %v12866_v35  ;;  %v5538_v46 = vor.u32 1.1754944e-38, %v5537_v0  ;;  %v11332_v0 = vld [vmem:[#allocation9 + $0x15c] sm:$0xf] }
 0x316   :  { %5412 = vmatpush.bf16.msrb.mxu1 %v12916_v26  ;;  %v5476_v26 = vadd.f32 %v5391_v10, %v4038_v15  ;;  %v5499_v15 = vand.u32 2147483648, %v12866_v35  ;;  %14412 = vst [vmem:[#allocation167_spill] sm:$0xff] %v12950_v14  ;;  %v5496_v35 = vsel %vm12959_vm13, %v12891_v48, %v5492_v32  ;;  %v11396_v48 = vld [vmem:[#allocation9 + $0x35c] sm:$0xf] }
 0x317   :  { %14409 = vst [vmem:[#allocation166_spill] sm:$0xff] %v12941_v50  ;;  %v5392_v2 = vpop.f32.mrf.mxu3  ;;  %v5539_v36 = vsel %vm5536_vm14, %v5538_v46, %v5534_v29  ;;  %5743 = vmatpush.bf16.msra.mxu2 %v11417_v56  ;;  %vm5498_vm15 = vcmp.eq.f32.partialorder %v5497_v30, 8.507059e+37  ;;  %v10343_v32 = vld [vmem:[#allocation9 + $0x378] sm:$0xf0]  ;;  %v12978_v29 = vor.u32 %v11332_v0, %v10087_v20 }
 0x318   :  { %5400 = vmatpush.bf16.msrb.mxu0 %v12922_v61  ;;  %11554 = vtanh.f32 %v5476_v26  ;;  %v5379_v26 = vpop.f32.mrf.mxu2  ;;  %14415 = vst [vmem:[#allocation168_spill] sm:$0xff] %v12969_v42  ;;  %v5500_v11 = vor.u32 1.1754944e-38, %v5499_v15  ;;  %v5596_v15 = vmul.f32 0.0, %v5539_v36  ;;  %v12981_v56 = vor.u32 %v11396_v48, %v10343_v32  ;;  %v11324_v30 = vld [vmem:[#allocation9 + $0x11c] sm:$0xf] }
 0x319   :  { %14416 = vst [vmem:[#allocation169_spill] sm:$0xff] %v12972_v38  ;;  %v10055_v59 = vld [vmem:[#allocation9 + $0x138] sm:$0xf0] }
 0x31a   :  { %5413 = vmatpush.bf16.msrb.mxu1 %v12925_v52  ;;  %v5501_v51 = vsel %vm5498_vm15, %v5500_v11, %v5496_v35  ;;  %14417 = vst [vmem:[#allocation170_spill] sm:$0xff] %v12978_v29  ;;  %v11388_v46 = vld [vmem:[#allocation9 + $0x31c] sm:$0xf]  ;;  %v12987_v26 = vor.u32 %v11324_v30, %v10055_v59 }
 0x31b   :  { %5789 = vmatpush.bf16.msrb.mxu2 %v12750_v44  ;;  %14418 = vst [vmem:[#allocation171_spill] sm:$0xff] %v12981_v56  ;;  %v10311_v10 = vld [vmem:[#allocation9 + $0x338] sm:$0xf0] }
 0x31c   :  { %5401 = vmatpush.bf16.msrb.mxu0 %v12934_v8  ;;  %14420 = vst [vmem:[#allocation173_spill] sm:$0xff] %v12987_v26  ;;  %v12990_v35 = vor.u32 %v11388_v46, %v10311_v10  ;;  %v11316_v2 = vld [vmem:[#allocation9 + $0xdc] sm:$0xf]  ;;  %v12993_v20 = vpop.f32.mrf.mxu0 }
 0x31d   :  { %v10023_v11 = vld [vmem:[#allocation9 + $0xf8] sm:$0xf0]  ;;  %14422 = vst [vmem:[#allocation175_spill] sm:$0xff] %v12993_v20 }
 0x31e   :  { %5414 = vmatpush.bf16.msrb.mxu1 %v12939_v53  ;;  %v11555_v60 = vpop.eup %11554  ;;  %14421 = vst [vmem:[#allocation174_spill] sm:$0xff] %v12990_v35  ;;  %v11380_v36 = vld [vmem:[#allocation9 + $0x2dc] sm:$0xf]  ;;  %v12996_v48 = vor.u32 %v11316_v2, %v10023_v11  ;;  %v12998_v32 = vpop.f32.mrf.mxu1  ;;  %v2302_v11 = vperm.slane %v12790_v7, 6 }
 0x31f   :  { %5402 = vmatmul.bf16.vlgmr.msrb.gmra.mxu0 %v14312_v9  ;;  %v5598_v62 = vmul.f32 %v11555_v60, %v5501_v51  ;;  %5790 = vmatpush.bf16.msrb.mxu2 %v12755_v39  ;;  %v10279_v0 = vld [vmem:[#allocation9 + $0x2f8] sm:$0xf0]  ;;  %14424 = vst [vmem:[#allocation177_spill] sm:$0xff] %v12998_v32 }
 0x320   :  { %5446 = vmatpush.bf16.msra.mxu0 %v12941_v50  ;;  %14423 = vst [vmem:[#allocation176_spill] sm:$0xff] %v12996_v48  ;;  %v13001_v60 = vor.u32 %v11380_v36, %v10279_v0  ;;  %v11308_v51 = vld [vmem:[#allocation9 + $0x9c] sm:$0xf]  ;;  %v4064_v7 = vadd.f32 %v12571_v63, %v2302_v11 }
 0x321   :  { %5415 = vmatmul.bf16.vlgmr.msrb.gmra.mxu1 %v14312_v9  ;;  %v12983_v54 = vadd.f32 %v5598_v62, %v5596_v15  ;;  %v9991_v15 = vld [vmem:[#allocation9 + $0xb8] sm:$0xf0] }
 0x322   :  { %5459 = vmatpush.bf16.msra.mxu1 %v12950_v14  ;;  %14425 = vst [vmem:[#allocation178_spill] sm:$0xff] %v13001_v60  ;;  %v11372_v62 = vld [vmem:[#allocation9 + $0x29c] sm:$0xf]  ;;  %v13005_v59 = vor.u32 %v11308_v51, %v9991_v15 }
 0x323   :  { %14419 = vst [vmem:[#allocation172_spill] sm:$0xff] %v12983_v54  ;;  %5791 = vmatpush.bf16.msrb.mxu2 %v12763_v23  ;;  %v10247_v30 = vld [vmem:[#allocation9 + $0x2b8] sm:$0xf0] }
 0x324   :  { %5447 = vmatpush.bf16.msra.mxu0 %v12969_v42  ;;  %14426 = vst [vmem:[#allocation179_spill] sm:$0xff] %v13005_v59  ;;  %v13008_v46 = vor.u32 %v11372_v62, %v10247_v30  ;;  %v11300_v10 = vld [vmem:[#allocation9 + $0x5c] sm:$0xf]  ;;  %v4429_v32 = vpop.f32.mrf.mxu0 }
 0x325   :  { %v9959_v2 = vld [vmem:[#allocation9 + $0x78] sm:$0xf0] }
 0x326   :  { %5460 = vmatpush.bf16.msra.mxu1 %v12972_v38  ;;  %14427 = vst [vmem:[#allocation180_spill] sm:$0xff] %v13008_v46  ;;  %v11364_v36 = vld [vmem:[#allocation9 + $0x25c] sm:$0xf]  ;;  %v4442_v51 = vpop.f32.mrf.mxu1 }
 0x327   :  { %5792 = vmatpush.bf16.msrb.mxu2 %v12769_v1  ;;  %v10215_v0 = vld [vmem:[#allocation9 + $0x278] sm:$0xf0]  ;;  %v13013_v1 = vor.u32 %v11300_v10, %v9959_v2 }
 0x328   :  { %5448 = vmatpush.bf16.msra.mxu0 %v12978_v29  ;;  %v13016_v62 = vor.u32 %v11364_v36, %v10215_v0  ;;  %v11292_v30 = vld [vmem:[#allocation9 + $0x1c] sm:$0xf] }
 0x329   :  { %14428 = vst [vmem:[#allocation181_spill] sm:$0xff] %v13013_v1  ;;  %v9927_v23 = vld [vmem:[#allocation9 + $0x38] sm:$0xf0] }
 0x32a   :  { %5461 = vmatpush.bf16.msra.mxu1 %v12981_v56  ;;  %14429 = vst [vmem:[#allocation182_spill] sm:$0xff] %v13016_v62  ;;  %v11356_v44 = vld [vmem:[#allocation9 + $0x21c] sm:$0xf]  ;;  %v13021_v10 = vor.u32 %v11292_v30, %v9927_v23 }
 0x32b   :  { %5793 = vmatpush.bf16.msrb.mxu2 %v12777_v24  ;;  %v14457_v24 = vld [vmem:[#allocation154_spill] sm:$0xff] }
 0x32c   :  { %5449 = vmatpush.bf16.msra.mxu0 %v12987_v26  ;;  %14430 = vst [vmem:[#allocation183_spill] sm:$0xff] %v13021_v10 }
 0x32d   :  { %v5429_v20 = vpop.f32.mrf.mxu2 }
 0x32e   :  { %5462 = vmatpush.bf16.msra.mxu1 %v12990_v35 }
 0x32f   :  { %v5442_v15 = vpop.f32.mrf.mxu3  ;;  %5794 = vmatpush.bf16.msrb.mxu2 %v12785_v18  ;;  %v14456_v18 = vld [vmem:[#allocation72_spill] sm:$0xff] }
 0x330   :  { %5450 = vmatpush.bf16.msra.mxu0 %v12996_v48  ;;  %v5443_v39 = vadd.f32 %v5442_v15, %v5429_v20 }
 0x332   :  { %5463 = vmatpush.bf16.msra.mxu1 %v13001_v60  ;;  %v10183_v60 = vld [vmem:[#allocation9 + $0x238] sm:$0xf0]  ;;  %v5478_v32 = vadd.f32 %v5443_v39, %v4064_v7 }
 0x333   :  { %v13024_v2 = vor.u32 %v11356_v44, %v10183_v60  ;;  %5795 = vmatpush.bf16.msrb.mxu2 %v12794_v25  ;;  %v14455_v25 = vld [vmem:[#allocation152_spill] sm:$0xff] }
 0x334   :  { %5451 = vmatpush.bf16.msra.mxu0 %v13005_v59  ;;  %v10415_v36 = vmul.f32 -1.442695, %v5478_v32 }
 0x335   :  { %14431 = vst [vmem:[#allocation184_spill] sm:$0xff] %v13024_v2  ;;  %v5431_v63 = vpop.f32.mrf.mxu2 }
 0x336   :  { %5464 = vmatpush.bf16.msra.mxu1 %v13008_v46  ;;  %11556 = vpow2.f32 %v10415_v36 }
 0x337   :  { %v5444_v39 = vpop.f32.mrf.mxu3  ;;  %5796 = vmatpush.bf16.msrb.mxu2 %v12801_v31  ;;  %v14454_v31 = vld [vmem:[#allocation70_spill] sm:$0xff] }
 0x338   :  { %5452 = vmatpush.bf16.msra.mxu0 %v13013_v1 }
 0x33a   :  { %5465 = vmatpush.bf16.msra.mxu1 %v13016_v62 }
 0x33c   :  { %5453 = vmatpush.bf16.msra.mxu0 %v13021_v10  ;;  %v11557_v44 = vpop.eup %11556  ;;  %v13038_v20 = vpop.f32.mrf.mxu0 }
 0x33d   :  { %v5564_v23 = vadd.f32 1.0, %v11557_v44  ;;  %14432 = vst [vmem:[#allocation185_spill] sm:$0xff] %v13038_v20 }
 0x33e   :  { %5466 = vmatpush.bf16.msra.mxu1 %v13024_v2  ;;  %v13041_v60 = vpop.f32.mrf.mxu1 }
 0x33f   :  { %5454 = vmatmul.bf16.vlgmr.msra.gmra.mxu0 %v14312_v9  ;;  %11558 = vrcp.f32 %v5564_v23  ;;  %14433 = vst [vmem:[#allocation186_spill] sm:$0xff] %v13041_v60  ;;  %v5577_v51 = vand.u32 2147483648, %v5564_v23  ;;  %v5575_v30 = vand.u32 2147483647, %v5564_v23  ;;  %vm5571_vm1 = vweird.f32 %v5564_v23 }
 0x340   :  { %5763 = vmatpush.bf16.msrb.mxu0 %v12477_v33  ;;  %11560 = vtanh.f32 %v12983_v54  ;;  %v14458_v54 = vld [vmem:[#allocation43_spill] sm:$0xff] }
 0x341   :  { %5467 = vmatmul.bf16.vlgmr.msra.gmra.mxu1 %v14312_v9  ;;  %v5578_v63 = vor.u32 1.1754944e-38, %v5577_v51  ;;  %vm5576_vm3 = vcmp.eq.f32.partialorder %v5575_v30, 8.507059e+37  ;;  %v14436_v30 = vld [vmem:[#allocation54_spill] sm:$0xff] }
 0x342   :  { %5776 = vmatpush.bf16.msrb.mxu1 %v12479_v55 }
 0x344   :  { %5764 = vmatpush.bf16.msrb.mxu0 %v12483_v4  ;;  %v4481_v7 = vpop.f32.mrf.mxu0 }
 0x345   :  { %v11559_v9 = vpop.eup %11558  ;;  %v14437_v7 = vld [vmem:[#allocation21_spill] sm:$0xff] }
 0x346   :  { %5777 = vmatpush.bf16.msrb.mxu1 %v12486_v17  ;;  %v5567_v11 = vmul.f32 %v11559_v9, %v5564_v23  ;;  %vm5572_vm0 = vweird.f32 %v11559_v9  ;;  %v4494_v32 = vpop.f32.mrf.mxu1  ;;  %v11561_v44 = vpop.eup %11560 }
 0x347   :  { %vm5573_vm2 = vmor %vm5571_vm1, %vm5572_vm0 }
 0x348   :  { %5765 = vmatpush.bf16.msrb.mxu0 %v12496_v6  ;;  %v5568_v0 = vsub.f32 1.0, %v5567_v11 }
 0x34a   :  { %5778 = vmatpush.bf16.msrb.mxu1 %v12499_v43  ;;  %v5569_v15 = vmul.f32 %v11559_v9, %v5568_v0 }
 0x34c   :  { %5766 = vmatpush.bf16.msrb.mxu0 %v12504_v21  ;;  %v5570_v36 = vadd.f32 %v11559_v9, %v5569_v15  ;;  %v14435_v15 = vld [vmem:[#allocation136_spill] sm:$0xff] }
 0x34e   :  { %5779 = vmatpush.bf16.msrb.mxu1 %v12507_v28  ;;  %v5574_v39 = vsel %vm5573_vm2, %v11559_v9, %v5570_v36  ;;  %v14434_v9 = vld [vmem:[#allocation53_spill] sm:$0xff]  ;;  %v14438_v36 = vld [vmem:[#allocation55_spill] sm:$0xff] }
 0x34f   :  { %v5579_v11 = vsel %vm5576_vm3, %v5578_v63, %v5574_v39  ;;  %v14439_v63 = vld [vmem:[#allocation139_spill] sm:$0xff]  ;;  %v14440_v39 = vld [vmem:[#allocation56_spill] sm:$0xff] }
 0x350   :  { %5767 = vmatpush.bf16.msrb.mxu0 %v12510_v41  ;;  %v5604_v60 = vmul.f32 %v11561_v44, %v5579_v11  ;;  %v14441_v11 = vld [vmem:[#allocation58_spill] sm:$0xff] }
 0x352   :  { %5780 = vmatpush.bf16.msrb.mxu1 %v12513_v58  ;;  %v13051_v0 = vpack.c.bf16 %v5604_v60, %v5604_v60 }
 0x354   :  { %5768 = vmatpush.bf16.msrb.mxu0 %v12516_v57  ;;  %5744 = vmatmul.bf16.vlgmr.msra.gmra.mxu2 %v13051_v0 }
 0x355   :  { %5841 = vmatpush.bf16.msra.mxu2 %v12806_v27  ;;  %v14451_v27 = vld [vmem:[#allocation65_spill] sm:$0xff] }
 0x356   :  { %5781 = vmatpush.bf16.msrb.mxu1 %v12519_v12 }
 0x358   :  { %5769 = vmatpush.bf16.msrb.mxu0 %v12526_v19 }
 0x359   :  { %5842 = vmatpush.bf16.msra.mxu2 %v12813_v49  ;;  %v14448_v49 = vld [vmem:[#allocation146_spill] sm:$0xff] }
 0x35a   :  { %5782 = vmatpush.bf16.msrb.mxu1 %v12530_v13 }
 0x35c   :  { %5770 = vmatpush.bf16.msrb.mxu0 %v12535_v16  ;;  %v5299_v23 = vpop.f32.mrf.mxu0 }
 0x35d   :  { %5843 = vmatpush.bf16.msra.mxu2 %v12821_v3  ;;  %v14442_v3 = vld [vmem:[#allocation142_spill] sm:$0xff] }
 0x35e   :  { %5783 = vmatpush.bf16.msrb.mxu1 %v12540_v22  ;;  %v5312_v60 = vpop.f32.mrf.mxu1 }
 0x35f   :  { %5771 = vmatmul.bf16.vlgmr.msrb.gmra.mxu0 %v13051_v0  ;;  %v5313_v51 = vadd.f32 %v5312_v60, %v5299_v23  ;;  %v14443_v23 = vld [vmem:[#allocation59_spill] sm:$0xff]  ;;  %v14444_v60 = vld [vmem:[#allocation60_spill] sm:$0xff] }
 0x360   :  { %5815 = vmatpush.bf16.msra.mxu0 %v12542_v47 }
 0x361   :  { %5844 = vmatpush.bf16.msra.mxu2 %v14435_v15  ;;  %v5473_v32 = vadd.f32 %v5313_v51, %v14437_v7  ;;  %v14445_v15 = vld [vmem:[#allocation144_spill] sm:$0xff]  ;;  %v14446_v51 = vld [vmem:[#allocation61_spill] sm:$0xff] }
 0x362   :  { %5828 = vmatpush.bf16.msra.mxu1 %v12544_v5  ;;  %v14447_v7 = vld [vmem:[#allocation64_spill] sm:$0xff] }
 0x364   :  { %5816 = vmatpush.bf16.msra.mxu0 %v12550_v34  ;;  %5797 = vmatmul.bf16.vlgmr.msrb.gmra.mxu2 %v13051_v0  ;;  %v5301_v44 = vpop.f32.mrf.mxu0 }
 0x365   :  { %5845 = vmatpush.bf16.msra.mxu2 %v14439_v63  ;;  %v14449_v63 = vld [vmem:[#allocation66_spill] sm:$0xff]  ;;  %v14450_v44 = vld [vmem:[#allocation148_spill] sm:$0xff] }
 0x366   :  { %5829 = vmatpush.bf16.msra.mxu1 %v12553_v37  ;;  %v5314_v20 = vpop.f32.mrf.mxu1 }
 0x367   :  { %v14452_v20 = vld [vmem:[#allocation68_spill] sm:$0xff] }
 0x368   :  { %5817 = vmatpush.bf16.msra.mxu0 %v12559_v45 }
 0x369   :  { %5846 = vmatpush.bf16.msra.mxu2 %v14442_v3  ;;  %v14453_v3 = vld [vmem:[#allocation150_spill] sm:$0xff] }
 0x36a   :  { %5830 = vmatpush.bf16.msra.mxu1 %v12562_v40 }
 0x36c   :  { %5818 = vmatpush.bf16.msra.mxu0 %v14434_v9 }
 0x36d   :  { %5847 = vmatpush.bf16.msra.mxu2 %v14445_v15  ;;  %v10412_v15 = vmul.f32 -1.442695, %v5473_v32  ;;  %v14460_v32 = vld [vmem:[#allocation157_spill] sm:$0xff] }
 0x36e   :  { %5831 = vmatpush.bf16.msra.mxu1 %v14436_v30 }
 0x36f   :  { %11562 = vpow2.f32 %v10412_v15 }
 0x370   :  { %5819 = vmatpush.bf16.msra.mxu0 %v14438_v36 }
 0x371   :  { %5848 = vmatpush.bf16.msra.mxu2 %v14448_v49 }
 0x372   :  { %5832 = vmatpush.bf16.msra.mxu1 %v14440_v39 }
 0x374   :  { %5820 = vmatpush.bf16.msra.mxu0 %v14441_v11  ;;  %5849 = vmatmul.bf16.vlgmr.msra.gmra.mxu2 %v13051_v0 }
 0x375   :  { %5893 = vmatpush.bf16.msrb.mxu2 %v14450_v44 }
 0x376   :  { %5833 = vmatpush.bf16.msra.mxu1 %v14443_v23  ;;  %v11563_v23 = vpop.eup %11562 }
 0x377   :  { %v13096_v15 = vadd.f32 1.0, %v11563_v23 }
 0x378   :  { %5821 = vmatpush.bf16.msra.mxu0 %v14444_v60 }
 0x379   :  { %5894 = vmatpush.bf16.msrb.mxu2 %v14453_v3  ;;  %vm5508_vm8 = vweird.f32 %v13096_v15 }
 0x37a   :  { %5834 = vmatpush.bf16.msra.mxu1 %v14446_v51  ;;  %v14459_v51 = vld [vmem:[#allocation77_spill] sm:$0xff] }
 0x37c   :  { %5822 = vmatpush.bf16.msra.mxu0 %v14447_v7  ;;  %v5351_v49 = vpop.f32.mrf.mxu0 }
 0x37d   :  { %5895 = vmatpush.bf16.msrb.mxu2 %v14455_v25 }
 0x37e   :  { %5835 = vmatpush.bf16.msra.mxu1 %v14451_v27 }
 0x37f   :  { %5823 = vmatmul.bf16.vlgmr.msra.gmra.mxu0 %v13051_v0 }
 0x380   :  { %5867 = vmatpush.bf16.msrb.mxu0 %v14449_v63  ;;  %v5364_v63 = vpop.f32.mrf.mxu1 }
 0x381   :  { %v5365_v44 = vadd.f32 %v5364_v63, %v5351_v49  ;;  %5896 = vmatpush.bf16.msrb.mxu2 %v14457_v24  ;;  %v11431_v49 = vld [vmem:[#allocation12 + $0x70] sm:$0xff]  ;;  %v14462_v63 = vld [vmem:[#allocation160_spill] sm:$0xff] }
 0x383   :  { %v5475_v27 = vadd.f32 %v5365_v44, %v14458_v54  ;;  %v14463_v54 = vld [vmem:[#allocation82_spill] sm:$0xff] }
 0x384   :  { %5868 = vmatpush.bf16.msrb.mxu0 %v14452_v20  ;;  %v11432_v20 = vld [vmem:[#allocation12 + $0x78] sm:$0xff]  ;;  %v5353_v25 = vpop.f32.mrf.mxu0  ;;  %v11430_v44 = vld [vmem:[#allocation12 + $0x68] sm:$0xff] }
 0x385   :  { %v10414_v3 = vmul.f32 -1.442695, %v5475_v27  ;;  %5897 = vmatpush.bf16.msrb.mxu2 %v14460_v32  ;;  %5749 = vmatpush.bf16.msra.mxu3 %v11432_v20  ;;  %v11429_v25 = vld [vmem:[#allocation12 + $0x60] sm:$0xff] }
 0x387   :  { %11564 = vpow2.f32 %v10414_v3  ;;  %v14464_v3 = vld [vmem:[#allocation84_spill] sm:$0xff] }
 0x388   :  { %5869 = vmatpush.bf16.msrb.mxu0 %v14454_v31  ;;  %v14461_v31 = vld [vmem:[#allocation80_spill] sm:$0xff]  ;;  %11566 = vrcp.f32 %v13096_v15 }
 0x389   :  { %5898 = vmatpush.bf16.msrb.mxu2 %v14462_v63  ;;  %5750 = vmatpush.bf16.msra.mxu3 %v11431_v49  ;;  %v11428_v49 = vld [vmem:[#allocation12 + $0x58] sm:$0xff] }
 0x38c   :  { %5870 = vmatpush.bf16.msrb.mxu0 %v14456_v18  ;;  %v5366_v18 = vpop.f32.mrf.mxu1 }
 0x38d   :  { %v11565_v27 = vpop.eup %11564  ;;  %5899 = vmatpush.bf16.msrb.mxu2 %v12922_v61  ;;  %5751 = vmatpush.bf16.msra.mxu3 %v11430_v44  ;;  %v14465_v18 = vld [vmem:[#allocation86_spill] sm:$0xff] }
 0x38e   :  { %v5525_v20 = vadd.f32 1.0, %v11565_v27  ;;  %v11567_v23 = vpop.eup %11566  ;;  %v14466_v44 = vld [vmem:[#allocation90_spill] sm:$0xff] }
 0x38f   :  { %v5504_v27 = vmul.f32 %v11567_v23, %v13096_v15  ;;  %vm5509_vm6 = vweird.f32 %v11567_v23 }
 0x390   :  { %5871 = vmatpush.bf16.msrb.mxu0 %v14459_v51  ;;  %11568 = vrcp.f32 %v5525_v20  ;;  %v14468_v51 = vld [vmem:[#allocation94_spill] sm:$0xff]  ;;  %vm5546_vm5 = vweird.f32 %v5525_v20  ;;  %vm5510_vm9 = vmor %vm5508_vm8, %vm5509_vm6 }
 0x391   :  { %5900 = vmatpush.bf16.msrb.mxu2 %v12934_v8  ;;  %5752 = vmatpush.bf16.msra.mxu3 %v11429_v25  ;;  %v11427_v8 = vld [vmem:[#allocation12 + $0x50] sm:$0xff]  ;;  %v5505_v32 = vsub.f32 1.0, %v5504_v27  ;;  %v5552_v27 = vand.u32 2147483648, %v5525_v20 }
 0x394   :  { %5872 = vmatpush.bf16.msrb.mxu0 %v14461_v31  ;;  %5901 = vmatmul.bf16.vlgmr.msrb.gmra.mxu2 %v13051_v0  ;;  %v5506_v31 = vmul.f32 %v11567_v23, %v5505_v32  ;;  %v5514_v32 = vand.u32 2147483648, %v13096_v15 }
 0x395   :  { %5945 = vmatpush.bf16.msra.mxu2 %v12941_v50  ;;  %5753 = vmatpush.bf16.msra.mxu3 %v11428_v49 }
 0x396   :  { %v11569_v61 = vpop.eup %11568 }
 0x397   :  { %v5542_v63 = vmul.f32 %v11569_v61, %v5525_v20  ;;  %vm5547_vm4 = vweird.f32 %v11569_v61 }
 0x398   :  { %5873 = vmatpush.bf16.msrb.mxu0 %v14463_v54  ;;  %vm13119_vm7 = vmor %vm5546_vm5, %vm5547_vm4 }
 0x399   :  { %5946 = vmatpush.bf16.msra.mxu2 %v12969_v42  ;;  %v5543_v24 = vsub.f32 1.0, %v5542_v63  ;;  %5754 = vmatpush.bf16.msra.mxu3 %v11427_v8  ;;  %v14469_v63 = vld [vmem:[#allocation22_spill] sm:$0xff]  ;;  %v14470_v8 = vld [vmem:[#allocation97_spill] sm:$0xff] }
 0x39b   :  { %v5544_v25 = vmul.f32 %v11569_v61, %v5543_v24  ;;  %v5550_v24 = vand.u32 2147483647, %v5525_v20  ;;  %v5553_v20 = vor.u32 1.1754944e-38, %v5552_v27  ;;  %v14478_v27 = vld [vmem:[#allocation106_spill] sm:$0xff] }
 0x39c   :  { %5874 = vmatpush.bf16.msrb.mxu0 %v14464_v3  ;;  %v5403_v50 = vpop.f32.mrf.mxu0  ;;  %v11426_v3 = vld [vmem:[#allocation12 + $0x48] sm:$0xff] }
 0x39d   :  { %5947 = vmatpush.bf16.msra.mxu2 %v12978_v29  ;;  %5755 = vmatpush.bf16.msra.mxu3 %v11426_v3  ;;  %v5545_v49 = vadd.f32 %v11569_v61, %v5544_v25  ;;  %v5507_v29 = vadd.f32 %v11567_v23, %v5506_v31  ;;  %vm5551_vm10 = vcmp.eq.f32.partialorder %v5550_v24, 8.507059e+37  ;;  %v14474_v25 = vld [vmem:[#allocation100_spill] sm:$0xff]  ;;  %v14479_v24 = vld [vmem:[#allocation119_spill] sm:$0xff] }
 0x39e   :  { %v5416_v54 = vpop.f32.mrf.mxu1 }
 0x39f   :  { %5875 = vmatmul.bf16.vlgmr.msrb.gmra.mxu0 %v13051_v0  ;;  %v5549_v31 = vsel %vm13119_vm7, %v11569_v61, %v5545_v49 }
 0x3a0   :  { %5919 = vmatpush.bf16.msra.mxu0 %v14465_v18  ;;  %v14467_v18 = vld [vmem:[#allocation92_spill] sm:$0xff] }
 0x3a1   :  { %5948 = vmatpush.bf16.msra.mxu2 %v12987_v26  ;;  %v14476_v26 = vld [vmem:[#allocation104_spill] sm:$0xff] }
 0x3a4   :  { %5920 = vmatpush.bf16.msra.mxu0 %v14466_v44  ;;  %v5417_v44 = vadd.f32 %v5416_v54, %v5403_v50  ;;  %v5512_v50 = vand.u32 2147483647, %v13096_v15  ;;  %v14473_v54 = vld [vmem:[#allocation113_spill] sm:$0xff]  ;;  %v5405_v3 = vpop.f32.mrf.mxu0 }
 0x3a5   :  { %5949 = vmatpush.bf16.msra.mxu2 %v12996_v48  ;;  %v5554_v48 = vsel %vm5551_vm10, %v5553_v20, %v5549_v31  ;;  %v14482_v3 = vld [vmem:[#allocation127_spill] sm:$0xff] }
 0x3a6   :  { %v5477_v42 = vadd.f32 %v5417_v44, %v14469_v63  ;;  %v5511_v44 = vsel %vm5510_vm9, %v11567_v23, %v5507_v29  ;;  %v5515_v63 = vor.u32 1.1754944e-38, %v5514_v32  ;;  %vm5513_vm11 = vcmp.eq.f32.partialorder %v5512_v50, 8.507059e+37  ;;  %v14477_v23 = vld [vmem:[#allocation117_spill] sm:$0xff] }
 0x3a7   :  { %v5597_v61 = vmul.f32 0.0, %v5554_v48  ;;  %v14480_v48 = vld [vmem:[#allocation122_spill] sm:$0xff]  ;;  %v14481_v32 = vld [vmem:[#allocation125_spill] sm:$0xff] }
 0x3a8   :  { %5921 = vmatpush.bf16.msra.mxu0 %v14467_v18  ;;  %v11425_v18 = vld [vmem:[#allocation12 + $0x40] sm:$0xff]  ;;  %11570 = vtanh.f32 %v5477_v42  ;;  %v5418_v42 = vpop.f32.mrf.mxu1 }
 0x3a9   :  { %5756 = vmatpush.bf16.msra.mxu3 %v11425_v18  ;;  %5950 = vmatpush.bf16.msra.mxu2 %v13005_v59  ;;  %v14475_v18 = vld [vmem:[#allocation115_spill] sm:$0xff]  ;;  %v14505_v59 = vld [vmem:[#allocation153_spill] sm:$0xff] }
 0x3ac   :  { %5922 = vmatpush.bf16.msra.mxu0 %v14468_v51  ;;  %v5516_v51 = vsel %vm5513_vm11, %v5515_v63, %v5511_v44  ;;  %v14483_v44 = vld [vmem:[#allocation57_spill] sm:$0xff] }
 0x3ad   :  { %5802 = vmatpush.bf16.msrb.mxu3 %v14473_v54  ;;  %5951 = vmatpush.bf16.msra.mxu2 %v13013_v1 }
 0x3ae   :  { %v11571_v15 = vpop.eup %11570 }
 0x3af   :  { %v5599_v49 = vmul.f32 %v11571_v15, %v5516_v51  ;;  %v14484_v15 = vld [vmem:[#allocation129_spill] sm:$0xff] }
 0x3b0   :  { %5923 = vmatpush.bf16.msra.mxu0 %v14470_v8 }
 0x3b1   :  { %5803 = vmatpush.bf16.msrb.mxu3 %v14475_v18  ;;  %v13134_v29 = vadd.f32 %v5599_v49, %v5597_v61  ;;  %5952 = vmatpush.bf16.msra.mxu2 %v13021_v10  ;;  %v14504_v10 = vld [vmem:[#allocation91_spill] sm:$0xff] }
 0x3b4   :  { %5924 = vmatpush.bf16.msra.mxu0 %v14474_v25  ;;  %5953 = vmatmul.bf16.vlgmr.msra.gmra.mxu2 %v13051_v0 }
 0x3b5   :  { %5804 = vmatpush.bf16.msrb.mxu3 %v14477_v23  ;;  %6263 = vmatpush.bf16.msrb.mxu2 %v12477_v33  ;;  %v14503_v33 = vld [vmem:[#allocation151_spill] sm:$0xff] }
 0x3b8   :  { %5925 = vmatpush.bf16.msra.mxu0 %v14476_v26 }
 0x3b9   :  { %5805 = vmatpush.bf16.msrb.mxu3 %v14479_v24  ;;  %6264 = vmatpush.bf16.msrb.mxu2 %v12483_v4  ;;  %v14501_v4 = vld [vmem:[#allocation149_spill] sm:$0xff] }
 0x3bc   :  { %5926 = vmatpush.bf16.msra.mxu0 %v14478_v27  ;;  %v5455_v50 = vpop.f32.mrf.mxu0 }
 0x3bd   :  { %5806 = vmatpush.bf16.msrb.mxu3 %v14480_v48  ;;  %6265 = vmatpush.bf16.msrb.mxu2 %v12496_v6  ;;  %v14500_v6 = vld [vmem:[#allocation85_spill] sm:$0xff] }
 0x3be   :  { %v5468_v31 = vpop.f32.mrf.mxu1 }
 0x3bf   :  { %5927 = vmatmul.bf16.vlgmr.msra.gmra.mxu0 %v13051_v0  ;;  %v5469_v20 = vadd.f32 %v5468_v31, %v5455_v50 }
 0x3c1   :  { %5807 = vmatpush.bf16.msrb.mxu3 %v14481_v32  ;;  %6266 = vmatpush.bf16.msrb.mxu2 %v12504_v21  ;;  %v5479_v42 = vadd.f32 %v5469_v20, %v14483_v44  ;;  %v14499_v21 = vld [vmem:[#allocation147_spill] sm:$0xff] }
 0x3c3   :  { %v10416_v63 = vmul.f32 -1.442695, %v5479_v42 }
 0x3c4   :  { %v5457_v0 = vpop.f32.mrf.mxu0 }
 0x3c5   :  { %5808 = vmatpush.bf16.msrb.mxu3 %v14482_v3  ;;  %6267 = vmatpush.bf16.msrb.mxu2 %v12510_v41  ;;  %11572 = vpow2.f32 %v10416_v63 }
 0x3c6   :  { %v5470_v51 = vpop.f32.mrf.mxu1 }
 0x3c9   :  { %5809 = vmatpush.bf16.msrb.mxu3 %v14484_v15  ;;  %6268 = vmatpush.bf16.msrb.mxu2 %v12516_v57 }
 0x3cb   :  { %v11573_v61 = vpop.eup %11572 }
 0x3cc   :  { %v5565_v49 = vadd.f32 1.0, %v11573_v61 }
 0x3cd   :  { %6269 = vmatpush.bf16.msrb.mxu2 %v12526_v19 }
 0x3ce   :  { %11574 = vrcp.f32 %v5565_v49  ;;  %v5592_v44 = vand.u32 2147483648, %v5565_v49  ;;  %v5590_v63 = vand.u32 2147483647, %v5565_v49  ;;  %vm5586_vm13 = vweird.f32 %v5565_v49 }
 0x3cf   :  { %11576 = vtanh.f32 %v13134_v29 }
 0x3d0   :  { %v5593_v61 = vor.u32 1.1754944e-38, %v5592_v44  ;;  %vm5591_vm15 = vcmp.eq.f32.partialorder %v5590_v63, 8.507059e+37  ;;  %v14486_v44 = vld [vmem:[#allocation67_spill] sm:$0xff]  ;;  %v14491_v63 = vld [vmem:[#allocation137_spill] sm:$0xff] }
 0x3d1   :  { %6270 = vmatpush.bf16.msrb.mxu2 %v12535_v16 }
 0x3d4   :  { %v11575_v50 = vpop.eup %11574 }
 0x3d5   :  { %6315 = vmatpush.bf16.msra.mxu2 %v12542_v47  ;;  %v5582_v31 = vmul.f32 %v11575_v50, %v5565_v49  ;;  %vm5587_vm12 = vweird.f32 %v11575_v50  ;;  %v14485_v49 = vld [vmem:[#allocation131_spill] sm:$0xff] }
 0x3d6   :  { %vm5588_vm14 = vmor %vm5586_vm13, %vm5587_vm12 }
 0x3d7   :  { %v5583_v20 = vsub.f32 1.0, %v5582_v31  ;;  %v13162_v16 = vpop.f32.mrf.mxu2 }
 0x3d9   :  { %6316 = vmatpush.bf16.msra.mxu2 %v12550_v34  ;;  %v5584_v42 = vmul.f32 %v11575_v50, %v5583_v20  ;;  %v11577_v34 = vpop.eup %11576 }
 0x3db   :  { %v5585_v51 = vadd.f32 %v11575_v50, %v5584_v42  ;;  %v14488_v42 = vld [vmem:[#allocation69_spill] sm:$0xff] }
 0x3dc   :  { %v13159_v0 = vpop.f32.mrf.mxu0 }
 0x3dd   :  { %6317 = vmatpush.bf16.msra.mxu2 %v12559_v45  ;;  %v5589_v47 = vsel %vm5588_vm14, %v11575_v50, %v5585_v51  ;;  %v14492_v51 = vld [vmem:[#allocation74_spill] sm:$0xff] }
 0x3de   :  { %v5594_v31 = vsel %vm5591_vm15, %v5593_v61, %v5589_v47  ;;  %v14487_v47 = vld [vmem:[#allocation133_spill] sm:$0xff]  ;;  %v14493_v61 = vld [vmem:[#allocation140_spill] sm:$0xff] }
 0x3df   :  { %v5605_v19 = vmul.f32 %v11577_v34, %v5594_v31  ;;  %v5747_v50 = vpop.f32.mrf.mxu2  ;;  %v14490_v34 = vld [vmem:[#allocation71_spill] sm:$0xff] }
 0x3e0   :  { %v14494_v31 = vld [vmem:[#allocation79_spill] sm:$0xff] }
 0x3e1   :  { %6318 = vmatpush.bf16.msra.mxu2 %v14434_v9  ;;  %v13165_v20 = vpack.c.bf16 %v5605_v19, %v5605_v19  ;;  %v14489_v19 = vld [vmem:[#allocation135_spill] sm:$0xff] }
 0x3e2   :  { %v14498_v9 = vld [vmem:[#allocation83_spill] sm:$0xff] }
 0x3e3   :  { %5757 = vmatmul.bf16.vlgmr.msra.gmra.mxu3 %v13165_v20  ;;  %5784 = vmatmul.bf16.vlgmr.msrb.gmra.mxu1 %v13165_v20 }
 0x3e4   :  { %v5774_v45 = vpop.f32.mrf.mxu0  ;;  %5854 = vmatpush.bf16.msra.mxu3 %v14485_v49  ;;  %5880 = vmatpush.bf16.msrb.mxu1 %v14486_v44 }
 0x3e5   :  { %6319 = vmatpush.bf16.msra.mxu2 %v14438_v36  ;;  %v14497_v36 = vld [vmem:[#allocation145_spill] sm:$0xff] }
 0x3e7   :  { %v13178_v45 = vpop.f32.mrf.mxu2 }
 0x3e8   :  { %5855 = vmatpush.bf16.msra.mxu3 %v14487_v47  ;;  %5881 = vmatpush.bf16.msrb.mxu1 %v14488_v42 }
 0x3e9   :  { %6320 = vmatpush.bf16.msra.mxu2 %v14441_v11  ;;  %v14495_v11 = vld [vmem:[#allocation143_spill] sm:$0xff] }
 0x3ec   :  { %5856 = vmatpush.bf16.msra.mxu3 %v14489_v19  ;;  %5882 = vmatpush.bf16.msrb.mxu1 %v14490_v34 }
 0x3ed   :  { %6321 = vmatpush.bf16.msra.mxu2 %v14444_v60 }
 0x3ef   :  { %v5800_v50 = vpop.f32.mrf.mxu2 }
 0x3f0   :  { %5857 = vmatpush.bf16.msra.mxu3 %v14491_v63  ;;  %5883 = vmatpush.bf16.msrb.mxu1 %v14492_v51  ;;  %v14502_v50 = vld [vmem:[#allocation89_spill] sm:$0xff] }
 0x3f1   :  { %6322 = vmatpush.bf16.msra.mxu2 %v14447_v7  ;;  %v14496_v7 = vld [vmem:[#allocation81_spill] sm:$0xff] }
 0x3f3   :  { %5810 = vmatmul.bf16.vlgmr.msrb.gmra.mxu3 %v13165_v20  ;;  %5836 = vmatmul.bf16.vlgmr.msra.gmra.mxu1 %v13165_v20 }
 0x3f4   :  { %5858 = vmatpush.bf16.msra.mxu3 %v14493_v61  ;;  %5884 = vmatpush.bf16.msrb.mxu1 %v14494_v31 }
 0x3f7   :  { %v13192_v57 = vpop.f32.mrf.mxu2 }
 0x3f8   :  { %5859 = vmatpush.bf16.msra.mxu3 %v14495_v11  ;;  %5885 = vmatpush.bf16.msrb.mxu1 %v14496_v7 }
 0x3fc   :  { %v13186_v60 = vpop.f32.mrf.mxu0  ;;  %5860 = vmatpush.bf16.msra.mxu3 %v14497_v36  ;;  %5886 = vmatpush.bf16.msrb.mxu1 %v14498_v9  ;;  %v14511_v36 = vld [vmem:[#allocation161_spill] sm:$0xff] }
 0x3ff   :  { %v5852_v1 = vpop.f32.mrf.mxu2 }
 0x400   :  { %5861 = vmatpush.bf16.msra.mxu3 %v14499_v21  ;;  %5887 = vmatpush.bf16.msrb.mxu1 %v14500_v6  ;;  %v14507_v21 = vld [vmem:[#allocation155_spill] sm:$0xff]  ;;  %v14508_v6 = vld [vmem:[#allocation96_spill] sm:$0xff]  ;;  %v14513_v1 = vld [vmem:[#allocation105_spill] sm:$0xff] }
 0x403   :  { %5862 = vmatmul.bf16.vlgmr.msra.gmra.mxu3 %v13165_v20  ;;  %5888 = vmatmul.bf16.vlgmr.msrb.gmra.mxu1 %v13165_v20 }
 0x404   :  { %v5826_v41 = vpop.f32.mrf.mxu0  ;;  %5906 = vmatpush.bf16.msrb.mxu3 %v14501_v4  ;;  %5932 = vmatpush.bf16.msra.mxu1 %v14502_v50  ;;  %v14509_v4 = vld [vmem:[#allocation158_spill] sm:$0xff]  ;;  %v14510_v50 = vld [vmem:[#allocation99_spill] sm:$0xff] }
 0x405   :  { %v14506_v41 = vld [vmem:[#allocation93_spill] sm:$0xff] }
 0x408   :  { %5907 = vmatpush.bf16.msrb.mxu3 %v14503_v33  ;;  %5933 = vmatpush.bf16.msra.mxu1 %v14504_v10  ;;  %v14512_v33 = vld [vmem:[#allocation101_spill] sm:$0xff] }
 0x40c   :  { %5908 = vmatpush.bf16.msrb.mxu3 %v14505_v59  ;;  %5934 = vmatpush.bf16.msra.mxu1 %v14506_v41 }
 0x410   :  { %5909 = vmatpush.bf16.msrb.mxu3 %v14507_v21  ;;  %5935 = vmatpush.bf16.msra.mxu1 %v14508_v6  ;;  %v14514_v6 = vld [vmem:[#allocation107_spill] sm:$0xff] }
 0x414   :  { %5910 = vmatpush.bf16.msrb.mxu3 %v14509_v4  ;;  %5936 = vmatpush.bf16.msra.mxu1 %v14510_v50 }
 0x417   :  { %v13214_v59 = vpop.f32.mrf.mxu2 }
 0x418   :  { %5911 = vmatpush.bf16.msrb.mxu3 %v14511_v36  ;;  %5937 = vmatpush.bf16.msra.mxu1 %v14512_v33 }
 0x41c   :  { %v13208_v9 = vpop.f32.mrf.mxu0  ;;  %5912 = vmatpush.bf16.msrb.mxu3 %v12925_v52  ;;  %5938 = vmatpush.bf16.msra.mxu1 %v14513_v1  ;;  %v14515_v1 = vld [vmem:[#allocation178_spill] sm:$0xff] }
 0x41f   :  { %v5904_v33 = vpop.f32.mrf.mxu2 }
 0x420   :  { %5913 = vmatpush.bf16.msrb.mxu3 %v12939_v53  ;;  %5939 = vmatpush.bf16.msra.mxu1 %v14514_v6 }
 0x423   :  { %5914 = vmatmul.bf16.vlgmr.msrb.gmra.mxu3 %v13165_v20  ;;  %5940 = vmatmul.bf16.vlgmr.msra.gmra.mxu1 %v13165_v20 }
 0x424   :  { %v5878_v41 = vpop.f32.mrf.mxu0  ;;  %5958 = vmatpush.bf16.msra.mxu3 %v12950_v14 }
 0x428   :  { %5959 = vmatpush.bf16.msra.mxu3 %v12972_v38 }
 0x42c   :  { %5960 = vmatpush.bf16.msra.mxu3 %v12981_v56 }
 0x430   :  { %5961 = vmatpush.bf16.msra.mxu3 %v12990_v35 }
 0x434   :  { %5962 = vmatpush.bf16.msra.mxu3 %v14515_v1 }
 0x437   :  { %v13229_v14 = vpop.f32.mrf.mxu2 }
 0x438   :  { %5963 = vmatpush.bf16.msra.mxu3 %v13008_v46 }
 0x43c   :  { %v13225_v41 = vpop.f32.mrf.mxu0  ;;  %5964 = vmatpush.bf16.msra.mxu3 %v13016_v62 }
 0x43f   :  { %v5956_v33 = vpop.f32.mrf.mxu2 }
 0x440   :  { %5965 = vmatpush.bf16.msra.mxu3 %v13024_v2 }
 0x443   :  { %5966 = vmatmul.bf16.vlgmr.msra.gmra.mxu3 %v13165_v20 }
 0x444   :  { %v5930_v6 = vpop.f32.mrf.mxu0  ;;  %6276 = vmatpush.bf16.msrb.mxu3 %v12479_v55 }
 0x445   :  { %v13242_v6 = vld [vmem:[#allocation10 + $0x8] sm:$0xff] }
 0x446   :  { %v2304_v20 = vperm.slane %v13242_v6, 0 }
 0x448   :  { %6277 = vmatpush.bf16.msrb.mxu3 %v12486_v17  ;;  %v11440_v17 = vld [vmem:[#allocation12 + $0xb8] sm:$0xff] }
 0x449   :  { %6236 = vmatpush.bf16.msrb.mxu0 %v11440_v17  ;;  %v14521_v17 = vld [vmem:[#allocation73_spill] sm:$0xff] }
 0x44c   :  { %6278 = vmatpush.bf16.msrb.mxu3 %v12499_v43 }
 0x450   :  { %6279 = vmatpush.bf16.msrb.mxu3 %v12507_v28  ;;  %v14516_v28 = vld [vmem:[#allocation27_spill] sm:$0xff] }
 0x451   :  { %v4090_v43 = vadd.f32 %v14516_v28, %v2304_v20  ;;  %v14519_v28 = vld [vmem:[#allocation59_spill] sm:$0xff]  ;;  %v11438_v20 = vld [vmem:[#allocation12 + $0xa8] sm:$0xff] }
 0x454   :  { %6280 = vmatpush.bf16.msrb.mxu3 %v12513_v58 }
 0x458   :  { %6281 = vmatpush.bf16.msrb.mxu3 %v12519_v12 }
 0x45c   :  { %6282 = vmatpush.bf16.msrb.mxu3 %v12530_v13 }
 0x460   :  { %6283 = vmatpush.bf16.msrb.mxu3 %v12540_v22  ;;  %v5785_v33 = vpop.f32.mrf.mxu1 }
 0x461   :  { %v5786_v58 = vadd.f32 %v5785_v33, %v13159_v0 }
 0x463   :  { %v5971_v12 = vadd.f32 %v5786_v58, %v4090_v43  ;;  %v2306_v58 = vperm.slane %v13242_v6, 2 }
 0x464   :  { %6328 = vmatpush.bf16.msra.mxu3 %v12544_v5 }
 0x465   :  { %v10481_v13 = vmul.f32 -1.442695, %v5971_v12 }
 0x466   :  { %v5758_v22 = vpop.f32.mrf.mxu3 }
 0x467   :  { %11578 = vpow2.f32 %v10481_v13  ;;  %v5759_v5 = vadd.f32 %v5758_v22, %v13162_v16  ;;  %v4116_v16 = vadd.f32 %v14521_v17, %v2306_v58  ;;  %v14523_v58 = vld [vmem:[#allocation28_spill] sm:$0xff] }
 0x468   :  { %6329 = vmatpush.bf16.msra.mxu3 %v12553_v37  ;;  %v5787_v55 = vpop.f32.mrf.mxu1  ;;  %v14517_v37 = vld [vmem:[#allocation31_spill] sm:$0xff] }
 0x469   :  { %v13253_v2 = vadd.f32 %v5759_v5, %v14517_v37  ;;  %v14520_v55 = vld [vmem:[#allocation61_spill] sm:$0xff] }
 0x46a   :  { %v11437_v5 = vld [vmem:[#allocation12 + $0xa0] sm:$0xff] }
 0x46b   :  { %14518 = vst [vmem:[#allocation21_spill] sm:$0xff] %v13253_v2  ;;  %v11434_v2 = vld [vmem:[#allocation12 + $0x88] sm:$0xff] }
 0x46c   :  { %6330 = vmatpush.bf16.msra.mxu3 %v12562_v40  ;;  %v11439_v40 = vld [vmem:[#allocation12 + $0xb0] sm:$0xff] }
 0x46d   :  { %6237 = vmatpush.bf16.msrb.mxu0 %v11439_v40  ;;  %v11579_v43 = vpop.eup %11578  ;;  %v14522_v40 = vld [vmem:[#allocation65_spill] sm:$0xff] }
 0x46e   :  { %v5985_v12 = vadd.f32 1.0, %v11579_v43  ;;  %v5760_v0 = vpop.f32.mrf.mxu3  ;;  %v2305_v43 = vperm.slane %v13242_v6, 1 }
 0x470   :  { %6331 = vmatpush.bf16.msra.mxu3 %v14436_v30  ;;  %11580 = vrcp.f32 %v5985_v12  ;;  %v5837_v13 = vpop.f32.mrf.mxu1  ;;  %v4103_v17 = vadd.f32 %v14523_v58, %v2305_v43  ;;  %v11433_v43 = vld [vmem:[#allocation12 + $0x80] sm:$0xff]  ;;  %v5998_v58 = vand.u32 2147483648, %v5985_v12  ;;  %vm5992_vm1 = vweird.f32 %v5985_v12 }
 0x471   :  { %6238 = vmatpush.bf16.msrb.mxu0 %v11438_v20  ;;  %v5838_v22 = vadd.f32 %v5837_v13, %v13186_v60  ;;  %v11435_v60 = vld [vmem:[#allocation12 + $0x90] sm:$0xff] }
 0x473   :  { %v5973_v37 = vadd.f32 %v5838_v22, %v4116_v16 }
 0x474   :  { %6332 = vmatpush.bf16.msra.mxu3 %v14440_v39  ;;  %v11436_v39 = vld [vmem:[#allocation12 + $0x98] sm:$0xff] }
 0x475   :  { %6239 = vmatpush.bf16.msrb.mxu0 %v11437_v5  ;;  %v10483_v33 = vmul.f32 -1.442695, %v5973_v37  ;;  %v2308_v5 = vperm.slane %v13242_v6, 4 }
 0x476   :  { %v5811_v0 = vpop.f32.mrf.mxu3 }
 0x477   :  { %11582 = vpow2.f32 %v10483_v33  ;;  %v5812_v20 = vadd.f32 %v5811_v0, %v13178_v45  ;;  %v14524_v45 = vld [vmem:[#allocation38_spill] sm:$0xff] }
 0x478   :  { %6333 = vmatpush.bf16.msra.mxu3 %v14519_v28  ;;  %v11581_v28 = vpop.eup %11580 }
 0x479   :  { %v5988_v30 = vmul.f32 %v11581_v28, %v5985_v12  ;;  %6240 = vmatpush.bf16.msrb.mxu0 %v11436_v39  ;;  %v5972_v16 = vadd.f32 %v5812_v20, %v4103_v17  ;;  %vm5993_vm0 = vweird.f32 %v11581_v28  ;;  %v14525_v17 = vld [vmem:[#allocation112_spill] sm:$0xff] }
 0x47a   :  { %vm13269_vm2 = vmor %vm5992_vm1, %vm5993_vm0 }
 0x47b   :  { %v5989_v13 = vsub.f32 1.0, %v5988_v30  ;;  %v10482_v46 = vmul.f32 -1.442695, %v5972_v16  ;;  %v2307_v30 = vperm.slane %v13242_v6, 3 }
 0x47c   :  { %6334 = vmatpush.bf16.msra.mxu3 %v14520_v55  ;;  %v5839_v55 = vpop.f32.mrf.mxu1 }
 0x47d   :  { %6241 = vmatpush.bf16.msrb.mxu0 %v11435_v60  ;;  %v11583_v22 = vpop.eup %11582  ;;  %v5990_v62 = vmul.f32 %v11581_v28, %v5989_v13  ;;  %v4142_v55 = vadd.f32 %v14524_v45, %v2308_v5  ;;  %v14528_v13 = vld [vmem:[#allocation78_spill] sm:$0xff]  ;;  %v5999_v5 = vor.u32 1.1754944e-38, %v5998_v58 }
 0x47e   :  { %v6023_v37 = vadd.f32 1.0, %v11583_v22  ;;  %v4129_v16 = vadd.f32 %v14528_v13, %v2307_v30  ;;  %v11447_v58 = vld [vmem:[#allocation12 + $0xf0] sm:$0xff] }
 0x47f   :  { %v5991_v20 = vadd.f32 %v11581_v28, %v5990_v62 }
 0x480   :  { %6335 = vmatpush.bf16.msra.mxu3 %v14522_v40  ;;  %v5813_v40 = vpop.f32.mrf.mxu3  ;;  %11584 = vrcp.f32 %v6023_v37  ;;  %v6034_v30 = vand.u32 2147483647, %v6023_v37  ;;  %vm6030_vm5 = vweird.f32 %v6023_v37 }
 0x481   :  { %6242 = vmatpush.bf16.msrb.mxu0 %v11434_v2  ;;  %11586 = vpow2.f32 %v10482_v46  ;;  %v5996_v40 = vand.u32 2147483647, %v5985_v12  ;;  %v5995_v62 = vsel %vm13269_vm2, %v11581_v28, %v5991_v20  ;;  %v14530_v20 = vld [vmem:[#allocation116_spill] sm:$0xff] }
 0x482   :  { %vm6035_vm7 = vcmp.eq.f32.partialorder %v6034_v30, 8.507059e+37 }
 0x483   :  { %vm5997_vm3 = vcmp.eq.f32.partialorder %v5996_v40, 8.507059e+37 }
 0x484   :  { %v5889_v33 = vpop.f32.mrf.mxu1 }
 0x485   :  { %v5890_v39 = vadd.f32 %v5889_v33, %v13208_v9  ;;  %6243 = vmatpush.bf16.msrb.mxu0 %v11433_v43 }
 0x486   :  { %v11585_v60 = vpop.eup %11584 }
 0x487   :  { %v5975_v0 = vadd.f32 %v5890_v39, %v4142_v55  ;;  %v6026_v22 = vmul.f32 %v11585_v60, %v6023_v37  ;;  %v14529_v55 = vld [vmem:[#allocation114_spill] sm:$0xff]  ;;  %v11448_v39 = vld [vmem:[#allocation12 + $0xf8] sm:$0xff]  ;;  %v11587_v43 = vpop.eup %11586  ;;  %vm6031_vm4 = vweird.f32 %v11585_v60 }
 0x488   :  { %v5863_v9 = vpop.f32.mrf.mxu3  ;;  %6249 = vmatpush.bf16.msrb.mxu1 %v11448_v39  ;;  %vm6032_vm6 = vmor %vm6030_vm5, %vm6031_vm4  ;;  %v13279_v2 = vadd.f32 1.0, %v11587_v43  ;;  %v11444_v39 = vld [vmem:[#allocation12 + $0xd8] sm:$0xff]  ;;  %v2310_v43 = vperm.slane %v13242_v6, 6 }
 0x489   :  { %11588 = vtanh.f32 %v5975_v0  ;;  %6289 = vmatpush.bf16.msra.mxu0 %v14525_v17  ;;  %v5864_v46 = vadd.f32 %v5863_v9, %v13192_v57  ;;  %v6027_v12 = vsub.f32 1.0, %v6026_v22  ;;  %v6036_v0 = vand.u32 2147483648, %v6023_v37 }
 0x48a   :  { %v6000_v17 = vsel %vm5997_vm3, %v5999_v5, %v5995_v62  ;;  %v14531_v62 = vld [vmem:[#allocation172_spill] sm:$0xff]  ;;  %v14532_v5 = vld [vmem:[#allocation118_spill] sm:$0xff]  ;;  %vm6007_vm12 = vweird.f32 %v13279_v2 }
 0x48b   :  { %v5974_v45 = vadd.f32 %v5864_v46, %v4129_v16  ;;  %v6028_v35 = vmul.f32 %v11585_v60, %v6027_v12  ;;  %v6037_v40 = vor.u32 1.1754944e-38, %v6036_v0  ;;  %v11445_v12 = vld [vmem:[#allocation12 + $0xe0] sm:$0xff] }
 0x48c   :  { %v5891_v33 = vpop.f32.mrf.mxu1  ;;  %6250 = vmatpush.bf16.msrb.mxu1 %v11447_v58  ;;  %v11443_v58 = vld [vmem:[#allocation12 + $0xd0] sm:$0xff] }
 0x48d   :  { %6290 = vmatpush.bf16.msra.mxu0 %v14529_v55  ;;  %v10484_v13 = vmul.f32 -1.442695, %v5974_v45  ;;  %v6029_v57 = vadd.f32 %v11585_v60, %v6028_v35  ;;  %v14533_v33 = vld [vmem:[#allocation121_spill] sm:$0xff]  ;;  %v14534_v45 = vld [vmem:[#allocation124_spill] sm:$0xff] }
 0x48f   :  { %v11589_v1 = vpop.eup %11588  ;;  %11590 = vpow2.f32 %v10484_v13  ;;  %v6033_v16 = vsel %vm6032_vm6, %v11585_v60, %v6029_v57  ;;  %v14535_v57 = vld [vmem:[#allocation126_spill] sm:$0xff] }
 0x490   :  { %v6097_v28 = vmul.f32 %v11589_v1, %v6000_v17  ;;  %v5865_v9 = vpop.f32.mrf.mxu3  ;;  %v6038_v22 = vsel %vm6035_vm7, %v6037_v40, %v6033_v16  ;;  %v11446_v1 = vld [vmem:[#allocation12 + $0xe8] sm:$0xff]  ;;  %11592 = vrcp.f32 %v13279_v2  ;;  %v14536_v40 = vld [vmem:[#allocation95_spill] sm:$0xff] }
 0x491   :  { %6291 = vmatpush.bf16.msra.mxu0 %v14530_v20  ;;  %v6095_v46 = vmul.f32 %v6038_v22, %v14531_v62  ;;  %6251 = vmatpush.bf16.msrb.mxu1 %v11446_v1  ;;  %v4168_v9 = vadd.f32 %v14536_v40, %v2310_v43  ;;  %v14538_v20 = vld [vmem:[#allocation39_spill] sm:$0xff] }
 0x493   :  { %v13284_v37 = vadd.f32 %v6097_v28, %v6095_v46  ;;  %v2309_v46 = vperm.slane %v13242_v6, 5 }
 0x495   :  { %6292 = vmatpush.bf16.msra.mxu0 %v14532_v5  ;;  %v11591_v35 = vpop.eup %11590  ;;  %6252 = vmatpush.bf16.msrb.mxu1 %v11445_v12  ;;  %v14537_v12 = vld [vmem:[#allocation128_spill] sm:$0xff] }
 0x496   :  { %v6024_v17 = vadd.f32 1.0, %v11591_v35  ;;  %v11593_v60 = vpop.eup %11592 }
 0x497   :  { %v6003_v0 = vmul.f32 %v11593_v60, %v13279_v2  ;;  %vm6008_vm10 = vweird.f32 %v11593_v60 }
 0x498   :  { %11594 = vrcp.f32 %v6024_v17  ;;  %vm6045_vm9 = vweird.f32 %v6024_v17  ;;  %vm6009_vm13 = vmor %vm6007_vm12, %vm6008_vm10 }
 0x499   :  { %6293 = vmatpush.bf16.msra.mxu0 %v14533_v33  ;;  %6253 = vmatpush.bf16.msrb.mxu1 %v11444_v39  ;;  %v6004_v22 = vsub.f32 1.0, %v6003_v0 }
 0x49b   :  { %v6005_v5 = vmul.f32 %v11593_v60, %v6004_v22 }
 0x49d   :  { %6294 = vmatpush.bf16.msra.mxu0 %v14534_v45  ;;  %6254 = vmatpush.bf16.msrb.mxu1 %v11443_v58  ;;  %v11442_v45 = vld [vmem:[#allocation12 + $0xc8] sm:$0xff]  ;;  %v11441_v58 = vld [vmem:[#allocation12 + $0xc0] sm:$0xff]  ;;  %v6006_v40 = vadd.f32 %v11593_v60, %v6005_v5 }
 0x49e   :  { %v11595_v30 = vpop.eup %11594 }
 0x49f   :  { %v6041_v13 = vmul.f32 %v11595_v30, %v6024_v17  ;;  %vm6046_vm8 = vweird.f32 %v11595_v30 }
 0x4a0   :  { %v5941_v28 = vpop.f32.mrf.mxu1  ;;  %vm13297_vm11 = vmor %vm6045_vm9, %vm6046_vm8 }
 0x4a1   :  { %6295 = vmatpush.bf16.msra.mxu0 %v14535_v57  ;;  %v5942_v16 = vadd.f32 %v5941_v28, %v13225_v41  ;;  %v6042_v62 = vsub.f32 1.0, %v6041_v13  ;;  %v4155_v57 = vadd.f32 %v14538_v20, %v2309_v46  ;;  %6255 = vmatpush.bf16.msrb.mxu1 %v11442_v45  ;;  %v6051_v13 = vand.u32 2147483648, %v6024_v17 }
 0x4a2   :  { %v6013_v20 = vand.u32 2147483648, %v13279_v2 }
 0x4a3   :  { %v5977_v1 = vadd.f32 %v5942_v16, %v4168_v9  ;;  %v6043_v35 = vmul.f32 %v11595_v30, %v6042_v62  ;;  %v6049_v9 = vand.u32 2147483647, %v6024_v17  ;;  %v6052_v45 = vor.u32 1.1754944e-38, %v6051_v13 }
 0x4a4   :  { %v6014_v62 = vor.u32 1.1754944e-38, %v6013_v20  ;;  %v2311_v16 = vperm.slane %v13242_v6, 7  ;;  %v14543_v6 = vld [vmem:[#allocation66_spill] sm:$0xff] }
 0x4a5   :  { %6296 = vmatpush.bf16.msra.mxu0 %v14537_v12  ;;  %v10485_v39 = vmul.f32 -1.442695, %v5977_v1  ;;  %v6044_v41 = vadd.f32 %v11595_v30, %v6043_v35  ;;  %6256 = vmatpush.bf16.msrb.mxu1 %v11441_v58  ;;  %vm6050_vm14 = vcmp.eq.f32.partialorder %v6049_v9, 8.507059e+37 }
 0x4a6   :  { %v5915_v33 = vpop.f32.mrf.mxu3 }
 0x4a7   :  { %11596 = vpow2.f32 %v10485_v39  ;;  %v5916_v43 = vadd.f32 %v5915_v33, %v13214_v59  ;;  %v6011_v59 = vand.u32 2147483647, %v13279_v2  ;;  %v6048_v33 = vsel %vm13297_vm11, %v11595_v30, %v6044_v41 }
 0x4a8   :  { %v5943_v0 = vpop.f32.mrf.mxu1  ;;  %v6053_v46 = vsel %vm6050_vm14, %v6052_v45, %v6048_v33  ;;  %v14541_v45 = vld [vmem:[#allocation98_spill] sm:$0xff] }
 0x4a9   :  { %v5976_v28 = vadd.f32 %v5916_v43, %v4155_v57  ;;  %6302 = vmatpush.bf16.msra.mxu1 %v14473_v54  ;;  %v6010_v57 = vsel %vm6009_vm13, %v11593_v60, %v6006_v40  ;;  %vm6012_vm15 = vcmp.eq.f32.partialorder %v6011_v59, 8.507059e+37  ;;  %v6096_v35 = vmul.f32 %v6053_v46, %v13134_v29 }
 0x4aa   :  { %v6015_v2 = vsel %vm6012_vm15, %v6014_v62, %v6010_v57  ;;  %v4181_v57 = vadd.f32 %v14541_v45, %v2311_v16  ;;  %v14542_v62 = vld [vmem:[#allocation130_spill] sm:$0xff]  ;;  %v14554_v45 = vld [vmem:[#allocation144_spill] sm:$0xff] }
 0x4ab   :  { %11598 = vtanh.f32 %v5976_v28 }
 0x4ad   :  { %v11597_v5 = vpop.eup %11596  ;;  %6303 = vmatpush.bf16.msra.mxu1 %v14475_v18 }
 0x4ae   :  { %v6063_v17 = vadd.f32 1.0, %v11597_v5  ;;  %v5917_v22 = vpop.f32.mrf.mxu3 }
 0x4b0   :  { %11600 = vrcp.f32 %v6063_v17  ;;  %v6076_v0 = vand.u32 2147483648, %v6063_v17  ;;  %v6074_v28 = vand.u32 2147483647, %v6063_v17  ;;  %vm6070_vm1 = vweird.f32 %v6063_v17 }
 0x4b1   :  { %v11599_v1 = vpop.eup %11598  ;;  %6304 = vmatpush.bf16.msra.mxu1 %v14477_v23  ;;  %11602 = vtanh.f32 %v13284_v37 }
 0x4b2   :  { %v6098_v30 = vmul.f32 %v11599_v1, %v6015_v2  ;;  %v6077_v29 = vor.u32 1.1754944e-38, %v6076_v0  ;;  %vm6075_vm3 = vcmp.eq.f32.partialorder %v6074_v28, 8.507059e+37  ;;  %v14544_v1 = vld [vmem:[#allocation132_spill] sm:$0xff]  ;;  %v14551_v28 = vld [vmem:[#allocation77_spill] sm:$0xff] }
 0x4b3   :  { %v14545_v2 = vld [vmem:[#allocation68_spill] sm:$0xff] }
 0x4b4   :  { %v13309_v39 = vadd.f32 %v6098_v30, %v6096_v35  ;;  %v14546_v35 = vld [vmem:[#allocation134_spill] sm:$0xff]  ;;  %v14549_v0 = vld [vmem:[#allocation72_spill] sm:$0xff] }
 0x4b5   :  { %6305 = vmatpush.bf16.msra.mxu1 %v14479_v24  ;;  %v14547_v30 = vld [vmem:[#allocation70_spill] sm:$0xff] }
 0x4b6   :  { %v11601_v43 = vpop.eup %11600 }
 0x4b7   :  { %v6066_v41 = vmul.f32 %v11601_v43, %v6063_v17  ;;  %vm6071_vm0 = vweird.f32 %v11601_v43  ;;  %v11603_v9 = vpop.eup %11602 }
 0x4b8   :  { %vm6072_vm2 = vmor %vm6070_vm1, %vm6071_vm0 }
 0x4b9   :  { %v6067_v60 = vsub.f32 1.0, %v6066_v41  ;;  %6306 = vmatpush.bf16.msra.mxu1 %v14480_v48 }
 0x4bb   :  { %v6068_v13 = vmul.f32 %v11601_v43, %v6067_v60  ;;  %v14548_v60 = vld [vmem:[#allocation136_spill] sm:$0xff] }
 0x4bd   :  { %v6069_v58 = vadd.f32 %v11601_v43, %v6068_v13  ;;  %6307 = vmatpush.bf16.msra.mxu1 %v14481_v32  ;;  %v14550_v13 = vld [vmem:[#allocation139_spill] sm:$0xff] }
 0x4bf   :  { %v6073_v40 = vsel %vm6072_vm2, %v11601_v43, %v6069_v58 }
 0x4c0   :  { %v6078_v20 = vsel %vm6075_vm3, %v6077_v29, %v6073_v40  ;;  %v14552_v40 = vld [vmem:[#allocation142_spill] sm:$0xff] }
 0x4c1   :  { %v6103_v59 = vmul.f32 %v11603_v9, %v6078_v20  ;;  %6308 = vmatpush.bf16.msra.mxu1 %v14482_v3  ;;  %v14553_v9 = vld [vmem:[#allocation80_spill] sm:$0xff] }
 0x4c3   :  { %v13317_v33 = vpack.c.bf16 %v6103_v59, %v6103_v59 }
 0x4c5   :  { %6244 = vmatmul.bf16.vlgmr.msrb.gmra.mxu0 %v13317_v33  ;;  %6271 = vmatmul.bf16.vlgmr.msrb.gmra.mxu2 %v13317_v33 }
 0x4c6   :  { %v5967_v5 = vpop.f32.mrf.mxu3  ;;  %6341 = vmatpush.bf16.msrb.mxu0 %v14542_v62  ;;  %6367 = vmatpush.bf16.msrb.mxu2 %v14543_v6 }
 0x4c7   :  { %v5968_v22 = vadd.f32 %v5967_v5, %v13229_v14  ;;  %6309 = vmatpush.bf16.msra.mxu1 %v14484_v15 }
 0x4c9   :  { %v5978_v17 = vadd.f32 %v5968_v22, %v4181_v57  ;;  %v14555_v57 = vld [vmem:[#allocation82_spill] sm:$0xff] }
 0x4ca   :  { %6342 = vmatpush.bf16.msrb.mxu0 %v14544_v1  ;;  %6368 = vmatpush.bf16.msrb.mxu2 %v14545_v2 }
 0x4cb   :  { %v10486_v46 = vmul.f32 -1.442695, %v5978_v17 }
 0x4cd   :  { %11604 = vpow2.f32 %v10486_v46 }
 0x4ce   :  { %v5969_v14 = vpop.f32.mrf.mxu3  ;;  %6343 = vmatpush.bf16.msrb.mxu0 %v14546_v35  ;;  %6369 = vmatpush.bf16.msrb.mxu2 %v14547_v30 }
 0x4cf   :  { %v14556_v14 = vld [vmem:[#allocation146_spill] sm:$0xff] }
 0x4d2   :  { %6344 = vmatpush.bf16.msrb.mxu0 %v14548_v60  ;;  %6370 = vmatpush.bf16.msrb.mxu2 %v14549_v0 }
 0x4d3   :  { %v11605_v43 = vpop.eup %11604 }
 0x4d4   :  { %v6064_v41 = vadd.f32 1.0, %v11605_v43  ;;  %v14557_v43 = vld [vmem:[#allocation84_spill] sm:$0xff] }
 0x4d5   :  { %6297 = vmatmul.bf16.vlgmr.msra.gmra.mxu0 %v13317_v33  ;;  %6323 = vmatmul.bf16.vlgmr.msra.gmra.mxu2 %v13317_v33 }
 0x4d6   :  { %11606 = vrcp.f32 %v6064_v41  ;;  %6345 = vmatpush.bf16.msrb.mxu0 %v14550_v13  ;;  %6371 = vmatpush.bf16.msrb.mxu2 %v14551_v28  ;;  %v6091_v20 = vand.u32 2147483648, %v6064_v41  ;;  %v6089_v5 = vand.u32 2147483647, %v6064_v41  ;;  %vm6085_vm5 = vweird.f32 %v6064_v41 }
 0x4d7   :  { %11608 = vtanh.f32 %v13309_v39 }
 0x4d8   :  { %v6092_v17 = vor.u32 1.1754944e-38, %v6091_v20  ;;  %vm6090_vm7 = vcmp.eq.f32.partialorder %v6089_v5, 8.507059e+37  ;;  %v14560_v20 = vld [vmem:[#allocation150_spill] sm:$0xff] }
 0x4d9   :  { %v14565_v5 = vld [vmem:[#allocation94_spill] sm:$0xff] }
 0x4da   :  { %6346 = vmatpush.bf16.msrb.mxu0 %v14552_v40  ;;  %6372 = vmatpush.bf16.msrb.mxu2 %v14553_v9  ;;  %v14558_v40 = vld [vmem:[#allocation148_spill] sm:$0xff] }
 0x4dc   :  { %v11607_v58 = vpop.eup %11606 }
 0x4dd   :  { %v6081_v29 = vmul.f32 %v11607_v58, %v6064_v41  ;;  %vm6086_vm4 = vweird.f32 %v11607_v58 }
 0x4de   :  { %6347 = vmatpush.bf16.msrb.mxu0 %v14554_v45  ;;  %6373 = vmatpush.bf16.msrb.mxu2 %v14555_v57  ;;  %vm6087_vm6 = vmor %vm6085_vm5, %vm6086_vm4 }
 0x4df   :  { %v6082_v16 = vsub.f32 1.0, %v6081_v29  ;;  %v11609_v29 = vpop.eup %11608 }
 0x4e1   :  { %v6083_v59 = vmul.f32 %v11607_v58, %v6082_v16  ;;  %v14559_v16 = vld [vmem:[#allocation86_spill] sm:$0xff] }
 0x4e2   :  { %6348 = vmatpush.bf16.msrb.mxu0 %v14556_v14  ;;  %6374 = vmatpush.bf16.msrb.mxu2 %v14557_v43 }
 0x4e3   :  { %v6084_v22 = vadd.f32 %v11607_v58, %v6083_v59  ;;  %v14562_v59 = vld [vmem:[#allocation152_spill] sm:$0xff] }
 0x4e5   :  { %v6088_v46 = vsel %vm6087_vm6, %v11607_v58, %v6084_v22  ;;  %6349 = vmatmul.bf16.vlgmr.msrb.gmra.mxu0 %v13317_v33  ;;  %6375 = vmatmul.bf16.vlgmr.msrb.gmra.mxu2 %v13317_v33  ;;  %v14561_v58 = vld [vmem:[#allocation90_spill] sm:$0xff]  ;;  %v14566_v22 = vld [vmem:[#allocation157_spill] sm:$0xff] }
 0x4e6   :  { %v6093_v9 = vsel %vm6090_vm7, %v6092_v17, %v6088_v46  ;;  %6393 = vmatpush.bf16.msra.mxu0 %v14558_v40  ;;  %6419 = vmatpush.bf16.msra.mxu2 %v14559_v16  ;;  %v14567_v17 = vld [vmem:[#allocation160_spill] sm:$0xff]  ;;  %v14568_v46 = vld [vmem:[#allocation162_spill] sm:$0xff] }
 0x4e7   :  { %v6104_v28 = vmul.f32 %v11609_v29, %v6093_v9  ;;  %v14563_v9 = vld [vmem:[#allocation92_spill] sm:$0xff] }
 0x4e8   :  { %v14569_v29 = vld [vmem:[#allocation164_spill] sm:$0xff] }
 0x4e9   :  { %v13348_v41 = vpack.c.bf16 %v6104_v28, %v6104_v28  ;;  %v14564_v28 = vld [vmem:[#allocation154_spill] sm:$0xff] }
 0x4ea   :  { %6394 = vmatpush.bf16.msra.mxu0 %v14560_v20  ;;  %6420 = vmatpush.bf16.msra.mxu2 %v14561_v58 }
 0x4eb   :  { %6257 = vmatmul.bf16.vlgmr.msrb.gmra.mxu1 %v13348_v41  ;;  %6284 = vmatmul.bf16.vlgmr.msrb.gmra.mxu3 %v13348_v41 }
 0x4ec   :  { %6354 = vmatpush.bf16.msrb.mxu1 %v14485_v49  ;;  %6380 = vmatpush.bf16.msrb.mxu3 %v14486_v44 }
 0x4ee   :  { %6395 = vmatpush.bf16.msra.mxu0 %v14562_v59  ;;  %6421 = vmatpush.bf16.msra.mxu2 %v14563_v9 }
 0x4f0   :  { %6355 = vmatpush.bf16.msrb.mxu1 %v14487_v47  ;;  %6381 = vmatpush.bf16.msrb.mxu3 %v14488_v42 }
 0x4f2   :  { %6396 = vmatpush.bf16.msra.mxu0 %v14564_v28  ;;  %6422 = vmatpush.bf16.msra.mxu2 %v14565_v5  ;;  %v14629_v28 = vld [vmem:[#allocation59_spill] sm:$0xff] }
 0x4f4   :  { %6356 = vmatpush.bf16.msrb.mxu1 %v14489_v19  ;;  %6382 = vmatpush.bf16.msrb.mxu3 %v14490_v34 }
 0x4f6   :  { %6397 = vmatpush.bf16.msra.mxu0 %v14566_v22  ;;  %6423 = vmatpush.bf16.msra.mxu2 %v14470_v8  ;;  %v14572_v8 = vld [vmem:[#allocation83_spill] sm:$0xff]  ;;  %v14575_v22 = vld [vmem:[#allocation85_spill] sm:$0xff] }
 0x4f8   :  { %6357 = vmatpush.bf16.msrb.mxu1 %v14491_v63  ;;  %6383 = vmatpush.bf16.msrb.mxu3 %v14492_v51 }
 0x4fa   :  { %6398 = vmatpush.bf16.msra.mxu0 %v14567_v17  ;;  %6424 = vmatpush.bf16.msra.mxu2 %v14474_v25  ;;  %v14570_v25 = vld [vmem:[#allocation166_spill] sm:$0xff]  ;;  %v14571_v17 = vld [vmem:[#allocation145_spill] sm:$0xff] }
 0x4fb   :  { %6310 = vmatmul.bf16.vlgmr.msra.gmra.mxu1 %v13348_v41  ;;  %6336 = vmatmul.bf16.vlgmr.msra.gmra.mxu3 %v13348_v41 }
 0x4fc   :  { %6358 = vmatpush.bf16.msrb.mxu1 %v14493_v61  ;;  %6384 = vmatpush.bf16.msrb.mxu3 %v14494_v31 }
 0x4fe   :  { %6399 = vmatpush.bf16.msra.mxu0 %v14568_v46  ;;  %6425 = vmatpush.bf16.msra.mxu2 %v14476_v26  ;;  %v14573_v46 = vld [vmem:[#allocation168_spill] sm:$0xff]  ;;  %v14574_v26 = vld [vmem:[#allocation147_spill] sm:$0xff] }
 0x500   :  { %6359 = vmatpush.bf16.msrb.mxu1 %v14495_v11  ;;  %6385 = vmatpush.bf16.msrb.mxu3 %v14496_v7  ;;  %v14576_v7 = vld [vmem:[#allocation149_spill] sm:$0xff]  ;;  %v14628_v11 = vld [vmem:[#allocation56_spill] sm:$0xff] }
 0x502   :  { %6400 = vmatpush.bf16.msra.mxu0 %v14569_v29  ;;  %6426 = vmatpush.bf16.msra.mxu2 %v14478_v27  ;;  %v14577_v29 = vld [vmem:[#allocation89_spill] sm:$0xff]  ;;  %v14578_v27 = vld [vmem:[#allocation170_spill] sm:$0xff] }
 0x504   :  { %6360 = vmatpush.bf16.msrb.mxu1 %v14571_v17  ;;  %6386 = vmatpush.bf16.msrb.mxu3 %v14572_v8  ;;  %v14580_v8 = vld [vmem:[#allocation173_spill] sm:$0xff] }
 0x505   :  { %6401 = vmatmul.bf16.vlgmr.msra.gmra.mxu0 %v13317_v33  ;;  %6427 = vmatmul.bf16.vlgmr.msra.gmra.mxu2 %v13317_v33 }
 0x506   :  { %6445 = vmatpush.bf16.msrb.mxu0 %v14570_v25  ;;  %v14579_v25 = vld [vmem:[#allocation151_spill] sm:$0xff] }
 0x508   :  { %6361 = vmatpush.bf16.msrb.mxu1 %v14574_v26  ;;  %6387 = vmatpush.bf16.msrb.mxu3 %v14575_v22  ;;  %v14582_v26 = vld [vmem:[#allocation93_spill] sm:$0xff]  ;;  %v14583_v22 = vld [vmem:[#allocation176_spill] sm:$0xff] }
 0x50a   :  { %6446 = vmatpush.bf16.msrb.mxu0 %v14573_v46  ;;  %v14581_v46 = vld [vmem:[#allocation153_spill] sm:$0xff] }
 0x50b   :  { %6362 = vmatmul.bf16.vlgmr.msrb.gmra.mxu1 %v13348_v41  ;;  %6388 = vmatmul.bf16.vlgmr.msrb.gmra.mxu3 %v13348_v41 }
 0x50c   :  { %6406 = vmatpush.bf16.msra.mxu1 %v14576_v7  ;;  %6432 = vmatpush.bf16.msra.mxu3 %v14577_v29  ;;  %v14584_v29 = vld [vmem:[#allocation96_spill] sm:$0xff] }
 0x50e   :  { %6447 = vmatpush.bf16.msrb.mxu0 %v14578_v27  ;;  %v14585_v27 = vld [vmem:[#allocation179_spill] sm:$0xff] }
 0x510   :  { %6407 = vmatpush.bf16.msra.mxu1 %v14579_v25  ;;  %6433 = vmatpush.bf16.msra.mxu3 %v14504_v10  ;;  %v14586_v25 = vld [vmem:[#allocation181_spill] sm:$0xff] }
 0x512   :  { %6448 = vmatpush.bf16.msrb.mxu0 %v14580_v8  ;;  %v14587_v8 = vld [vmem:[#allocation101_spill] sm:$0xff] }
 0x514   :  { %6408 = vmatpush.bf16.msra.mxu1 %v14581_v46  ;;  %6434 = vmatpush.bf16.msra.mxu3 %v14582_v26  ;;  %v14588_v46 = vld [vmem:[#allocation183_spill] sm:$0xff] }
 0x515   :  { %v14589_v26 = vld [vmem:[#allocation23_spill] sm:$0xff] }
 0x516   :  { %6449 = vmatpush.bf16.msrb.mxu0 %v14583_v22  ;;  %v14590_v22 = vld [vmem:[#allocation105_spill] sm:$0xff] }
 0x518   :  { %6409 = vmatpush.bf16.msra.mxu1 %v14507_v21  ;;  %6435 = vmatpush.bf16.msra.mxu3 %v14584_v29  ;;  %v14624_v21 = vld [vmem:[#allocation21_spill] sm:$0xff] }
 0x51a   :  { %6450 = vmatpush.bf16.msrb.mxu0 %v14585_v27  ;;  %v14591_v27 = vld [vmem:[#allocation25_spill] sm:$0xff] }
 0x51c   :  { %6410 = vmatpush.bf16.msra.mxu1 %v14509_v4  ;;  %6436 = vmatpush.bf16.msra.mxu3 %v14510_v50  ;;  %v14592_v50 = vld [vmem:[#allocation107_spill] sm:$0xff]  ;;  %v14619_v4 = vld [vmem:[#allocation41_spill] sm:$0xff] }
 0x51e   :  { %6451 = vmatpush.bf16.msrb.mxu0 %v14586_v25  ;;  %v14593_v25 = vld [vmem:[#allocation167_spill] sm:$0xff] }
 0x520   :  { %6411 = vmatpush.bf16.msra.mxu1 %v14511_v36  ;;  %6437 = vmatpush.bf16.msra.mxu3 %v14587_v8  ;;  %v14615_v8 = vld [vmem:[#allocation35_spill] sm:$0xff]  ;;  %v14616_v36 = vld [vmem:[#allocation60_spill] sm:$0xff] }
 0x522   :  { %6452 = vmatpush.bf16.msrb.mxu0 %v14588_v46  ;;  %v14594_v46 = vld [vmem:[#allocation29_spill] sm:$0xff] }
 0x524   :  { %6412 = vmatpush.bf16.msra.mxu1 %v12925_v52  ;;  %6438 = vmatpush.bf16.msra.mxu3 %v14590_v22  ;;  %v14601_v22 = vld [vmem:[#allocation180_spill] sm:$0xff]  ;;  %v14602_v52 = vld [vmem:[#allocation42_spill] sm:$0xff] }
 0x525   :  { %6453 = vmatmul.bf16.vlgmr.msrb.gmra.mxu0 %v13317_v33  ;;  %v14596_v33 = vld [vmem:[#allocation34_spill] sm:$0xff] }
 0x526   :  { %6763 = vmatpush.bf16.msra.mxu0 %v14589_v26  ;;  %v14595_v26 = vld [vmem:[#allocation32_spill] sm:$0xff] }
 0x528   :  { %6413 = vmatpush.bf16.msra.mxu1 %v12939_v53  ;;  %6439 = vmatpush.bf16.msra.mxu3 %v14592_v50  ;;  %v14598_v53 = vld [vmem:[#allocation36_spill] sm:$0xff]  ;;  %v14599_v50 = vld [vmem:[#allocation178_spill] sm:$0xff] }
 0x52a   :  { %6764 = vmatpush.bf16.msra.mxu0 %v14591_v27  ;;  %v14597_v27 = vld [vmem:[#allocation174_spill] sm:$0xff] }
 0x52b   :  { %6414 = vmatmul.bf16.vlgmr.msra.gmra.mxu1 %v13348_v41  ;;  %6440 = vmatmul.bf16.vlgmr.msra.gmra.mxu3 %v13348_v41 }
 0x52c   :  { %6458 = vmatpush.bf16.msrb.mxu1 %v14593_v25  ;;  %v14600_v25 = vld [vmem:[#allocation40_spill] sm:$0xff] }
 0x52e   :  { %6765 = vmatpush.bf16.msra.mxu0 %v14594_v46  ;;  %v14603_v46 = vld [vmem:[#allocation182_spill] sm:$0xff] }
 0x530   :  { %6459 = vmatpush.bf16.msrb.mxu1 %v12972_v38  ;;  %v14604_v38 = vld [vmem:[#allocation45_spill] sm:$0xff] }
 0x532   :  { %6766 = vmatpush.bf16.msra.mxu0 %v14595_v26  ;;  %v14605_v26 = vld [vmem:[#allocation184_spill] sm:$0xff] }
 0x534   :  { %6460 = vmatpush.bf16.msrb.mxu1 %v12981_v56  ;;  %v14606_v56 = vld [vmem:[#allocation47_spill] sm:$0xff] }
 0x536   :  { %6767 = vmatpush.bf16.msra.mxu0 %v14596_v33  ;;  %v14607_v33 = vld [vmem:[#allocation24_spill] sm:$0xff] }
 0x538   :  { %6461 = vmatpush.bf16.msrb.mxu1 %v14597_v27  ;;  %v14611_v27 = vld [vmem:[#allocation30_spill] sm:$0xff] }
 0x53a   :  { %6768 = vmatpush.bf16.msra.mxu0 %v14598_v53 }
 0x53c   :  { %6462 = vmatpush.bf16.msrb.mxu1 %v14599_v50  ;;  %v14608_v50 = vld [vmem:[#allocation49_spill] sm:$0xff] }
 0x53e   :  { %6769 = vmatpush.bf16.msra.mxu0 %v14600_v25  ;;  %v14609_v25 = vld [vmem:[#allocation26_spill] sm:$0xff] }
 0x540   :  { %6463 = vmatpush.bf16.msrb.mxu1 %v14601_v22  ;;  %v14610_v22 = vld [vmem:[#allocation53_spill] sm:$0xff] }
 0x542   :  { %6770 = vmatpush.bf16.msra.mxu0 %v14602_v52  ;;  %v6245_v53 = vpop.f32.mrf.mxu0 }
 0x544   :  { %6464 = vmatpush.bf16.msrb.mxu1 %v14603_v46 }
 0x546   :  { %6815 = vmatpush.bf16.msrb.mxu0 %v14604_v38  ;;  %v14612_v38 = vld [vmem:[#allocation55_spill] sm:$0xff] }
 0x548   :  { %6465 = vmatpush.bf16.msrb.mxu1 %v14605_v26  ;;  %v6272_v52 = vpop.f32.mrf.mxu2  ;;  %v14613_v26 = vld [vmem:[#allocation33_spill] sm:$0xff] }
 0x54a   :  { %6816 = vmatpush.bf16.msrb.mxu0 %v14606_v56  ;;  %v6247_v46 = vpop.f32.mrf.mxu0  ;;  %v14614_v56 = vld [vmem:[#allocation58_spill] sm:$0xff] }
 0x54b   :  { %6466 = vmatmul.bf16.vlgmr.msrb.gmra.mxu1 %v13348_v41 }
 0x54c   :  { %6776 = vmatpush.bf16.msra.mxu1 %v14607_v33 }
 0x54e   :  { %6817 = vmatpush.bf16.msrb.mxu0 %v14608_v50  ;;  %v14617_v50 = vld [vmem:[#allocation37_spill] sm:$0xff] }
 0x550   :  { %6777 = vmatpush.bf16.msra.mxu1 %v14609_v25  ;;  %v6274_v33 = vpop.f32.mrf.mxu2  ;;  %v14618_v25 = vld [vmem:[#allocation64_spill] sm:$0xff] }
 0x552   :  { %6818 = vmatpush.bf16.msrb.mxu0 %v14610_v22  ;;  %v6298_v41 = vpop.f32.mrf.mxu0 }
 0x554   :  { %6778 = vmatpush.bf16.msra.mxu1 %v14611_v27  ;;  %v14620_v27 = vld [vmem:[#allocation44_spill] sm:$0xff] }
 0x556   :  { %6819 = vmatpush.bf16.msrb.mxu0 %v14612_v38  ;;  %v14621_v38 = vld [vmem:[#allocation46_spill] sm:$0xff] }
 0x558   :  { %6779 = vmatpush.bf16.msra.mxu1 %v14613_v26  ;;  %v6324_v22 = vpop.f32.mrf.mxu2 }
 0x55a   :  { %6820 = vmatpush.bf16.msrb.mxu0 %v14614_v56  ;;  %v6300_v46 = vpop.f32.mrf.mxu0  ;;  %v14622_v56 = vld [vmem:[#allocation48_spill] sm:$0xff] }
 0x55c   :  { %6780 = vmatpush.bf16.msra.mxu1 %v14615_v8  ;;  %v13450_v8 = vld [vmem:[#allocation10 + $0x10] sm:$0xff] }
 0x55e   :  { %6821 = vmatpush.bf16.msrb.mxu0 %v14616_v36  ;;  %v14623_v36 = vld [vmem:[#allocation50_spill] sm:$0xff] }
 0x560   :  { %6781 = vmatpush.bf16.msra.mxu1 %v14617_v50  ;;  %v6326_v26 = vpop.f32.mrf.mxu2 }
 0x562   :  { %6822 = vmatpush.bf16.msrb.mxu0 %v14618_v25  ;;  %v6350_v33 = vpop.f32.mrf.mxu0  ;;  %v2312_v25 = vperm.slane %v13450_v8, 0 }
 0x564   :  { %6782 = vmatpush.bf16.msra.mxu1 %v14619_v4  ;;  %v14627_v4 = vld [vmem:[#allocation51_spill] sm:$0xff] }
 0x568   :  { %6783 = vmatpush.bf16.msra.mxu1 %v14620_v27  ;;  %v6258_v29 = vpop.f32.mrf.mxu1  ;;  %v13457_v46 = vpop.f32.mrf.mxu2  ;;  %v14626_v27 = vld [vmem:[#allocation54_spill] sm:$0xff] }
 0x569   :  { %v6259_v50 = vadd.f32 %v6258_v29, %v6245_v53  ;;  %v11456_v29 = vld [vmem:[#allocation12 + $0x138] sm:$0xff] }
 0x56a   :  { %6736 = vmatpush.bf16.msrb.mxu2 %v11456_v29  ;;  %v14633_v29 = vld [vmem:[#allocation108_spill] sm:$0xff] }
 0x56b   :  { %v13455_v10 = vadd.f32 %v6259_v50, %v14624_v21  ;;  %v2313_v21 = vperm.slane %v13450_v8, 1 }
 0x56c   :  { %6828 = vmatpush.bf16.msrb.mxu1 %v14621_v38  ;;  %v6352_v38 = vpop.f32.mrf.mxu0 }
 0x56d   :  { %14625 = vst [vmem:[#allocation43_spill] sm:$0xff] %v13455_v10  ;;  %v11455_v38 = vld [vmem:[#allocation12 + $0x130] sm:$0xff] }
 0x56e   :  { %v6285_v26 = vpop.f32.mrf.mxu3  ;;  %6737 = vmatpush.bf16.msrb.mxu2 %v11455_v38 }
 0x56f   :  { %v6286_v7 = vadd.f32 %v6285_v26, %v6272_v52  ;;  %v11454_v26 = vld [vmem:[#allocation12 + $0x128] sm:$0xff] }
 0x570   :  { %6829 = vmatpush.bf16.msrb.mxu1 %v14622_v56  ;;  %v4194_v56 = vadd.f32 %v14627_v4, %v2312_v25  ;;  %v6260_v17 = vpop.f32.mrf.mxu1  ;;  %v6378_v53 = vpop.f32.mrf.mxu2  ;;  %v14631_v4 = vld [vmem:[#allocation52_spill] sm:$0xff] }
 0x571   :  { %v4207_v52 = vadd.f32 %v14631_v4, %v2313_v21  ;;  %v14632_v53 = vld [vmem:[#allocation65_spill] sm:$0xff] }
 0x572   :  { %v6471_v5 = vadd.f32 %v6286_v7, %v4194_v56  ;;  %v2314_v56 = vperm.slane %v13450_v8, 2  ;;  %6738 = vmatpush.bf16.msrb.mxu2 %v11454_v26  ;;  %v11453_v21 = vld [vmem:[#allocation12 + $0x120] sm:$0xff] }
 0x574   :  { %6830 = vmatpush.bf16.msrb.mxu1 %v14623_v36  ;;  %v10551_v36 = vmul.f32 -1.442695, %v6471_v5 }
 0x576   :  { %11610 = vpow2.f32 %v10551_v36  ;;  %v6287_v50 = vpop.f32.mrf.mxu3  ;;  %6739 = vmatpush.bf16.msrb.mxu2 %v11453_v21 }
 0x577   :  { %v4220_v50 = vadd.f32 %v14633_v29, %v2314_v56  ;;  %v11451_v56 = vld [vmem:[#allocation12 + $0x110] sm:$0xff] }
 0x578   :  { %6831 = vmatpush.bf16.msrb.mxu1 %v14626_v27  ;;  %v6311_v10 = vpop.f32.mrf.mxu1  ;;  %v14630_v27 = vld [vmem:[#allocation61_spill] sm:$0xff] }
 0x579   :  { %v6312_v25 = vadd.f32 %v6311_v10, %v6298_v41 }
 0x57b   :  { %v6472_v7 = vadd.f32 %v6312_v25, %v4207_v52  ;;  %v11452_v25 = vld [vmem:[#allocation12 + $0x118] sm:$0xff] }
 0x57c   :  { %6832 = vmatpush.bf16.msrb.mxu1 %v14628_v11  ;;  %v11611_v17 = vpop.eup %11610  ;;  %6740 = vmatpush.bf16.msrb.mxu2 %v11452_v25  ;;  %v11464_v11 = vld [vmem:[#allocation12 + $0x178] sm:$0xff]  ;;  %v11450_v25 = vld [vmem:[#allocation12 + $0x108] sm:$0xff] }
 0x57d   :  { %v13467_v5 = vadd.f32 1.0, %v11611_v17  ;;  %v10552_v41 = vmul.f32 -1.442695, %v6472_v7  ;;  %v2315_v17 = vperm.slane %v13450_v8, 3  ;;  %v14634_v7 = vld [vmem:[#allocation109_spill] sm:$0xff]  ;;  %6749 = vmatpush.bf16.msrb.mxu3 %v11464_v11 }
 0x57e   :  { %v6337_v36 = vpop.f32.mrf.mxu3 }
 0x57f   :  { %11612 = vrcp.f32 %v13467_v5  ;;  %v4233_v26 = vadd.f32 %v14634_v7, %v2315_v17  ;;  %vm6492_vm9 = vweird.f32 %v13467_v5 }
 0x580   :  { %6833 = vmatpush.bf16.msrb.mxu1 %v14629_v28  ;;  %v6313_v28 = vpop.f32.mrf.mxu1  ;;  %6741 = vmatpush.bf16.msrb.mxu2 %v11451_v56  ;;  %v14635_v56 = vld [vmem:[#allocation62_spill] sm:$0xff] }
 0x582   :  { %v13472_v38 = vpop.f32.mrf.mxu0 }
 0x584   :  { %6834 = vmatpush.bf16.msrb.mxu1 %v14630_v27  ;;  %v6338_v27 = vadd.f32 %v6337_v36, %v6324_v22  ;;  %6742 = vmatpush.bf16.msrb.mxu2 %v11450_v25  ;;  %v6496_v25 = vand.u32 2147483647, %v13467_v5 }
 0x585   :  { %v13474_v52 = vpop.eup %11612 }
 0x586   :  { %v6473_v10 = vadd.f32 %v6338_v27, %v4220_v50  ;;  %v6488_v22 = vmul.f32 %v13474_v52, %v13467_v5  ;;  %vm6493_vm8 = vweird.f32 %v13474_v52  ;;  %vm6497_vm12 = vcmp.eq.f32.partialorder %v6496_v25, 8.507059e+37 }
 0x587   :  { %vm13497_vm10 = vmor %vm6492_vm9, %vm6493_vm8 }
 0x588   :  { %6835 = vmatpush.bf16.msrb.mxu1 %v14632_v53  ;;  %v10553_v4 = vmul.f32 -1.442695, %v6473_v10  ;;  %v6339_v53 = vpop.f32.mrf.mxu3  ;;  %v13479_v28 = vpop.f32.mrf.mxu2  ;;  %v6489_v21 = vsub.f32 1.0, %v6488_v22 }
 0x589   :  { %v6363_v27 = vpop.f32.mrf.mxu1  ;;  %v2316_v53 = vperm.slane %v13450_v8, 4 }
 0x58a   :  { %11614 = vpow2.f32 %v10553_v4  ;;  %v6364_v36 = vadd.f32 %v6363_v27, %v6350_v33  ;;  %v6404_v29 = vpop.f32.mrf.mxu0  ;;  %v6490_v33 = vmul.f32 %v13474_v52, %v6489_v21  ;;  %v11463_v27 = vld [vmem:[#allocation12 + $0x170] sm:$0xff]  ;;  %v11462_v21 = vld [vmem:[#allocation12 + $0x168] sm:$0xff] }
 0x58b   :  { %11616 = vpow2.f32 %v10552_v41  ;;  %v4246_v22 = vadd.f32 %v14635_v56, %v2316_v53  ;;  %v11449_v29 = vld [vmem:[#allocation12 + $0x100] sm:$0xff]  ;;  %6750 = vmatpush.bf16.msrb.mxu3 %v11463_v27 }
 0x58c   :  { %v6474_v10 = vadd.f32 %v6364_v36, %v4233_v26  ;;  %6743 = vmatpush.bf16.msrb.mxu2 %v11449_v29  ;;  %v6491_v11 = vadd.f32 %v13474_v52, %v6490_v33  ;;  %v11460_v33 = vld [vmem:[#allocation12 + $0x158] sm:$0xff] }
 0x58e   :  { %v10554_v31 = vmul.f32 -1.442695, %v6474_v10  ;;  %v6495_v56 = vsel %vm13497_vm10, %v13474_v52, %v6491_v11  ;;  %v14639_v11 = vld [vmem:[#allocation116_spill] sm:$0xff] }
 0x58f   :  { %6751 = vmatpush.bf16.msrb.mxu3 %v11462_v21 }
 0x590   :  { %v11615_v50 = vpop.eup %11614  ;;  %v6389_v17 = vpop.f32.mrf.mxu3 }
 0x591   :  { %v11617_v4 = vpop.eup %11616  ;;  %v6523_v41 = vadd.f32 1.0, %v11615_v50  ;;  %v6390_v7 = vadd.f32 %v6389_v17, %v13457_v46  ;;  %v6430_v26 = vpop.f32.mrf.mxu2 }
 0x592   :  { %v13483_v61 = vadd.f32 1.0, %v11617_v4  ;;  %v6365_v36 = vpop.f32.mrf.mxu1  ;;  %v6498_v4 = vand.u32 2147483648, %v13467_v5 }
 0x593   :  { %11618 = vrcp.f32 %v6523_v41  ;;  %v6475_v50 = vadd.f32 %v6390_v7, %v4246_v22  ;;  %v11461_v7 = vld [vmem:[#allocation12 + $0x160] sm:$0xff]  ;;  %v6536_v26 = vand.u32 2147483648, %v6523_v41  ;;  %vm6530_vm13 = vweird.f32 %v6523_v41 }
 0x594   :  { %11620 = vpow2.f32 %v10554_v31  ;;  %v14636_v31 = vld [vmem:[#allocation112_spill] sm:$0xff]  ;;  %v6499_v5 = vor.u32 1.1754944e-38, %v6498_v4  ;;  %6752 = vmatpush.bf16.msrb.mxu3 %v11461_v7  ;;  %vm6507_vm4 = vweird.f32 %v13483_v61 }
 0x595   :  { %11622 = vrcp.f32 %v13483_v61  ;;  %6789 = vmatpush.bf16.msra.mxu2 %v14636_v31 }
 0x596   :  { %11624 = vtanh.f32 %v6475_v50  ;;  %v6534_v50 = vand.u32 2147483647, %v6523_v41 }
 0x598   :  { %v6391_v22 = vpop.f32.mrf.mxu3  ;;  %vm6535_vm15 = vcmp.eq.f32.partialorder %v6534_v50, 8.507059e+37  ;;  %6753 = vmatpush.bf16.msrb.mxu3 %v11460_v33 }
 0x599   :  { %v11619_v10 = vpop.eup %11618  ;;  %6790 = vmatpush.bf16.msra.mxu2 %v14529_v55  ;;  %v6537_v22 = vor.u32 1.1754944e-38, %v6536_v26 }
 0x59a   :  { %v11621_v46 = vpop.eup %11620  ;;  %v6526_v53 = vmul.f32 %v11619_v10, %v6523_v41  ;;  %vm6531_vm11 = vweird.f32 %v11619_v10 }
 0x59b   :  { %v13495_v17 = vadd.f32 1.0, %v11621_v46  ;;  %v13506_v36 = vpop.eup %11622  ;;  %v6500_v46 = vsel %vm6497_vm12, %v6499_v5, %v6495_v56  ;;  %vm6532_vm14 = vmor %vm6530_vm13, %vm6531_vm11  ;;  %v14640_v5 = vld [vmem:[#allocation118_spill] sm:$0xff] }
 0x59c   :  { %v6527_v27 = vsub.f32 1.0, %v6526_v53  ;;  %v11625_v21 = vpop.eup %11624  ;;  %v6503_v4 = vmul.f32 %v13506_v36, %v13483_v61  ;;  %vm6508_vm2 = vweird.f32 %v13506_v36 }
 0x59d   :  { %11626 = vrcp.f32 %v13495_v17  ;;  %v6597_v52 = vmul.f32 %v11625_v21, %v6500_v46  ;;  %6791 = vmatpush.bf16.msra.mxu2 %v14639_v11  ;;  %vm6545_vm1 = vweird.f32 %v13495_v17  ;;  %vm6509_vm5 = vmor %vm6507_vm4, %vm6508_vm2 }
 0x59e   :  { %v6528_v29 = vmul.f32 %v11619_v10, %v6527_v27  ;;  %v6504_v21 = vsub.f32 1.0, %v6503_v4 }
 0x5a0   :  { %v6529_v53 = vadd.f32 %v11619_v10, %v6528_v29  ;;  %v11459_v29 = vld [vmem:[#allocation12 + $0x150] sm:$0xff] }
 0x5a1   :  { %6792 = vmatpush.bf16.msra.mxu2 %v14640_v5  ;;  %6754 = vmatpush.bf16.msrb.mxu3 %v11459_v29  ;;  %v2318_v29 = vperm.slane %v13450_v8, 6 }
 0x5a2   :  { %v6533_v55 = vsel %vm6532_vm14, %v11619_v10, %v6529_v53  ;;  %v13513_v41 = vpop.f32.mrf.mxu0  ;;  %v2317_v10 = vperm.slane %v13450_v8, 5  ;;  %v14641_v53 = vld [vmem:[#allocation121_spill] sm:$0xff] }
 0x5a3   :  { %v11627_v27 = vpop.eup %11626  ;;  %v6538_v25 = vsel %vm6535_vm15, %v6537_v22, %v6533_v55  ;;  %v11458_v55 = vld [vmem:[#allocation12 + $0x148] sm:$0xff]  ;;  %v6505_v22 = vmul.f32 %v13506_v36, %v6504_v21 }
 0x5a4   :  { %v6541_v7 = vmul.f32 %v11627_v27, %v13495_v17  ;;  %v6595_v56 = vmul.f32 %v6538_v25, %v13284_v37  ;;  %v14642_v37 = vld [vmem:[#allocation63_spill] sm:$0xff]  ;;  %vm6546_vm0 = vweird.f32 %v11627_v27 }
 0x5a5   :  { %6793 = vmatpush.bf16.msra.mxu2 %v14641_v53  ;;  %6755 = vmatpush.bf16.msrb.mxu3 %v11458_v55  ;;  %v4259_v25 = vadd.f32 %v14642_v37, %v2317_v10  ;;  %v6506_v21 = vadd.f32 %v13506_v36, %v6505_v22  ;;  %v6549_v10 = vand.u32 2147483647, %v13495_v17  ;;  %vm13530_vm3 = vmor %vm6545_vm1, %vm6546_vm0  ;;  %v14646_v22 = vld [vmem:[#allocation126_spill] sm:$0xff] }
 0x5a6   :  { %v6542_v46 = vsub.f32 1.0, %v6541_v7  ;;  %v13516_v26 = vadd.f32 %v6597_v52, %v6595_v56  ;;  %v14643_v52 = vld [vmem:[#allocation124_spill] sm:$0xff] }
 0x5a7   :  { %v11457_v56 = vld [vmem:[#allocation12 + $0x140] sm:$0xff]  ;;  %vm6550_vm6 = vcmp.eq.f32.partialorder %v6549_v10, 8.507059e+37 }
 0x5a8   :  { %v6543_v50 = vmul.f32 %v11627_v27, %v6542_v46  ;;  %v6415_v33 = vpop.f32.mrf.mxu1  ;;  %v6551_v46 = vand.u32 2147483648, %v13495_v17  ;;  %v14647_v17 = vld [vmem:[#allocation120_spill] sm:$0xff] }
 0x5a9   :  { %v6416_v5 = vadd.f32 %v6415_v33, %v13472_v38  ;;  %6794 = vmatpush.bf16.msra.mxu2 %v14643_v52  ;;  %6756 = vmatpush.bf16.msrb.mxu3 %v11457_v56  ;;  %v4272_v37 = vadd.f32 %v14647_v17, %v2318_v29  ;;  %v14648_v38 = vld [vmem:[#allocation123_spill] sm:$0xff] }
 0x5aa   :  { %v6544_v4 = vadd.f32 %v11627_v27, %v6543_v50  ;;  %v6456_v7 = vpop.f32.mrf.mxu0  ;;  %v6513_v50 = vand.u32 2147483648, %v13483_v61 }
 0x5ab   :  { %v6476_v53 = vadd.f32 %v6416_v5, %v4259_v25  ;;  %v6511_v5 = vand.u32 2147483647, %v13483_v61  ;;  %v6552_v25 = vor.u32 1.1754944e-38, %v6551_v46 }
 0x5ac   :  { %v6548_v55 = vsel %vm13530_vm3, %v11627_v27, %v6544_v4 }
 0x5ad   :  { %11628 = vtanh.f32 %v6476_v53  ;;  %6802 = vmatpush.bf16.msra.mxu3 %v14473_v54  ;;  %6795 = vmatpush.bf16.msra.mxu2 %v14646_v22  ;;  %v6510_v53 = vsel %vm6509_vm5, %v13506_v36, %v6506_v21  ;;  %v6514_v54 = vor.u32 1.1754944e-38, %v6513_v50  ;;  %v6553_v52 = vsel %vm6550_vm6, %v6552_v25, %v6548_v55 }
 0x5ae   :  { %v6441_v33 = vpop.f32.mrf.mxu3  ;;  %vm6512_vm7 = vcmp.eq.f32.partialorder %v6511_v5, 8.507059e+37  ;;  %v6596_v29 = vmul.f32 %v6553_v52, %v13309_v39 }
 0x5af   :  { %v6442_v7 = vadd.f32 %v6441_v33, %v13479_v28  ;;  %v6515_v27 = vsel %vm6512_vm7, %v6514_v54, %v6510_v53  ;;  %v2319_v54 = vperm.slane %v13450_v8, 7 }
 0x5b0   :  { %v6417_v56 = vpop.f32.mrf.mxu1 }
 0x5b1   :  { %v6477_v11 = vadd.f32 %v6442_v7, %v4272_v37  ;;  %6803 = vmatpush.bf16.msra.mxu3 %v14475_v18  ;;  %6796 = vmatpush.bf16.msra.mxu2 %v14537_v12  ;;  %v4285_v50 = vadd.f32 %v14648_v38, %v2319_v54 }
 0x5b3   :  { %v11629_v61 = vpop.eup %11628  ;;  %v10555_v4 = vmul.f32 -1.442695, %v6477_v11 }
 0x5b4   :  { %v6598_v46 = vmul.f32 %v11629_v61, %v6515_v27 }
 0x5b5   :  { %11630 = vpow2.f32 %v10555_v4  ;;  %6804 = vmatpush.bf16.msra.mxu3 %v14477_v23 }
 0x5b6   :  { %v13548_v28 = vadd.f32 %v6598_v46, %v6596_v29  ;;  %v6443_v36 = vpop.f32.mrf.mxu3 }
 0x5b9   :  { %6805 = vmatpush.bf16.msra.mxu3 %v14479_v24 }
 0x5bb   :  { %v11631_v21 = vpop.eup %11630 }
 0x5bc   :  { %v6563_v10 = vadd.f32 1.0, %v11631_v21 }
 0x5bd   :  { %6806 = vmatpush.bf16.msra.mxu3 %v14480_v48 }
 0x5be   :  { %11632 = vrcp.f32 %v6563_v10  ;;  %v6576_v33 = vand.u32 2147483648, %v6563_v10  ;;  %v6574_v25 = vand.u32 2147483647, %v6563_v10  ;;  %vm6570_vm9 = vweird.f32 %v6563_v10 }
 0x5bf   :  { %11634 = vtanh.f32 %v13516_v26 }
 0x5c0   :  { %v6577_v53 = vor.u32 1.1754944e-38, %v6576_v33  ;;  %vm6575_vm11 = vcmp.eq.f32.partialorder %v6574_v25, 8.507059e+37 }
 0x5c1   :  { %6807 = vmatpush.bf16.msra.mxu3 %v14481_v32 }
 0x5c4   :  { %v11633_v11 = vpop.eup %11632 }
 0x5c5   :  { %v6566_v39 = vmul.f32 %v11633_v11, %v6563_v10  ;;  %6808 = vmatpush.bf16.msra.mxu3 %v14482_v3  ;;  %vm6571_vm8 = vweird.f32 %v11633_v11 }
 0x5c6   :  { %vm6572_vm10 = vmor %vm6570_vm9, %vm6571_vm8 }
 0x5c7   :  { %v6567_v55 = vsub.f32 1.0, %v6566_v39 }
 0x5c8   :  { %v6467_v52 = vpop.f32.mrf.mxu1 }
 0x5c9   :  { %v6468_v5 = vadd.f32 %v6467_v52, %v13513_v41  ;;  %v6568_v37 = vmul.f32 %v11633_v11, %v6567_v55  ;;  %6809 = vmatpush.bf16.msra.mxu3 %v14484_v15  ;;  %v11635_v41 = vpop.eup %11634  ;;  %v14649_v55 = vld [vmem:[#allocation77_spill] sm:$0xff] }
 0x5cb   :  { %v6478_v17 = vadd.f32 %v6468_v5, %v4285_v50  ;;  %v6569_v7 = vadd.f32 %v11633_v11, %v6568_v37 }
 0x5cd   :  { %v10556_v8 = vmul.f32 -1.442695, %v6478_v17  ;;  %v6573_v56 = vsel %vm6572_vm10, %v11633_v11, %v6569_v7  ;;  %v14651_v7 = vld [vmem:[#allocation80_spill] sm:$0xff] }
 0x5ce   :  { %v6578_v27 = vsel %vm6575_vm11, %v6577_v53, %v6573_v56  ;;  %v14652_v53 = vld [vmem:[#allocation140_spill] sm:$0xff]  ;;  %v14653_v56 = vld [vmem:[#allocation79_spill] sm:$0xff] }
 0x5cf   :  { %11636 = vpow2.f32 %v10556_v8  ;;  %v6603_v4 = vmul.f32 %v11635_v41, %v6578_v27  ;;  %v14650_v8 = vld [vmem:[#allocation142_spill] sm:$0xff]  ;;  %v14656_v27 = vld [vmem:[#allocation143_spill] sm:$0xff] }
 0x5d0   :  { %v6469_v61 = vpop.f32.mrf.mxu1  ;;  %v14655_v41 = vld [vmem:[#allocation94_spill] sm:$0xff] }
 0x5d1   :  { %v13559_v29 = vpack.c.bf16 %v6603_v4, %v6603_v4  ;;  %v14654_v61 = vld [vmem:[#allocation154_spill] sm:$0xff]  ;;  %v14657_v4 = vld [vmem:[#allocation81_spill] sm:$0xff] }
 0x5d3   :  { %6744 = vmatmul.bf16.vlgmr.msrb.gmra.mxu2 %v13559_v29  ;;  %6771 = vmatmul.bf16.vlgmr.msra.gmra.mxu0 %v13559_v29 }
 0x5d4   :  { %6841 = vmatpush.bf16.msrb.mxu2 %v14542_v62  ;;  %6867 = vmatpush.bf16.msra.mxu0 %v14543_v6 }
 0x5d5   :  { %v11637_v46 = vpop.eup %11636 }
 0x5d6   :  { %v6564_v36 = vadd.f32 1.0, %v11637_v46  ;;  %v14658_v46 = vld [vmem:[#allocation157_spill] sm:$0xff] }
 0x5d8   :  { %11638 = vrcp.f32 %v6564_v36  ;;  %6842 = vmatpush.bf16.msrb.mxu2 %v14544_v1  ;;  %6868 = vmatpush.bf16.msra.mxu0 %v14545_v2  ;;  %v6591_v11 = vand.u32 2147483648, %v6564_v36  ;;  %v6589_v52 = vand.u32 2147483647, %v6564_v36  ;;  %vm6585_vm13 = vweird.f32 %v6564_v36 }
 0x5d9   :  { %11640 = vtanh.f32 %v13548_v28 }
 0x5da   :  { %v6592_v50 = vor.u32 1.1754944e-38, %v6591_v11  ;;  %vm6590_vm15 = vcmp.eq.f32.partialorder %v6589_v52, 8.507059e+37  ;;  %v14663_v11 = vld [vmem:[#allocation100_spill] sm:$0xff]  ;;  %v14665_v52 = vld [vmem:[#allocation85_spill] sm:$0xff] }
 0x5dc   :  { %6843 = vmatpush.bf16.msrb.mxu2 %v14546_v35  ;;  %6869 = vmatpush.bf16.msra.mxu0 %v14547_v30 }
 0x5de   :  { %v11639_v21 = vpop.eup %11638 }
 0x5df   :  { %v6581_v10 = vmul.f32 %v11639_v21, %v6564_v36  ;;  %vm6586_vm12 = vweird.f32 %v11639_v21  ;;  %v11641_v33 = vpop.eup %11640  ;;  %v14659_v36 = vld [vmem:[#allocation97_spill] sm:$0xff] }
 0x5e0   :  { %6844 = vmatpush.bf16.msrb.mxu2 %v14548_v60  ;;  %6870 = vmatpush.bf16.msra.mxu0 %v14549_v0  ;;  %vm6587_vm14 = vmor %vm6585_vm13, %vm6586_vm12 }
 0x5e1   :  { %v6582_v54 = vsub.f32 1.0, %v6581_v10  ;;  %v14661_v10 = vld [vmem:[#allocation83_spill] sm:$0xff] }
 0x5e3   :  { %v6583_v39 = vmul.f32 %v11639_v21, %v6582_v54  ;;  %6797 = vmatmul.bf16.vlgmr.msra.gmra.mxu2 %v13559_v29  ;;  %6823 = vmatmul.bf16.vlgmr.msrb.gmra.mxu0 %v13559_v29  ;;  %v14662_v54 = vld [vmem:[#allocation160_spill] sm:$0xff] }
 0x5e4   :  { %6845 = vmatpush.bf16.msrb.mxu2 %v14550_v13  ;;  %6871 = vmatpush.bf16.msra.mxu0 %v14649_v55 }
 0x5e5   :  { %v6584_v38 = vadd.f32 %v11639_v21, %v6583_v39  ;;  %v14664_v39 = vld [vmem:[#allocation147_spill] sm:$0xff] }
 0x5e7   :  { %v6588_v5 = vsel %vm6587_vm14, %v11639_v21, %v6584_v38  ;;  %v14660_v21 = vld [vmem:[#allocation145_spill] sm:$0xff] }
 0x5e8   :  { %v6593_v17 = vsel %vm6590_vm15, %v6592_v50, %v6588_v5  ;;  %6846 = vmatpush.bf16.msrb.mxu2 %v14650_v8  ;;  %6872 = vmatpush.bf16.msra.mxu0 %v14651_v7  ;;  %v14666_v38 = vld [vmem:[#allocation149_spill] sm:$0xff]  ;;  %v14668_v5 = vld [vmem:[#allocation162_spill] sm:$0xff] }
 0x5e9   :  { %v6604_v37 = vmul.f32 %v11641_v33, %v6593_v17  ;;  %v14667_v50 = vld [vmem:[#allocation89_spill] sm:$0xff]  ;;  %v14669_v33 = vld [vmem:[#allocation104_spill] sm:$0xff]  ;;  %v14670_v17 = vld [vmem:[#allocation151_spill] sm:$0xff] }
 0x5eb   :  { %v13576_v25 = vpack.c.bf16 %v6604_v37, %v6604_v37  ;;  %v14671_v37 = vld [vmem:[#allocation91_spill] sm:$0xff] }
 0x5ec   :  { %6847 = vmatpush.bf16.msrb.mxu2 %v14554_v45  ;;  %6873 = vmatpush.bf16.msra.mxu0 %v14555_v57 }
 0x5ed   :  { %6757 = vmatmul.bf16.vlgmr.msrb.gmra.mxu3 %v13576_v25  ;;  %6784 = vmatmul.bf16.vlgmr.msra.gmra.mxu1 %v13576_v25 }
 0x5ee   :  { %6854 = vmatpush.bf16.msrb.mxu3 %v14485_v49  ;;  %6880 = vmatpush.bf16.msra.mxu1 %v14486_v44 }
 0x5f0   :  { %6848 = vmatpush.bf16.msrb.mxu2 %v14556_v14  ;;  %6874 = vmatpush.bf16.msra.mxu0 %v14557_v43 }
 0x5f2   :  { %6855 = vmatpush.bf16.msrb.mxu3 %v14487_v47  ;;  %6881 = vmatpush.bf16.msra.mxu1 %v14488_v42 }
 0x5f3   :  { %6849 = vmatmul.bf16.vlgmr.msrb.gmra.mxu2 %v13559_v29  ;;  %6875 = vmatmul.bf16.vlgmr.msra.gmra.mxu0 %v13559_v29 }
 0x5f4   :  { %6893 = vmatpush.bf16.msra.mxu2 %v14558_v40  ;;  %6919 = vmatpush.bf16.msrb.mxu0 %v14559_v16 }
 0x5f6   :  { %6856 = vmatpush.bf16.msrb.mxu3 %v14489_v19  ;;  %6882 = vmatpush.bf16.msra.mxu1 %v14490_v34 }
 0x5f8   :  { %6894 = vmatpush.bf16.msra.mxu2 %v14560_v20  ;;  %6920 = vmatpush.bf16.msrb.mxu0 %v14561_v58 }
 0x5fa   :  { %6857 = vmatpush.bf16.msrb.mxu3 %v14491_v63  ;;  %6883 = vmatpush.bf16.msra.mxu1 %v14492_v51  ;;  %v11472_v63 = vld [vmem:[#allocation12 + $0x1b8] sm:$0xff] }
 0x5fc   :  { %6895 = vmatpush.bf16.msra.mxu2 %v14562_v59  ;;  %6921 = vmatpush.bf16.msrb.mxu0 %v14563_v9 }
 0x5fd   :  { %6810 = vmatmul.bf16.vlgmr.msra.gmra.mxu3 %v13576_v25  ;;  %6836 = vmatmul.bf16.vlgmr.msrb.gmra.mxu1 %v13576_v25 }
 0x5fe   :  { %6858 = vmatpush.bf16.msrb.mxu3 %v14652_v53  ;;  %6884 = vmatpush.bf16.msra.mxu1 %v14653_v56  ;;  %v14728_v56 = vld [vmem:[#allocation50_spill] sm:$0xff] }
 0x600   :  { %6896 = vmatpush.bf16.msra.mxu2 %v14654_v61  ;;  %6922 = vmatpush.bf16.msrb.mxu0 %v14655_v41  ;;  %v11466_v41 = vld [vmem:[#allocation12 + $0x188] sm:$0xff]  ;;  %v11480_v61 = vld [vmem:[#allocation12 + $0x1f8] sm:$0xff] }
 0x602   :  { %6859 = vmatpush.bf16.msrb.mxu3 %v14656_v27  ;;  %6885 = vmatpush.bf16.msra.mxu1 %v14657_v4  ;;  %v14678_v4 = vld [vmem:[#allocation155_spill] sm:$0xff]  ;;  %v14684_v27 = vld [vmem:[#allocation161_spill] sm:$0xff] }
 0x604   :  { %6897 = vmatpush.bf16.msra.mxu2 %v14658_v46  ;;  %6923 = vmatpush.bf16.msrb.mxu0 %v14659_v36  ;;  %v14731_v46 = vld [vmem:[#allocation56_spill] sm:$0xff] }
 0x606   :  { %6860 = vmatpush.bf16.msrb.mxu3 %v14660_v21  ;;  %6886 = vmatpush.bf16.msra.mxu1 %v14661_v10  ;;  %v14672_v10 = vld [vmem:[#allocation164_spill] sm:$0xff] }
 0x607   :  { %v14677_v21 = vld [vmem:[#allocation168_spill] sm:$0xff] }
 0x608   :  { %6898 = vmatpush.bf16.msra.mxu2 %v14662_v54  ;;  %6924 = vmatpush.bf16.msrb.mxu0 %v14663_v11  ;;  %v14730_v11 = vld [vmem:[#allocation54_spill] sm:$0xff] }
 0x60a   :  { %6861 = vmatpush.bf16.msrb.mxu3 %v14664_v39  ;;  %6887 = vmatpush.bf16.msra.mxu1 %v14665_v52  ;;  %v14673_v39 = vld [vmem:[#allocation106_spill] sm:$0xff] }
 0x60b   :  { %v14674_v52 = vld [vmem:[#allocation166_spill] sm:$0xff] }
 0x60c   :  { %6899 = vmatpush.bf16.msra.mxu2 %v14668_v5  ;;  %6925 = vmatpush.bf16.msrb.mxu0 %v14669_v33  ;;  %v14686_v33 = vld [vmem:[#allocation176_spill] sm:$0xff] }
 0x60d   :  { %6862 = vmatmul.bf16.vlgmr.msrb.gmra.mxu3 %v13576_v25  ;;  %6888 = vmatmul.bf16.vlgmr.msra.gmra.mxu1 %v13576_v25  ;;  %v14725_v5 = vld [vmem:[#allocation60_spill] sm:$0xff] }
 0x60e   :  { %6906 = vmatpush.bf16.msra.mxu3 %v14666_v38  ;;  %6932 = vmatpush.bf16.msrb.mxu1 %v14667_v50  ;;  %v14675_v50 = vld [vmem:[#allocation153_spill] sm:$0xff] }
 0x60f   :  { %v14676_v38 = vld [vmem:[#allocation93_spill] sm:$0xff] }
 0x610   :  { %6900 = vmatpush.bf16.msra.mxu2 %v14672_v10  ;;  %6926 = vmatpush.bf16.msrb.mxu0 %v14673_v39  ;;  %v14681_v10 = vld [vmem:[#allocation158_spill] sm:$0xff]  ;;  %v14682_v39 = vld [vmem:[#allocation99_spill] sm:$0xff] }
 0x612   :  { %6907 = vmatpush.bf16.msra.mxu3 %v14670_v17  ;;  %6933 = vmatpush.bf16.msrb.mxu1 %v14671_v37  ;;  %v14679_v17 = vld [vmem:[#allocation96_spill] sm:$0xff]  ;;  %v14680_v37 = vld [vmem:[#allocation170_spill] sm:$0xff] }
 0x613   :  { %6901 = vmatmul.bf16.vlgmr.msra.gmra.mxu2 %v13559_v29  ;;  %6927 = vmatmul.bf16.vlgmr.msrb.gmra.mxu0 %v13559_v29 }
 0x614   :  { %6945 = vmatpush.bf16.msrb.mxu2 %v14674_v52  ;;  %v14683_v52 = vld [vmem:[#allocation173_spill] sm:$0xff]  ;;  %7236 = vmatpush.bf16.msra.mxu0 %v11472_v63 }
 0x616   :  { %6908 = vmatpush.bf16.msra.mxu3 %v14675_v50  ;;  %6934 = vmatpush.bf16.msrb.mxu1 %v14676_v38  ;;  %v14685_v50 = vld [vmem:[#allocation101_spill] sm:$0xff]  ;;  %v14687_v38 = vld [vmem:[#allocation163_spill] sm:$0xff] }
 0x618   :  { %6946 = vmatpush.bf16.msrb.mxu2 %v14677_v21  ;;  %v14688_v21 = vld [vmem:[#allocation105_spill] sm:$0xff] }
 0x61a   :  { %6909 = vmatpush.bf16.msra.mxu3 %v14678_v4  ;;  %6935 = vmatpush.bf16.msrb.mxu1 %v14679_v17  ;;  %v14689_v4 = vld [vmem:[#allocation179_spill] sm:$0xff]  ;;  %v14690_v17 = vld [vmem:[#allocation165_spill] sm:$0xff] }
 0x61c   :  { %6947 = vmatpush.bf16.msrb.mxu2 %v14680_v37  ;;  %v14691_v37 = vld [vmem:[#allocation107_spill] sm:$0xff] }
 0x61e   :  { %6910 = vmatpush.bf16.msra.mxu3 %v14681_v10  ;;  %6936 = vmatpush.bf16.msrb.mxu1 %v14682_v39  ;;  %v14692_v10 = vld [vmem:[#allocation167_spill] sm:$0xff]  ;;  %v14693_v39 = vld [vmem:[#allocation181_spill] sm:$0xff] }
 0x620   :  { %6948 = vmatpush.bf16.msrb.mxu2 %v14683_v52  ;;  %v14723_v52 = vld [vmem:[#allocation44_spill] sm:$0xff] }
 0x622   :  { %6911 = vmatpush.bf16.msra.mxu3 %v14684_v27  ;;  %6937 = vmatpush.bf16.msrb.mxu1 %v14685_v50  ;;  %v14694_v50 = vld [vmem:[#allocation169_spill] sm:$0xff]  ;;  %v14695_v27 = vld [vmem:[#allocation183_spill] sm:$0xff] }
 0x624   :  { %6949 = vmatpush.bf16.msrb.mxu2 %v14686_v33  ;;  %v14703_v33 = vld [vmem:[#allocation180_spill] sm:$0xff] }
 0x626   :  { %6912 = vmatpush.bf16.msra.mxu3 %v14687_v38  ;;  %6938 = vmatpush.bf16.msrb.mxu1 %v14688_v21  ;;  %v14696_v38 = vld [vmem:[#allocation23_spill] sm:$0xff] }
 0x627   :  { %v14697_v21 = vld [vmem:[#allocation171_spill] sm:$0xff] }
 0x628   :  { %6950 = vmatpush.bf16.msrb.mxu2 %v14689_v4  ;;  %v14702_v4 = vld [vmem:[#allocation32_spill] sm:$0xff] }
 0x62a   :  { %6913 = vmatpush.bf16.msra.mxu3 %v14690_v17  ;;  %6939 = vmatpush.bf16.msrb.mxu1 %v14691_v37  ;;  %v14698_v17 = vld [vmem:[#allocation25_spill] sm:$0xff]  ;;  %v14699_v37 = vld [vmem:[#allocation174_spill] sm:$0xff] }
 0x62c   :  { %6951 = vmatpush.bf16.msrb.mxu2 %v14693_v39  ;;  %v14701_v39 = vld [vmem:[#allocation178_spill] sm:$0xff] }
 0x62d   :  { %6914 = vmatmul.bf16.vlgmr.msra.gmra.mxu3 %v13576_v25  ;;  %6940 = vmatmul.bf16.vlgmr.msrb.gmra.mxu1 %v13576_v25 }
 0x62e   :  { %6958 = vmatpush.bf16.msrb.mxu3 %v14692_v10  ;;  %v14700_v10 = vld [vmem:[#allocation29_spill] sm:$0xff]  ;;  %7249 = vmatpush.bf16.msra.mxu1 %v11480_v61  ;;  %v14745_v61 = vld [vmem:[#allocation118_spill] sm:$0xff] }
 0x630   :  { %6952 = vmatpush.bf16.msrb.mxu2 %v14695_v27  ;;  %v14705_v27 = vld [vmem:[#allocation182_spill] sm:$0xff] }
 0x632   :  { %6959 = vmatpush.bf16.msrb.mxu3 %v14694_v50  ;;  %v14704_v50 = vld [vmem:[#allocation34_spill] sm:$0xff] }
 0x633   :  { %6953 = vmatmul.bf16.vlgmr.msrb.gmra.mxu2 %v13559_v29  ;;  %v14707_v29 = vld [vmem:[#allocation184_spill] sm:$0xff] }
 0x634   :  { %7263 = vmatpush.bf16.msra.mxu2 %v14696_v38  ;;  %v14706_v38 = vld [vmem:[#allocation36_spill] sm:$0xff] }
 0x636   :  { %6960 = vmatpush.bf16.msrb.mxu3 %v14697_v21  ;;  %v14708_v21 = vld [vmem:[#allocation24_spill] sm:$0xff] }
 0x638   :  { %7264 = vmatpush.bf16.msra.mxu2 %v14698_v17  ;;  %v14709_v17 = vld [vmem:[#allocation40_spill] sm:$0xff] }
 0x63a   :  { %6961 = vmatpush.bf16.msrb.mxu3 %v14699_v37  ;;  %v14719_v37 = vld [vmem:[#allocation37_spill] sm:$0xff] }
 0x63c   :  { %7265 = vmatpush.bf16.msra.mxu2 %v14700_v10  ;;  %v14710_v10 = vld [vmem:[#allocation26_spill] sm:$0xff] }
 0x63e   :  { %6962 = vmatpush.bf16.msrb.mxu3 %v14701_v39  ;;  %v14711_v39 = vld [vmem:[#allocation42_spill] sm:$0xff] }
 0x640   :  { %7266 = vmatpush.bf16.msra.mxu2 %v14702_v4  ;;  %v14712_v4 = vld [vmem:[#allocation45_spill] sm:$0xff] }
 0x642   :  { %6963 = vmatpush.bf16.msrb.mxu3 %v14703_v33  ;;  %v14713_v33 = vld [vmem:[#allocation30_spill] sm:$0xff] }
 0x644   :  { %7267 = vmatpush.bf16.msra.mxu2 %v14704_v50  ;;  %v14714_v50 = vld [vmem:[#allocation47_spill] sm:$0xff] }
 0x646   :  { %6964 = vmatpush.bf16.msrb.mxu3 %v14705_v27  ;;  %v14715_v27 = vld [vmem:[#allocation33_spill] sm:$0xff] }
 0x648   :  { %7268 = vmatpush.bf16.msra.mxu2 %v14706_v38 }
 0x64a   :  { %6965 = vmatpush.bf16.msrb.mxu3 %v14707_v29  ;;  %v14716_v29 = vld [vmem:[#allocation49_spill] sm:$0xff] }
 0x64c   :  { %7269 = vmatpush.bf16.msra.mxu2 %v14709_v17  ;;  %v14718_v17 = vld [vmem:[#allocation53_spill] sm:$0xff] }
 0x64d   :  { %6966 = vmatmul.bf16.vlgmr.msrb.gmra.mxu3 %v13576_v25 }
 0x64e   :  { %7276 = vmatpush.bf16.msra.mxu3 %v14708_v21  ;;  %v14717_v21 = vld [vmem:[#allocation35_spill] sm:$0xff] }
 0x650   :  { %7270 = vmatpush.bf16.msra.mxu2 %v14711_v39  ;;  %v6772_v38 = vpop.f32.mrf.mxu0  ;;  %v14720_v39 = vld [vmem:[#allocation55_spill] sm:$0xff] }
 0x652   :  { %7277 = vmatpush.bf16.msra.mxu3 %v14710_v10 }
 0x654   :  { %7315 = vmatpush.bf16.msrb.mxu2 %v14712_v4  ;;  %v14721_v4 = vld [vmem:[#allocation41_spill] sm:$0xff] }
 0x656   :  { %7278 = vmatpush.bf16.msra.mxu3 %v14713_v33  ;;  %v6745_v25 = vpop.f32.mrf.mxu2  ;;  %v14722_v33 = vld [vmem:[#allocation58_spill] sm:$0xff] }
 0x658   :  { %7316 = vmatpush.bf16.msrb.mxu2 %v14714_v50  ;;  %v6774_v10 = vpop.f32.mrf.mxu0 }
 0x659   :  { %v14727_v10 = vld [vmem:[#allocation64_spill] sm:$0xff] }
 0x65a   :  { %7279 = vmatpush.bf16.msra.mxu3 %v14715_v27  ;;  %v14724_v27 = vld [vmem:[#allocation46_spill] sm:$0xff] }
 0x65c   :  { %7317 = vmatpush.bf16.msrb.mxu2 %v14716_v29 }
 0x65e   :  { %7280 = vmatpush.bf16.msra.mxu3 %v14717_v21  ;;  %v6747_v50 = vpop.f32.mrf.mxu2  ;;  %v13686_v21 = vld [vmem:[#allocation10 + $0x18] sm:$0xff] }
 0x660   :  { %7318 = vmatpush.bf16.msrb.mxu2 %v14718_v17  ;;  %v6824_v29 = vpop.f32.mrf.mxu0  ;;  %v14726_v17 = vld [vmem:[#allocation48_spill] sm:$0xff] }
 0x662   :  { %7281 = vmatpush.bf16.msra.mxu3 %v14719_v37  ;;  %v2320_v37 = vperm.slane %v13686_v21, 0 }
 0x664   :  { %7319 = vmatpush.bf16.msrb.mxu2 %v14720_v39 }
 0x666   :  { %7282 = vmatpush.bf16.msra.mxu3 %v14721_v4  ;;  %v6798_v39 = vpop.f32.mrf.mxu2 }
 0x668   :  { %7320 = vmatpush.bf16.msrb.mxu2 %v14722_v33  ;;  %v14729_v33 = vld [vmem:[#allocation75_spill] sm:$0xff]  ;;  %v6826_v53 = vpop.f32.mrf.mxu0 }
 0x669   :  { %v4298_v50 = vadd.f32 %v14729_v33, %v2320_v37  ;;  %v11471_v37 = vld [vmem:[#allocation12 + $0x1b0] sm:$0xff]  ;;  %v14735_v33 = vld [vmem:[#allocation61_spill] sm:$0xff] }
 0x66a   :  { %7283 = vmatpush.bf16.msra.mxu3 %v14723_v52  ;;  %v6785_v4 = vpop.f32.mrf.mxu1  ;;  %7237 = vmatpush.bf16.msra.mxu0 %v11471_v37 }
 0x66b   :  { %v6786_v52 = vadd.f32 %v6785_v4, %v6772_v38  ;;  %v14734_v38 = vld [vmem:[#allocation59_spill] sm:$0xff] }
 0x66c   :  { %7321 = vmatpush.bf16.msrb.mxu2 %v14725_v5 }
 0x66e   :  { %7328 = vmatpush.bf16.msrb.mxu3 %v14724_v27  ;;  %v6971_v27 = vadd.f32 %v6786_v52, %v4298_v50 }
 0x670   :  { %7322 = vmatpush.bf16.msrb.mxu2 %v14727_v10  ;;  %v10621_v5 = vmul.f32 -1.442695, %v6971_v27  ;;  %v6758_v54 = vpop.f32.mrf.mxu3  ;;  %v14732_v10 = vld [vmem:[#allocation43_spill] sm:$0xff]  ;;  %v2321_v27 = vperm.slane %v13686_v21, 1 }
 0x671   :  { %v6759_v51 = vadd.f32 %v6758_v54, %v6745_v25  ;;  %v11470_v25 = vld [vmem:[#allocation12 + $0x1a8] sm:$0xff] }
 0x672   :  { %7329 = vmatpush.bf16.msrb.mxu3 %v14726_v17  ;;  %11642 = vpow2.f32 %v10621_v5  ;;  %v6800_v17 = vpop.f32.mrf.mxu2  ;;  %v6787_v36 = vpop.f32.mrf.mxu1  ;;  %7238 = vmatpush.bf16.msra.mxu0 %v11470_v25 }
 0x673   :  { %v13696_v34 = vadd.f32 %v6759_v51, %v14732_v10  ;;  %v14736_v51 = vld [vmem:[#allocation138_spill] sm:$0xff]  ;;  %v11469_v17 = vld [vmem:[#allocation12 + $0x1a0] sm:$0xff] }
 0x674   :  { %v14737_v10 = vld [vmem:[#allocation65_spill] sm:$0xff] }
 0x675   :  { %14733 = vst [vmem:[#allocation22_spill] sm:$0xff] %v13696_v34 }
 0x676   :  { %7330 = vmatpush.bf16.msrb.mxu3 %v14728_v56  ;;  %v6876_v56 = vpop.f32.mrf.mxu0  ;;  %7239 = vmatpush.bf16.msra.mxu0 %v11469_v17 }
 0x678   :  { %v11643_v53 = vpop.eup %11642  ;;  %v6760_v54 = vpop.f32.mrf.mxu3 }
 0x679   :  { %v13700_v4 = vadd.f32 1.0, %v11643_v53  ;;  %v14738_v54 = vld [vmem:[#allocation76_spill] sm:$0xff] }
 0x67a   :  { %7331 = vmatpush.bf16.msrb.mxu3 %v14730_v11  ;;  %v2322_v11 = vperm.slane %v13686_v21, 2  ;;  %v6850_v36 = vpop.f32.mrf.mxu2  ;;  %v4311_v34 = vadd.f32 %v14738_v54, %v2321_v27 }
 0x67b   :  { %11644 = vrcp.f32 %v13700_v4  ;;  %vm6992_vm1 = vweird.f32 %v13700_v4 }
 0x67c   :  { %v4324_v63 = vadd.f32 %v14736_v51, %v2322_v11  ;;  %v11468_v11 = vld [vmem:[#allocation12 + $0x198] sm:$0xff] }
 0x67d   :  { %7240 = vmatpush.bf16.msra.mxu0 %v11468_v11  ;;  %v11465_v11 = vld [vmem:[#allocation12 + $0x180] sm:$0xff] }
 0x67e   :  { %7332 = vmatpush.bf16.msrb.mxu3 %v14731_v46  ;;  %v6837_v46 = vpop.f32.mrf.mxu1  ;;  %v6878_v52 = vpop.f32.mrf.mxu0 }
 0x67f   :  { %v6838_v50 = vadd.f32 %v6837_v46, %v6824_v29  ;;  %v2324_v52 = vperm.slane %v13686_v21, 4 }
 0x680   :  { %v6811_v53 = vpop.f32.mrf.mxu3 }
 0x681   :  { %v6973_v5 = vadd.f32 %v6838_v50, %v4324_v63  ;;  %v11467_v63 = vld [vmem:[#allocation12 + $0x190] sm:$0xff] }
 0x682   :  { %7333 = vmatpush.bf16.msrb.mxu3 %v14734_v38  ;;  %v11645_v38 = vpop.eup %11644  ;;  %v6852_v29 = vpop.f32.mrf.mxu2  ;;  %7241 = vmatpush.bf16.msra.mxu0 %v11467_v63 }
 0x683   :  { %v10623_v37 = vmul.f32 -1.442695, %v6973_v5  ;;  %v6988_v19 = vmul.f32 %v11645_v38, %v13700_v4  ;;  %vm6993_vm0 = vweird.f32 %v11645_v38  ;;  %v6998_v29 = vand.u32 2147483648, %v13700_v4 }
 0x684   :  { %vm13715_vm2 = vmor %vm6992_vm1, %vm6993_vm0 }
 0x685   :  { %11646 = vpow2.f32 %v10623_v37  ;;  %v6989_v51 = vsub.f32 1.0, %v6988_v19  ;;  %v14739_v37 = vld [vmem:[#allocation87_spill] sm:$0xff] }
 0x686   :  { %7334 = vmatpush.bf16.msrb.mxu3 %v14735_v33  ;;  %v6812_v33 = vadd.f32 %v6811_v53, %v6798_v39  ;;  %v6839_v25 = vpop.f32.mrf.mxu1  ;;  %v4350_v39 = vadd.f32 %v14739_v37, %v2324_v52  ;;  %7242 = vmatpush.bf16.msra.mxu0 %v11466_v41 }
 0x687   :  { %v6996_v25 = vand.u32 2147483647, %v13700_v4 }
 0x688   :  { %v6972_v46 = vadd.f32 %v6812_v33, %v4311_v34  ;;  %v6813_v17 = vpop.f32.mrf.mxu3  ;;  %v2323_v34 = vperm.slane %v13686_v21, 3 }
 0x689   :  { %vm6997_vm3 = vcmp.eq.f32.partialorder %v6996_v25, 8.507059e+37 }
 0x68a   :  { %7335 = vmatpush.bf16.msrb.mxu3 %v14737_v10  ;;  %v6990_v10 = vmul.f32 %v11645_v38, %v6989_v51  ;;  %v10622_v27 = vmul.f32 -1.442695, %v6972_v46  ;;  %7243 = vmatpush.bf16.msra.mxu0 %v11465_v11  ;;  %v14743_v11 = vld [vmem:[#allocation114_spill] sm:$0xff] }
 0x68b   :  { %v11647_v50 = vpop.eup %11646 }
 0x68c   :  { %v7023_v5 = vadd.f32 1.0, %v11647_v50  ;;  %v6991_v19 = vadd.f32 %v11645_v38, %v6990_v10 }
 0x68e   :  { %11648 = vrcp.f32 %v7023_v5  ;;  %v6889_v54 = vpop.f32.mrf.mxu1  ;;  %7289 = vmatpush.bf16.msrb.mxu0 %v14636_v31  ;;  %v6995_v52 = vsel %vm13715_vm2, %v11645_v38, %v6991_v19  ;;  %vm7030_vm5 = vweird.f32 %v7023_v5 }
 0x68f   :  { %v6890_v53 = vadd.f32 %v6889_v54, %v6876_v56  ;;  %11650 = vpow2.f32 %v10622_v27  ;;  %v14742_v56 = vld [vmem:[#allocation141_spill] sm:$0xff]  ;;  %v6999_v27 = vor.u32 1.1754944e-38, %v6998_v29 }
 0x690   :  { %v6863_v41 = vpop.f32.mrf.mxu3  ;;  %v4337_v63 = vadd.f32 %v14742_v56, %v2323_v34  ;;  %v6928_v17 = vpop.f32.mrf.mxu0  ;;  %v7034_v34 = vand.u32 2147483647, %v7023_v5 }
 0x691   :  { %v6975_v33 = vadd.f32 %v6890_v53, %v4350_v39  ;;  %v6864_v10 = vadd.f32 %v6863_v41, %v6850_v36  ;;  %v7036_v53 = vand.u32 2147483648, %v7023_v5  ;;  %v14744_v41 = vld [vmem:[#allocation116_spill] sm:$0xff] }
 0x692   :  { %7290 = vmatpush.bf16.msrb.mxu0 %v14743_v11  ;;  %vm7035_vm7 = vcmp.eq.f32.partialorder %v7034_v34, 8.507059e+37  ;;  %v2326_v11 = vperm.slane %v13686_v21, 6 }
 0x693   :  { %11652 = vtanh.f32 %v6975_v33  ;;  %v6974_v37 = vadd.f32 %v6864_v10, %v4337_v63  ;;  %v7000_v33 = vsel %vm6997_vm3, %v6999_v27, %v6995_v52  ;;  %v7037_v19 = vor.u32 1.1754944e-38, %v7036_v53  ;;  %v11479_v63 = vld [vmem:[#allocation12 + $0x1f0] sm:$0xff] }
 0x694   :  { %v11649_v46 = vpop.eup %11648  ;;  %7250 = vmatpush.bf16.msra.mxu1 %v11479_v63 }
 0x695   :  { %v7026_v50 = vmul.f32 %v11649_v46, %v7023_v5  ;;  %v11651_v39 = vpop.eup %11650  ;;  %vm7031_vm4 = vweird.f32 %v11649_v46  ;;  %v10624_v56 = vmul.f32 -1.442695, %v6974_v37 }
 0x696   :  { %v6891_v4 = vpop.f32.mrf.mxu1  ;;  %v6902_v38 = vpop.f32.mrf.mxu2  ;;  %vm7032_vm6 = vmor %vm7030_vm5, %vm7031_vm4  ;;  %v13724_v29 = vadd.f32 1.0, %v11651_v39  ;;  %7291 = vmatpush.bf16.msrb.mxu0 %v14744_v41  ;;  %v14746_v39 = vld [vmem:[#allocation121_spill] sm:$0xff] }
 0x697   :  { %v7027_v54 = vsub.f32 1.0, %v7026_v50  ;;  %11654 = vpow2.f32 %v10624_v56 }
 0x698   :  { %v6865_v25 = vpop.f32.mrf.mxu3  ;;  %v6930_v52 = vpop.f32.mrf.mxu0  ;;  %11656 = vrcp.f32 %v13724_v29  ;;  %vm7007_vm12 = vweird.f32 %v13724_v29 }
 0x699   :  { %v11653_v31 = vpop.eup %11652  ;;  %v7028_v42 = vmul.f32 %v11649_v46, %v7027_v54  ;;  %v2325_v52 = vperm.slane %v13686_v21, 5 }
 0x69a   :  { %v7097_v51 = vmul.f32 %v11653_v31, %v7000_v33  ;;  %7292 = vmatpush.bf16.msrb.mxu0 %v14745_v61  ;;  %v14747_v33 = vld [vmem:[#allocation124_spill] sm:$0xff] }
 0x69b   :  { %v7029_v36 = vadd.f32 %v11649_v46, %v7028_v42  ;;  %v11478_v42 = vld [vmem:[#allocation12 + $0x1e8] sm:$0xff] }
 0x69c   :  { %7251 = vmatpush.bf16.msra.mxu1 %v11478_v42 }
 0x69d   :  { %v7033_v50 = vsel %vm7032_vm6, %v11649_v46, %v7029_v36  ;;  %v11655_v5 = vpop.eup %11654  ;;  %v11477_v46 = vld [vmem:[#allocation12 + $0x1e0] sm:$0xff]  ;;  %v11475_v36 = vld [vmem:[#allocation12 + $0x1d0] sm:$0xff] }
 0x69e   :  { %v7038_v10 = vsel %vm7035_vm7, %v7037_v19, %v7033_v50  ;;  %v7024_v54 = vadd.f32 1.0, %v11655_v5  ;;  %v6904_v37 = vpop.f32.mrf.mxu2  ;;  %7293 = vmatpush.bf16.msrb.mxu0 %v14746_v39  ;;  %v11657_v53 = vpop.eup %11656  ;;  %v14748_v19 = vld [vmem:[#allocation156_spill] sm:$0xff] }
 0x69f   :  { %v7095_v27 = vmul.f32 %v7038_v10, %v13516_v26  ;;  %v11476_v26 = vld [vmem:[#allocation12 + $0x1d8] sm:$0xff]  ;;  %v7003_v31 = vmul.f32 %v11657_v53, %v13724_v29  ;;  %v4376_v25 = vadd.f32 %v14748_v19, %v2326_v11  ;;  %v11474_v37 = vld [vmem:[#allocation12 + $0x1c8] sm:$0xff]  ;;  %vm7008_vm10 = vweird.f32 %v11657_v53 }
 0x6a0   :  { %11658 = vrcp.f32 %v7024_v54  ;;  %7252 = vmatpush.bf16.msra.mxu1 %v11477_v46  ;;  %v14749_v39 = vld [vmem:[#allocation88_spill] sm:$0xff]  ;;  %vm7045_vm9 = vweird.f32 %v7024_v54  ;;  %vm7009_vm13 = vmor %vm7007_vm12, %vm7008_vm10 }
 0x6a1   :  { %v13730_v4 = vadd.f32 %v7097_v51, %v7095_v27  ;;  %v7004_v41 = vsub.f32 1.0, %v7003_v31  ;;  %v4363_v46 = vadd.f32 %v14749_v39, %v2325_v52 }
 0x6a2   :  { %7294 = vmatpush.bf16.msrb.mxu0 %v14747_v33 }
 0x6a3   :  { %v7005_v5 = vmul.f32 %v11657_v53, %v7004_v41 }
 0x6a4   :  { %7253 = vmatpush.bf16.msra.mxu1 %v11476_v26  ;;  %v7051_v26 = vand.u32 2147483648, %v7024_v54 }
 0x6a5   :  { %v7006_v31 = vadd.f32 %v11657_v53, %v7005_v5 }
 0x6a6   :  { %v11659_v34 = vpop.eup %11658  ;;  %7295 = vmatpush.bf16.msrb.mxu0 %v14646_v22  ;;  %v7052_v41 = vor.u32 1.1754944e-38, %v7051_v26 }
 0x6a7   :  { %v7041_v56 = vmul.f32 %v11659_v34, %v7024_v54  ;;  %vm7046_vm8 = vweird.f32 %v11659_v34 }
 0x6a8   :  { %7254 = vmatpush.bf16.msra.mxu1 %v11475_v36  ;;  %vm13741_vm11 = vmor %vm7045_vm9, %vm7046_vm8  ;;  %v7013_v36 = vand.u32 2147483648, %v13724_v29 }
 0x6a9   :  { %v7042_v63 = vsub.f32 1.0, %v7041_v56  ;;  %v7049_v56 = vand.u32 2147483647, %v7024_v54  ;;  %v14752_v54 = vld [vmem:[#allocation113_spill] sm:$0xff] }
 0x6aa   :  { %v6941_v51 = vpop.f32.mrf.mxu1  ;;  %7296 = vmatpush.bf16.msrb.mxu0 %v14537_v12  ;;  %v14753_v12 = vld [vmem:[#allocation159_spill] sm:$0xff] }
 0x6ab   :  { %v6942_v50 = vadd.f32 %v6941_v51, %v6928_v17  ;;  %v7043_v10 = vmul.f32 %v11659_v34, %v7042_v63  ;;  %v11473_v51 = vld [vmem:[#allocation12 + $0x1c0] sm:$0xff]  ;;  %vm7050_vm14 = vcmp.eq.f32.partialorder %v7049_v56, 8.507059e+37 }
 0x6ac   :  { %7255 = vmatpush.bf16.msra.mxu1 %v11474_v37 }
 0x6ad   :  { %v6977_v27 = vadd.f32 %v6942_v50, %v4376_v25  ;;  %v7044_v33 = vadd.f32 %v11659_v34, %v7043_v10  ;;  %v7010_v50 = vsel %vm7009_vm13, %v11657_v53, %v7006_v31 }
 0x6af   :  { %v10625_v61 = vmul.f32 -1.442695, %v6977_v27  ;;  %v7048_v19 = vsel %vm13741_vm11, %v11659_v34, %v7044_v33  ;;  %v7014_v27 = vor.u32 1.1754944e-38, %v7013_v36 }
 0x6b0   :  { %v6915_v42 = vpop.f32.mrf.mxu3  ;;  %7256 = vmatpush.bf16.msra.mxu1 %v11473_v51 }
 0x6b1   :  { %v6916_v22 = vadd.f32 %v6915_v42, %v6902_v38  ;;  %11660 = vpow2.f32 %v10625_v61  ;;  %v7011_v38 = vand.u32 2147483647, %v13724_v29  ;;  %v7053_v61 = vsel %vm7050_vm14, %v7052_v41, %v7048_v19  ;;  %v14767_v41 = vld [vmem:[#allocation162_spill] sm:$0xff] }
 0x6b2   :  { %v6943_v11 = vpop.f32.mrf.mxu1  ;;  %v7096_v34 = vmul.f32 %v7053_v61, %v13548_v28  ;;  %v14774_v61 = vld [vmem:[#allocation145_spill] sm:$0xff] }
 0x6b3   :  { %v6976_v17 = vadd.f32 %v6916_v22, %v4363_v46  ;;  %vm7012_vm15 = vcmp.eq.f32.partialorder %v7011_v38, 8.507059e+37  ;;  %v2327_v11 = vperm.slane %v13686_v21, 7 }
 0x6b4   :  { %7302 = vmatpush.bf16.msrb.mxu1 %v14752_v54  ;;  %v7015_v29 = vsel %vm7012_vm15, %v7014_v27, %v7010_v50  ;;  %v14768_v54 = vld [vmem:[#allocation104_spill] sm:$0xff]  ;;  %v14770_v50 = vld [vmem:[#allocation81_spill] sm:$0xff]  ;;  %v14773_v27 = vld [vmem:[#allocation166_spill] sm:$0xff] }
 0x6b5   :  { %11662 = vtanh.f32 %v6976_v17  ;;  %v4389_v36 = vadd.f32 %v14753_v12, %v2327_v11  ;;  %v14788_v11 = vld [vmem:[#allocation155_spill] sm:$0xff]  ;;  %v14794_v12 = vld [vmem:[#allocation161_spill] sm:$0xff] }
 0x6b6   :  { %v6954_v25 = vpop.f32.mrf.mxu2 }
 0x6b7   :  { %v11661_v63 = vpop.eup %11660 }
 0x6b8   :  { %v6917_v52 = vpop.f32.mrf.mxu3  ;;  %v7063_v10 = vadd.f32 1.0, %v11661_v63  ;;  %7303 = vmatpush.bf16.msrb.mxu1 %v14475_v18  ;;  %v14769_v63 = vld [vmem:[#allocation143_spill] sm:$0xff] }
 0x6b9   :  { %v14771_v52 = vld [vmem:[#allocation164_spill] sm:$0xff] }
 0x6ba   :  { %11664 = vrcp.f32 %v7063_v10  ;;  %v7076_v33 = vand.u32 2147483648, %v7063_v10  ;;  %v7074_v17 = vand.u32 2147483647, %v7063_v10  ;;  %vm7070_vm1 = vweird.f32 %v7063_v10 }
 0x6bb   :  { %v11663_v42 = vpop.eup %11662  ;;  %11666 = vtanh.f32 %v13730_v4 }
 0x6bc   :  { %v7098_v5 = vmul.f32 %v11663_v42, %v7015_v29  ;;  %7304 = vmatpush.bf16.msrb.mxu1 %v14477_v23  ;;  %v7077_v28 = vor.u32 1.1754944e-38, %v7076_v33  ;;  %vm7075_vm3 = vcmp.eq.f32.partialorder %v7074_v17, 8.507059e+37  ;;  %v14775_v42 = vld [vmem:[#allocation83_spill] sm:$0xff]  ;;  %v14776_v29 = vld [vmem:[#allocation168_spill] sm:$0xff]  ;;  %v14785_v17 = vld [vmem:[#allocation153_spill] sm:$0xff] }
 0x6bd   :  { %v14783_v33 = vld [vmem:[#allocation91_spill] sm:$0xff] }
 0x6be   :  { %v13753_v37 = vadd.f32 %v7098_v5, %v7096_v34  ;;  %v6956_v39 = vpop.f32.mrf.mxu2  ;;  %v14777_v34 = vld [vmem:[#allocation147_spill] sm:$0xff]  ;;  %v14778_v5 = vld [vmem:[#allocation85_spill] sm:$0xff] }
 0x6bf   :  { %v14779_v39 = vld [vmem:[#allocation149_spill] sm:$0xff] }
 0x6c0   :  { %v11665_v53 = vpop.eup %11664  ;;  %7305 = vmatpush.bf16.msrb.mxu1 %v14479_v24 }
 0x6c1   :  { %v7066_v46 = vmul.f32 %v11665_v53, %v7063_v10  ;;  %vm7071_vm0 = vweird.f32 %v11665_v53  ;;  %v11667_v31 = vpop.eup %11666  ;;  %v14772_v10 = vld [vmem:[#allocation106_spill] sm:$0xff] }
 0x6c2   :  { %vm7072_vm2 = vmor %vm7070_vm1, %vm7071_vm0 }
 0x6c3   :  { %v7067_v22 = vsub.f32 1.0, %v7066_v46  ;;  %v14781_v46 = vld [vmem:[#allocation170_spill] sm:$0xff] }
 0x6c4   :  { %7306 = vmatpush.bf16.msrb.mxu1 %v14480_v48 }
 0x6c5   :  { %v7068_v26 = vmul.f32 %v11665_v53, %v7067_v22  ;;  %v14782_v22 = vld [vmem:[#allocation151_spill] sm:$0xff] }
 0x6c7   :  { %v7069_v18 = vadd.f32 %v11665_v53, %v7068_v26  ;;  %v14784_v26 = vld [vmem:[#allocation173_spill] sm:$0xff] }
 0x6c8   :  { %7307 = vmatpush.bf16.msrb.mxu1 %v14481_v32 }
 0x6c9   :  { %v7073_v23 = vsel %vm7072_vm2, %v11665_v53, %v7069_v18  ;;  %v14780_v53 = vld [vmem:[#allocation89_spill] sm:$0xff] }
 0x6ca   :  { %v7078_v56 = vsel %vm7075_vm3, %v7077_v28, %v7073_v23  ;;  %v14786_v18 = vld [vmem:[#allocation93_spill] sm:$0xff]  ;;  %v14787_v28 = vld [vmem:[#allocation176_spill] sm:$0xff] }
 0x6cb   :  { %v7103_v24 = vmul.f32 %v11667_v31, %v7078_v56  ;;  %v14789_v23 = vld [vmem:[#allocation96_spill] sm:$0xff]  ;;  %v14790_v31 = vld [vmem:[#allocation179_spill] sm:$0xff]  ;;  %v14791_v56 = vld [vmem:[#allocation158_spill] sm:$0xff] }
 0x6cc   :  { %7308 = vmatpush.bf16.msrb.mxu1 %v14482_v3 }
 0x6cd   :  { %v13762_v38 = vpack.c.bf16 %v7103_v24, %v7103_v24  ;;  %v14792_v24 = vld [vmem:[#allocation99_spill] sm:$0xff] }
 0x6cf   :  { %7244 = vmatmul.bf16.vlgmr.msra.gmra.mxu0 %v13762_v38  ;;  %7271 = vmatmul.bf16.vlgmr.msra.gmra.mxu2 %v13762_v38 }
 0x6d0   :  { %v6967_v51 = vpop.f32.mrf.mxu3  ;;  %7341 = vmatpush.bf16.msra.mxu0 %v14542_v62  ;;  %7367 = vmatpush.bf16.msra.mxu2 %v14543_v6 }
 0x6d1   :  { %v6968_v19 = vadd.f32 %v6967_v51, %v6954_v25  ;;  %7309 = vmatpush.bf16.msrb.mxu1 %v14484_v15  ;;  %v14793_v51 = vld [vmem:[#allocation181_spill] sm:$0xff] }
 0x6d3   :  { %v6978_v48 = vadd.f32 %v6968_v19, %v4389_v36  ;;  %v14795_v36 = vld [vmem:[#allocation101_spill] sm:$0xff]  ;;  %v14796_v19 = vld [vmem:[#allocation183_spill] sm:$0xff] }
 0x6d4   :  { %7342 = vmatpush.bf16.msra.mxu0 %v14544_v1  ;;  %7368 = vmatpush.bf16.msra.mxu2 %v14545_v2 }
 0x6d5   :  { %v10626_v21 = vmul.f32 -1.442695, %v6978_v48  ;;  %v14797_v48 = vld [vmem:[#allocation163_spill] sm:$0xff] }
 0x6d7   :  { %11668 = vpow2.f32 %v10626_v21  ;;  %v14798_v21 = vld [vmem:[#allocation105_spill] sm:$0xff] }
 0x6d8   :  { %v6969_v32 = vpop.f32.mrf.mxu3  ;;  %7343 = vmatpush.bf16.msra.mxu0 %v14546_v35  ;;  %7369 = vmatpush.bf16.msra.mxu2 %v14547_v30 }
 0x6d9   :  { %v14799_v32 = vld [vmem:[#allocation165_spill] sm:$0xff] }
 0x6dc   :  { %7344 = vmatpush.bf16.msra.mxu0 %v14548_v60  ;;  %7370 = vmatpush.bf16.msra.mxu2 %v14549_v0 }
 0x6dd   :  { %v11669_v3 = vpop.eup %11668 }
 0x6de   :  { %v7064_v25 = vadd.f32 1.0, %v11669_v3  ;;  %v14800_v3 = vld [vmem:[#allocation107_spill] sm:$0xff] }
 0x6df   :  { %7297 = vmatmul.bf16.vlgmr.msrb.gmra.mxu0 %v13762_v38  ;;  %7323 = vmatmul.bf16.vlgmr.msrb.gmra.mxu2 %v13762_v38 }
 0x6e0   :  { %11670 = vrcp.f32 %v7064_v25  ;;  %7345 = vmatpush.bf16.msra.mxu0 %v14550_v13  ;;  %7371 = vmatpush.bf16.msra.mxu2 %v14649_v55  ;;  %v7091_v1 = vand.u32 2147483648, %v7064_v25  ;;  %v7089_v35 = vand.u32 2147483647, %v7064_v25  ;;  %vm7085_vm5 = vweird.f32 %v7064_v25 }
 0x6e1   :  { %11672 = vtanh.f32 %v13753_v37 }
 0x6e2   :  { %v7092_v60 = vor.u32 1.1754944e-38, %v7091_v1  ;;  %vm7090_vm7 = vcmp.eq.f32.partialorder %v7089_v35, 8.507059e+37  ;;  %v14805_v1 = vld [vmem:[#allocation178_spill] sm:$0xff]  ;;  %v14808_v35 = vld [vmem:[#allocation184_spill] sm:$0xff] }
 0x6e4   :  { %7346 = vmatpush.bf16.msra.mxu0 %v14650_v8  ;;  %7372 = vmatpush.bf16.msra.mxu2 %v14651_v7  ;;  %v14766_v7 = vld [vmem:[#allocation79_spill] sm:$0xff] }
 0x6e6   :  { %v11671_v15 = vpop.eup %11670 }
 0x6e7   :  { %v7081_v62 = vmul.f32 %v11671_v15, %v7064_v25  ;;  %vm7086_vm4 = vweird.f32 %v11671_v15  ;;  %v11673_v13 = vpop.eup %11672  ;;  %v14801_v25 = vld [vmem:[#allocation167_spill] sm:$0xff] }
 0x6e8   :  { %7347 = vmatpush.bf16.msra.mxu0 %v14554_v45  ;;  %7373 = vmatpush.bf16.msra.mxu2 %v14555_v57  ;;  %vm7087_vm6 = vmor %vm7085_vm5, %vm7086_vm4  ;;  %v14755_v57 = vld [vmem:[#allocation154_spill] sm:$0xff] }
 0x6e9   :  { %v7082_v6 = vsub.f32 1.0, %v7081_v62  ;;  %v14803_v62 = vld [vmem:[#allocation171_spill] sm:$0xff] }
 0x6eb   :  { %v7083_v2 = vmul.f32 %v11671_v15, %v7082_v6  ;;  %v14804_v6 = vld [vmem:[#allocation174_spill] sm:$0xff] }
 0x6ec   :  { %7348 = vmatpush.bf16.msra.mxu0 %v14556_v14  ;;  %7374 = vmatpush.bf16.msra.mxu2 %v14557_v43  ;;  %v14756_v14 = vld [vmem:[#allocation94_spill] sm:$0xff]  ;;  %v14757_v43 = vld [vmem:[#allocation135_spill] sm:$0xff] }
 0x6ed   :  { %v7084_v30 = vadd.f32 %v11671_v15, %v7083_v2  ;;  %v14806_v2 = vld [vmem:[#allocation180_spill] sm:$0xff] }
 0x6ef   :  { %v7088_v0 = vsel %vm7087_vm6, %v11671_v15, %v7084_v30  ;;  %7349 = vmatmul.bf16.vlgmr.msra.gmra.mxu0 %v13762_v38  ;;  %7375 = vmatmul.bf16.vlgmr.msra.gmra.mxu2 %v13762_v38  ;;  %v14802_v15 = vld [vmem:[#allocation169_spill] sm:$0xff] }
 0x6f0   :  { %v7093_v55 = vsel %vm7090_vm7, %v7092_v60, %v7088_v0  ;;  %7393 = vmatpush.bf16.msrb.mxu0 %v14558_v40  ;;  %7419 = vmatpush.bf16.msrb.mxu2 %v14559_v16  ;;  %v14754_v40 = vld [vmem:[#allocation69_spill] sm:$0xff]  ;;  %v14758_v16 = vld [vmem:[#allocation71_spill] sm:$0xff] }
 0x6f1   :  { %v7104_v8 = vmul.f32 %v11673_v13, %v7093_v55 }
 0x6f3   :  { %v13789_v45 = vpack.c.bf16 %v7104_v8, %v7104_v8 }
 0x6f4   :  { %7394 = vmatpush.bf16.msrb.mxu0 %v14560_v20  ;;  %7420 = vmatpush.bf16.msrb.mxu2 %v14561_v58  ;;  %v14759_v20 = vld [vmem:[#allocation157_spill] sm:$0xff]  ;;  %v14762_v58 = vld [vmem:[#allocation74_spill] sm:$0xff] }
 0x6f5   :  { %7257 = vmatmul.bf16.vlgmr.msra.gmra.mxu1 %v13789_v45  ;;  %7284 = vmatmul.bf16.vlgmr.msra.gmra.mxu3 %v13789_v45 }
 0x6f6   :  { %7354 = vmatpush.bf16.msra.mxu1 %v14485_v49  ;;  %7380 = vmatpush.bf16.msra.mxu3 %v14486_v44  ;;  %v14760_v49 = vld [vmem:[#allocation97_spill] sm:$0xff] }
 0x6f7   :  { %v14761_v44 = vld [vmem:[#allocation137_spill] sm:$0xff] }
 0x6f8   :  { %7395 = vmatpush.bf16.msrb.mxu0 %v14562_v59  ;;  %7421 = vmatpush.bf16.msrb.mxu2 %v14563_v9  ;;  %v14763_v59 = vld [vmem:[#allocation160_spill] sm:$0xff] }
 0x6f9   :  { %v14765_v9 = vld [vmem:[#allocation140_spill] sm:$0xff] }
 0x6fa   :  { %7355 = vmatpush.bf16.msra.mxu1 %v14487_v47  ;;  %7381 = vmatpush.bf16.msra.mxu3 %v14754_v40  ;;  %v14764_v47 = vld [vmem:[#allocation100_spill] sm:$0xff] }
 0x6fc   :  { %7396 = vmatpush.bf16.msrb.mxu0 %v14755_v57  ;;  %7422 = vmatpush.bf16.msrb.mxu2 %v14756_v14 }
 0x6fe   :  { %7356 = vmatpush.bf16.msra.mxu1 %v14757_v43  ;;  %7382 = vmatpush.bf16.msra.mxu3 %v14758_v16  ;;  %v13867_v43 = vld [vmem:[#allocation10 + $0x20] sm:$0xff] }
 0x700   :  { %7397 = vmatpush.bf16.msrb.mxu0 %v14759_v20  ;;  %7423 = vmatpush.bf16.msrb.mxu2 %v14760_v49  ;;  %v2328_v49 = vperm.slane %v13867_v43, 0 }
 0x702   :  { %7357 = vmatpush.bf16.msra.mxu1 %v14761_v44  ;;  %7383 = vmatpush.bf16.msra.mxu3 %v14762_v58  ;;  %v14809_v44 = vld [vmem:[#allocation22_spill] sm:$0xff] }
 0x704   :  { %7398 = vmatpush.bf16.msrb.mxu0 %v14763_v59  ;;  %7424 = vmatpush.bf16.msrb.mxu2 %v14764_v47 }
 0x705   :  { %7310 = vmatmul.bf16.vlgmr.msrb.gmra.mxu1 %v13789_v45  ;;  %7336 = vmatmul.bf16.vlgmr.msrb.gmra.mxu3 %v13789_v45 }
 0x706   :  { %7358 = vmatpush.bf16.msra.mxu1 %v14765_v9  ;;  %7384 = vmatpush.bf16.msra.mxu3 %v14766_v7  ;;  %v14810_v9 = vld [vmem:[#allocation102_spill] sm:$0xff] }
 0x707   :  { %v4402_v7 = vadd.f32 %v14810_v9, %v2328_v49 }
 0x708   :  { %7399 = vmatpush.bf16.msrb.mxu0 %v14767_v41  ;;  %7425 = vmatpush.bf16.msrb.mxu2 %v14768_v54 }
 0x70a   :  { %7359 = vmatpush.bf16.msra.mxu1 %v14769_v63  ;;  %7385 = vmatpush.bf16.msra.mxu3 %v14770_v50 }
 0x70c   :  { %7400 = vmatpush.bf16.msrb.mxu0 %v14771_v52  ;;  %7426 = vmatpush.bf16.msrb.mxu2 %v14772_v10  ;;  %v2329_v10 = vperm.slane %v13867_v43, 1 }
 0x70e   :  { %7360 = vmatpush.bf16.msra.mxu1 %v14774_v61  ;;  %7386 = vmatpush.bf16.msra.mxu3 %v14775_v42  ;;  %v14811_v42 = vld [vmem:[#allocation103_spill] sm:$0xff] }
 0x70f   :  { %7401 = vmatmul.bf16.vlgmr.msrb.gmra.mxu0 %v13762_v38  ;;  %7427 = vmatmul.bf16.vlgmr.msrb.gmra.mxu2 %v13762_v38 }
 0x710   :  { %7445 = vmatpush.bf16.msra.mxu0 %v14773_v27 }
 0x712   :  { %7361 = vmatpush.bf16.msra.mxu1 %v14777_v34  ;;  %7387 = vmatpush.bf16.msra.mxu3 %v14778_v5 }
 0x714   :  { %7446 = vmatpush.bf16.msra.mxu0 %v14776_v29  ;;  %v4415_v29 = vadd.f32 %v14811_v42, %v2329_v10 }
 0x715   :  { %7362 = vmatmul.bf16.vlgmr.msra.gmra.mxu1 %v13789_v45  ;;  %7388 = vmatmul.bf16.vlgmr.msra.gmra.mxu3 %v13789_v45 }
 0x716   :  { %7406 = vmatpush.bf16.msrb.mxu1 %v14779_v39  ;;  %7432 = vmatpush.bf16.msrb.mxu3 %v14780_v53  ;;  %v2330_v39 = vperm.slane %v13867_v43, 2 }
 0x718   :  { %7447 = vmatpush.bf16.msra.mxu0 %v14781_v46 }
 0x71a   :  { %7407 = vmatpush.bf16.msrb.mxu1 %v14782_v22  ;;  %7433 = vmatpush.bf16.msrb.mxu3 %v14783_v33  ;;  %v14812_v33 = vld [vmem:[#allocation175_spill] sm:$0xff] }
 0x71c   :  { %7448 = vmatpush.bf16.msra.mxu0 %v14784_v26  ;;  %v4428_v26 = vadd.f32 %v14812_v33, %v2330_v39 }
 0x71e   :  { %7408 = vmatpush.bf16.msrb.mxu1 %v14785_v17  ;;  %7434 = vmatpush.bf16.msrb.mxu3 %v14786_v18 }
 0x720   :  { %7449 = vmatpush.bf16.msra.mxu0 %v14787_v28 }
 0x722   :  { %7409 = vmatpush.bf16.msrb.mxu1 %v14788_v11  ;;  %7435 = vmatpush.bf16.msrb.mxu3 %v14789_v23 }
 0x724   :  { %7450 = vmatpush.bf16.msra.mxu0 %v14790_v31 }
 0x726   :  { %7410 = vmatpush.bf16.msrb.mxu1 %v14791_v56  ;;  %7436 = vmatpush.bf16.msrb.mxu3 %v14792_v24  ;;  %v2331_v24 = vperm.slane %v13867_v43, 3 }
 0x728   :  { %7451 = vmatpush.bf16.msra.mxu0 %v14793_v51 }
 0x72a   :  { %7411 = vmatpush.bf16.msrb.mxu1 %v14794_v12  ;;  %7437 = vmatpush.bf16.msrb.mxu3 %v14795_v36 }
 0x72c   :  { %7452 = vmatpush.bf16.msra.mxu0 %v14796_v19 }
 0x72e   :  { %7412 = vmatpush.bf16.msrb.mxu1 %v14797_v48  ;;  %7438 = vmatpush.bf16.msrb.mxu3 %v14798_v21  ;;  %v14813_v48 = vld [vmem:[#allocation177_spill] sm:$0xff] }
 0x72f   :  { %7453 = vmatmul.bf16.vlgmr.msra.gmra.mxu0 %v13762_v38  ;;  %v14807_v38 = vld [vmem:[#allocation182_spill] sm:$0xff]  ;;  %v4441_v21 = vadd.f32 %v14813_v48, %v2331_v24 }
 0x730   :  { %v11483_v48 = vld [vmem:[#allocation12 + $0x210] sm:$0xff] }
 0x732   :  { %7413 = vmatpush.bf16.msrb.mxu1 %v14799_v32  ;;  %7439 = vmatpush.bf16.msrb.mxu3 %v14800_v3 }
 0x735   :  { %7414 = vmatmul.bf16.vlgmr.msrb.gmra.mxu1 %v13789_v45  ;;  %7440 = vmatmul.bf16.vlgmr.msrb.gmra.mxu3 %v13789_v45 }
 0x736   :  { %7458 = vmatpush.bf16.msra.mxu1 %v14801_v25 }
 0x73a   :  { %7459 = vmatpush.bf16.msra.mxu1 %v14802_v15 }
 0x73e   :  { %7460 = vmatpush.bf16.msra.mxu1 %v14803_v62 }
 0x742   :  { %7461 = vmatpush.bf16.msra.mxu1 %v14804_v6 }
 0x746   :  { %7462 = vmatpush.bf16.msra.mxu1 %v14805_v1  ;;  %v2332_v1 = vperm.slane %v13867_v43, 4 }
 0x74a   :  { %7463 = vmatpush.bf16.msra.mxu1 %v14806_v2 }
 0x74c   :  { %v7245_v30 = vpop.f32.mrf.mxu0 }
 0x74e   :  { %7464 = vmatpush.bf16.msra.mxu1 %v14807_v38 }
 0x752   :  { %7465 = vmatpush.bf16.msra.mxu1 %v14808_v35  ;;  %v7272_v60 = vpop.f32.mrf.mxu2 }
 0x754   :  { %v7247_v0 = vpop.f32.mrf.mxu0 }
 0x755   :  { %7466 = vmatmul.bf16.vlgmr.msra.gmra.mxu1 %v13789_v45  ;;  %v11488_v0 = vld [vmem:[#allocation12 + $0x238] sm:$0xff] }
 0x756   :  { %7736 = vmatpush.bf16.msra.mxu2 %v11488_v0 }
 0x75a   :  { %v7274_v13 = vpop.f32.mrf.mxu2 }
 0x75b   :  { %v14814_v13 = vld [vmem:[#allocation110_spill] sm:$0xff] }
 0x75c   :  { %v7298_v55 = vpop.f32.mrf.mxu0 }
 0x762   :  { %v7324_v8 = vpop.f32.mrf.mxu2 }
 0x764   :  { %v7300_v40 = vpop.f32.mrf.mxu0 }
 0x76a   :  { %v7326_v57 = vpop.f32.mrf.mxu2 }
 0x76c   :  { %v7350_v14 = vpop.f32.mrf.mxu0 }
 0x772   :  { %v7258_v16 = vpop.f32.mrf.mxu1  ;;  %v7376_v59 = vpop.f32.mrf.mxu2 }
 0x773   :  { %v7259_v20 = vadd.f32 %v7258_v16, %v7245_v30 }
 0x774   :  { %v7352_v45 = vpop.f32.mrf.mxu0 }
 0x775   :  { %v13871_v58 = vadd.f32 %v7259_v20, %v14809_v44  ;;  %v11487_v20 = vld [vmem:[#allocation12 + $0x230] sm:$0xff] }
 0x776   :  { %7737 = vmatpush.bf16.msra.mxu2 %v11487_v20 }
 0x778   :  { %v7285_v47 = vpop.f32.mrf.mxu3 }
 0x779   :  { %v7286_v41 = vadd.f32 %v7285_v47, %v7272_v60 }
 0x77a   :  { %v7260_v54 = vpop.f32.mrf.mxu1  ;;  %v7378_v52 = vpop.f32.mrf.mxu2 }
 0x77b   :  { %v7471_v63 = vadd.f32 %v7286_v41, %v4402_v7  ;;  %v11494_v7 = vld [vmem:[#allocation12 + $0x268] sm:$0xff] }
 0x77d   :  { %v10691_v50 = vmul.f32 -1.442695, %v7471_v63 }
 0x77f   :  { %11674 = vpow2.f32 %v10691_v50  ;;  %v11486_v50 = vld [vmem:[#allocation12 + $0x228] sm:$0xff] }
 0x780   :  { %v7287_v27 = vpop.f32.mrf.mxu3  ;;  %7738 = vmatpush.bf16.msra.mxu2 %v11486_v50 }
 0x782   :  { %v7311_v61 = vpop.f32.mrf.mxu1 }
 0x783   :  { %v7312_v34 = vadd.f32 %v7311_v61, %v7298_v55  ;;  %v4454_v55 = vadd.f32 %v14814_v13, %v2332_v1  ;;  %v11482_v1 = vld [vmem:[#allocation12 + $0x208] sm:$0xff] }
 0x785   :  { %v11675_v5 = vpop.eup %11674  ;;  %v7472_v53 = vadd.f32 %v7312_v34, %v4415_v29 }
 0x786   :  { %v13877_v46 = vadd.f32 1.0, %v11675_v5 }
 0x787   :  { %v10692_v11 = vmul.f32 -1.442695, %v7472_v53  ;;  %v11485_v53 = vld [vmem:[#allocation12 + $0x220] sm:$0xff] }
 0x788   :  { %11676 = vrcp.f32 %v13877_v46  ;;  %v7337_v22 = vpop.f32.mrf.mxu3  ;;  %v7498_v44 = vand.u32 2147483648, %v13877_v46  ;;  %vm7492_vm9 = vweird.f32 %v13877_v46  ;;  %v7496_v9 = vand.u32 2147483647, %v13877_v46  ;;  %7739 = vmatpush.bf16.msra.mxu2 %v11485_v53  ;;  %v11489_v53 = vld [vmem:[#allocation12 + $0x240] sm:$0xff] }
 0x789   :  { %v7338_v17 = vadd.f32 %v7337_v22, %v7324_v8 }
 0x78a   :  { %v7313_v18 = vpop.f32.mrf.mxu1  ;;  %v7499_v10 = vor.u32 1.1754944e-38, %v7498_v44  ;;  %vm7497_vm12 = vcmp.eq.f32.partialorder %v7496_v9, 8.507059e+37 }
 0x78b   :  { %v7473_v28 = vadd.f32 %v7338_v17, %v4428_v26 }
 0x78c   :  { %v13881_v23 = vpop.f32.mrf.mxu0 }
 0x78d   :  { %v10693_v31 = vmul.f32 -1.442695, %v7473_v28 }
 0x78e   :  { %v11677_v56 = vpop.eup %11676 }
 0x78f   :  { %11678 = vpow2.f32 %v10693_v31  ;;  %v7488_v12 = vmul.f32 %v11677_v56, %v13877_v46  ;;  %vm7493_vm8 = vweird.f32 %v11677_v56  ;;  %v11484_v31 = vld [vmem:[#allocation12 + $0x218] sm:$0xff] }
 0x790   :  { %11680 = vpow2.f32 %v10692_v11  ;;  %v7339_v51 = vpop.f32.mrf.mxu3  ;;  %vm13898_vm10 = vmor %vm7492_vm9, %vm7493_vm8  ;;  %7740 = vmatpush.bf16.msra.mxu2 %v11484_v31 }
 0x791   :  { %v7489_v15 = vsub.f32 1.0, %v7488_v12  ;;  %v2333_v12 = vperm.slane %v13867_v43, 5 }
 0x792   :  { %v13885_v36 = vpop.f32.mrf.mxu2  ;;  %v7363_v19 = vpop.f32.mrf.mxu1 }
 0x793   :  { %v7364_v32 = vadd.f32 %v7363_v19, %v7350_v14  ;;  %v7490_v60 = vmul.f32 %v11677_v56, %v7489_v15  ;;  %v11496_v15 = vld [vmem:[#allocation12 + $0x278] sm:$0xff] }
 0x794   :  { %v7404_v3 = vpop.f32.mrf.mxu0  ;;  %7741 = vmatpush.bf16.msra.mxu2 %v11483_v48  ;;  %7749 = vmatpush.bf16.msra.mxu3 %v11496_v15 }
 0x795   :  { %v11679_v25 = vpop.eup %11678  ;;  %v7474_v62 = vadd.f32 %v7364_v32, %v4441_v21  ;;  %v7491_v16 = vadd.f32 %v11677_v56, %v7490_v60  ;;  %v14817_v3 = vld [vmem:[#allocation111_spill] sm:$0xff] }
 0x796   :  { %v11681_v6 = vpop.eup %11680  ;;  %v7523_v2 = vadd.f32 1.0, %v11679_v25  ;;  %v4467_v25 = vadd.f32 %v14817_v3, %v2333_v12 }
 0x797   :  { %v10694_v38 = vmul.f32 -1.442695, %v7474_v62  ;;  %v13889_v35 = vadd.f32 1.0, %v11681_v6  ;;  %v7495_v54 = vsel %vm13898_vm10, %v11677_v56, %v7491_v16  ;;  %v14820_v16 = vld [vmem:[#allocation185_spill] sm:$0xff] }
 0x798   :  { %11682 = vrcp.f32 %v7523_v2  ;;  %v7389_v30 = vpop.f32.mrf.mxu3  ;;  %v7536_v52 = vand.u32 2147483648, %v7523_v2  ;;  %v7534_v42 = vand.u32 2147483647, %v7523_v2  ;;  %v7500_v34 = vsel %vm7497_vm12, %v7499_v10, %v7495_v54  ;;  %7742 = vmatpush.bf16.msra.mxu2 %v11482_v1 }
 0x799   :  { %11684 = vpow2.f32 %v10694_v38  ;;  %v7390_v8 = vadd.f32 %v7389_v30, %v7376_v59  ;;  %vm7530_vm13 = vweird.f32 %v7523_v2  ;;  %v7513_v13 = vand.u32 2147483648, %v13889_v35 }
 0x79a   :  { %v7430_v40 = vpop.f32.mrf.mxu2  ;;  %v7365_v57 = vpop.f32.mrf.mxu1  ;;  %11686 = vrcp.f32 %v13889_v35  ;;  %v7537_v46 = vor.u32 1.1754944e-38, %v7536_v52  ;;  %vm7535_vm15 = vcmp.eq.f32.partialorder %v7534_v42, 8.507059e+37  ;;  %vm7507_vm4 = vweird.f32 %v13889_v35 }
 0x79b   :  { %v7475_v14 = vadd.f32 %v7390_v8, %v4454_v55  ;;  %v11495_v55 = vld [vmem:[#allocation12 + $0x270] sm:$0xff]  ;;  %v7511_v8 = vand.u32 2147483647, %v13889_v35  ;;  %v7514_v9 = vor.u32 1.1754944e-38, %v7513_v13 }
 0x79c   :  { %7750 = vmatpush.bf16.msra.mxu3 %v11495_v55 }
 0x79d   :  { %11688 = vtanh.f32 %v7475_v14  ;;  %v11481_v14 = vld [vmem:[#allocation12 + $0x200] sm:$0xff]  ;;  %vm7512_vm7 = vcmp.eq.f32.partialorder %v7511_v8, 8.507059e+37 }
 0x79e   :  { %v11683_v49 = vpop.eup %11682  ;;  %7743 = vmatpush.bf16.msra.mxu2 %v11481_v14 }
 0x79f   :  { %v11685_v45 = vpop.eup %11684  ;;  %v7526_v47 = vmul.f32 %v11683_v49, %v7523_v2  ;;  %vm7531_vm11 = vweird.f32 %v11683_v49  ;;  %v2334_v2 = vperm.slane %v13867_v43, 6 }
 0x7a0   :  { %v13896_v59 = vadd.f32 1.0, %v11685_v45  ;;  %v7391_v63 = vpop.f32.mrf.mxu3  ;;  %v13905_v27 = vpop.eup %11686  ;;  %vm7532_vm14 = vmor %vm7530_vm13, %vm7531_vm11  ;;  %7751 = vmatpush.bf16.msra.mxu3 %v11494_v7 }
 0x7a1   :  { %v7527_v41 = vsub.f32 1.0, %v7526_v47  ;;  %v7503_v22 = vmul.f32 %v13905_v27, %v13889_v35  ;;  %vm7508_vm2 = vweird.f32 %v13905_v27  ;;  %v4480_v20 = vadd.f32 %v14820_v16, %v2334_v2 }
 0x7a2   :  { %11690 = vrcp.f32 %v13896_v59  ;;  %v7551_v38 = vand.u32 2147483648, %v13896_v59  ;;  %vm7545_vm1 = vweird.f32 %v13896_v59  ;;  %v7549_v0 = vand.u32 2147483647, %v13896_v59  ;;  %vm7509_vm5 = vmor %vm7507_vm4, %vm7508_vm2 }
 0x7a3   :  { %v7528_v61 = vmul.f32 %v11683_v49, %v7527_v41  ;;  %v11689_v29 = vpop.eup %11688  ;;  %v7504_v56 = vsub.f32 1.0, %v7503_v22 }
 0x7a4   :  { %v7597_v39 = vmul.f32 %v11689_v29, %v7500_v34  ;;  %vm7550_vm6 = vcmp.eq.f32.partialorder %v7549_v0, 8.507059e+37  ;;  %v11491_v34 = vld [vmem:[#allocation12 + $0x250] sm:$0xff] }
 0x7a5   :  { %v7529_v5 = vadd.f32 %v11683_v49, %v7528_v61  ;;  %v7505_v32 = vmul.f32 %v13905_v27, %v7504_v56 }
 0x7a7   :  { %v7533_v33 = vsel %vm7532_vm14, %v11683_v49, %v7529_v5  ;;  %v7506_v60 = vadd.f32 %v13905_v27, %v7505_v32  ;;  %v7552_v49 = vor.u32 1.1754944e-38, %v7551_v38  ;;  %v11490_v5 = vld [vmem:[#allocation12 + $0x248] sm:$0xff] }
 0x7a8   :  { %v11691_v26 = vpop.eup %11690  ;;  %v7538_v17 = vsel %vm7535_vm15, %v7537_v46, %v7533_v33  ;;  %v14821_v33 = vld [vmem:[#allocation186_spill] sm:$0xff] }
 0x7a9   :  { %v7541_v18 = vmul.f32 %v11691_v26, %v13896_v59  ;;  %v7595_v28 = vmul.f32 %v7538_v17, %v13730_v4  ;;  %vm7546_vm0 = vweird.f32 %v11691_v26  ;;  %v7510_v45 = vsel %vm7509_vm5, %v13905_v27, %v7506_v60  ;;  %v11492_v27 = vld [vmem:[#allocation12 + $0x258] sm:$0xff] }
 0x7aa   :  { %vm13925_vm3 = vmor %vm7545_vm1, %vm7546_vm0  ;;  %v7515_v54 = vsel %vm7512_vm7, %v7514_v9, %v7510_v45 }
 0x7ab   :  { %v7542_v24 = vsub.f32 1.0, %v7541_v18  ;;  %v13913_v51 = vadd.f32 %v7597_v39, %v7595_v28  ;;  %v2335_v39 = vperm.slane %v13867_v43, 7 }
 0x7ac   :  { %v13911_v11 = vpop.f32.mrf.mxu0 }
 0x7ad   :  { %v7543_v19 = vmul.f32 %v11691_v26, %v7542_v24 }
 0x7af   :  { %v7544_v62 = vadd.f32 %v11691_v26, %v7543_v19 }
 0x7b1   :  { %v7548_v40 = vsel %vm13925_vm3, %v11691_v26, %v7544_v62  ;;  %v4493_v26 = vadd.f32 %v14821_v33, %v2335_v39 }
 0x7b2   :  { %v7415_v21 = vpop.f32.mrf.mxu1  ;;  %v7553_v59 = vsel %vm7550_vm6, %v7552_v49, %v7548_v40 }
 0x7b3   :  { %v7416_v4 = vadd.f32 %v7415_v21, %v13881_v23  ;;  %v7596_v50 = vmul.f32 %v7553_v59, %v13753_v37 }
 0x7b4   :  { %v7456_v6 = vpop.f32.mrf.mxu0 }
 0x7b5   :  { %v7476_v30 = vadd.f32 %v7416_v4, %v4467_v25 }
 0x7b7   :  { %11692 = vtanh.f32 %v7476_v30 }
 0x7b8   :  { %v7441_v57 = vpop.f32.mrf.mxu3 }
 0x7b9   :  { %v7442_v44 = vadd.f32 %v7441_v57, %v13885_v36  ;;  %v11493_v36 = vld [vmem:[#allocation12 + $0x260] sm:$0xff] }
 0x7ba   :  { %v7417_v47 = vpop.f32.mrf.mxu1  ;;  %7752 = vmatpush.bf16.msra.mxu3 %v11493_v36 }
 0x7bb   :  { %v7477_v35 = vadd.f32 %v7442_v44, %v4480_v20 }
 0x7bd   :  { %v11693_v41 = vpop.eup %11692  ;;  %v10695_v63 = vmul.f32 -1.442695, %v7477_v35 }
 0x7be   :  { %v7598_v52 = vmul.f32 %v11693_v41, %v7515_v54  ;;  %7753 = vmatpush.bf16.msra.mxu3 %v11492_v27 }
 0x7bf   :  { %11694 = vpow2.f32 %v10695_v63 }
 0x7c0   :  { %v7600_v10 = vadd.f32 %v7598_v52, %v7596_v50  ;;  %v7443_v61 = vpop.f32.mrf.mxu3 }
 0x7c2   :  { %7754 = vmatpush.bf16.msra.mxu3 %v11491_v34 }
 0x7c5   :  { %v11695_v42 = vpop.eup %11694 }
 0x7c6   :  { %v7563_v29 = vadd.f32 1.0, %v11695_v42  ;;  %7755 = vmatpush.bf16.msra.mxu3 %v11490_v5 }
 0x7c8   :  { %11696 = vrcp.f32 %v7563_v29  ;;  %v7576_v28 = vand.u32 2147483648, %v7563_v29  ;;  %v7574_v24 = vand.u32 2147483647, %v7563_v29  ;;  %vm7570_vm9 = vweird.f32 %v7563_v29 }
 0x7c9   :  { %11698 = vtanh.f32 %v13913_v51 }
 0x7ca   :  { %7756 = vmatpush.bf16.msra.mxu3 %v11489_v53  ;;  %v7577_v19 = vor.u32 1.1754944e-38, %v7576_v28  ;;  %vm7575_vm11 = vcmp.eq.f32.partialorder %v7574_v24, 8.507059e+37 }
 0x7ce   :  { %v11697_v46 = vpop.eup %11696 }
 0x7cf   :  { %v7566_v37 = vmul.f32 %v11697_v46, %v7563_v29  ;;  %vm7571_vm8 = vweird.f32 %v11697_v46  ;;  %v11699_v32 = vpop.eup %11698 }
 0x7d0   :  { %vm7572_vm10 = vmor %vm7570_vm9, %vm7571_vm8 }
 0x7d1   :  { %v7567_v18 = vsub.f32 1.0, %v7566_v37 }
 0x7d2   :  { %v7467_v22 = vpop.f32.mrf.mxu1 }
 0x7d3   :  { %v7468_v17 = vadd.f32 %v7467_v22, %v13911_v11  ;;  %v7568_v56 = vmul.f32 %v11697_v46, %v7567_v18 }
 0x7d5   :  { %v7478_v31 = vadd.f32 %v7468_v17, %v4493_v26  ;;  %v7569_v43 = vadd.f32 %v11697_v46, %v7568_v56 }
 0x7d7   :  { %v10696_v12 = vmul.f32 -1.442695, %v7478_v31  ;;  %v7573_v21 = vsel %vm7572_vm10, %v11697_v46, %v7569_v43 }
 0x7d8   :  { %v7578_v11 = vsel %vm7575_vm11, %v7577_v19, %v7573_v21 }
 0x7d9   :  { %11700 = vpow2.f32 %v10696_v12  ;;  %v7603_v3 = vmul.f32 %v11699_v32, %v7578_v11 }
 0x7da   :  { %v7469_v48 = vpop.f32.mrf.mxu1 }
 0x7db   :  { %v7605_v25 = vpack.c.bf16 %v7603_v3, %v7603_v3 }
 0x7dd   :  { %7744 = vmatmul.bf16.vlgmr.msra.gmra.mxu2 %v7605_v25 }
 0x7df   :  { %v11701_v4 = vpop.eup %11700 }
 0x7e0   :  { %v7564_v51 = vadd.f32 1.0, %v11701_v4 }
 0x7e2   :  { %11702 = vrcp.f32 %v7564_v51  ;;  %v7591_v1 = vand.u32 2147483648, %v7564_v51  ;;  %v7589_v38 = vand.u32 2147483647, %v7564_v51  ;;  %vm7585_vm13 = vweird.f32 %v7564_v51 }
 0x7e3   :  { %11704 = vtanh.f32 %v7600_v10 }
 0x7e4   :  { %v7592_v60 = vor.u32 1.1754944e-38, %v7591_v1  ;;  %vm7590_vm15 = vcmp.eq.f32.partialorder %v7589_v38, 8.507059e+37 }
 0x7e8   :  { %v11703_v15 = vpop.eup %11702 }
 0x7e9   :  { %v7581_v62 = vmul.f32 %v11703_v15, %v7564_v51  ;;  %vm7586_vm12 = vweird.f32 %v11703_v15  ;;  %v11705_v23 = vpop.eup %11704 }
 0x7ea   :  { %vm7587_vm14 = vmor %vm7585_vm13, %vm7586_vm12 }
 0x7eb   :  { %v7582_v6 = vsub.f32 1.0, %v7581_v62 }
 0x7ed   :  { %v7583_v2 = vmul.f32 %v11703_v15, %v7582_v6 }
 0x7ef   :  { %v7584_v30 = vadd.f32 %v11703_v15, %v7583_v2 }
 0x7f1   :  { %v7588_v0 = vsel %vm7587_vm14, %v11703_v15, %v7584_v30 }
 0x7f2   :  { %v7593_v13 = vsel %vm7590_vm15, %v7592_v60, %v7588_v0 }
 0x7f3   :  { %v7604_v55 = vmul.f32 %v11705_v23, %v7593_v13 }
 0x7f5   :  { %v7606_v8 = vpack.c.bf16 %v7604_v55, %v7604_v55 }
 0x7f7   :  { %7757 = vmatmul.bf16.vlgmr.msra.gmra.mxu3 %v7606_v8 }
 0x860   :  { %v7745_v40 = vpop.f32.mrf.mxu2 }
 0x868   :  { %v7747_v57 = vpop.f32.mrf.mxu2 }
 0x87a   :  { %v7758_v14 = vpop.f32.mrf.mxu3 }
 0x87b   :  { %v7759_v16 = vadd.f32 %v7758_v14, %v7745_v40 }
 0x87d   :  { %v7762_v20 = vadd.f32 %v7759_v16, %v13871_v58 }
 0x87f   :  { %7763 = vst [vmem:[%s13958_s12] sm:$0xff] %v7762_v20 }
 0x882   :  { %v7760_v49 = vpop.f32.mrf.mxu3 }
 0x883   :  { %7776 = vsyncpa [#allocation3], 1 }
 0x884   :  { %7777 = vsyncpa [#allocation5], 1 }
 0x885   :  { %7778 = vsyncpa [#allocation8], 1 }
 0x886   :  { %7779 = vsyncpa [#allocation11], 1 }
 0x887   :  { %7780 = vsyncpa [#allocation14], 1 }

</bundles_post_ra>
